<compile_context>
chip_gen: v7x
topology: tpu7x:2x2x1
jax: 0.10.0
libtpu: 0.0.40
codegen_flags: <defaults>
</compile_context>

<pallas_src>
import functools

import jax
import jax.numpy as jnp
from jax.experimental import pallas as pl
from jax.experimental.pallas import tpu as pltpu

GP = 128       # per-gate lane padding (r/z/n blocks each 128 lanes wide)
OUT_PAD = 128  # lane-dense padding of the 6-wide final-decoder output


# ----------------------------------------------------------------------------
# Fused forward kernel (single invocation, everything in VMEM)
# ----------------------------------------------------------------------------
def _prosit_kernel(
    # activations
    x_ref, xrev_ref, side_ref,
    # bidirectional GRU (fwd+bwd fused, gate-packed)
    bi_wih_f_ref, bi_wih_b_ref, bi_bih_ref, bi_whh_ref, bi_bhh_ref,
    # main GRU
    g_wih_f_ref, g_wih_b_ref, g_bih_ref, g_whh_ref, g_bhh_ref,
    # AttentalSum + side encoder
    agg_w_ref, agg_b_ref, side_w_ref, side_b_ref,
    # decoder GRU
    d_wih_ref, d_bih_ref, d_whh_ref, d_bhh_ref,
    # in_frag (kron'd) + final decoder
    frag_k_ref, frag_b_ref, final_w_ref, final_b_ref,
    # output
    out_ref,
    # scratch
    fwd_scr, bwd_scr, gru_scr, dec_scr,
    *, L, B, Lm1,
):
    f32 = jnp.float32
    bf16 = jnp.bfloat16

    def gru_step(h, gx, whh_ref, bhh_ref):
        """One GRU cell step on gate-packed 128-lane blocks [r | z | n].

        h:  (B, GP)     f32 lane-padded hidden state (padding stays 0).
        gx: (B, 3*GP)   hoisted input-gate projection for this step.
        Hidden matmul is ONE bf16 MXU push; r and z share one sigmoid call.
        """
        gh = jnp.dot(h.astype(bf16), whh_ref[...],
                     preferred_element_type=f32) + bhh_ref[...]
        rz = jax.nn.sigmoid(gx[:, :2 * GP] + gh[:, :2 * GP])   # [r | z] in one EUP pass
        r = rz[:, :GP]
        z = rz[:, GP:2 * GP]
        n = jnp.tanh(gx[:, 2 * GP:] + r * gh[:, 2 * GP:])
        return (1.0 - z) * n + z * h

    # ---- Stage 1: bidirectional GRU, both directions fused in one state -----
    # bwd direction consumes the time-reversed input, so both directions index
    # the same row block t inside the loop and share one hidden matmul.
    gx_bi = (jnp.dot(x_ref[...], bi_wih_f_ref[...], preferred_element_type=f32)
             + jnp.dot(xrev_ref[...], bi_wih_b_ref[...], preferred_element_type=f32)
             + bi_bih_ref[...])                              # (L*B, 3*GP)
    hbi = jnp.zeros((B, GP), f32)                            # [hf | hb | 0-pad]
    for t in range(L):                                       # static unroll
        hbi = gru_step(hbi, gx_bi[t * B:(t + 1) * B, :], bi_whh_ref, bi_bhh_ref)
        fwd_scr[pl.ds(t * B, B), :] = hbi                    # fwd half valid @ time t
        bwd_scr[pl.ds((L - 1 - t) * B, B), :] = hbi          # bwd half valid @ time L-1-t

    # ---- Stage 2: main GRU over [fwd|bwd]; zero weight rows mask unused half -
    gxm = (jnp.dot(fwd_scr[...], g_wih_f_ref[...], preferred_element_type=f32)
           + jnp.dot(bwd_scr[...], g_wih_b_ref[...], preferred_element_type=f32)
           + g_bih_ref[...])                                 # (L*B, 3*GP)
    hm = jnp.zeros((B, GP), f32)
    for t in range(L):
        hm = gru_step(hm, gxm[t * B:(t + 1) * B, :], g_whh_ref, g_bhh_ref)
        gru_scr[pl.ds(t * B, B), :] = hm

    # ---- Stage 3: AttentalSum (softmax over time) + side encoder + gating ----
    xg = gru_scr[...]                                        # (L*B, GP)
    s = jnp.sum(xg * agg_w_ref[...], axis=-1, keepdims=True) + agg_b_ref[...]
    e = jnp.exp(jnp.tanh(s))                                 # tanh-bounded -> safe
    num = jnp.zeros((B, GP), f32)
    den = jnp.zeros((B, 1), f32)
    for t in range(L):                                       # per-batch sum over time
        num = num + xg[t * B:(t + 1) * B, :] * e[t * B:(t + 1) * B, :]
        den = den + e[t * B:(t + 1) * B, :]
    agg = num * pl.reciprocal(den, approx=True)              # softmax normalization
    side = (jnp.dot(side_ref[...], side_w_ref[...], preferred_element_type=f32)
            + side_b_ref[...])                               # (B, GP)
    g_in = agg * side                                        # (B, GP), padding stays 0

    # ---- Stage 4: decoder GRU; constant input -> projection hoisted once -----
    gxd = (jnp.dot(g_in, d_wih_ref[...], preferred_element_type=f32)
           + d_bih_ref[...])                                 # (B, 3*GP), reused each step
    hd = jnp.zeros((B, GP), f32)
    for t in range(Lm1):
        hd = gru_step(hd, gxd, d_whh_ref, d_bhh_ref)
        dec_scr[pl.ds(t * B, B), :] = hd

    # ---- Stage 5: in_frag gate (kron -> one MXU push) + final + LeakyReLU ----
    xdec = dec_scr[...]                                      # (Lm1*B, GP)
    gate = (jnp.dot(frag_k_ref[...], xdec, preferred_element_type=f32)
            + frag_b_ref[...])                               # per-(b,d) mix over time
    y = xdec * gate
    o = (jnp.dot(y, final_w_ref[...], preferred_element_type=f32)
         + final_b_ref[...])                                 # (Lm1*B, OUT_PAD)
    out_ref[...] = jnp.where(o > 0, o, 0.01 * o)             # LeakyReLU, lane-dense store


# ----------------------------------------------------------------------------
# PyTorch-layout parameter init (deterministic)
# ----------------------------------------------------------------------------
def init_params(key, peptide_dim, E, H, max_sequence, percursor_dim):
    D = 2 * H
    Lm1 = max_sequence - 1
    keys = iter(jax.random.split(key, 32))

    def u(shape, fan_in):
        s = 1.0 / (fan_in ** 0.5)
        return jax.random.uniform(next(keys), shape, jnp.float32, -s, s)

    p = {}
    p['embedding'] = jax.random.normal(next(keys), (peptide_dim, E), jnp.float32)
    for d in ('f', 'b'):                                  # bidirectional GRU (E -> H)
        p[f'bi_wih_{d}'] = u((3 * H, E), H)
        p[f'bi_whh_{d}'] = u((3 * H, H), H)
        p[f'bi_bih_{d}'] = u((3 * H,), H)
        p[f'bi_bhh_{d}'] = u((3 * H,), H)
    p['gru_wih'] = u((3 * D, D), D); p['gru_whh'] = u((3 * D, D), D)
    p['gru_bih'] = u((3 * D,), D);   p['gru_bhh'] = u((3 * D,), D)
    p['agg_w'] = u((1, D), D); p['agg_b'] = u((1,), D)
    p['side_w'] = u((D, percursor_dim + 1), percursor_dim + 1)
    p['side_b'] = u((D,), percursor_dim + 1)
    p['dec_wih'] = u((3 * D, D), D); p['dec_whh'] = u((3 * D, D), D)
    p['dec_bih'] = u((3 * D,), D);   p['dec_bhh'] = u((3 * D,), D)
    p['frag_w'] = u((Lm1, Lm1), Lm1); p['frag_b'] = u((Lm1,), Lm1)
    p['final_w'] = u((6, D), D); p['final_b'] = u((6,), D)
    return p


# ----------------------------------------------------------------------------
# One-time weight packing (gate-pack to 128-lane blocks, pre-transpose, pad).
# Run once outside the per-call path.
# ----------------------------------------------------------------------------
def _gate_blocks(w, b, h):
    """Split PyTorch (3h, in) weight / (3h,) bias into per-gate [r,z,n] blocks,
    transposed to (in, h)."""
    ws = [w[g * h:(g + 1) * h, :].T for g in range(3)]
    bs = [b[g * h:(g + 1) * h] for g in range(3)]
    return ws, bs


def _pack_gates(blocks, row_off, col_off, n_rows, dtype=jnp.float32):
    """Place gate block g at rows [row_off:row_off+r], cols [g*GP+col_off : ...+c]
    of an (n_rows, 3*GP) zero matrix."""
    out = jnp.zeros((n_rows, 3 * GP), dtype)
    for g, blk in enumerate(blocks):
        r, c = blk.shape
        out = out.at[row_off:row_off + r, g * GP + col_off:g * GP + col_off + c].set(
            blk.astype(dtype))
    return out


def _pack_gate_bias(bs, col_off):
    out = jnp.zeros((1, 3 * GP), jnp.float32)
    for g, b in enumerate(bs):
        out = out.at[0, g * GP + col_off:g * GP + col_off + b.shape[0]].set(b)
    return out


def pack_params(p, *, H, max_sequence, batch):
    D = 2 * H
    Lm1 = max_sequence - 1
    B = batch
    E = p['bi_wih_f'].shape[1]
    q = {'embedding': p['embedding']}

    # --- bidirectional GRU: fwd+bwd fused; state layout [hf(0:H) | hb(H:2H) | pad]
    wih_f, bih_f = _gate_blocks(p['bi_wih_f'], p['bi_bih_f'], H)
    wih_b, bih_b = _gate_blocks(p['bi_wih_b'], p['bi_bih_b'], H)
    whh_f, bhh_f = _gate_blocks(p['bi_whh_f'], p['bi_bhh_f'], H)
    whh_b, bhh_b = _gate_blocks(p['bi_whh_b'], p['bi_bhh_b'], H)
    q['bi_wih_f'] = _pack_gates(wih_f, 0, 0, E)               # fwd gate cols [0:H]
    q['bi_wih_b'] = _pack_gates(wih_b, 0, H, E)               # bwd gate cols [H:2H]
    q['bi_bih'] = _pack_gate_bias(bih_f, 0) + _pack_gate_bias(bih_b, H)
    q['bi_whh'] = (_pack_gates(whh_f, 0, 0, GP)               # block-diagonal [Wf;Wb]
                   + _pack_gates(whh_b, H, H, GP)).astype(jnp.bfloat16)
    q['bi_bhh'] = _pack_gate_bias(bhh_f, 0) + _pack_gate_bias(bhh_b, H)

    # --- main GRU (input = [fwd | bwd], zero rows mask the unused scratch half)
    g_wih, g_bih = _gate_blocks(p['gru_wih'], p['gru_bih'], D)    # (2H, D) x3
    g_whh, g_bhh = _gate_blocks(p['gru_whh'], p['gru_bhh'], D)    # (D, D) x3
    q['g_wih_f'] = _pack_gates([w[:H, :] for w in g_wih], 0, 0, GP)
    q['g_wih_b'] = _pack_gates([w[H:, :] for w in g_wih], H, 0, GP)
    q['g_bih'] = _pack_gate_bias(g_bih, 0)
    q['g_whh'] = _pack_gates(g_whh, 0, 0, GP).astype(jnp.bfloat16)
    q['g_bhh'] = _pack_gate_bias(g_bhh, 0)

    # --- AttentalSum + side encoder
    q['agg_w'] = jnp.zeros((1, GP), jnp.float32).at[:, :D].set(p['agg_w'])
    q['agg_b'] = p['agg_b'].reshape(1, 1)
    S = p['side_w'].shape[1]
    q['side_w'] = jnp.zeros((S, GP), jnp.float32).at[:, :D].set(p['side_w'].T)
    q['side_b'] = jnp.zeros((1, GP), jnp.float32).at[0, :D].set(p['side_b'])

    # --- decoder GRU
    d_wih, d_bih = _gate_blocks(p['dec_wih'], p['dec_bih'], D)
    d_whh, d_bhh = _gate_blocks(p['dec_whh'], p['dec_bhh'], D)
    q['d_wih'] = _pack_gates(d_wih, 0, 0, GP)
    q['d_bih'] = _pack_gate_bias(d_bih, 0)
    q['d_whh'] = _pack_gates(d_whh, 0, 0, GP).astype(jnp.bfloat16)
    q['d_bhh'] = _pack_gate_bias(d_bhh, 0)

    # --- in_frag gate: kron with I_B so the time-mix is one MXU push on the
    #     flat (Lm1*B, GP) decoder scratch (no reshape). For large B switch to
    #     the per-t broadcast-sum form instead of the kron matrix.
    q['frag_k'] = jnp.kron(p['frag_w'], jnp.eye(B, dtype=jnp.float32))
    q['frag_b'] = jnp.repeat(p['frag_b'], B).reshape(Lm1 * B, 1)

    # --- final decoder (6 -> 128 lane-dense padding)
    q['final_w'] = jnp.zeros((GP, OUT_PAD), jnp.float32).at[:D, :6].set(p['final_w'].T)
    q['final_b'] = jnp.zeros((1, OUT_PAD), jnp.float32).at[0, :6].set(p['final_b'])
    return q


# ----------------------------------------------------------------------------
# Forward wrapper: embedding gather + side concat + time-reverse in JAX glue,
# everything else in the single fused kernel.
# ----------------------------------------------------------------------------
def prosit_forward(q, peptides, nce, charge, *, max_sequence):
    B, L = peptides.shape
    Lm1 = max_sequence - 1
    E = q['embedding'].shape[1]

    x = jnp.take(q['embedding'], peptides.T, axis=0)      # (L, B, E) time-major
    x_fwd = x.reshape(L * B, E)                           # flat, no in-kernel reshape
    x_bwd = x[::-1].reshape(L * B, E)                     # time-reversed for bwd dir
    side_in = jnp.concatenate([charge, nce], axis=1)      # (B, percursor+1)

    kernel = functools.partial(_prosit_kernel, L=L, B=B, Lm1=Lm1)
    out_flat = pl.pallas_call(
        kernel,
        out_shape=jax.ShapeDtypeStruct((Lm1 * B, OUT_PAD), jnp.float32),
        scratch_shapes=[
            pltpu.VMEM((L * B, GP), jnp.float32),         # bi-GRU fwd outputs (lanes 0:H)
            pltpu.VMEM((L * B, GP), jnp.float32),         # bi-GRU bwd outputs (lanes H:2H)
            pltpu.VMEM((L * B, GP), jnp.float32),         # main GRU outputs
            pltpu.VMEM((Lm1 * B, GP), jnp.float32),       # decoder GRU outputs
        ],
    )(x_fwd, x_bwd, side_in,
      q['bi_wih_f'], q['bi_wih_b'], q['bi_bih'], q['bi_whh'], q['bi_bhh'],
      q['g_wih_f'], q['g_wih_b'], q['g_bih'], q['g_whh'], q['g_bhh'],
      q['agg_w'], q['agg_b'], q['side_w'], q['side_b'],
      q['d_wih'], q['d_bih'], q['d_whh'], q['d_bhh'],
      q['frag_k'], q['frag_b'], q['final_w'], q['final_b'])

    out = out_flat.reshape(Lm1, B, OUT_PAD)[:, :, :6]     # drop lane padding
    return jnp.transpose(out, (1, 0, 2)).reshape(B, Lm1 * 6)


if __name__ == "__main__":
    # small, module-consistent shapes
    PEPTIDE_DIM = 22      # vocabulary size
    E = 16                # peptide_embed_dim
    H = 32                # bi_dim -> 2H = 64
    MAX_SEQ = 9           # max_lenght -> 8 fragment positions
    PERCURSOR = 6         # percursor_dim (side input dim = 7)
    B, L = 8, 8           # batch (multiple of 8 -> full sublanes), peptide length

    key = jax.random.PRNGKey(0)
    kp, kseq, knce, kch = jax.random.split(key, 4)

    params = init_params(kp, PEPTIDE_DIM, E, H, MAX_SEQ, PERCURSOR)
    packed = pack_params(params, H=H, max_sequence=MAX_SEQ, batch=B)  # one-time prep

    peptides = jax.random.randint(kseq, (B, L), 0, PEPTIDE_DIM)
    nce = jax.random.uniform(knce, (B, 1), jnp.float32)
    charge = jax.random.uniform(kch, (B, PERCURSOR), jnp.float32)

    fwd_fn = jax.jit(functools.partial(prosit_forward, max_sequence=MAX_SEQ))
    out = fwd_fn(packed, peptides, nce, charge)
    out = jax.block_until_ready(out)

    assert out.shape == (B, (MAX_SEQ - 1) * 6), out.shape
    assert bool(jnp.all(jnp.isfinite(out)))
    print("KERNEL_OK")
</pallas_src>

<mosaic_0001>
module attributes {stable_mosaic.version = 11 : i64} {
  func.func @_prosit_kernel(%arg0: memref<64x16xf32, #tpu.memory_space<vmem>>, %arg1: memref<64x16xf32, #tpu.memory_space<vmem>>, %arg2: memref<8x7xf32, #tpu.memory_space<vmem>>, %arg3: memref<16x384xf32, #tpu.memory_space<vmem>>, %arg4: memref<16x384xf32, #tpu.memory_space<vmem>>, %arg5: memref<1x384xf32, #tpu.memory_space<vmem>>, %arg6: memref<128x384xbf16, #tpu.memory_space<vmem>>, %arg7: memref<1x384xf32, #tpu.memory_space<vmem>>, %arg8: memref<128x384xf32, #tpu.memory_space<vmem>>, %arg9: memref<128x384xf32, #tpu.memory_space<vmem>>, %arg10: memref<1x384xf32, #tpu.memory_space<vmem>>, %arg11: memref<128x384xbf16, #tpu.memory_space<vmem>>, %arg12: memref<1x384xf32, #tpu.memory_space<vmem>>, %arg13: memref<1x128xf32, #tpu.memory_space<vmem>>, %arg14: memref<1x1xf32, #tpu.memory_space<vmem>>, %arg15: memref<7x128xf32, #tpu.memory_space<vmem>>, %arg16: memref<1x128xf32, #tpu.memory_space<vmem>>, %arg17: memref<128x384xf32, #tpu.memory_space<vmem>>, %arg18: memref<1x384xf32, #tpu.memory_space<vmem>>, %arg19: memref<128x384xbf16, #tpu.memory_space<vmem>>, %arg20: memref<1x384xf32, #tpu.memory_space<vmem>>, %arg21: memref<64x64xf32, #tpu.memory_space<vmem>>, %arg22: memref<64x1xf32, #tpu.memory_space<vmem>>, %arg23: memref<128x128xf32, #tpu.memory_space<vmem>>, %arg24: memref<1x128xf32, #tpu.memory_space<vmem>>, %arg25: memref<64x128xf32, #tpu.memory_space<vmem>>, %arg26: memref<64x128xf32, #tpu.memory_space<vmem>>, %arg27: memref<64x128xf32, #tpu.memory_space<vmem>>, %arg28: memref<64x128xf32, #tpu.memory_space<vmem>>, %arg29: memref<64x128xf32, #tpu.memory_space<vmem>>) attributes {dimension_semantics = [], scalar_prefetch = 0 : i64, scratch_operands = 4 : i64, tpu.core_type = #tpu.core_type<tc>} {
    %c0 = arith.constant 0 : index
    %c0_0 = arith.constant 0 : index
    %0 = vector.load %arg0[%c0, %c0_0] : memref<64x16xf32, #tpu.memory_space<vmem>>, vector<64x16xf32>
    %c0_1 = arith.constant 0 : index
    %c0_2 = arith.constant 0 : index
    %1 = vector.load %arg3[%c0_1, %c0_2] : memref<16x384xf32, #tpu.memory_space<vmem>>, vector<16x384xf32>
    %cst = arith.constant dense<0.000000e+00> : vector<64x384xf32>
    %2 = tpu.matmul %0, %1, %cst {dimension_numbers = #tpu.dot_dimension_numbers<[1], [0], [0], [1], [0, 0, 1, 1], [], []>} : vector<64x16xf32>, vector<16x384xf32>, vector<64x384xf32> -> vector<64x384xf32>
    %c0_3 = arith.constant 0 : index
    %c0_4 = arith.constant 0 : index
    %3 = vector.load %arg1[%c0_3, %c0_4] : memref<64x16xf32, #tpu.memory_space<vmem>>, vector<64x16xf32>
    %c0_5 = arith.constant 0 : index
    %c0_6 = arith.constant 0 : index
    %4 = vector.load %arg4[%c0_5, %c0_6] : memref<16x384xf32, #tpu.memory_space<vmem>>, vector<16x384xf32>
    %cst_7 = arith.constant dense<0.000000e+00> : vector<64x384xf32>
    %5 = tpu.matmul %3, %4, %cst_7 {dimension_numbers = #tpu.dot_dimension_numbers<[1], [0], [0], [1], [0, 0, 1, 1], [], []>} : vector<64x16xf32>, vector<16x384xf32>, vector<64x384xf32> -> vector<64x384xf32>
    %6 = arith.addf %2, %5 : vector<64x384xf32>
    %c0_8 = arith.constant 0 : index
    %c0_9 = arith.constant 0 : index
    %7 = vector.load %arg5[%c0_8, %c0_9] : memref<1x384xf32, #tpu.memory_space<vmem>>, vector<1x384xf32>
    %8 = vector.broadcast %7 : vector<1x384xf32> to vector<64x384xf32>
    %9 = arith.addf %6, %8 : vector<64x384xf32>
    %cst_10 = arith.constant 0.000000e+00 : f32
    %10 = vector.broadcast %cst_10 : f32 to vector<8x128xf32>
    %11 = vector.extract_strided_slice %9 {offsets = [0, 0], sizes = [8, 384], strides = [1, 1]} : vector<64x384xf32> to vector<8x384xf32>
    %12 = arith.truncf %10 : vector<8x128xf32> to vector<8x128xbf16>
    %c0_11 = arith.constant 0 : index
    %c0_12 = arith.constant 0 : index
    %13 = vector.load %arg6[%c0_11, %c0_12] : memref<128x384xbf16, #tpu.memory_space<vmem>>, vector<128x384xbf16>
    %cst_13 = arith.constant dense<0.000000e+00> : vector<8x384xf32>
    %14 = tpu.matmul %12, %13, %cst_13 {dimension_numbers = #tpu.dot_dimension_numbers<[1], [0], [0], [1], [0, 0, 1, 1], [], []>} : vector<8x128xbf16>, vector<128x384xbf16>, vector<8x384xf32> -> vector<8x384xf32>
    %c0_14 = arith.constant 0 : index
    %c0_15 = arith.constant 0 : index
    %15 = vector.load %arg7[%c0_14, %c0_15] : memref<1x384xf32, #tpu.memory_space<vmem>>, vector<1x384xf32>
    %16 = vector.broadcast %15 : vector<1x384xf32> to vector<8x384xf32>
    %17 = arith.addf %14, %16 : vector<8x384xf32>
    %18 = vector.extract_strided_slice %11 {offsets = [0, 0], sizes = [8, 256], strides = [1, 1]} : vector<8x384xf32> to vector<8x256xf32>
    %19 = vector.extract_strided_slice %17 {offsets = [0, 0], sizes = [8, 256], strides = [1, 1]} : vector<8x384xf32> to vector<8x256xf32>
    %20 = arith.addf %18, %19 : vector<8x256xf32>
    %21 = arith.negf %20 : vector<8x256xf32>
    %22 = math.exp %21 : vector<8x256xf32>
    %cst_16 = arith.constant 1.000000e+00 : f32
    %23 = vector.broadcast %cst_16 : f32 to vector<8x256xf32>
    %24 = arith.addf %23, %22 : vector<8x256xf32>
    %25 = arith.divf %23, %24 : vector<8x256xf32>
    %26 = vector.extract_strided_slice %25 {offsets = [0, 0], sizes = [8, 128], strides = [1, 1]} : vector<8x256xf32> to vector<8x128xf32>
    %27 = vector.extract_strided_slice %25 {offsets = [0, 128], sizes = [8, 128], strides = [1, 1]} : vector<8x256xf32> to vector<8x128xf32>
    %28 = vector.extract_strided_slice %11 {offsets = [0, 256], sizes = [8, 128], strides = [1, 1]} : vector<8x384xf32> to vector<8x128xf32>
    %29 = vector.extract_strided_slice %17 {offsets = [0, 256], sizes = [8, 128], strides = [1, 1]} : vector<8x384xf32> to vector<8x128xf32>
    %30 = arith.mulf %26, %29 : vector<8x128xf32>
    %31 = arith.addf %28, %30 : vector<8x128xf32>
    %32 = math.tanh %31 : vector<8x128xf32>
    %cst_17 = arith.constant 1.000000e+00 : f32
    %33 = vector.broadcast %cst_17 : f32 to vector<8x128xf32>
    %34 = arith.subf %33, %27 : vector<8x128xf32>
    %35 = arith.mulf %34, %32 : vector<8x128xf32>
    %36 = arith.mulf %27, %10 : vector<8x128xf32>
    %37 = arith.addf %35, %36 : vector<8x128xf32>
    %c0_18 = arith.constant 0 : index
    %c0_19 = arith.constant 0 : index
    %38 = vector.load %arg26[%c0_18, %c0_19] : memref<64x128xf32, #tpu.memory_space<vmem>>, vector<8x128xf32>
    tpu.vector_store %arg26[%c0_18, %c0_19], %37 {strides = array<i32>} : memref<64x128xf32, #tpu.memory_space<vmem>>, vector<8x128xf32>,
    %c56 = arith.constant 56 : index
    %c0_20 = arith.constant 0 : index
    %39 = vector.load %arg27[%c56, %c0_20] : memref<64x128xf32, #tpu.memory_space<vmem>>, vector<8x128xf32>
    tpu.vector_store %arg27[%c56, %c0_20], %37 {strides = array<i32>} : memref<64x128xf32, #tpu.memory_space<vmem>>, vector<8x128xf32>,
    %40 = vector.extract_strided_slice %9 {offsets = [8, 0], sizes = [8, 384], strides = [1, 1]} : vector<64x384xf32> to vector<8x384xf32>
    %41 = arith.truncf %37 : vector<8x128xf32> to vector<8x128xbf16>
    %c0_21 = arith.constant 0 : index
    %c0_22 = arith.constant 0 : index
    %42 = vector.load %arg6[%c0_21, %c0_22] : memref<128x384xbf16, #tpu.memory_space<vmem>>, vector<128x384xbf16>
    %cst_23 = arith.constant dense<0.000000e+00> : vector<8x384xf32>
    %43 = tpu.matmul %41, %42, %cst_23 {dimension_numbers = #tpu.dot_dimension_numbers<[1], [0], [0], [1], [0, 0, 1, 1], [], []>} : vector<8x128xbf16>, vector<128x384xbf16>, vector<8x384xf32> -> vector<8x384xf32>
    %c0_24 = arith.constant 0 : index
    %c0_25 = arith.constant 0 : index
    %44 = vector.load %arg7[%c0_24, %c0_25] : memref<1x384xf32, #tpu.memory_space<vmem>>, vector<1x384xf32>
    %45 = vector.broadcast %44 : vector<1x384xf32> to vector<8x384xf32>
    %46 = arith.addf %43, %45 : vector<8x384xf32>
    %47 = vector.extract_strided_slice %40 {offsets = [0, 0], sizes = [8, 256], strides = [1, 1]} : vector<8x384xf32> to vector<8x256xf32>
    %48 = vector.extract_strided_slice %46 {offsets = [0, 0], sizes = [8, 256], strides = [1, 1]} : vector<8x384xf32> to vector<8x256xf32>
    %49 = arith.addf %47, %48 : vector<8x256xf32>
    %50 = arith.negf %49 : vector<8x256xf32>
    %51 = math.exp %50 : vector<8x256xf32>
    %cst_26 = arith.constant 1.000000e+00 : f32
    %52 = vector.broadcast %cst_26 : f32 to vector<8x256xf32>
    %53 = arith.addf %52, %51 : vector<8x256xf32>
    %54 = arith.divf %52, %53 : vector<8x256xf32>
    %55 = vector.extract_strided_slice %54 {offsets = [0, 0], sizes = [8, 128], strides = [1, 1]} : vector<8x256xf32> to vector<8x128xf32>
    %56 = vector.extract_strided_slice %54 {offsets = [0, 128], sizes = [8, 128], strides = [1, 1]} : vector<8x256xf32> to vector<8x128xf32>
    %57 = vector.extract_strided_slice %40 {offsets = [0, 256], sizes = [8, 128], strides = [1, 1]} : vector<8x384xf32> to vector<8x128xf32>
    %58 = vector.extract_strided_slice %46 {offsets = [0, 256], sizes = [8, 128], strides = [1, 1]} : vector<8x384xf32> to vector<8x128xf32>
    %59 = arith.mulf %55, %58 : vector<8x128xf32>
    %60 = arith.addf %57, %59 : vector<8x128xf32>
    %61 = math.tanh %60 : vector<8x128xf32>
    %cst_27 = arith.constant 1.000000e+00 : f32
    %62 = vector.broadcast %cst_27 : f32 to vector<8x128xf32>
    %63 = arith.subf %62, %56 : vector<8x128xf32>
    %64 = arith.mulf %63, %61 : vector<8x128xf32>
    %65 = arith.mulf %56, %37 : vector<8x128xf32>
    %66 = arith.addf %64, %65 : vector<8x128xf32>
    %c8 = arith.constant 8 : index
    %c0_28 = arith.constant 0 : index
    %67 = vector.load %arg26[%c8, %c0_28] : memref<64x128xf32, #tpu.memory_space<vmem>>, vector<8x128xf32>
    tpu.vector_store %arg26[%c8, %c0_28], %66 {strides = array<i32>} : memref<64x128xf32, #tpu.memory_space<vmem>>, vector<8x128xf32>,
    %c48 = arith.constant 48 : index
    %c0_29 = arith.constant 0 : index
    %68 = vector.load %arg27[%c48, %c0_29] : memref<64x128xf32, #tpu.memory_space<vmem>>, vector<8x128xf32>
    tpu.vector_store %arg27[%c48, %c0_29], %66 {strides = array<i32>} : memref<64x128xf32, #tpu.memory_space<vmem>>, vector<8x128xf32>,
    %69 = vector.extract_strided_slice %9 {offsets = [16, 0], sizes = [8, 384], strides = [1, 1]} : vector<64x384xf32> to vector<8x384xf32>
    %70 = arith.truncf %66 : vector<8x128xf32> to vector<8x128xbf16>
    %c0_30 = arith.constant 0 : index
    %c0_31 = arith.constant 0 : index
    %71 = vector.load %arg6[%c0_30, %c0_31] : memref<128x384xbf16, #tpu.memory_space<vmem>>, vector<128x384xbf16>
    %cst_32 = arith.constant dense<0.000000e+00> : vector<8x384xf32>
    %72 = tpu.matmul %70, %71, %cst_32 {dimension_numbers = #tpu.dot_dimension_numbers<[1], [0], [0], [1], [0, 0, 1, 1], [], []>} : vector<8x128xbf16>, vector<128x384xbf16>, vector<8x384xf32> -> vector<8x384xf32>
    %c0_33 = arith.constant 0 : index
    %c0_34 = arith.constant 0 : index
    %73 = vector.load %arg7[%c0_33, %c0_34] : memref<1x384xf32, #tpu.memory_space<vmem>>, vector<1x384xf32>
    %74 = vector.broadcast %73 : vector<1x384xf32> to vector<8x384xf32>
    %75 = arith.addf %72, %74 : vector<8x384xf32>
    %76 = vector.extract_strided_slice %69 {offsets = [0, 0], sizes = [8, 256], strides = [1, 1]} : vector<8x384xf32> to vector<8x256xf32>
    %77 = vector.extract_strided_slice %75 {offsets = [0, 0], sizes = [8, 256], strides = [1, 1]} : vector<8x384xf32> to vector<8x256xf32>
    %78 = arith.addf %76, %77 : vector<8x256xf32>
    %79 = arith.negf %78 : vector<8x256xf32>
    %80 = math.exp %79 : vector<8x256xf32>
    %cst_35 = arith.constant 1.000000e+00 : f32
    %81 = vector.broadcast %cst_35 : f32 to vector<8x256xf32>
    %82 = arith.addf %81, %80 : vector<8x256xf32>
    %83 = arith.divf %81, %82 : vector<8x256xf32>
    %84 = vector.extract_strided_slice %83 {offsets = [0, 0], sizes = [8, 128], strides = [1, 1]} : vector<8x256xf32> to vector<8x128xf32>
    %85 = vector.extract_strided_slice %83 {offsets = [0, 128], sizes = [8, 128], strides = [1, 1]} : vector<8x256xf32> to vector<8x128xf32>
    %86 = vector.extract_strided_slice %69 {offsets = [0, 256], sizes = [8, 128], strides = [1, 1]} : vector<8x384xf32> to vector<8x128xf32>
    %87 = vector.extract_strided_slice %75 {offsets = [0, 256], sizes = [8, 128], strides = [1, 1]} : vector<8x384xf32> to vector<8x128xf32>
    %88 = arith.mulf %84, %87 : vector<8x128xf32>
    %89 = arith.addf %86, %88 : vector<8x128xf32>
    %90 = math.tanh %89 : vector<8x128xf32>
    %cst_36 = arith.constant 1.000000e+00 : f32
    %91 = vector.broadcast %cst_36 : f32 to vector<8x128xf32>
    %92 = arith.subf %91, %85 : vector<8x128xf32>
    %93 = arith.mulf %92, %90 : vector<8x128xf32>
    %94 = arith.mulf %85, %66 : vector<8x128xf32>
    %95 = arith.addf %93, %94 : vector<8x128xf32>
    %c16 = arith.constant 16 : index
    %c0_37 = arith.constant 0 : index
    %96 = vector.load %arg26[%c16, %c0_37] : memref<64x128xf32, #tpu.memory_space<vmem>>, vector<8x128xf32>
    tpu.vector_store %arg26[%c16, %c0_37], %95 {strides = array<i32>} : memref<64x128xf32, #tpu.memory_space<vmem>>, vector<8x128xf32>,
    %c40 = arith.constant 40 : index
    %c0_38 = arith.constant 0 : index
    %97 = vector.load %arg27[%c40, %c0_38] : memref<64x128xf32, #tpu.memory_space<vmem>>, vector<8x128xf32>
    tpu.vector_store %arg27[%c40, %c0_38], %95 {strides = array<i32>} : memref<64x128xf32, #tpu.memory_space<vmem>>, vector<8x128xf32>,
    %98 = vector.extract_strided_slice %9 {offsets = [24, 0], sizes = [8, 384], strides = [1, 1]} : vector<64x384xf32> to vector<8x384xf32>
    %99 = arith.truncf %95 : vector<8x128xf32> to vector<8x128xbf16>
    %c0_39 = arith.constant 0 : index
    %c0_40 = arith.constant 0 : index
    %100 = vector.load %arg6[%c0_39, %c0_40] : memref<128x384xbf16, #tpu.memory_space<vmem>>, vector<128x384xbf16>
    %cst_41 = arith.constant dense<0.000000e+00> : vector<8x384xf32>
    %101 = tpu.matmul %99, %100, %cst_41 {dimension_numbers = #tpu.dot_dimension_numbers<[1], [0], [0], [1], [0, 0, 1, 1], [], []>} : vector<8x128xbf16>, vector<128x384xbf16>, vector<8x384xf32> -> vector<8x384xf32>
    %c0_42 = arith.constant 0 : index
    %c0_43 = arith.constant 0 : index
    %102 = vector.load %arg7[%c0_42, %c0_43] : memref<1x384xf32, #tpu.memory_space<vmem>>, vector<1x384xf32>
    %103 = vector.broadcast %102 : vector<1x384xf32> to vector<8x384xf32>
    %104 = arith.addf %101, %103 : vector<8x384xf32>
    %105 = vector.extract_strided_slice %98 {offsets = [0, 0], sizes = [8, 256], strides = [1, 1]} : vector<8x384xf32> to vector<8x256xf32>
    %106 = vector.extract_strided_slice %104 {offsets = [0, 0], sizes = [8, 256], strides = [1, 1]} : vector<8x384xf32> to vector<8x256xf32>
    %107 = arith.addf %105, %106 : vector<8x256xf32>
    %108 = arith.negf %107 : vector<8x256xf32>
    %109 = math.exp %108 : vector<8x256xf32>
    %cst_44 = arith.constant 1.000000e+00 : f32
    %110 = vector.broadcast %cst_44 : f32 to vector<8x256xf32>
    %111 = arith.addf %110, %109 : vector<8x256xf32>
    %112 = arith.divf %110, %111 : vector<8x256xf32>
    %113 = vector.extract_strided_slice %112 {offsets = [0, 0], sizes = [8, 128], strides = [1, 1]} : vector<8x256xf32> to vector<8x128xf32>
    %114 = vector.extract_strided_slice %112 {offsets = [0, 128], sizes = [8, 128], strides = [1, 1]} : vector<8x256xf32> to vector<8x128xf32>
    %115 = vector.extract_strided_slice %98 {offsets = [0, 256], sizes = [8, 128], strides = [1, 1]} : vector<8x384xf32> to vector<8x128xf32>
    %116 = vector.extract_strided_slice %104 {offsets = [0, 256], sizes = [8, 128], strides = [1, 1]} : vector<8x384xf32> to vector<8x128xf32>
    %117 = arith.mulf %113, %116 : vector<8x128xf32>
    %118 = arith.addf %115, %117 : vector<8x128xf32>
    %119 = math.tanh %118 : vector<8x128xf32>
    %cst_45 = arith.constant 1.000000e+00 : f32
    %120 = vector.broadcast %cst_45 : f32 to vector<8x128xf32>
    %121 = arith.subf %120, %114 : vector<8x128xf32>
    %122 = arith.mulf %121, %119 : vector<8x128xf32>
    %123 = arith.mulf %114, %95 : vector<8x128xf32>
    %124 = arith.addf %122, %123 : vector<8x128xf32>
    %c24 = arith.constant 24 : index
    %c0_46 = arith.constant 0 : index
    %125 = vector.load %arg26[%c24, %c0_46] : memref<64x128xf32, #tpu.memory_space<vmem>>, vector<8x128xf32>
    tpu.vector_store %arg26[%c24, %c0_46], %124 {strides = array<i32>} : memref<64x128xf32, #tpu.memory_space<vmem>>, vector<8x128xf32>,
    %c32 = arith.constant 32 : index
    %c0_47 = arith.constant 0 : index
    %126 = vector.load %arg27[%c32, %c0_47] : memref<64x128xf32, #tpu.memory_space<vmem>>, vector<8x128xf32>
    tpu.vector_store %arg27[%c32, %c0_47], %124 {strides = array<i32>} : memref<64x128xf32, #tpu.memory_space<vmem>>, vector<8x128xf32>,
    %127 = vector.extract_strided_slice %9 {offsets = [32, 0], sizes = [8, 384], strides = [1, 1]} : vector<64x384xf32> to vector<8x384xf32>
    %128 = arith.truncf %124 : vector<8x128xf32> to vector<8x128xbf16>
    %c0_48 = arith.constant 0 : index
    %c0_49 = arith.constant 0 : index
    %129 = vector.load %arg6[%c0_48, %c0_49] : memref<128x384xbf16, #tpu.memory_space<vmem>>, vector<128x384xbf16>
    %cst_50 = arith.constant dense<0.000000e+00> : vector<8x384xf32>
    %130 = tpu.matmul %128, %129, %cst_50 {dimension_numbers = #tpu.dot_dimension_numbers<[1], [0], [0], [1], [0, 0, 1, 1], [], []>} : vector<8x128xbf16>, vector<128x384xbf16>, vector<8x384xf32> -> vector<8x384xf32>
    %c0_51 = arith.constant 0 : index
    %c0_52 = arith.constant 0 : index
    %131 = vector.load %arg7[%c0_51, %c0_52] : memref<1x384xf32, #tpu.memory_space<vmem>>, vector<1x384xf32>
    %132 = vector.broadcast %131 : vector<1x384xf32> to vector<8x384xf32>
    %133 = arith.addf %130, %132 : vector<8x384xf32>
    %134 = vector.extract_strided_slice %127 {offsets = [0, 0], sizes = [8, 256], strides = [1, 1]} : vector<8x384xf32> to vector<8x256xf32>
    %135 = vector.extract_strided_slice %133 {offsets = [0, 0], sizes = [8, 256], strides = [1, 1]} : vector<8x384xf32> to vector<8x256xf32>
    %136 = arith.addf %134, %135 : vector<8x256xf32>
    %137 = arith.negf %136 : vector<8x256xf32>
    %138 = math.exp %137 : vector<8x256xf32>
    %cst_53 = arith.constant 1.000000e+00 : f32
    %139 = vector.broadcast %cst_53 : f32 to vector<8x256xf32>
    %140 = arith.addf %139, %138 : vector<8x256xf32>
    %141 = arith.divf %139, %140 : vector<8x256xf32>
    %142 = vector.extract_strided_slice %141 {offsets = [0, 0], sizes = [8, 128], strides = [1, 1]} : vector<8x256xf32> to vector<8x128xf32>
    %143 = vector.extract_strided_slice %141 {offsets = [0, 128], sizes = [8, 128], strides = [1, 1]} : vector<8x256xf32> to vector<8x128xf32>
    %144 = vector.extract_strided_slice %127 {offsets = [0, 256], sizes = [8, 128], strides = [1, 1]} : vector<8x384xf32> to vector<8x128xf32>
    %145 = vector.extract_strided_slice %133 {offsets = [0, 256], sizes = [8, 128], strides = [1, 1]} : vector<8x384xf32> to vector<8x128xf32>
    %146 = arith.mulf %142, %145 : vector<8x128xf32>
    %147 = arith.addf %144, %146 : vector<8x128xf32>
    %148 = math.tanh %147 : vector<8x128xf32>
    %cst_54 = arith.constant 1.000000e+00 : f32
    %149 = vector.broadcast %cst_54 : f32 to vector<8x128xf32>
    %150 = arith.subf %149, %143 : vector<8x128xf32>
    %151 = arith.mulf %150, %148 : vector<8x128xf32>
    %152 = arith.mulf %143, %124 : vector<8x128xf32>
    %153 = arith.addf %151, %152 : vector<8x128xf32>
    %c32_55 = arith.constant 32 : index
    %c0_56 = arith.constant 0 : index
    %154 = vector.load %arg26[%c32_55, %c0_56] : memref<64x128xf32, #tpu.memory_space<vmem>>, vector<8x128xf32>
    tpu.vector_store %arg26[%c32_55, %c0_56], %153 {strides = array<i32>} : memref<64x128xf32, #tpu.memory_space<vmem>>, vector<8x128xf32>,
    %c24_57 = arith.constant 24 : index
    %c0_58 = arith.constant 0 : index
    %155 = vector.load %arg27[%c24_57, %c0_58] : memref<64x128xf32, #tpu.memory_space<vmem>>, vector<8x128xf32>
    tpu.vector_store %arg27[%c24_57, %c0_58], %153 {strides = array<i32>} : memref<64x128xf32, #tpu.memory_space<vmem>>, vector<8x128xf32>,
    %156 = vector.extract_strided_slice %9 {offsets = [40, 0], sizes = [8, 384], strides = [1, 1]} : vector<64x384xf32> to vector<8x384xf32>
    %157 = arith.truncf %153 : vector<8x128xf32> to vector<8x128xbf16>
    %c0_59 = arith.constant 0 : index
    %c0_60 = arith.constant 0 : index
    %158 = vector.load %arg6[%c0_59, %c0_60] : memref<128x384xbf16, #tpu.memory_space<vmem>>, vector<128x384xbf16>
    %cst_61 = arith.constant dense<0.000000e+00> : vector<8x384xf32>
    %159 = tpu.matmul %157, %158, %cst_61 {dimension_numbers = #tpu.dot_dimension_numbers<[1], [0], [0], [1], [0, 0, 1, 1], [], []>} : vector<8x128xbf16>, vector<128x384xbf16>, vector<8x384xf32> -> vector<8x384xf32>
    %c0_62 = arith.constant 0 : index
    %c0_63 = arith.constant 0 : index
    %160 = vector.load %arg7[%c0_62, %c0_63] : memref<1x384xf32, #tpu.memory_space<vmem>>, vector<1x384xf32>
    %161 = vector.broadcast %160 : vector<1x384xf32> to vector<8x384xf32>
    %162 = arith.addf %159, %161 : vector<8x384xf32>
    %163 = vector.extract_strided_slice %156 {offsets = [0, 0], sizes = [8, 256], strides = [1, 1]} : vector<8x384xf32> to vector<8x256xf32>
    %164 = vector.extract_strided_slice %162 {offsets = [0, 0], sizes = [8, 256], strides = [1, 1]} : vector<8x384xf32> to vector<8x256xf32>
    %165 = arith.addf %163, %164 : vector<8x256xf32>
    %166 = arith.negf %165 : vector<8x256xf32>
    %167 = math.exp %166 : vector<8x256xf32>
    %cst_64 = arith.constant 1.000000e+00 : f32
    %168 = vector.broadcast %cst_64 : f32 to vector<8x256xf32>
    %169 = arith.addf %168, %167 : vector<8x256xf32>
    %170 = arith.divf %168, %169 : vector<8x256xf32>
    %171 = vector.extract_strided_slice %170 {offsets = [0, 0], sizes = [8, 128], strides = [1, 1]} : vector<8x256xf32> to vector<8x128xf32>
    %172 = vector.extract_strided_slice %170 {offsets = [0, 128], sizes = [8, 128], strides = [1, 1]} : vector<8x256xf32> to vector<8x128xf32>
    %173 = vector.extract_strided_slice %156 {offsets = [0, 256], sizes = [8, 128], strides = [1, 1]} : vector<8x384xf32> to vector<8x128xf32>
    %174 = vector.extract_strided_slice %162 {offsets = [0, 256], sizes = [8, 128], strides = [1, 1]} : vector<8x384xf32> to vector<8x128xf32>
    %175 = arith.mulf %171, %174 : vector<8x128xf32>
    %176 = arith.addf %173, %175 : vector<8x128xf32>
    %177 = math.tanh %176 : vector<8x128xf32>
    %cst_65 = arith.constant 1.000000e+00 : f32
    %178 = vector.broadcast %cst_65 : f32 to vector<8x128xf32>
    %179 = arith.subf %178, %172 : vector<8x128xf32>
    %180 = arith.mulf %179, %177 : vector<8x128xf32>
    %181 = arith.mulf %172, %153 : vector<8x128xf32>
    %182 = arith.addf %180, %181 : vector<8x128xf32>
    %c40_66 = arith.constant 40 : index
    %c0_67 = arith.constant 0 : index
    %183 = vector.load %arg26[%c40_66, %c0_67] : memref<64x128xf32, #tpu.memory_space<vmem>>, vector<8x128xf32>
    tpu.vector_store %arg26[%c40_66, %c0_67], %182 {strides = array<i32>} : memref<64x128xf32, #tpu.memory_space<vmem>>, vector<8x128xf32>,
    %c16_68 = arith.constant 16 : index
    %c0_69 = arith.constant 0 : index
    %184 = vector.load %arg27[%c16_68, %c0_69] : memref<64x128xf32, #tpu.memory_space<vmem>>, vector<8x128xf32>
    tpu.vector_store %arg27[%c16_68, %c0_69], %182 {strides = array<i32>} : memref<64x128xf32, #tpu.memory_space<vmem>>, vector<8x128xf32>,
    %185 = vector.extract_strided_slice %9 {offsets = [48, 0], sizes = [8, 384], strides = [1, 1]} : vector<64x384xf32> to vector<8x384xf32>
    %186 = arith.truncf %182 : vector<8x128xf32> to vector<8x128xbf16>
    %c0_70 = arith.constant 0 : index
    %c0_71 = arith.constant 0 : index
    %187 = vector.load %arg6[%c0_70, %c0_71] : memref<128x384xbf16, #tpu.memory_space<vmem>>, vector<128x384xbf16>
    %cst_72 = arith.constant dense<0.000000e+00> : vector<8x384xf32>
    %188 = tpu.matmul %186, %187, %cst_72 {dimension_numbers = #tpu.dot_dimension_numbers<[1], [0], [0], [1], [0, 0, 1, 1], [], []>} : vector<8x128xbf16>, vector<128x384xbf16>, vector<8x384xf32> -> vector<8x384xf32>
    %c0_73 = arith.constant 0 : index
    %c0_74 = arith.constant 0 : index
    %189 = vector.load %arg7[%c0_73, %c0_74] : memref<1x384xf32, #tpu.memory_space<vmem>>, vector<1x384xf32>
    %190 = vector.broadcast %189 : vector<1x384xf32> to vector<8x384xf32>
    %191 = arith.addf %188, %190 : vector<8x384xf32>
    %192 = vector.extract_strided_slice %185 {offsets = [0, 0], sizes = [8, 256], strides = [1, 1]} : vector<8x384xf32> to vector<8x256xf32>
    %193 = vector.extract_strided_slice %191 {offsets = [0, 0], sizes = [8, 256], strides = [1, 1]} : vector<8x384xf32> to vector<8x256xf32>
    %194 = arith.addf %192, %193 : vector<8x256xf32>
    %195 = arith.negf %194 : vector<8x256xf32>
    %196 = math.exp %195 : vector<8x256xf32>
    %cst_75 = arith.constant 1.000000e+00 : f32
    %197 = vector.broadcast %cst_75 : f32 to vector<8x256xf32>
    %198 = arith.addf %197, %196 : vector<8x256xf32>
    %199 = arith.divf %197, %198 : vector<8x256xf32>
    %200 = vector.extract_strided_slice %199 {offsets = [0, 0], sizes = [8, 128], strides = [1, 1]} : vector<8x256xf32> to vector<8x128xf32>
    %201 = vector.extract_strided_slice %199 {offsets = [0, 128], sizes = [8, 128], strides = [1, 1]} : vector<8x256xf32> to vector<8x128xf32>
    %202 = vector.extract_strided_slice %185 {offsets = [0, 256], sizes = [8, 128], strides = [1, 1]} : vector<8x384xf32> to vector<8x128xf32>
    %203 = vector.extract_strided_slice %191 {offsets = [0, 256], sizes = [8, 128], strides = [1, 1]} : vector<8x384xf32> to vector<8x128xf32>
    %204 = arith.mulf %200, %203 : vector<8x128xf32>
    %205 = arith.addf %202, %204 : vector<8x128xf32>
    %206 = math.tanh %205 : vector<8x128xf32>
    %cst_76 = arith.constant 1.000000e+00 : f32
    %207 = vector.broadcast %cst_76 : f32 to vector<8x128xf32>
    %208 = arith.subf %207, %201 : vector<8x128xf32>
    %209 = arith.mulf %208, %206 : vector<8x128xf32>
    %210 = arith.mulf %201, %182 : vector<8x128xf32>
    %211 = arith.addf %209, %210 : vector<8x128xf32>
    %c48_77 = arith.constant 48 : index
    %c0_78 = arith.constant 0 : index
    %212 = vector.load %arg26[%c48_77, %c0_78] : memref<64x128xf32, #tpu.memory_space<vmem>>, vector<8x128xf32>
    tpu.vector_store %arg26[%c48_77, %c0_78], %211 {strides = array<i32>} : memref<64x128xf32, #tpu.memory_space<vmem>>, vector<8x128xf32>,
    %c8_79 = arith.constant 8 : index
    %c0_80 = arith.constant 0 : index
    %213 = vector.load %arg27[%c8_79, %c0_80] : memref<64x128xf32, #tpu.memory_space<vmem>>, vector<8x128xf32>
    tpu.vector_store %arg27[%c8_79, %c0_80], %211 {strides = array<i32>} : memref<64x128xf32, #tpu.memory_space<vmem>>, vector<8x128xf32>,
    %214 = vector.extract_strided_slice %9 {offsets = [56, 0], sizes = [8, 384], strides = [1, 1]} : vector<64x384xf32> to vector<8x384xf32>
    %215 = arith.truncf %211 : vector<8x128xf32> to vector<8x128xbf16>
    %c0_81 = arith.constant 0 : index
    %c0_82 = arith.constant 0 : index
    %216 = vector.load %arg6[%c0_81, %c0_82] : memref<128x384xbf16, #tpu.memory_space<vmem>>, vector<128x384xbf16>
    %cst_83 = arith.constant dense<0.000000e+00> : vector<8x384xf32>
    %217 = tpu.matmul %215, %216, %cst_83 {dimension_numbers = #tpu.dot_dimension_numbers<[1], [0], [0], [1], [0, 0, 1, 1], [], []>} : vector<8x128xbf16>, vector<128x384xbf16>, vector<8x384xf32> -> vector<8x384xf32>
    %c0_84 = arith.constant 0 : index
    %c0_85 = arith.constant 0 : index
    %218 = vector.load %arg7[%c0_84, %c0_85] : memref<1x384xf32, #tpu.memory_space<vmem>>, vector<1x384xf32>
    %219 = vector.broadcast %218 : vector<1x384xf32> to vector<8x384xf32>
    %220 = arith.addf %217, %219 : vector<8x384xf32>
    %221 = vector.extract_strided_slice %214 {offsets = [0, 0], sizes = [8, 256], strides = [1, 1]} : vector<8x384xf32> to vector<8x256xf32>
    %222 = vector.extract_strided_slice %220 {offsets = [0, 0], sizes = [8, 256], strides = [1, 1]} : vector<8x384xf32> to vector<8x256xf32>
    %223 = arith.addf %221, %222 : vector<8x256xf32>
    %224 = arith.negf %223 : vector<8x256xf32>
    %225 = math.exp %224 : vector<8x256xf32>
    %cst_86 = arith.constant 1.000000e+00 : f32
    %226 = vector.broadcast %cst_86 : f32 to vector<8x256xf32>
    %227 = arith.addf %226, %225 : vector<8x256xf32>
    %228 = arith.divf %226, %227 : vector<8x256xf32>
    %229 = vector.extract_strided_slice %228 {offsets = [0, 0], sizes = [8, 128], strides = [1, 1]} : vector<8x256xf32> to vector<8x128xf32>
    %230 = vector.extract_strided_slice %228 {offsets = [0, 128], sizes = [8, 128], strides = [1, 1]} : vector<8x256xf32> to vector<8x128xf32>
    %231 = vector.extract_strided_slice %214 {offsets = [0, 256], sizes = [8, 128], strides = [1, 1]} : vector<8x384xf32> to vector<8x128xf32>
    %232 = vector.extract_strided_slice %220 {offsets = [0, 256], sizes = [8, 128], strides = [1, 1]} : vector<8x384xf32> to vector<8x128xf32>
    %233 = arith.mulf %229, %232 : vector<8x128xf32>
    %234 = arith.addf %231, %233 : vector<8x128xf32>
    %235 = math.tanh %234 : vector<8x128xf32>
    %cst_87 = arith.constant 1.000000e+00 : f32
    %236 = vector.broadcast %cst_87 : f32 to vector<8x128xf32>
    %237 = arith.subf %236, %230 : vector<8x128xf32>
    %238 = arith.mulf %237, %235 : vector<8x128xf32>
    %239 = arith.mulf %230, %211 : vector<8x128xf32>
    %240 = arith.addf %238, %239 : vector<8x128xf32>
    %c56_88 = arith.constant 56 : index
    %c0_89 = arith.constant 0 : index
    %241 = vector.load %arg26[%c56_88, %c0_89] : memref<64x128xf32, #tpu.memory_space<vmem>>, vector<8x128xf32>
    tpu.vector_store %arg26[%c56_88, %c0_89], %240 {strides = array<i32>} : memref<64x128xf32, #tpu.memory_space<vmem>>, vector<8x128xf32>,
    %c0_90 = arith.constant 0 : index
    %c0_91 = arith.constant 0 : index
    %242 = vector.load %arg27[%c0_90, %c0_91] : memref<64x128xf32, #tpu.memory_space<vmem>>, vector<8x128xf32>
    tpu.vector_store %arg27[%c0_90, %c0_91], %240 {strides = array<i32>} : memref<64x128xf32, #tpu.memory_space<vmem>>, vector<8x128xf32>,
    %c0_92 = arith.constant 0 : index
    %c0_93 = arith.constant 0 : index
    %243 = vector.load %arg26[%c0_92, %c0_93] : memref<64x128xf32, #tpu.memory_space<vmem>>, vector<64x128xf32>
    %c0_94 = arith.constant 0 : index
    %c0_95 = arith.constant 0 : index
    %244 = vector.load %arg8[%c0_94, %c0_95] : memref<128x384xf32, #tpu.memory_space<vmem>>, vector<128x384xf32>
    %cst_96 = arith.constant dense<0.000000e+00> : vector<64x384xf32>
    %245 = tpu.matmul %243, %244, %cst_96 {dimension_numbers = #tpu.dot_dimension_numbers<[1], [0], [0], [1], [0, 0, 1, 1], [], []>} : vector<64x128xf32>, vector<128x384xf32>, vector<64x384xf32> -> vector<64x384xf32>
    %c0_97 = arith.constant 0 : index
    %c0_98 = arith.constant 0 : index
    %246 = vector.load %arg27[%c0_97, %c0_98] : memref<64x128xf32, #tpu.memory_space<vmem>>, vector<64x128xf32>
    %c0_99 = arith.constant 0 : index
    %c0_100 = arith.constant 0 : index
    %247 = vector.load %arg9[%c0_99, %c0_100] : memref<128x384xf32, #tpu.memory_space<vmem>>, vector<128x384xf32>
    %cst_101 = arith.constant dense<0.000000e+00> : vector<64x384xf32>
    %248 = tpu.matmul %246, %247, %cst_101 {dimension_numbers = #tpu.dot_dimension_numbers<[1], [0], [0], [1], [0, 0, 1, 1], [], []>} : vector<64x128xf32>, vector<128x384xf32>, vector<64x384xf32> -> vector<64x384xf32>
    %249 = arith.addf %245, %248 : vector<64x384xf32>
    %c0_102 = arith.constant 0 : index
    %c0_103 = arith.constant 0 : index
    %250 = vector.load %arg10[%c0_102, %c0_103] : memref<1x384xf32, #tpu.memory_space<vmem>>, vector<1x384xf32>
    %251 = vector.broadcast %250 : vector<1x384xf32> to vector<64x384xf32>
    %252 = arith.addf %249, %251 : vector<64x384xf32>
    %cst_104 = arith.constant 0.000000e+00 : f32
    %253 = vector.broadcast %cst_104 : f32 to vector<8x128xf32>
    %254 = vector.extract_strided_slice %252 {offsets = [0, 0], sizes = [8, 384], strides = [1, 1]} : vector<64x384xf32> to vector<8x384xf32>
    %255 = arith.truncf %253 : vector<8x128xf32> to vector<8x128xbf16>
    %c0_105 = arith.constant 0 : index
    %c0_106 = arith.constant 0 : index
    %256 = vector.load %arg11[%c0_105, %c0_106] : memref<128x384xbf16, #tpu.memory_space<vmem>>, vector<128x384xbf16>
    %cst_107 = arith.constant dense<0.000000e+00> : vector<8x384xf32>
    %257 = tpu.matmul %255, %256, %cst_107 {dimension_numbers = #tpu.dot_dimension_numbers<[1], [0], [0], [1], [0, 0, 1, 1], [], []>} : vector<8x128xbf16>, vector<128x384xbf16>, vector<8x384xf32> -> vector<8x384xf32>
    %c0_108 = arith.constant 0 : index
    %c0_109 = arith.constant 0 : index
    %258 = vector.load %arg12[%c0_108, %c0_109] : memref<1x384xf32, #tpu.memory_space<vmem>>, vector<1x384xf32>
    %259 = vector.broadcast %258 : vector<1x384xf32> to vector<8x384xf32>
    %260 = arith.addf %257, %259 : vector<8x384xf32>
    %261 = vector.extract_strided_slice %254 {offsets = [0, 0], sizes = [8, 256], strides = [1, 1]} : vector<8x384xf32> to vector<8x256xf32>
    %262 = vector.extract_strided_slice %260 {offsets = [0, 0], sizes = [8, 256], strides = [1, 1]} : vector<8x384xf32> to vector<8x256xf32>
    %263 = arith.addf %261, %262 : vector<8x256xf32>
    %264 = arith.negf %263 : vector<8x256xf32>
    %265 = math.exp %264 : vector<8x256xf32>
    %cst_110 = arith.constant 1.000000e+00 : f32
    %266 = vector.broadcast %cst_110 : f32 to vector<8x256xf32>
    %267 = arith.addf %266, %265 : vector<8x256xf32>
    %268 = arith.divf %266, %267 : vector<8x256xf32>
    %269 = vector.extract_strided_slice %268 {offsets = [0, 0], sizes = [8, 128], strides = [1, 1]} : vector<8x256xf32> to vector<8x128xf32>
    %270 = vector.extract_strided_slice %268 {offsets = [0, 128], sizes = [8, 128], strides = [1, 1]} : vector<8x256xf32> to vector<8x128xf32>
    %271 = vector.extract_strided_slice %254 {offsets = [0, 256], sizes = [8, 128], strides = [1, 1]} : vector<8x384xf32> to vector<8x128xf32>
    %272 = vector.extract_strided_slice %260 {offsets = [0, 256], sizes = [8, 128], strides = [1, 1]} : vector<8x384xf32> to vector<8x128xf32>
    %273 = arith.mulf %269, %272 : vector<8x128xf32>
    %274 = arith.addf %271, %273 : vector<8x128xf32>
    %275 = math.tanh %274 : vector<8x128xf32>
    %cst_111 = arith.constant 1.000000e+00 : f32
    %276 = vector.broadcast %cst_111 : f32 to vector<8x128xf32>
    %277 = arith.subf %276, %270 : vector<8x128xf32>
    %278 = arith.mulf %277, %275 : vector<8x128xf32>
    %279 = arith.mulf %270, %253 : vector<8x128xf32>
    %280 = arith.addf %278, %279 : vector<8x128xf32>
    %c0_112 = arith.constant 0 : index
    %c0_113 = arith.constant 0 : index
    %281 = vector.load %arg28[%c0_112, %c0_113] : memref<64x128xf32, #tpu.memory_space<vmem>>, vector<8x128xf32>
    tpu.vector_store %arg28[%c0_112, %c0_113], %280 {strides = array<i32>} : memref<64x128xf32, #tpu.memory_space<vmem>>, vector<8x128xf32>,
    %282 = vector.extract_strided_slice %252 {offsets = [8, 0], sizes = [8, 384], strides = [1, 1]} : vector<64x384xf32> to vector<8x384xf32>
    %283 = arith.truncf %280 : vector<8x128xf32> to vector<8x128xbf16>
    %c0_114 = arith.constant 0 : index
    %c0_115 = arith.constant 0 : index
    %284 = vector.load %arg11[%c0_114, %c0_115] : memref<128x384xbf16, #tpu.memory_space<vmem>>, vector<128x384xbf16>
    %cst_116 = arith.constant dense<0.000000e+00> : vector<8x384xf32>
    %285 = tpu.matmul %283, %284, %cst_116 {dimension_numbers = #tpu.dot_dimension_numbers<[1], [0], [0], [1], [0, 0, 1, 1], [], []>} : vector<8x128xbf16>, vector<128x384xbf16>, vector<8x384xf32> -> vector<8x384xf32>
    %c0_117 = arith.constant 0 : index
    %c0_118 = arith.constant 0 : index
    %286 = vector.load %arg12[%c0_117, %c0_118] : memref<1x384xf32, #tpu.memory_space<vmem>>, vector<1x384xf32>
    %287 = vector.broadcast %286 : vector<1x384xf32> to vector<8x384xf32>
    %288 = arith.addf %285, %287 : vector<8x384xf32>
    %289 = vector.extract_strided_slice %282 {offsets = [0, 0], sizes = [8, 256], strides = [1, 1]} : vector<8x384xf32> to vector<8x256xf32>
    %290 = vector.extract_strided_slice %288 {offsets = [0, 0], sizes = [8, 256], strides = [1, 1]} : vector<8x384xf32> to vector<8x256xf32>
    %291 = arith.addf %289, %290 : vector<8x256xf32>
    %292 = arith.negf %291 : vector<8x256xf32>
    %293 = math.exp %292 : vector<8x256xf32>
    %cst_119 = arith.constant 1.000000e+00 : f32
    %294 = vector.broadcast %cst_119 : f32 to vector<8x256xf32>
    %295 = arith.addf %294, %293 : vector<8x256xf32>
    %296 = arith.divf %294, %295 : vector<8x256xf32>
    %297 = vector.extract_strided_slice %296 {offsets = [0, 0], sizes = [8, 128], strides = [1, 1]} : vector<8x256xf32> to vector<8x128xf32>
    %298 = vector.extract_strided_slice %296 {offsets = [0, 128], sizes = [8, 128], strides = [1, 1]} : vector<8x256xf32> to vector<8x128xf32>
    %299 = vector.extract_strided_slice %282 {offsets = [0, 256], sizes = [8, 128], strides = [1, 1]} : vector<8x384xf32> to vector<8x128xf32>
    %300 = vector.extract_strided_slice %288 {offsets = [0, 256], sizes = [8, 128], strides = [1, 1]} : vector<8x384xf32> to vector<8x128xf32>
    %301 = arith.mulf %297, %300 : vector<8x128xf32>
    %302 = arith.addf %299, %301 : vector<8x128xf32>
    %303 = math.tanh %302 : vector<8x128xf32>
    %cst_120 = arith.constant 1.000000e+00 : f32
    %304 = vector.broadcast %cst_120 : f32 to vector<8x128xf32>
    %305 = arith.subf %304, %298 : vector<8x128xf32>
    %306 = arith.mulf %305, %303 : vector<8x128xf32>
    %307 = arith.mulf %298, %280 : vector<8x128xf32>
    %308 = arith.addf %306, %307 : vector<8x128xf32>
    %c8_121 = arith.constant 8 : index
    %c0_122 = arith.constant 0 : index
    %309 = vector.load %arg28[%c8_121, %c0_122] : memref<64x128xf32, #tpu.memory_space<vmem>>, vector<8x128xf32>
    tpu.vector_store %arg28[%c8_121, %c0_122], %308 {strides = array<i32>} : memref<64x128xf32, #tpu.memory_space<vmem>>, vector<8x128xf32>,
    %310 = vector.extract_strided_slice %252 {offsets = [16, 0], sizes = [8, 384], strides = [1, 1]} : vector<64x384xf32> to vector<8x384xf32>
    %311 = arith.truncf %308 : vector<8x128xf32> to vector<8x128xbf16>
    %c0_123 = arith.constant 0 : index
    %c0_124 = arith.constant 0 : index
    %312 = vector.load %arg11[%c0_123, %c0_124] : memref<128x384xbf16, #tpu.memory_space<vmem>>, vector<128x384xbf16>
    %cst_125 = arith.constant dense<0.000000e+00> : vector<8x384xf32>
    %313 = tpu.matmul %311, %312, %cst_125 {dimension_numbers = #tpu.dot_dimension_numbers<[1], [0], [0], [1], [0, 0, 1, 1], [], []>} : vector<8x128xbf16>, vector<128x384xbf16>, vector<8x384xf32> -> vector<8x384xf32>
    %c0_126 = arith.constant 0 : index
    %c0_127 = arith.constant 0 : index
    %314 = vector.load %arg12[%c0_126, %c0_127] : memref<1x384xf32, #tpu.memory_space<vmem>>, vector<1x384xf32>
    %315 = vector.broadcast %314 : vector<1x384xf32> to vector<8x384xf32>
    %316 = arith.addf %313, %315 : vector<8x384xf32>
    %317 = vector.extract_strided_slice %310 {offsets = [0, 0], sizes = [8, 256], strides = [1, 1]} : vector<8x384xf32> to vector<8x256xf32>
    %318 = vector.extract_strided_slice %316 {offsets = [0, 0], sizes = [8, 256], strides = [1, 1]} : vector<8x384xf32> to vector<8x256xf32>
    %319 = arith.addf %317, %318 : vector<8x256xf32>
    %320 = arith.negf %319 : vector<8x256xf32>
    %321 = math.exp %320 : vector<8x256xf32>
    %cst_128 = arith.constant 1.000000e+00 : f32
    %322 = vector.broadcast %cst_128 : f32 to vector<8x256xf32>
    %323 = arith.addf %322, %321 : vector<8x256xf32>
    %324 = arith.divf %322, %323 : vector<8x256xf32>
    %325 = vector.extract_strided_slice %324 {offsets = [0, 0], sizes = [8, 128], strides = [1, 1]} : vector<8x256xf32> to vector<8x128xf32>
    %326 = vector.extract_strided_slice %324 {offsets = [0, 128], sizes = [8, 128], strides = [1, 1]} : vector<8x256xf32> to vector<8x128xf32>
    %327 = vector.extract_strided_slice %310 {offsets = [0, 256], sizes = [8, 128], strides = [1, 1]} : vector<8x384xf32> to vector<8x128xf32>
    %328 = vector.extract_strided_slice %316 {offsets = [0, 256], sizes = [8, 128], strides = [1, 1]} : vector<8x384xf32> to vector<8x128xf32>
    %329 = arith.mulf %325, %328 : vector<8x128xf32>
    %330 = arith.addf %327, %329 : vector<8x128xf32>
    %331 = math.tanh %330 : vector<8x128xf32>
    %cst_129 = arith.constant 1.000000e+00 : f32
    %332 = vector.broadcast %cst_129 : f32 to vector<8x128xf32>
    %333 = arith.subf %332, %326 : vector<8x128xf32>
    %334 = arith.mulf %333, %331 : vector<8x128xf32>
    %335 = arith.mulf %326, %308 : vector<8x128xf32>
    %336 = arith.addf %334, %335 : vector<8x128xf32>
    %c16_130 = arith.constant 16 : index
    %c0_131 = arith.constant 0 : index
    %337 = vector.load %arg28[%c16_130, %c0_131] : memref<64x128xf32, #tpu.memory_space<vmem>>, vector<8x128xf32>
    tpu.vector_store %arg28[%c16_130, %c0_131], %336 {strides = array<i32>} : memref<64x128xf32, #tpu.memory_space<vmem>>, vector<8x128xf32>,
    %338 = vector.extract_strided_slice %252 {offsets = [24, 0], sizes = [8, 384], strides = [1, 1]} : vector<64x384xf32> to vector<8x384xf32>
    %339 = arith.truncf %336 : vector<8x128xf32> to vector<8x128xbf16>
    %c0_132 = arith.constant 0 : index
    %c0_133 = arith.constant 0 : index
    %340 = vector.load %arg11[%c0_132, %c0_133] : memref<128x384xbf16, #tpu.memory_space<vmem>>, vector<128x384xbf16>
    %cst_134 = arith.constant dense<0.000000e+00> : vector<8x384xf32>
    %341 = tpu.matmul %339, %340, %cst_134 {dimension_numbers = #tpu.dot_dimension_numbers<[1], [0], [0], [1], [0, 0, 1, 1], [], []>} : vector<8x128xbf16>, vector<128x384xbf16>, vector<8x384xf32> -> vector<8x384xf32>
    %c0_135 = arith.constant 0 : index
    %c0_136 = arith.constant 0 : index
    %342 = vector.load %arg12[%c0_135, %c0_136] : memref<1x384xf32, #tpu.memory_space<vmem>>, vector<1x384xf32>
    %343 = vector.broadcast %342 : vector<1x384xf32> to vector<8x384xf32>
    %344 = arith.addf %341, %343 : vector<8x384xf32>
    %345 = vector.extract_strided_slice %338 {offsets = [0, 0], sizes = [8, 256], strides = [1, 1]} : vector<8x384xf32> to vector<8x256xf32>
    %346 = vector.extract_strided_slice %344 {offsets = [0, 0], sizes = [8, 256], strides = [1, 1]} : vector<8x384xf32> to vector<8x256xf32>
    %347 = arith.addf %345, %346 : vector<8x256xf32>
    %348 = arith.negf %347 : vector<8x256xf32>
    %349 = math.exp %348 : vector<8x256xf32>
    %cst_137 = arith.constant 1.000000e+00 : f32
    %350 = vector.broadcast %cst_137 : f32 to vector<8x256xf32>
    %351 = arith.addf %350, %349 : vector<8x256xf32>
    %352 = arith.divf %350, %351 : vector<8x256xf32>
    %353 = vector.extract_strided_slice %352 {offsets = [0, 0], sizes = [8, 128], strides = [1, 1]} : vector<8x256xf32> to vector<8x128xf32>
    %354 = vector.extract_strided_slice %352 {offsets = [0, 128], sizes = [8, 128], strides = [1, 1]} : vector<8x256xf32> to vector<8x128xf32>
    %355 = vector.extract_strided_slice %338 {offsets = [0, 256], sizes = [8, 128], strides = [1, 1]} : vector<8x384xf32> to vector<8x128xf32>
    %356 = vector.extract_strided_slice %344 {offsets = [0, 256], sizes = [8, 128], strides = [1, 1]} : vector<8x384xf32> to vector<8x128xf32>
    %357 = arith.mulf %353, %356 : vector<8x128xf32>
    %358 = arith.addf %355, %357 : vector<8x128xf32>
    %359 = math.tanh %358 : vector<8x128xf32>
    %cst_138 = arith.constant 1.000000e+00 : f32
    %360 = vector.broadcast %cst_138 : f32 to vector<8x128xf32>
    %361 = arith.subf %360, %354 : vector<8x128xf32>
    %362 = arith.mulf %361, %359 : vector<8x128xf32>
    %363 = arith.mulf %354, %336 : vector<8x128xf32>
    %364 = arith.addf %362, %363 : vector<8x128xf32>
    %c24_139 = arith.constant 24 : index
    %c0_140 = arith.constant 0 : index
    %365 = vector.load %arg28[%c24_139, %c0_140] : memref<64x128xf32, #tpu.memory_space<vmem>>, vector<8x128xf32>
    tpu.vector_store %arg28[%c24_139, %c0_140], %364 {strides = array<i32>} : memref<64x128xf32, #tpu.memory_space<vmem>>, vector<8x128xf32>,
    %366 = vector.extract_strided_slice %252 {offsets = [32, 0], sizes = [8, 384], strides = [1, 1]} : vector<64x384xf32> to vector<8x384xf32>
    %367 = arith.truncf %364 : vector<8x128xf32> to vector<8x128xbf16>
    %c0_141 = arith.constant 0 : index
    %c0_142 = arith.constant 0 : index
    %368 = vector.load %arg11[%c0_141, %c0_142] : memref<128x384xbf16, #tpu.memory_space<vmem>>, vector<128x384xbf16>
    %cst_143 = arith.constant dense<0.000000e+00> : vector<8x384xf32>
    %369 = tpu.matmul %367, %368, %cst_143 {dimension_numbers = #tpu.dot_dimension_numbers<[1], [0], [0], [1], [0, 0, 1, 1], [], []>} : vector<8x128xbf16>, vector<128x384xbf16>, vector<8x384xf32> -> vector<8x384xf32>
    %c0_144 = arith.constant 0 : index
    %c0_145 = arith.constant 0 : index
    %370 = vector.load %arg12[%c0_144, %c0_145] : memref<1x384xf32, #tpu.memory_space<vmem>>, vector<1x384xf32>
    %371 = vector.broadcast %370 : vector<1x384xf32> to vector<8x384xf32>
    %372 = arith.addf %369, %371 : vector<8x384xf32>
    %373 = vector.extract_strided_slice %366 {offsets = [0, 0], sizes = [8, 256], strides = [1, 1]} : vector<8x384xf32> to vector<8x256xf32>
    %374 = vector.extract_strided_slice %372 {offsets = [0, 0], sizes = [8, 256], strides = [1, 1]} : vector<8x384xf32> to vector<8x256xf32>
    %375 = arith.addf %373, %374 : vector<8x256xf32>
    %376 = arith.negf %375 : vector<8x256xf32>
    %377 = math.exp %376 : vector<8x256xf32>
    %cst_146 = arith.constant 1.000000e+00 : f32
    %378 = vector.broadcast %cst_146 : f32 to vector<8x256xf32>
    %379 = arith.addf %378, %377 : vector<8x256xf32>
    %380 = arith.divf %378, %379 : vector<8x256xf32>
    %381 = vector.extract_strided_slice %380 {offsets = [0, 0], sizes = [8, 128], strides = [1, 1]} : vector<8x256xf32> to vector<8x128xf32>
    %382 = vector.extract_strided_slice %380 {offsets = [0, 128], sizes = [8, 128], strides = [1, 1]} : vector<8x256xf32> to vector<8x128xf32>
    %383 = vector.extract_strided_slice %366 {offsets = [0, 256], sizes = [8, 128], strides = [1, 1]} : vector<8x384xf32> to vector<8x128xf32>
    %384 = vector.extract_strided_slice %372 {offsets = [0, 256], sizes = [8, 128], strides = [1, 1]} : vector<8x384xf32> to vector<8x128xf32>
    %385 = arith.mulf %381, %384 : vector<8x128xf32>
    %386 = arith.addf %383, %385 : vector<8x128xf32>
    %387 = math.tanh %386 : vector<8x128xf32>
    %cst_147 = arith.constant 1.000000e+00 : f32
    %388 = vector.broadcast %cst_147 : f32 to vector<8x128xf32>
    %389 = arith.subf %388, %382 : vector<8x128xf32>
    %390 = arith.mulf %389, %387 : vector<8x128xf32>
    %391 = arith.mulf %382, %364 : vector<8x128xf32>
    %392 = arith.addf %390, %391 : vector<8x128xf32>
    %c32_148 = arith.constant 32 : index
    %c0_149 = arith.constant 0 : index
    %393 = vector.load %arg28[%c32_148, %c0_149] : memref<64x128xf32, #tpu.memory_space<vmem>>, vector<8x128xf32>
    tpu.vector_store %arg28[%c32_148, %c0_149], %392 {strides = array<i32>} : memref<64x128xf32, #tpu.memory_space<vmem>>, vector<8x128xf32>,
    %394 = vector.extract_strided_slice %252 {offsets = [40, 0], sizes = [8, 384], strides = [1, 1]} : vector<64x384xf32> to vector<8x384xf32>
    %395 = arith.truncf %392 : vector<8x128xf32> to vector<8x128xbf16>
    %c0_150 = arith.constant 0 : index
    %c0_151 = arith.constant 0 : index
    %396 = vector.load %arg11[%c0_150, %c0_151] : memref<128x384xbf16, #tpu.memory_space<vmem>>, vector<128x384xbf16>
    %cst_152 = arith.constant dense<0.000000e+00> : vector<8x384xf32>
    %397 = tpu.matmul %395, %396, %cst_152 {dimension_numbers = #tpu.dot_dimension_numbers<[1], [0], [0], [1], [0, 0, 1, 1], [], []>} : vector<8x128xbf16>, vector<128x384xbf16>, vector<8x384xf32> -> vector<8x384xf32>
    %c0_153 = arith.constant 0 : index
    %c0_154 = arith.constant 0 : index
    %398 = vector.load %arg12[%c0_153, %c0_154] : memref<1x384xf32, #tpu.memory_space<vmem>>, vector<1x384xf32>
    %399 = vector.broadcast %398 : vector<1x384xf32> to vector<8x384xf32>
    %400 = arith.addf %397, %399 : vector<8x384xf32>
    %401 = vector.extract_strided_slice %394 {offsets = [0, 0], sizes = [8, 256], strides = [1, 1]} : vector<8x384xf32> to vector<8x256xf32>
    %402 = vector.extract_strided_slice %400 {offsets = [0, 0], sizes = [8, 256], strides = [1, 1]} : vector<8x384xf32> to vector<8x256xf32>
    %403 = arith.addf %401, %402 : vector<8x256xf32>
    %404 = arith.negf %403 : vector<8x256xf32>
    %405 = math.exp %404 : vector<8x256xf32>
    %cst_155 = arith.constant 1.000000e+00 : f32
    %406 = vector.broadcast %cst_155 : f32 to vector<8x256xf32>
    %407 = arith.addf %406, %405 : vector<8x256xf32>
    %408 = arith.divf %406, %407 : vector<8x256xf32>
    %409 = vector.extract_strided_slice %408 {offsets = [0, 0], sizes = [8, 128], strides = [1, 1]} : vector<8x256xf32> to vector<8x128xf32>
    %410 = vector.extract_strided_slice %408 {offsets = [0, 128], sizes = [8, 128], strides = [1, 1]} : vector<8x256xf32> to vector<8x128xf32>
    %411 = vector.extract_strided_slice %394 {offsets = [0, 256], sizes = [8, 128], strides = [1, 1]} : vector<8x384xf32> to vector<8x128xf32>
    %412 = vector.extract_strided_slice %400 {offsets = [0, 256], sizes = [8, 128], strides = [1, 1]} : vector<8x384xf32> to vector<8x128xf32>
    %413 = arith.mulf %409, %412 : vector<8x128xf32>
    %414 = arith.addf %411, %413 : vector<8x128xf32>
    %415 = math.tanh %414 : vector<8x128xf32>
    %cst_156 = arith.constant 1.000000e+00 : f32
    %416 = vector.broadcast %cst_156 : f32 to vector<8x128xf32>
    %417 = arith.subf %416, %410 : vector<8x128xf32>
    %418 = arith.mulf %417, %415 : vector<8x128xf32>
    %419 = arith.mulf %410, %392 : vector<8x128xf32>
    %420 = arith.addf %418, %419 : vector<8x128xf32>
    %c40_157 = arith.constant 40 : index
    %c0_158 = arith.constant 0 : index
    %421 = vector.load %arg28[%c40_157, %c0_158] : memref<64x128xf32, #tpu.memory_space<vmem>>, vector<8x128xf32>
    tpu.vector_store %arg28[%c40_157, %c0_158], %420 {strides = array<i32>} : memref<64x128xf32, #tpu.memory_space<vmem>>, vector<8x128xf32>,
    %422 = vector.extract_strided_slice %252 {offsets = [48, 0], sizes = [8, 384], strides = [1, 1]} : vector<64x384xf32> to vector<8x384xf32>
    %423 = arith.truncf %420 : vector<8x128xf32> to vector<8x128xbf16>
    %c0_159 = arith.constant 0 : index
    %c0_160 = arith.constant 0 : index
    %424 = vector.load %arg11[%c0_159, %c0_160] : memref<128x384xbf16, #tpu.memory_space<vmem>>, vector<128x384xbf16>
    %cst_161 = arith.constant dense<0.000000e+00> : vector<8x384xf32>
    %425 = tpu.matmul %423, %424, %cst_161 {dimension_numbers = #tpu.dot_dimension_numbers<[1], [0], [0], [1], [0, 0, 1, 1], [], []>} : vector<8x128xbf16>, vector<128x384xbf16>, vector<8x384xf32> -> vector<8x384xf32>
    %c0_162 = arith.constant 0 : index
    %c0_163 = arith.constant 0 : index
    %426 = vector.load %arg12[%c0_162, %c0_163] : memref<1x384xf32, #tpu.memory_space<vmem>>, vector<1x384xf32>
    %427 = vector.broadcast %426 : vector<1x384xf32> to vector<8x384xf32>
    %428 = arith.addf %425, %427 : vector<8x384xf32>
    %429 = vector.extract_strided_slice %422 {offsets = [0, 0], sizes = [8, 256], strides = [1, 1]} : vector<8x384xf32> to vector<8x256xf32>
    %430 = vector.extract_strided_slice %428 {offsets = [0, 0], sizes = [8, 256], strides = [1, 1]} : vector<8x384xf32> to vector<8x256xf32>
    %431 = arith.addf %429, %430 : vector<8x256xf32>
    %432 = arith.negf %431 : vector<8x256xf32>
    %433 = math.exp %432 : vector<8x256xf32>
    %cst_164 = arith.constant 1.000000e+00 : f32
    %434 = vector.broadcast %cst_164 : f32 to vector<8x256xf32>
    %435 = arith.addf %434, %433 : vector<8x256xf32>
    %436 = arith.divf %434, %435 : vector<8x256xf32>
    %437 = vector.extract_strided_slice %436 {offsets = [0, 0], sizes = [8, 128], strides = [1, 1]} : vector<8x256xf32> to vector<8x128xf32>
    %438 = vector.extract_strided_slice %436 {offsets = [0, 128], sizes = [8, 128], strides = [1, 1]} : vector<8x256xf32> to vector<8x128xf32>
    %439 = vector.extract_strided_slice %422 {offsets = [0, 256], sizes = [8, 128], strides = [1, 1]} : vector<8x384xf32> to vector<8x128xf32>
    %440 = vector.extract_strided_slice %428 {offsets = [0, 256], sizes = [8, 128], strides = [1, 1]} : vector<8x384xf32> to vector<8x128xf32>
    %441 = arith.mulf %437, %440 : vector<8x128xf32>
    %442 = arith.addf %439, %441 : vector<8x128xf32>
    %443 = math.tanh %442 : vector<8x128xf32>
    %cst_165 = arith.constant 1.000000e+00 : f32
    %444 = vector.broadcast %cst_165 : f32 to vector<8x128xf32>
    %445 = arith.subf %444, %438 : vector<8x128xf32>
    %446 = arith.mulf %445, %443 : vector<8x128xf32>
    %447 = arith.mulf %438, %420 : vector<8x128xf32>
    %448 = arith.addf %446, %447 : vector<8x128xf32>
    %c48_166 = arith.constant 48 : index
    %c0_167 = arith.constant 0 : index
    %449 = vector.load %arg28[%c48_166, %c0_167] : memref<64x128xf32, #tpu.memory_space<vmem>>, vector<8x128xf32>
    tpu.vector_store %arg28[%c48_166, %c0_167], %448 {strides = array<i32>} : memref<64x128xf32, #tpu.memory_space<vmem>>, vector<8x128xf32>,
    %450 = vector.extract_strided_slice %252 {offsets = [56, 0], sizes = [8, 384], strides = [1, 1]} : vector<64x384xf32> to vector<8x384xf32>
    %451 = arith.truncf %448 : vector<8x128xf32> to vector<8x128xbf16>
    %c0_168 = arith.constant 0 : index
    %c0_169 = arith.constant 0 : index
    %452 = vector.load %arg11[%c0_168, %c0_169] : memref<128x384xbf16, #tpu.memory_space<vmem>>, vector<128x384xbf16>
    %cst_170 = arith.constant dense<0.000000e+00> : vector<8x384xf32>
    %453 = tpu.matmul %451, %452, %cst_170 {dimension_numbers = #tpu.dot_dimension_numbers<[1], [0], [0], [1], [0, 0, 1, 1], [], []>} : vector<8x128xbf16>, vector<128x384xbf16>, vector<8x384xf32> -> vector<8x384xf32>
    %c0_171 = arith.constant 0 : index
    %c0_172 = arith.constant 0 : index
    %454 = vector.load %arg12[%c0_171, %c0_172] : memref<1x384xf32, #tpu.memory_space<vmem>>, vector<1x384xf32>
    %455 = vector.broadcast %454 : vector<1x384xf32> to vector<8x384xf32>
    %456 = arith.addf %453, %455 : vector<8x384xf32>
    %457 = vector.extract_strided_slice %450 {offsets = [0, 0], sizes = [8, 256], strides = [1, 1]} : vector<8x384xf32> to vector<8x256xf32>
    %458 = vector.extract_strided_slice %456 {offsets = [0, 0], sizes = [8, 256], strides = [1, 1]} : vector<8x384xf32> to vector<8x256xf32>
    %459 = arith.addf %457, %458 : vector<8x256xf32>
    %460 = arith.negf %459 : vector<8x256xf32>
    %461 = math.exp %460 : vector<8x256xf32>
    %cst_173 = arith.constant 1.000000e+00 : f32
    %462 = vector.broadcast %cst_173 : f32 to vector<8x256xf32>
    %463 = arith.addf %462, %461 : vector<8x256xf32>
    %464 = arith.divf %462, %463 : vector<8x256xf32>
    %465 = vector.extract_strided_slice %464 {offsets = [0, 0], sizes = [8, 128], strides = [1, 1]} : vector<8x256xf32> to vector<8x128xf32>
    %466 = vector.extract_strided_slice %464 {offsets = [0, 128], sizes = [8, 128], strides = [1, 1]} : vector<8x256xf32> to vector<8x128xf32>
    %467 = vector.extract_strided_slice %450 {offsets = [0, 256], sizes = [8, 128], strides = [1, 1]} : vector<8x384xf32> to vector<8x128xf32>
    %468 = vector.extract_strided_slice %456 {offsets = [0, 256], sizes = [8, 128], strides = [1, 1]} : vector<8x384xf32> to vector<8x128xf32>
    %469 = arith.mulf %465, %468 : vector<8x128xf32>
    %470 = arith.addf %467, %469 : vector<8x128xf32>
    %471 = math.tanh %470 : vector<8x128xf32>
    %cst_174 = arith.constant 1.000000e+00 : f32
    %472 = vector.broadcast %cst_174 : f32 to vector<8x128xf32>
    %473 = arith.subf %472, %466 : vector<8x128xf32>
    %474 = arith.mulf %473, %471 : vector<8x128xf32>
    %475 = arith.mulf %466, %448 : vector<8x128xf32>
    %476 = arith.addf %474, %475 : vector<8x128xf32>
    %c56_175 = arith.constant 56 : index
    %c0_176 = arith.constant 0 : index
    %477 = vector.load %arg28[%c56_175, %c0_176] : memref<64x128xf32, #tpu.memory_space<vmem>>, vector<8x128xf32>
    tpu.vector_store %arg28[%c56_175, %c0_176], %476 {strides = array<i32>} : memref<64x128xf32, #tpu.memory_space<vmem>>, vector<8x128xf32>,
    %c0_177 = arith.constant 0 : index
    %c0_178 = arith.constant 0 : index
    %478 = vector.load %arg28[%c0_177, %c0_178] : memref<64x128xf32, #tpu.memory_space<vmem>>, vector<64x128xf32>
    %c0_179 = arith.constant 0 : index
    %c0_180 = arith.constant 0 : index
    %479 = vector.load %arg13[%c0_179, %c0_180] : memref<1x128xf32, #tpu.memory_space<vmem>>, vector<1x128xf32>
    %480 = vector.broadcast %479 : vector<1x128xf32> to vector<64x128xf32>
    %481 = arith.mulf %478, %480 : vector<64x128xf32>
    %cst_181 = arith.constant dense<0.000000e+00> : vector<64xf32>
    %482 = vector.multi_reduction <add>, %481, %cst_181 [1] : vector<64x128xf32> to vector<64xf32>
    %483 = vector.shape_cast %482 : vector<64xf32> to vector<64x1xf32>
    %c0_182 = arith.constant 0 : index
    %c0_183 = arith.constant 0 : index
    %484 = vector.load %arg14[%c0_182, %c0_183] : memref<1x1xf32, #tpu.memory_space<vmem>>, vector<1x1xf32>
    %485 = vector.broadcast %484 : vector<1x1xf32> to vector<64x1xf32>
    %486 = arith.addf %483, %485 : vector<64x1xf32>
    %487 = math.tanh %486 : vector<64x1xf32>
    %488 = math.exp %487 : vector<64x1xf32>
    %cst_184 = arith.constant 0.000000e+00 : f32
    %489 = vector.broadcast %cst_184 : f32 to vector<8x128xf32>
    %cst_185 = arith.constant 0.000000e+00 : f32
    %490 = vector.broadcast %cst_185 : f32 to vector<8x1xf32>
    %491 = vector.extract_strided_slice %478 {offsets = [0, 0], sizes = [8, 128], strides = [1, 1]} : vector<64x128xf32> to vector<8x128xf32>
    %492 = vector.extract_strided_slice %488 {offsets = [0, 0], sizes = [8, 1], strides = [1, 1]} : vector<64x1xf32> to vector<8x1xf32>
    %493 = vector.broadcast %492 : vector<8x1xf32> to vector<8x128xf32>
    %494 = arith.mulf %491, %493 : vector<8x128xf32>
    %495 = arith.addf %489, %494 : vector<8x128xf32>
    %496 = vector.extract_strided_slice %488 {offsets = [0, 0], sizes = [8, 1], strides = [1, 1]} : vector<64x1xf32> to vector<8x1xf32>
    %497 = arith.addf %490, %496 : vector<8x1xf32>
    %498 = vector.extract_strided_slice %478 {offsets = [8, 0], sizes = [8, 128], strides = [1, 1]} : vector<64x128xf32> to vector<8x128xf32>
    %499 = vector.extract_strided_slice %488 {offsets = [8, 0], sizes = [8, 1], strides = [1, 1]} : vector<64x1xf32> to vector<8x1xf32>
    %500 = vector.broadcast %499 : vector<8x1xf32> to vector<8x128xf32>
    %501 = arith.mulf %498, %500 : vector<8x128xf32>
    %502 = arith.addf %495, %501 : vector<8x128xf32>
    %503 = vector.extract_strided_slice %488 {offsets = [8, 0], sizes = [8, 1], strides = [1, 1]} : vector<64x1xf32> to vector<8x1xf32>
    %504 = arith.addf %497, %503 : vector<8x1xf32>
    %505 = vector.extract_strided_slice %478 {offsets = [16, 0], sizes = [8, 128], strides = [1, 1]} : vector<64x128xf32> to vector<8x128xf32>
    %506 = vector.extract_strided_slice %488 {offsets = [16, 0], sizes = [8, 1], strides = [1, 1]} : vector<64x1xf32> to vector<8x1xf32>
    %507 = vector.broadcast %506 : vector<8x1xf32> to vector<8x128xf32>
    %508 = arith.mulf %505, %507 : vector<8x128xf32>
    %509 = arith.addf %502, %508 : vector<8x128xf32>
    %510 = vector.extract_strided_slice %488 {offsets = [16, 0], sizes = [8, 1], strides = [1, 1]} : vector<64x1xf32> to vector<8x1xf32>
    %511 = arith.addf %504, %510 : vector<8x1xf32>
    %512 = vector.extract_strided_slice %478 {offsets = [24, 0], sizes = [8, 128], strides = [1, 1]} : vector<64x128xf32> to vector<8x128xf32>
    %513 = vector.extract_strided_slice %488 {offsets = [24, 0], sizes = [8, 1], strides = [1, 1]} : vector<64x1xf32> to vector<8x1xf32>
    %514 = vector.broadcast %513 : vector<8x1xf32> to vector<8x128xf32>
    %515 = arith.mulf %512, %514 : vector<8x128xf32>
    %516 = arith.addf %509, %515 : vector<8x128xf32>
    %517 = vector.extract_strided_slice %488 {offsets = [24, 0], sizes = [8, 1], strides = [1, 1]} : vector<64x1xf32> to vector<8x1xf32>
    %518 = arith.addf %511, %517 : vector<8x1xf32>
    %519 = vector.extract_strided_slice %478 {offsets = [32, 0], sizes = [8, 128], strides = [1, 1]} : vector<64x128xf32> to vector<8x128xf32>
    %520 = vector.extract_strided_slice %488 {offsets = [32, 0], sizes = [8, 1], strides = [1, 1]} : vector<64x1xf32> to vector<8x1xf32>
    %521 = vector.broadcast %520 : vector<8x1xf32> to vector<8x128xf32>
    %522 = arith.mulf %519, %521 : vector<8x128xf32>
    %523 = arith.addf %516, %522 : vector<8x128xf32>
    %524 = vector.extract_strided_slice %488 {offsets = [32, 0], sizes = [8, 1], strides = [1, 1]} : vector<64x1xf32> to vector<8x1xf32>
    %525 = arith.addf %518, %524 : vector<8x1xf32>
    %526 = vector.extract_strided_slice %478 {offsets = [40, 0], sizes = [8, 128], strides = [1, 1]} : vector<64x128xf32> to vector<8x128xf32>
    %527 = vector.extract_strided_slice %488 {offsets = [40, 0], sizes = [8, 1], strides = [1, 1]} : vector<64x1xf32> to vector<8x1xf32>
    %528 = vector.broadcast %527 : vector<8x1xf32> to vector<8x128xf32>
    %529 = arith.mulf %526, %528 : vector<8x128xf32>
    %530 = arith.addf %523, %529 : vector<8x128xf32>
    %531 = vector.extract_strided_slice %488 {offsets = [40, 0], sizes = [8, 1], strides = [1, 1]} : vector<64x1xf32> to vector<8x1xf32>
    %532 = arith.addf %525, %531 : vector<8x1xf32>
    %533 = vector.extract_strided_slice %478 {offsets = [48, 0], sizes = [8, 128], strides = [1, 1]} : vector<64x128xf32> to vector<8x128xf32>
    %534 = vector.extract_strided_slice %488 {offsets = [48, 0], sizes = [8, 1], strides = [1, 1]} : vector<64x1xf32> to vector<8x1xf32>
    %535 = vector.broadcast %534 : vector<8x1xf32> to vector<8x128xf32>
    %536 = arith.mulf %533, %535 : vector<8x128xf32>
    %537 = arith.addf %530, %536 : vector<8x128xf32>
    %538 = vector.extract_strided_slice %488 {offsets = [48, 0], sizes = [8, 1], strides = [1, 1]} : vector<64x1xf32> to vector<8x1xf32>
    %539 = arith.addf %532, %538 : vector<8x1xf32>
    %540 = vector.extract_strided_slice %478 {offsets = [56, 0], sizes = [8, 128], strides = [1, 1]} : vector<64x128xf32> to vector<8x128xf32>
    %541 = vector.extract_strided_slice %488 {offsets = [56, 0], sizes = [8, 1], strides = [1, 1]} : vector<64x1xf32> to vector<8x1xf32>
    %542 = vector.broadcast %541 : vector<8x1xf32> to vector<8x128xf32>
    %543 = arith.mulf %540, %542 : vector<8x128xf32>
    %544 = arith.addf %537, %543 : vector<8x128xf32>
    %545 = vector.extract_strided_slice %488 {offsets = [56, 0], sizes = [8, 1], strides = [1, 1]} : vector<64x1xf32> to vector<8x1xf32>
    %546 = arith.addf %539, %545 : vector<8x1xf32>
    %547 = tpu.reciprocal %546 {approx = true} : vector<8x1xf32> -> vector<8x1xf32>
    %548 = vector.broadcast %547 : vector<8x1xf32> to vector<8x128xf32>
    %549 = arith.mulf %544, %548 : vector<8x128xf32>
    %c0_186 = arith.constant 0 : index
    %c0_187 = arith.constant 0 : index
    %550 = vector.load %arg2[%c0_186, %c0_187] : memref<8x7xf32, #tpu.memory_space<vmem>>, vector<8x7xf32>
    %c0_188 = arith.constant 0 : index
    %c0_189 = arith.constant 0 : index
    %551 = vector.load %arg15[%c0_188, %c0_189] : memref<7x128xf32, #tpu.memory_space<vmem>>, vector<7x128xf32>
    %cst_190 = arith.constant dense<0.000000e+00> : vector<8x128xf32>
    %552 = tpu.matmul %550, %551, %cst_190 {dimension_numbers = #tpu.dot_dimension_numbers<[1], [0], [0], [1], [0, 0, 1, 1], [], []>} : vector<8x7xf32>, vector<7x128xf32>, vector<8x128xf32> -> vector<8x128xf32>
    %c0_191 = arith.constant 0 : index
    %c0_192 = arith.constant 0 : index
    %553 = vector.load %arg16[%c0_191, %c0_192] : memref<1x128xf32, #tpu.memory_space<vmem>>, vector<1x128xf32>
    %554 = vector.broadcast %553 : vector<1x128xf32> to vector<8x128xf32>
    %555 = arith.addf %552, %554 : vector<8x128xf32>
    %556 = arith.mulf %549, %555 : vector<8x128xf32>
    %c0_193 = arith.constant 0 : index
    %c0_194 = arith.constant 0 : index
    %557 = vector.load %arg17[%c0_193, %c0_194] : memref<128x384xf32, #tpu.memory_space<vmem>>, vector<128x384xf32>
    %cst_195 = arith.constant dense<0.000000e+00> : vector<8x384xf32>
    %558 = tpu.matmul %556, %557, %cst_195 {dimension_numbers = #tpu.dot_dimension_numbers<[1], [0], [0], [1], [0, 0, 1, 1], [], []>} : vector<8x128xf32>, vector<128x384xf32>, vector<8x384xf32> -> vector<8x384xf32>
    %c0_196 = arith.constant 0 : index
    %c0_197 = arith.constant 0 : index
    %559 = vector.load %arg18[%c0_196, %c0_197] : memref<1x384xf32, #tpu.memory_space<vmem>>, vector<1x384xf32>
    %560 = vector.broadcast %559 : vector<1x384xf32> to vector<8x384xf32>
    %561 = arith.addf %558, %560 : vector<8x384xf32>
    %cst_198 = arith.constant 0.000000e+00 : f32
    %562 = vector.broadcast %cst_198 : f32 to vector<8x128xf32>
    %563 = arith.truncf %562 : vector<8x128xf32> to vector<8x128xbf16>
    %c0_199 = arith.constant 0 : index
    %c0_200 = arith.constant 0 : index
    %564 = vector.load %arg19[%c0_199, %c0_200] : memref<128x384xbf16, #tpu.memory_space<vmem>>, vector<128x384xbf16>
    %cst_201 = arith.constant dense<0.000000e+00> : vector<8x384xf32>
    %565 = tpu.matmul %563, %564, %cst_201 {dimension_numbers = #tpu.dot_dimension_numbers<[1], [0], [0], [1], [0, 0, 1, 1], [], []>} : vector<8x128xbf16>, vector<128x384xbf16>, vector<8x384xf32> -> vector<8x384xf32>
    %c0_202 = arith.constant 0 : index
    %c0_203 = arith.constant 0 : index
    %566 = vector.load %arg20[%c0_202, %c0_203] : memref<1x384xf32, #tpu.memory_space<vmem>>, vector<1x384xf32>
    %567 = vector.broadcast %566 : vector<1x384xf32> to vector<8x384xf32>
    %568 = arith.addf %565, %567 : vector<8x384xf32>
    %569 = vector.extract_strided_slice %561 {offsets = [0, 0], sizes = [8, 256], strides = [1, 1]} : vector<8x384xf32> to vector<8x256xf32>
    %570 = vector.extract_strided_slice %568 {offsets = [0, 0], sizes = [8, 256], strides = [1, 1]} : vector<8x384xf32> to vector<8x256xf32>
    %571 = arith.addf %569, %570 : vector<8x256xf32>
    %572 = arith.negf %571 : vector<8x256xf32>
    %573 = math.exp %572 : vector<8x256xf32>
    %cst_204 = arith.constant 1.000000e+00 : f32
    %574 = vector.broadcast %cst_204 : f32 to vector<8x256xf32>
    %575 = arith.addf %574, %573 : vector<8x256xf32>
    %576 = arith.divf %574, %575 : vector<8x256xf32>
    %577 = vector.extract_strided_slice %576 {offsets = [0, 0], sizes = [8, 128], strides = [1, 1]} : vector<8x256xf32> to vector<8x128xf32>
    %578 = vector.extract_strided_slice %576 {offsets = [0, 128], sizes = [8, 128], strides = [1, 1]} : vector<8x256xf32> to vector<8x128xf32>
    %579 = vector.extract_strided_slice %561 {offsets = [0, 256], sizes = [8, 128], strides = [1, 1]} : vector<8x384xf32> to vector<8x128xf32>
    %580 = vector.extract_strided_slice %568 {offsets = [0, 256], sizes = [8, 128], strides = [1, 1]} : vector<8x384xf32> to vector<8x128xf32>
    %581 = arith.mulf %577, %580 : vector<8x128xf32>
    %582 = arith.addf %579, %581 : vector<8x128xf32>
    %583 = math.tanh %582 : vector<8x128xf32>
    %cst_205 = arith.constant 1.000000e+00 : f32
    %584 = vector.broadcast %cst_205 : f32 to vector<8x128xf32>
    %585 = arith.subf %584, %578 : vector<8x128xf32>
    %586 = arith.mulf %585, %583 : vector<8x128xf32>
    %587 = arith.mulf %578, %562 : vector<8x128xf32>
    %588 = arith.addf %586, %587 : vector<8x128xf32>
    %c0_206 = arith.constant 0 : index
    %c0_207 = arith.constant 0 : index
    %589 = vector.load %arg29[%c0_206, %c0_207] : memref<64x128xf32, #tpu.memory_space<vmem>>, vector<8x128xf32>
    tpu.vector_store %arg29[%c0_206, %c0_207], %588 {strides = array<i32>} : memref<64x128xf32, #tpu.memory_space<vmem>>, vector<8x128xf32>,
    %590 = arith.truncf %588 : vector<8x128xf32> to vector<8x128xbf16>
    %c0_208 = arith.constant 0 : index
    %c0_209 = arith.constant 0 : index
    %591 = vector.load %arg19[%c0_208, %c0_209] : memref<128x384xbf16, #tpu.memory_space<vmem>>, vector<128x384xbf16>
    %cst_210 = arith.constant dense<0.000000e+00> : vector<8x384xf32>
    %592 = tpu.matmul %590, %591, %cst_210 {dimension_numbers = #tpu.dot_dimension_numbers<[1], [0], [0], [1], [0, 0, 1, 1], [], []>} : vector<8x128xbf16>, vector<128x384xbf16>, vector<8x384xf32> -> vector<8x384xf32>
    %c0_211 = arith.constant 0 : index
    %c0_212 = arith.constant 0 : index
    %593 = vector.load %arg20[%c0_211, %c0_212] : memref<1x384xf32, #tpu.memory_space<vmem>>, vector<1x384xf32>
    %594 = vector.broadcast %593 : vector<1x384xf32> to vector<8x384xf32>
    %595 = arith.addf %592, %594 : vector<8x384xf32>
    %596 = vector.extract_strided_slice %561 {offsets = [0, 0], sizes = [8, 256], strides = [1, 1]} : vector<8x384xf32> to vector<8x256xf32>
    %597 = vector.extract_strided_slice %595 {offsets = [0, 0], sizes = [8, 256], strides = [1, 1]} : vector<8x384xf32> to vector<8x256xf32>
    %598 = arith.addf %596, %597 : vector<8x256xf32>
    %599 = arith.negf %598 : vector<8x256xf32>
    %600 = math.exp %599 : vector<8x256xf32>
    %cst_213 = arith.constant 1.000000e+00 : f32
    %601 = vector.broadcast %cst_213 : f32 to vector<8x256xf32>
    %602 = arith.addf %601, %600 : vector<8x256xf32>
    %603 = arith.divf %601, %602 : vector<8x256xf32>
    %604 = vector.extract_strided_slice %603 {offsets = [0, 0], sizes = [8, 128], strides = [1, 1]} : vector<8x256xf32> to vector<8x128xf32>
    %605 = vector.extract_strided_slice %603 {offsets = [0, 128], sizes = [8, 128], strides = [1, 1]} : vector<8x256xf32> to vector<8x128xf32>
    %606 = vector.extract_strided_slice %561 {offsets = [0, 256], sizes = [8, 128], strides = [1, 1]} : vector<8x384xf32> to vector<8x128xf32>
    %607 = vector.extract_strided_slice %595 {offsets = [0, 256], sizes = [8, 128], strides = [1, 1]} : vector<8x384xf32> to vector<8x128xf32>
    %608 = arith.mulf %604, %607 : vector<8x128xf32>
    %609 = arith.addf %606, %608 : vector<8x128xf32>
    %610 = math.tanh %609 : vector<8x128xf32>
    %cst_214 = arith.constant 1.000000e+00 : f32
    %611 = vector.broadcast %cst_214 : f32 to vector<8x128xf32>
    %612 = arith.subf %611, %605 : vector<8x128xf32>
    %613 = arith.mulf %612, %610 : vector<8x128xf32>
    %614 = arith.mulf %605, %588 : vector<8x128xf32>
    %615 = arith.addf %613, %614 : vector<8x128xf32>
    %c8_215 = arith.constant 8 : index
    %c0_216 = arith.constant 0 : index
    %616 = vector.load %arg29[%c8_215, %c0_216] : memref<64x128xf32, #tpu.memory_space<vmem>>, vector<8x128xf32>
    tpu.vector_store %arg29[%c8_215, %c0_216], %615 {strides = array<i32>} : memref<64x128xf32, #tpu.memory_space<vmem>>, vector<8x128xf32>,
    %617 = arith.truncf %615 : vector<8x128xf32> to vector<8x128xbf16>
    %c0_217 = arith.constant 0 : index
    %c0_218 = arith.constant 0 : index
    %618 = vector.load %arg19[%c0_217, %c0_218] : memref<128x384xbf16, #tpu.memory_space<vmem>>, vector<128x384xbf16>
    %cst_219 = arith.constant dense<0.000000e+00> : vector<8x384xf32>
    %619 = tpu.matmul %617, %618, %cst_219 {dimension_numbers = #tpu.dot_dimension_numbers<[1], [0], [0], [1], [0, 0, 1, 1], [], []>} : vector<8x128xbf16>, vector<128x384xbf16>, vector<8x384xf32> -> vector<8x384xf32>
    %c0_220 = arith.constant 0 : index
    %c0_221 = arith.constant 0 : index
    %620 = vector.load %arg20[%c0_220, %c0_221] : memref<1x384xf32, #tpu.memory_space<vmem>>, vector<1x384xf32>
    %621 = vector.broadcast %620 : vector<1x384xf32> to vector<8x384xf32>
    %622 = arith.addf %619, %621 : vector<8x384xf32>
    %623 = vector.extract_strided_slice %561 {offsets = [0, 0], sizes = [8, 256], strides = [1, 1]} : vector<8x384xf32> to vector<8x256xf32>
    %624 = vector.extract_strided_slice %622 {offsets = [0, 0], sizes = [8, 256], strides = [1, 1]} : vector<8x384xf32> to vector<8x256xf32>
    %625 = arith.addf %623, %624 : vector<8x256xf32>
    %626 = arith.negf %625 : vector<8x256xf32>
    %627 = math.exp %626 : vector<8x256xf32>
    %cst_222 = arith.constant 1.000000e+00 : f32
    %628 = vector.broadcast %cst_222 : f32 to vector<8x256xf32>
    %629 = arith.addf %628, %627 : vector<8x256xf32>
    %630 = arith.divf %628, %629 : vector<8x256xf32>
    %631 = vector.extract_strided_slice %630 {offsets = [0, 0], sizes = [8, 128], strides = [1, 1]} : vector<8x256xf32> to vector<8x128xf32>
    %632 = vector.extract_strided_slice %630 {offsets = [0, 128], sizes = [8, 128], strides = [1, 1]} : vector<8x256xf32> to vector<8x128xf32>
    %633 = vector.extract_strided_slice %561 {offsets = [0, 256], sizes = [8, 128], strides = [1, 1]} : vector<8x384xf32> to vector<8x128xf32>
    %634 = vector.extract_strided_slice %622 {offsets = [0, 256], sizes = [8, 128], strides = [1, 1]} : vector<8x384xf32> to vector<8x128xf32>
    %635 = arith.mulf %631, %634 : vector<8x128xf32>
    %636 = arith.addf %633, %635 : vector<8x128xf32>
    %637 = math.tanh %636 : vector<8x128xf32>
    %cst_223 = arith.constant 1.000000e+00 : f32
    %638 = vector.broadcast %cst_223 : f32 to vector<8x128xf32>
    %639 = arith.subf %638, %632 : vector<8x128xf32>
    %640 = arith.mulf %639, %637 : vector<8x128xf32>
    %641 = arith.mulf %632, %615 : vector<8x128xf32>
    %642 = arith.addf %640, %641 : vector<8x128xf32>
    %c16_224 = arith.constant 16 : index
    %c0_225 = arith.constant 0 : index
    %643 = vector.load %arg29[%c16_224, %c0_225] : memref<64x128xf32, #tpu.memory_space<vmem>>, vector<8x128xf32>
    tpu.vector_store %arg29[%c16_224, %c0_225], %642 {strides = array<i32>} : memref<64x128xf32, #tpu.memory_space<vmem>>, vector<8x128xf32>,
    %644 = arith.truncf %642 : vector<8x128xf32> to vector<8x128xbf16>
    %c0_226 = arith.constant 0 : index
    %c0_227 = arith.constant 0 : index
    %645 = vector.load %arg19[%c0_226, %c0_227] : memref<128x384xbf16, #tpu.memory_space<vmem>>, vector<128x384xbf16>
    %cst_228 = arith.constant dense<0.000000e+00> : vector<8x384xf32>
    %646 = tpu.matmul %644, %645, %cst_228 {dimension_numbers = #tpu.dot_dimension_numbers<[1], [0], [0], [1], [0, 0, 1, 1], [], []>} : vector<8x128xbf16>, vector<128x384xbf16>, vector<8x384xf32> -> vector<8x384xf32>
    %c0_229 = arith.constant 0 : index
    %c0_230 = arith.constant 0 : index
    %647 = vector.load %arg20[%c0_229, %c0_230] : memref<1x384xf32, #tpu.memory_space<vmem>>, vector<1x384xf32>
    %648 = vector.broadcast %647 : vector<1x384xf32> to vector<8x384xf32>
    %649 = arith.addf %646, %648 : vector<8x384xf32>
    %650 = vector.extract_strided_slice %561 {offsets = [0, 0], sizes = [8, 256], strides = [1, 1]} : vector<8x384xf32> to vector<8x256xf32>
    %651 = vector.extract_strided_slice %649 {offsets = [0, 0], sizes = [8, 256], strides = [1, 1]} : vector<8x384xf32> to vector<8x256xf32>
    %652 = arith.addf %650, %651 : vector<8x256xf32>
    %653 = arith.negf %652 : vector<8x256xf32>
    %654 = math.exp %653 : vector<8x256xf32>
    %cst_231 = arith.constant 1.000000e+00 : f32
    %655 = vector.broadcast %cst_231 : f32 to vector<8x256xf32>
    %656 = arith.addf %655, %654 : vector<8x256xf32>
    %657 = arith.divf %655, %656 : vector<8x256xf32>
    %658 = vector.extract_strided_slice %657 {offsets = [0, 0], sizes = [8, 128], strides = [1, 1]} : vector<8x256xf32> to vector<8x128xf32>
    %659 = vector.extract_strided_slice %657 {offsets = [0, 128], sizes = [8, 128], strides = [1, 1]} : vector<8x256xf32> to vector<8x128xf32>
    %660 = vector.extract_strided_slice %561 {offsets = [0, 256], sizes = [8, 128], strides = [1, 1]} : vector<8x384xf32> to vector<8x128xf32>
    %661 = vector.extract_strided_slice %649 {offsets = [0, 256], sizes = [8, 128], strides = [1, 1]} : vector<8x384xf32> to vector<8x128xf32>
    %662 = arith.mulf %658, %661 : vector<8x128xf32>
    %663 = arith.addf %660, %662 : vector<8x128xf32>
    %664 = math.tanh %663 : vector<8x128xf32>
    %cst_232 = arith.constant 1.000000e+00 : f32
    %665 = vector.broadcast %cst_232 : f32 to vector<8x128xf32>
    %666 = arith.subf %665, %659 : vector<8x128xf32>
    %667 = arith.mulf %666, %664 : vector<8x128xf32>
    %668 = arith.mulf %659, %642 : vector<8x128xf32>
    %669 = arith.addf %667, %668 : vector<8x128xf32>
    %c24_233 = arith.constant 24 : index
    %c0_234 = arith.constant 0 : index
    %670 = vector.load %arg29[%c24_233, %c0_234] : memref<64x128xf32, #tpu.memory_space<vmem>>, vector<8x128xf32>
    tpu.vector_store %arg29[%c24_233, %c0_234], %669 {strides = array<i32>} : memref<64x128xf32, #tpu.memory_space<vmem>>, vector<8x128xf32>,
    %671 = arith.truncf %669 : vector<8x128xf32> to vector<8x128xbf16>
    %c0_235 = arith.constant 0 : index
    %c0_236 = arith.constant 0 : index
    %672 = vector.load %arg19[%c0_235, %c0_236] : memref<128x384xbf16, #tpu.memory_space<vmem>>, vector<128x384xbf16>
    %cst_237 = arith.constant dense<0.000000e+00> : vector<8x384xf32>
    %673 = tpu.matmul %671, %672, %cst_237 {dimension_numbers = #tpu.dot_dimension_numbers<[1], [0], [0], [1], [0, 0, 1, 1], [], []>} : vector<8x128xbf16>, vector<128x384xbf16>, vector<8x384xf32> -> vector<8x384xf32>
    %c0_238 = arith.constant 0 : index
    %c0_239 = arith.constant 0 : index
    %674 = vector.load %arg20[%c0_238, %c0_239] : memref<1x384xf32, #tpu.memory_space<vmem>>, vector<1x384xf32>
    %675 = vector.broadcast %674 : vector<1x384xf32> to vector<8x384xf32>
    %676 = arith.addf %673, %675 : vector<8x384xf32>
    %677 = vector.extract_strided_slice %561 {offsets = [0, 0], sizes = [8, 256], strides = [1, 1]} : vector<8x384xf32> to vector<8x256xf32>
    %678 = vector.extract_strided_slice %676 {offsets = [0, 0], sizes = [8, 256], strides = [1, 1]} : vector<8x384xf32> to vector<8x256xf32>
    %679 = arith.addf %677, %678 : vector<8x256xf32>
    %680 = arith.negf %679 : vector<8x256xf32>
    %681 = math.exp %680 : vector<8x256xf32>
    %cst_240 = arith.constant 1.000000e+00 : f32
    %682 = vector.broadcast %cst_240 : f32 to vector<8x256xf32>
    %683 = arith.addf %682, %681 : vector<8x256xf32>
    %684 = arith.divf %682, %683 : vector<8x256xf32>
    %685 = vector.extract_strided_slice %684 {offsets = [0, 0], sizes = [8, 128], strides = [1, 1]} : vector<8x256xf32> to vector<8x128xf32>
    %686 = vector.extract_strided_slice %684 {offsets = [0, 128], sizes = [8, 128], strides = [1, 1]} : vector<8x256xf32> to vector<8x128xf32>
    %687 = vector.extract_strided_slice %561 {offsets = [0, 256], sizes = [8, 128], strides = [1, 1]} : vector<8x384xf32> to vector<8x128xf32>
    %688 = vector.extract_strided_slice %676 {offsets = [0, 256], sizes = [8, 128], strides = [1, 1]} : vector<8x384xf32> to vector<8x128xf32>
    %689 = arith.mulf %685, %688 : vector<8x128xf32>
    %690 = arith.addf %687, %689 : vector<8x128xf32>
    %691 = math.tanh %690 : vector<8x128xf32>
    %cst_241 = arith.constant 1.000000e+00 : f32
    %692 = vector.broadcast %cst_241 : f32 to vector<8x128xf32>
    %693 = arith.subf %692, %686 : vector<8x128xf32>
    %694 = arith.mulf %693, %691 : vector<8x128xf32>
    %695 = arith.mulf %686, %669 : vector<8x128xf32>
    %696 = arith.addf %694, %695 : vector<8x128xf32>
    %c32_242 = arith.constant 32 : index
    %c0_243 = arith.constant 0 : index
    %697 = vector.load %arg29[%c32_242, %c0_243] : memref<64x128xf32, #tpu.memory_space<vmem>>, vector<8x128xf32>
    tpu.vector_store %arg29[%c32_242, %c0_243], %696 {strides = array<i32>} : memref<64x128xf32, #tpu.memory_space<vmem>>, vector<8x128xf32>,
    %698 = arith.truncf %696 : vector<8x128xf32> to vector<8x128xbf16>
    %c0_244 = arith.constant 0 : index
    %c0_245 = arith.constant 0 : index
    %699 = vector.load %arg19[%c0_244, %c0_245] : memref<128x384xbf16, #tpu.memory_space<vmem>>, vector<128x384xbf16>
    %cst_246 = arith.constant dense<0.000000e+00> : vector<8x384xf32>
    %700 = tpu.matmul %698, %699, %cst_246 {dimension_numbers = #tpu.dot_dimension_numbers<[1], [0], [0], [1], [0, 0, 1, 1], [], []>} : vector<8x128xbf16>, vector<128x384xbf16>, vector<8x384xf32> -> vector<8x384xf32>
    %c0_247 = arith.constant 0 : index
    %c0_248 = arith.constant 0 : index
    %701 = vector.load %arg20[%c0_247, %c0_248] : memref<1x384xf32, #tpu.memory_space<vmem>>, vector<1x384xf32>
    %702 = vector.broadcast %701 : vector<1x384xf32> to vector<8x384xf32>
    %703 = arith.addf %700, %702 : vector<8x384xf32>
    %704 = vector.extract_strided_slice %561 {offsets = [0, 0], sizes = [8, 256], strides = [1, 1]} : vector<8x384xf32> to vector<8x256xf32>
    %705 = vector.extract_strided_slice %703 {offsets = [0, 0], sizes = [8, 256], strides = [1, 1]} : vector<8x384xf32> to vector<8x256xf32>
    %706 = arith.addf %704, %705 : vector<8x256xf32>
    %707 = arith.negf %706 : vector<8x256xf32>
    %708 = math.exp %707 : vector<8x256xf32>
    %cst_249 = arith.constant 1.000000e+00 : f32
    %709 = vector.broadcast %cst_249 : f32 to vector<8x256xf32>
    %710 = arith.addf %709, %708 : vector<8x256xf32>
    %711 = arith.divf %709, %710 : vector<8x256xf32>
    %712 = vector.extract_strided_slice %711 {offsets = [0, 0], sizes = [8, 128], strides = [1, 1]} : vector<8x256xf32> to vector<8x128xf32>
    %713 = vector.extract_strided_slice %711 {offsets = [0, 128], sizes = [8, 128], strides = [1, 1]} : vector<8x256xf32> to vector<8x128xf32>
    %714 = vector.extract_strided_slice %561 {offsets = [0, 256], sizes = [8, 128], strides = [1, 1]} : vector<8x384xf32> to vector<8x128xf32>
    %715 = vector.extract_strided_slice %703 {offsets = [0, 256], sizes = [8, 128], strides = [1, 1]} : vector<8x384xf32> to vector<8x128xf32>
    %716 = arith.mulf %712, %715 : vector<8x128xf32>
    %717 = arith.addf %714, %716 : vector<8x128xf32>
    %718 = math.tanh %717 : vector<8x128xf32>
    %cst_250 = arith.constant 1.000000e+00 : f32
    %719 = vector.broadcast %cst_250 : f32 to vector<8x128xf32>
    %720 = arith.subf %719, %713 : vector<8x128xf32>
    %721 = arith.mulf %720, %718 : vector<8x128xf32>
    %722 = arith.mulf %713, %696 : vector<8x128xf32>
    %723 = arith.addf %721, %722 : vector<8x128xf32>
    %c40_251 = arith.constant 40 : index
    %c0_252 = arith.constant 0 : index
    %724 = vector.load %arg29[%c40_251, %c0_252] : memref<64x128xf32, #tpu.memory_space<vmem>>, vector<8x128xf32>
    tpu.vector_store %arg29[%c40_251, %c0_252], %723 {strides = array<i32>} : memref<64x128xf32, #tpu.memory_space<vmem>>, vector<8x128xf32>,
    %725 = arith.truncf %723 : vector<8x128xf32> to vector<8x128xbf16>
    %c0_253 = arith.constant 0 : index
    %c0_254 = arith.constant 0 : index
    %726 = vector.load %arg19[%c0_253, %c0_254] : memref<128x384xbf16, #tpu.memory_space<vmem>>, vector<128x384xbf16>
    %cst_255 = arith.constant dense<0.000000e+00> : vector<8x384xf32>
    %727 = tpu.matmul %725, %726, %cst_255 {dimension_numbers = #tpu.dot_dimension_numbers<[1], [0], [0], [1], [0, 0, 1, 1], [], []>} : vector<8x128xbf16>, vector<128x384xbf16>, vector<8x384xf32> -> vector<8x384xf32>
    %c0_256 = arith.constant 0 : index
    %c0_257 = arith.constant 0 : index
    %728 = vector.load %arg20[%c0_256, %c0_257] : memref<1x384xf32, #tpu.memory_space<vmem>>, vector<1x384xf32>
    %729 = vector.broadcast %728 : vector<1x384xf32> to vector<8x384xf32>
    %730 = arith.addf %727, %729 : vector<8x384xf32>
    %731 = vector.extract_strided_slice %561 {offsets = [0, 0], sizes = [8, 256], strides = [1, 1]} : vector<8x384xf32> to vector<8x256xf32>
    %732 = vector.extract_strided_slice %730 {offsets = [0, 0], sizes = [8, 256], strides = [1, 1]} : vector<8x384xf32> to vector<8x256xf32>
    %733 = arith.addf %731, %732 : vector<8x256xf32>
    %734 = arith.negf %733 : vector<8x256xf32>
    %735 = math.exp %734 : vector<8x256xf32>
    %cst_258 = arith.constant 1.000000e+00 : f32
    %736 = vector.broadcast %cst_258 : f32 to vector<8x256xf32>
    %737 = arith.addf %736, %735 : vector<8x256xf32>
    %738 = arith.divf %736, %737 : vector<8x256xf32>
    %739 = vector.extract_strided_slice %738 {offsets = [0, 0], sizes = [8, 128], strides = [1, 1]} : vector<8x256xf32> to vector<8x128xf32>
    %740 = vector.extract_strided_slice %738 {offsets = [0, 128], sizes = [8, 128], strides = [1, 1]} : vector<8x256xf32> to vector<8x128xf32>
    %741 = vector.extract_strided_slice %561 {offsets = [0, 256], sizes = [8, 128], strides = [1, 1]} : vector<8x384xf32> to vector<8x128xf32>
    %742 = vector.extract_strided_slice %730 {offsets = [0, 256], sizes = [8, 128], strides = [1, 1]} : vector<8x384xf32> to vector<8x128xf32>
    %743 = arith.mulf %739, %742 : vector<8x128xf32>
    %744 = arith.addf %741, %743 : vector<8x128xf32>
    %745 = math.tanh %744 : vector<8x128xf32>
    %cst_259 = arith.constant 1.000000e+00 : f32
    %746 = vector.broadcast %cst_259 : f32 to vector<8x128xf32>
    %747 = arith.subf %746, %740 : vector<8x128xf32>
    %748 = arith.mulf %747, %745 : vector<8x128xf32>
    %749 = arith.mulf %740, %723 : vector<8x128xf32>
    %750 = arith.addf %748, %749 : vector<8x128xf32>
    %c48_260 = arith.constant 48 : index
    %c0_261 = arith.constant 0 : index
    %751 = vector.load %arg29[%c48_260, %c0_261] : memref<64x128xf32, #tpu.memory_space<vmem>>, vector<8x128xf32>
    tpu.vector_store %arg29[%c48_260, %c0_261], %750 {strides = array<i32>} : memref<64x128xf32, #tpu.memory_space<vmem>>, vector<8x128xf32>,
    %752 = arith.truncf %750 : vector<8x128xf32> to vector<8x128xbf16>
    %c0_262 = arith.constant 0 : index
    %c0_263 = arith.constant 0 : index
    %753 = vector.load %arg19[%c0_262, %c0_263] : memref<128x384xbf16, #tpu.memory_space<vmem>>, vector<128x384xbf16>
    %cst_264 = arith.constant dense<0.000000e+00> : vector<8x384xf32>
    %754 = tpu.matmul %752, %753, %cst_264 {dimension_numbers = #tpu.dot_dimension_numbers<[1], [0], [0], [1], [0, 0, 1, 1], [], []>} : vector<8x128xbf16>, vector<128x384xbf16>, vector<8x384xf32> -> vector<8x384xf32>
    %c0_265 = arith.constant 0 : index
    %c0_266 = arith.constant 0 : index
    %755 = vector.load %arg20[%c0_265, %c0_266] : memref<1x384xf32, #tpu.memory_space<vmem>>, vector<1x384xf32>
    %756 = vector.broadcast %755 : vector<1x384xf32> to vector<8x384xf32>
    %757 = arith.addf %754, %756 : vector<8x384xf32>
    %758 = vector.extract_strided_slice %561 {offsets = [0, 0], sizes = [8, 256], strides = [1, 1]} : vector<8x384xf32> to vector<8x256xf32>
    %759 = vector.extract_strided_slice %757 {offsets = [0, 0], sizes = [8, 256], strides = [1, 1]} : vector<8x384xf32> to vector<8x256xf32>
    %760 = arith.addf %758, %759 : vector<8x256xf32>
    %761 = arith.negf %760 : vector<8x256xf32>
    %762 = math.exp %761 : vector<8x256xf32>
    %cst_267 = arith.constant 1.000000e+00 : f32
    %763 = vector.broadcast %cst_267 : f32 to vector<8x256xf32>
    %764 = arith.addf %763, %762 : vector<8x256xf32>
    %765 = arith.divf %763, %764 : vector<8x256xf32>
    %766 = vector.extract_strided_slice %765 {offsets = [0, 0], sizes = [8, 128], strides = [1, 1]} : vector<8x256xf32> to vector<8x128xf32>
    %767 = vector.extract_strided_slice %765 {offsets = [0, 128], sizes = [8, 128], strides = [1, 1]} : vector<8x256xf32> to vector<8x128xf32>
    %768 = vector.extract_strided_slice %561 {offsets = [0, 256], sizes = [8, 128], strides = [1, 1]} : vector<8x384xf32> to vector<8x128xf32>
    %769 = vector.extract_strided_slice %757 {offsets = [0, 256], sizes = [8, 128], strides = [1, 1]} : vector<8x384xf32> to vector<8x128xf32>
    %770 = arith.mulf %766, %769 : vector<8x128xf32>
    %771 = arith.addf %768, %770 : vector<8x128xf32>
    %772 = math.tanh %771 : vector<8x128xf32>
    %cst_268 = arith.constant 1.000000e+00 : f32
    %773 = vector.broadcast %cst_268 : f32 to vector<8x128xf32>
    %774 = arith.subf %773, %767 : vector<8x128xf32>
    %775 = arith.mulf %774, %772 : vector<8x128xf32>
    %776 = arith.mulf %767, %750 : vector<8x128xf32>
    %777 = arith.addf %775, %776 : vector<8x128xf32>
    %c56_269 = arith.constant 56 : index
    %c0_270 = arith.constant 0 : index
    %778 = vector.load %arg29[%c56_269, %c0_270] : memref<64x128xf32, #tpu.memory_space<vmem>>, vector<8x128xf32>
    tpu.vector_store %arg29[%c56_269, %c0_270], %777 {strides = array<i32>} : memref<64x128xf32, #tpu.memory_space<vmem>>, vector<8x128xf32>,
    %c0_271 = arith.constant 0 : index
    %c0_272 = arith.constant 0 : index
    %779 = vector.load %arg29[%c0_271, %c0_272] : memref<64x128xf32, #tpu.memory_space<vmem>>, vector<64x128xf32>
    %c0_273 = arith.constant 0 : index
    %c0_274 = arith.constant 0 : index
    %780 = vector.load %arg21[%c0_273, %c0_274] : memref<64x64xf32, #tpu.memory_space<vmem>>, vector<64x64xf32>
    %cst_275 = arith.constant dense<0.000000e+00> : vector<64x128xf32>
    %781 = tpu.matmul %780, %779, %cst_275 {dimension_numbers = #tpu.dot_dimension_numbers<[1], [0], [0], [1], [0, 0, 1, 1], [], []>} : vector<64x64xf32>, vector<64x128xf32>, vector<64x128xf32> -> vector<64x128xf32>
    %c0_276 = arith.constant 0 : index
    %c0_277 = arith.constant 0 : index
    %782 = vector.load %arg22[%c0_276, %c0_277] : memref<64x1xf32, #tpu.memory_space<vmem>>, vector<64x1xf32>
    %783 = vector.broadcast %782 : vector<64x1xf32> to vector<64x128xf32>
    %784 = arith.addf %781, %783 : vector<64x128xf32>
    %785 = arith.mulf %779, %784 : vector<64x128xf32>
    %c0_278 = arith.constant 0 : index
    %c0_279 = arith.constant 0 : index
    %786 = vector.load %arg23[%c0_278, %c0_279] : memref<128x128xf32, #tpu.memory_space<vmem>>, vector<128x128xf32>
    %cst_280 = arith.constant dense<0.000000e+00> : vector<64x128xf32>
    %787 = tpu.matmul %785, %786, %cst_280 {dimension_numbers = #tpu.dot_dimension_numbers<[1], [0], [0], [1], [0, 0, 1, 1], [], []>} : vector<64x128xf32>, vector<128x128xf32>, vector<64x128xf32> -> vector<64x128xf32>
    %c0_281 = arith.constant 0 : index
    %c0_282 = arith.constant 0 : index
    %788 = vector.load %arg24[%c0_281, %c0_282] : memref<1x128xf32, #tpu.memory_space<vmem>>, vector<1x128xf32>
    %789 = vector.broadcast %788 : vector<1x128xf32> to vector<64x128xf32>
    %790 = arith.addf %787, %789 : vector<64x128xf32>
    %cst_283 = arith.constant 0.000000e+00 : f32
    %791 = vector.broadcast %cst_283 : f32 to vector<64x128xf32>
    %792 = arith.cmpf ogt, %790, %791 : vector<64x128xf32>
    %cst_284 = arith.constant 0.00999999977 : f32
    %793 = vector.broadcast %cst_284 : f32 to vector<64x128xf32>
    %794 = arith.mulf %793, %790 : vector<64x128xf32>
    %795 = arith.select %792, %790, %794 : vector<64x128xi1>, vector<64x128xf32>
    %c0_285 = arith.constant 0 : index
    %c0_286 = arith.constant 0 : index
    %796 = vector.load %arg25[%c0_285, %c0_286] : memref<64x128xf32, #tpu.memory_space<vmem>>, vector<64x128xf32>
    tpu.vector_store %arg25[%c0_285, %c0_286], %795 {strides = array<i32>} : memref<64x128xf32, #tpu.memory_space<vmem>>, vector<64x128xf32>,
    return
  }
}

</mosaic_0001>

<bundles_post_ra>
// kernel: prosit_forward.1
= control target key start
LH: loop header
LB: loop body
LE: loop exit
PB: predicated region body
PF: predicated region fallthrough
CT: control target
= control target key end

     0   :  { %s14312_s0 = inlined_call_operand.vmem [shape: f32[64,16], index: 0, kind: input, shape index: {}]   ;;  %s14313_s1 = inlined_call_operand.vmem [shape: f32[64,16], index: 1, kind: input, shape index: {}]   ;;  %s14314_s2 = inlined_call_operand.vmem [shape: f32[8,7], index: 2, kind: input, shape index: {}]   ;;  %s14315_s3 = inlined_call_operand.hbm [shape: f32[16,384], index: 3, kind: input, shape index: {}]   ;;  %s14316_s4 = inlined_call_operand.hbm [shape: f32[16,384], index: 4, kind: input, shape index: {}]   ;;  %s14317_s5 = inlined_call_operand.hbm [shape: f32[1,384], index: 5, kind: input, shape index: {}]   ;;  %s14318_s6 = inlined_call_operand.hbm [shape: bf16[128,384], index: 6, kind: input, shape index: {}]   ;;  %s14319_s7 = inlined_call_operand.hbm [shape: f32[1,384], index: 7, kind: input, shape index: {}]   ;;  %s14320_s8 = inlined_call_operand.vmem [shape: f32[128,384], index: 8, kind: input, shape index: {}]   ;;  %s14321_s9 = inlined_call_operand.vmem [shape: f32[128,384], index: 9, kind: input, shape index: {}]   ;;  %s14322_s10 = inlined_call_operand.hbm [shape: f32[1,384], index: 10, kind: input, shape index: {}]   ;;  %s14323_s11 = inlined_call_operand.hbm [shape: bf16[128,384], index: 11, kind: input, shape index: {}]   ;;  %s14324_s12 = inlined_call_operand.hbm [shape: f32[1,384], index: 12, kind: input, shape index: {}]   ;;  %s14325_s13 = inlined_call_operand.hbm [shape: f32[1,128], index: 13, kind: input, shape index: {}]   ;;  %s14326_s14 = inlined_call_operand.<no memory space> [shape: f32[1,1], index: 14, kind: input, shape index: {}]   ;;  %s14327_s15 = inlined_call_operand.vmem [shape: f32[7,128], index: 15, kind: input, shape index: {}]   ;;  %s14328_s16 = inlined_call_operand.vmem [shape: f32[1,128], index: 16, kind: input, shape index: {}]   ;;  %s14329_s17 = inlined_call_operand.vmem [shape: f32[128,384], index: 17, kind: input, shape index: {}]   ;;  %s14330_s18 = inlined_call_operand.hbm [shape: f32[1,384], index: 18, kind: input, shape index: {}]   ;;  %s14331_s19 = inlined_call_operand.hbm [shape: bf16[128,384], index: 19, kind: input, shape index: {}]   ;;  %s14332_s20 = inlined_call_operand.hbm [shape: f32[1,384], index: 20, kind: input, shape index: {}]   ;;  %s14333_s21 = inlined_call_operand.vmem [shape: f32[64,64], index: 21, kind: input, shape index: {}]   ;;  %s14334_s22 = inlined_call_operand.vmem [shape: f32[64,1], index: 22, kind: input, shape index: {}]   ;;  %s14335_s23 = inlined_call_operand.hbm [shape: f32[128,128], index: 23, kind: input, shape index: {}]   ;;  %s14336_s24 = inlined_call_operand.hbm [shape: f32[1,128], index: 24, kind: input, shape index: {}]   ;;  %s14337_s25 = inlined_call_operand.vmem [shape: f32[64,128], index: 25, kind: output, shape index: {}]  }
   0x1   :  { %14354 = sst [smem:[#allocation40_spill]] %s14312_s0  ;;  %v30_v0 = vstv %s14326_s14 }
   0x2   :  { %14355 = sst [smem:[#allocation41_spill]] %s14313_s1  ;;  %31 = vst [vmem:[#allocation6] sm:$0x1] %v30_v0 }
   0x3   :  { %14356 = sst [smem:[#allocation42_spill]] %s14314_s2 }
   0x4   :  { %14357 = sst [smem:[#allocation43_spill]] %s14315_s3 }
   0x5   :  { %14358 = sst [smem:[#allocation44_spill]] %s14316_s4 }
   0x6   :  { %14359 = sst [smem:[#allocation45_spill]] %s14317_s5 }
   0x7   :  { %14360 = sst [smem:[#allocation46_spill]] %s14318_s6 }
   0x8   :  { %14361 = sst [smem:[#allocation47_spill]] %s14319_s7 }
   0x9   :  { %14362 = sst [smem:[#allocation48_spill]] %s14320_s8 }
   0xa   :  { %14363 = sst [smem:[#allocation49_spill]] %s14321_s9 }
   0xb   :  { %14364 = sst [smem:[#allocation50_spill]] %s14337_s25 }
   0xc   :  { %32 = vsyncpa [#allocation8], 0 }
   0xd   :  { %33 = vsyncpa [#allocation10], 0 }
   0xe   :  { %34 = vsyncpa [#allocation13], 0 }
   0xf   :  { %35 = vsyncpa [#allocation16], 0 }
  0x10   :  { %36 = vsyncpa [#allocation19], 0 }
  0x11   :  { %37 = vsyncpa [#allocation22], 0 }
  0x12   :  { %38 = vsyncpa [#allocation25], 0 }
  0x13   :  { %39 = vsyncpa [#allocation28], 0  ;;  %s11966_s6 = smov [#allocation9]   ;;  %s11967_s7 = smov [#allocation12]  }
  0x14   :  { %s63_s30 = sshll.u32 %s11966_s6, 4  ;;  %s85_s3 = sshll.u32 %s11967_s7, 4  ;;  %s64_s30 = int_to_ptr.vmem [resolvable:$true] %s63_s30  ;;  %s12123_s3 = int_to_ptr.vmem [resolvable:$true] %s85_s3 }
  0x15   :  { %s14365_s8 = sld [smem:[#allocation44_spill]] }
  0x1b   :  { %s11642_s14 = scalar_lea.hbm %s14365_s8, 768 }
  0x1c   :  { %p11643_p0 = scmp.ne.s32.totalorder %s14365_s8, %s11642_s14  ;;  %p11646_p1 = scmp.lt.u32.totalorder %s11642_s14, %s14365_s8 }
  0x1e   :  { %p11648_p2 = pnand %p11646_p1, %p11643_p0 }
  0x20   :  { %11651 = shalt.err (!%p11648_p2)
}
  0x21   :  { %s11652_s5 = scalar_lea.vmem %s64_s30, 768  ;;  %p11657_p4 = scmp.lt.s32.totalorder %s64_s30, %s64_s30 }
  0x22   :  { %p11653_p3 = scmp.ne.s32.totalorder %s64_s30, %s11652_s5  ;;  %p11658_p5 = scmp.lt.s32.totalorder %s11652_s5, %s11652_s5 }
  0x24   :  { %p11659_p6 = por %p11658_p5, %p11657_p4 }
  0x26   :  { %p11660_p7 = pnand %p11659_p6, %p11653_p3 }
  0x28   :  { %11663 = shalt.err (!%p11660_p7)
}
  0x29   :  { %s14347_s0 = smov 384   ;;  %s14348_s29 = smov 24  }
  0x2a   :  { %69 = dma.hbm_to_vmem [thread:$0]  %s14365_s8, 768, %s64_s30, [#allocation10], %s14347_s0, %s14347_s0, %s14348_s29  }
  0x2b   :  { %s14366_s1 = sld [smem:[#allocation46_spill]] }
  0x31   :  { %s11664_s14 = scalar_lea.hbm %s14366_s1, 3072 }
  0x32   :  { %p11665_p8 = scmp.ne.s32.totalorder %s14366_s1, %s11664_s14  ;;  %p11668_p9 = scmp.lt.u32.totalorder %s11664_s14, %s14366_s1 }
  0x34   :  { %p11670_p10 = pnand %p11668_p9, %p11665_p8 }
  0x36   :  { %11673 = shalt.err (!%p11670_p10)
}
  0x37   :  { %s11674_s5 = scalar_lea.vmem %s12123_s3, 3072  ;;  %p11679_p12 = scmp.lt.s32.totalorder %s12123_s3, %s12123_s3 }
  0x38   :  { %p11675_p11 = scmp.ne.s32.totalorder %s12123_s3, %s11674_s5  ;;  %p11680_p13 = scmp.lt.s32.totalorder %s11674_s5, %s11674_s5 }
  0x3a   :  { %p11681_p0 = por %p11680_p13, %p11679_p12 }
  0x3c   :  { %p11682_p1 = pnand %p11681_p0, %p11675_p11 }
  0x3e   :  { %11685 = shalt.err (!%p11682_p1)
}
  0x3f   :  { %s11970_s30 = smov 192   ;;  %s11971_s8 = smov 12  }
  0x40   :  { %91 = dma.hbm_to_vmem [thread:$0]  %s14366_s1, 3072, %s12123_s3, [#allocation13], %s11970_s30, %s11970_s30, %s11971_s8  }
  0x41   :  { %s11972_s7 = smov [#allocation15]   ;;  %s11973_s14 = smov [#allocation18]  }
  0x42   :  { %s112_s26 = sshll.u32 %s11972_s7, 4  ;;  %s134_s27 = sshll.u32 %s11973_s14, 4  ;;  %s113_s26 = int_to_ptr.vmem [resolvable:$true] %s112_s26  ;;  %s135_s27 = int_to_ptr.vmem [resolvable:$true] %s134_s27 }
  0x43   :  { %s11686_s9 = scalar_lea.hbm %s14322_s10, 48 }
  0x44   :  { %p11687_p2 = scmp.ne.s32.totalorder %s14322_s10, %s11686_s9  ;;  %p11690_p3 = scmp.lt.u32.totalorder %s11686_s9, %s14322_s10 }
  0x46   :  { %p11692_p4 = pnand %p11690_p3, %p11687_p2 }
  0x48   :  { %11695 = shalt.err (!%p11692_p4)
}
  0x49   :  { %s11696_s3 = scalar_lea.vmem %s113_s26, 48  ;;  %s11700_s1 = scalar_lea.vmem %s113_s26, 64 }
  0x4a   :  { %p11697_p5 = scmp.ne.s32.totalorder %s113_s26, %s11696_s3  ;;  %p11701_p6 = scmp.lt.s32.totalorder %s113_s26, %s113_s26 }
  0x4b   :  { %p11702_p7 = scmp.lt.s32.totalorder %s11700_s1, %s11696_s3 }
  0x4d   :  { %p11703_p8 = por %p11702_p7, %p11701_p6 }
  0x4f   :  { %p11704_p9 = pnand %p11703_p8, %p11697_p5 }
  0x51   :  { %11707 = shalt.err (!%p11704_p9)
}
  0x52   :  { %115 = dma.hbm_to_vmem [thread:$0]  %s14322_s10, 48, %s113_s26, [#allocation16]  }
  0x53   :  { %s11708_s14 = scalar_lea.hbm %s14324_s12, 48 }
  0x54   :  { %p11709_p10 = scmp.ne.s32.totalorder %s14324_s12, %s11708_s14  ;;  %p11712_p11 = scmp.lt.u32.totalorder %s11708_s14, %s14324_s12 }
  0x56   :  { %p11714_p12 = pnand %p11712_p11, %p11709_p10 }
  0x58   :  { %11717 = shalt.err (!%p11714_p12)
}
  0x59   :  { %s11718_s9 = scalar_lea.vmem %s135_s27, 48  ;;  %s11722_s5 = scalar_lea.vmem %s135_s27, 64 }
  0x5a   :  { %p11719_p13 = scmp.ne.s32.totalorder %s135_s27, %s11718_s9  ;;  %p11723_p0 = scmp.lt.s32.totalorder %s135_s27, %s135_s27 }
  0x5b   :  { %p11724_p1 = scmp.lt.s32.totalorder %s11722_s5, %s11718_s9 }
  0x5d   :  { %p11725_p2 = por %p11724_p1, %p11723_p0 }
  0x5f   :  { %p11726_p3 = pnand %p11725_p2, %p11719_p13 }
  0x61   :  { %11729 = shalt.err (!%p11726_p3)
}
  0x62   :  { %137 = dma.hbm_to_vmem [thread:$0]  %s14324_s12, 48, %s135_s27, [#allocation19]  }
  0x63   :  { %s11974_s3 = smov [#allocation21]   ;;  %s11975_s2 = smov [#allocation24]  }
  0x64   :  { %s162_s1 = sshll.u32 %s11974_s3, 4  ;;  %s184_s6 = sshll.u32 %s11975_s2, 4  ;;  %s163_s1 = int_to_ptr.vmem [resolvable:$true] %s162_s1  ;;  %s185_s6 = int_to_ptr.vmem [resolvable:$true] %s184_s6 }
  0x65   :  { %s11730_s14 = scalar_lea.hbm %s14330_s18, 48 }
  0x66   :  { %p11731_p4 = scmp.ne.s32.totalorder %s14330_s18, %s11730_s14  ;;  %p11734_p5 = scmp.lt.u32.totalorder %s11730_s14, %s14330_s18 }
  0x68   :  { %p11736_p6 = pnand %p11734_p5, %p11731_p4 }
  0x6a   :  { %11739 = shalt.err (!%p11736_p6)
}
  0x6b   :  { %s11740_s12 = scalar_lea.vmem %s163_s1, 48  ;;  %s11744_s27 = scalar_lea.vmem %s163_s1, 64 }
  0x6c   :  { %p11741_p7 = scmp.ne.s32.totalorder %s163_s1, %s11740_s12  ;;  %p11745_p8 = scmp.lt.s32.totalorder %s163_s1, %s163_s1 }
  0x6d   :  { %p11746_p9 = scmp.lt.s32.totalorder %s11744_s27, %s11740_s12 }
  0x6f   :  { %p11747_p10 = por %p11746_p9, %p11745_p8 }
  0x71   :  { %p11748_p11 = pnand %p11747_p10, %p11741_p7 }
  0x73   :  { %11751 = shalt.err (!%p11748_p11)
}
  0x74   :  { %165 = dma.hbm_to_vmem [thread:$0]  %s14330_s18, 48, %s163_s1, [#allocation22]  }
  0x75   :  { %s11752_s3 = scalar_lea.hbm %s14332_s20, 48 }
  0x76   :  { %p11753_p12 = scmp.ne.s32.totalorder %s14332_s20, %s11752_s3  ;;  %p11756_p13 = scmp.lt.u32.totalorder %s11752_s3, %s14332_s20 }
  0x78   :  { %p11758_p0 = pnand %p11756_p13, %p11753_p12 }
  0x7a   :  { %11761 = shalt.err (!%p11758_p0)
}
  0x7b   :  { %s11762_s25 = scalar_lea.vmem %s185_s6, 48  ;;  %s11766_s29 = scalar_lea.vmem %s185_s6, 64 }
  0x7c   :  { %p11763_p1 = scmp.ne.s32.totalorder %s185_s6, %s11762_s25  ;;  %p11767_p2 = scmp.lt.s32.totalorder %s185_s6, %s185_s6 }
  0x7d   :  { %p11768_p3 = scmp.lt.s32.totalorder %s11766_s29, %s11762_s25 }
  0x7f   :  { %p11769_p4 = por %p11768_p3, %p11767_p2 }
  0x81   :  { %p11770_p5 = pnand %p11769_p4, %p11763_p1 }
  0x83   :  { %11773 = shalt.err (!%p11770_p5)
}
  0x84   :  { %187 = dma.hbm_to_vmem [thread:$0]  %s14332_s20, 48, %s185_s6, [#allocation25]  }
  0x85   :  { %s11976_s4 = smov [#allocation7]   ;;  %s11977_s12 = smov [#allocation11]  }
  0x86   :  { %s51_s28 = sshll.u32 %s11976_s4, 4  ;;  %s76_s27 = sshll.u32 %s11977_s12, 4  ;;  %s52_s28 = int_to_ptr.vmem [resolvable:$true] %s51_s28  ;;  %s77_s27 = int_to_ptr.vmem [resolvable:$true] %s76_s27 }
  0x87   :  { %s14367_s10 = sld [smem:[#allocation43_spill]] }
  0x8d   :  { %s11774_s26 = scalar_lea.hbm %s14367_s10, 768 }
  0x8e   :  { %p11775_p6 = scmp.ne.s32.totalorder %s14367_s10, %s11774_s26  ;;  %p11778_p7 = scmp.lt.u32.totalorder %s11774_s26, %s14367_s10 }
  0x90   :  { %p11780_p8 = pnand %p11778_p7, %p11775_p6 }
  0x92   :  { %11783 = shalt.err (!%p11780_p8)
}
  0x93   :  { %s11784_s20 = scalar_lea.vmem %s52_s28, 768  ;;  %p11789_p10 = scmp.lt.s32.totalorder %s52_s28, %s52_s28 }
  0x94   :  { %p11785_p9 = scmp.ne.s32.totalorder %s52_s28, %s11784_s20  ;;  %p11790_p11 = scmp.lt.s32.totalorder %s11784_s20, %s11784_s20 }
  0x96   :  { %p11791_p12 = por %p11790_p11, %p11789_p10 }
  0x98   :  { %p11792_p13 = pnand %p11791_p12, %p11785_p9 }
  0x9a   :  { %11795 = shalt.err (!%p11792_p13)
}
  0x9b   :  { %s14368_s6 = smov 24   ;;  %s14369_s14 = smov 384  }
  0x9c   :  { %57 = dma.hbm_to_vmem [thread:$0]  %s14367_s10, 768, %s52_s28, [#allocation8], %s14369_s14, %s14369_s14, %s14368_s6  }
  0x9d   :  { %s14370_s4 = sld [smem:[#allocation45_spill]] }
  0xa3   :  { %s11796_s12 = scalar_lea.hbm %s14370_s4, 48 }
  0xa4   :  { %p11797_p0 = scmp.ne.s32.totalorder %s14370_s4, %s11796_s12  ;;  %p11800_p1 = scmp.lt.u32.totalorder %s11796_s12, %s14370_s4 }
  0xa6   :  { %p11802_p2 = pnand %p11800_p1, %p11797_p0 }
  0xa8   :  { %11805 = shalt.err (!%p11802_p2)
}
  0xa9   :  { %s11806_s2 = scalar_lea.vmem %s77_s27, 48  ;;  %s11810_s0 = scalar_lea.vmem %s77_s27, 64 }
  0xaa   :  { %p11807_p3 = scmp.ne.s32.totalorder %s77_s27, %s11806_s2  ;;  %p11811_p4 = scmp.lt.s32.totalorder %s77_s27, %s77_s27 }
  0xab   :  { %p11812_p5 = scmp.lt.s32.totalorder %s11810_s0, %s11806_s2 }
  0xad   :  { %p11813_p6 = por %p11812_p5, %p11811_p4 }
  0xaf   :  { %p11814_p7 = pnand %p11813_p6, %p11807_p3 }
  0xb1   :  { %11817 = shalt.err (!%p11814_p7)
}
  0xb2   :  { %79 = dma.hbm_to_vmem [thread:$0]  %s14370_s4, 48, %s77_s27, [#allocation10]  }
  0xb3   :  { %s11978_s7 = smov [#allocation14]   ;;  %s11979_s6 = smov [#allocation17]  }
  0xb4   :  { %s98_s20 = sshll.u32 %s11978_s7, 4  ;;  %s121_s14 = sshll.u32 %s11979_s6, 4  ;;  %s99_s20 = int_to_ptr.vmem [resolvable:$true] %s98_s20  ;;  %s12235_s14 = int_to_ptr.vmem [resolvable:$true] %s121_s14 }
  0xb5   :  { %s14371_s18 = sld [smem:[#allocation47_spill]] }
  0xbb   :  { %s11818_s1 = scalar_lea.hbm %s14371_s18, 48 }
  0xbc   :  { %p11819_p8 = scmp.ne.s32.totalorder %s14371_s18, %s11818_s1  ;;  %p11822_p9 = scmp.lt.u32.totalorder %s11818_s1, %s14371_s18 }
  0xbe   :  { %p11824_p10 = pnand %p11822_p9, %p11819_p8 }
  0xc0   :  { %11827 = shalt.err (!%p11824_p10)
}
  0xc1   :  { %s11828_s27 = scalar_lea.vmem %s99_s20, 48  ;;  %s11832_s4 = scalar_lea.vmem %s99_s20, 64 }
  0xc2   :  { %p11829_p11 = scmp.ne.s32.totalorder %s99_s20, %s11828_s27  ;;  %p11833_p12 = scmp.lt.s32.totalorder %s99_s20, %s99_s20 }
  0xc3   :  { %p11834_p13 = scmp.lt.s32.totalorder %s11832_s4, %s11828_s27 }
  0xc5   :  { %p11835_p0 = por %p11834_p13, %p11833_p12 }
  0xc7   :  { %p11836_p1 = pnand %p11835_p0, %p11829_p11 }
  0xc9   :  { %11839 = shalt.err (!%p11836_p1)
}
  0xca   :  { %101 = dma.hbm_to_vmem [thread:$0]  %s14371_s18, 48, %s99_s20, [#allocation13]  }
  0xcb   :  { %s11840_s10 = scalar_lea.hbm %s14323_s11, 3072 }
  0xcc   :  { %p11841_p2 = scmp.ne.s32.totalorder %s14323_s11, %s11840_s10  ;;  %p11844_p3 = scmp.lt.u32.totalorder %s11840_s10, %s14323_s11 }
  0xce   :  { %p11846_p4 = pnand %p11844_p3, %p11841_p2 }
  0xd0   :  { %11849 = shalt.err (!%p11846_p4)
}
  0xd1   :  { %s11850_s1 = scalar_lea.vmem %s12235_s14, 3072  ;;  %p11855_p6 = scmp.lt.s32.totalorder %s12235_s14, %s12235_s14 }
  0xd2   :  { %p11851_p5 = scmp.ne.s32.totalorder %s12235_s14, %s11850_s1  ;;  %p11856_p7 = scmp.lt.s32.totalorder %s11850_s1, %s11850_s1 }
  0xd4   :  { %p11857_p8 = por %p11856_p7, %p11855_p6 }
  0xd6   :  { %p11858_p9 = pnand %p11857_p8, %p11851_p5 }
  0xd8   :  { %11861 = shalt.err (!%p11858_p9)
}
  0xd9   :  { %127 = dma.hbm_to_vmem [thread:$0]  %s14323_s11, 3072, %s12235_s14, [#allocation16], %s11970_s30, %s11970_s30, %s11971_s8  }
  0xda   :  { %s11980_s12 = smov [#allocation20]   ;;  %s11981_s5 = smov [#allocation23]  }
  0xdb   :  { %s144_s9 = sshll.u32 %s11980_s12, 4  ;;  %s171_s26 = sshll.u32 %s11981_s5, 4  ;;  %s145_s9 = int_to_ptr.vmem [resolvable:$true] %s144_s9  ;;  %s12269_s26 = int_to_ptr.vmem [resolvable:$true] %s171_s26 }
  0xdc   :  { %s11862_s3 = scalar_lea.hbm %s14325_s13, 16 }
  0xdd   :  { %p11863_p10 = scmp.ne.s32.totalorder %s14325_s13, %s11862_s3  ;;  %p11866_p11 = scmp.lt.u32.totalorder %s11862_s3, %s14325_s13 }
  0xdf   :  { %p11868_p12 = pnand %p11866_p11, %p11863_p10 }
  0xe1   :  { %11871 = shalt.err (!%p11868_p12)
}
  0xe2   :  { %s11872_s11 = scalar_lea.vmem %s145_s9, 16  ;;  %s11876_s14 = scalar_lea.vmem %s145_s9, 32 }
  0xe3   :  { %p11873_p13 = scmp.ne.s32.totalorder %s145_s9, %s11872_s11  ;;  %p11877_p0 = scmp.lt.s32.totalorder %s145_s9, %s145_s9 }
  0xe4   :  { %p11878_p1 = scmp.lt.s32.totalorder %s11876_s14, %s11872_s11 }
  0xe6   :  { %p11879_p2 = por %p11878_p1, %p11877_p0 }
  0xe8   :  { %p11880_p3 = pnand %p11879_p2, %p11873_p13 }
  0xea   :  { %11883 = shalt.err (!%p11880_p3)
}
  0xeb   :  { %147 = dma.hbm_to_vmem [thread:$0]  %s14325_s13, 16, %s145_s9, [#allocation19]  }
  0xec   :  { %s11884_s1 = scalar_lea.hbm %s14331_s19, 3072 }
  0xed   :  { %p11885_p4 = scmp.ne.s32.totalorder %s14331_s19, %s11884_s1  ;;  %p11888_p5 = scmp.lt.u32.totalorder %s11884_s1, %s14331_s19 }
  0xef   :  { %p11890_p6 = pnand %p11888_p5, %p11885_p4 }
  0xf1   :  { %11893 = shalt.err (!%p11890_p6)
}
  0xf2   :  { %s11894_s27 = scalar_lea.vmem %s12269_s26, 3072  ;;  %p11899_p8 = scmp.lt.s32.totalorder %s12269_s26, %s12269_s26 }
  0xf3   :  { %p11895_p7 = scmp.ne.s32.totalorder %s12269_s26, %s11894_s27  ;;  %p11900_p9 = scmp.lt.s32.totalorder %s11894_s27, %s11894_s27 }
  0xf5   :  { %p11901_p10 = por %p11900_p9, %p11899_p8 }
  0xf7   :  { %p11902_p11 = pnand %p11901_p10, %p11895_p7 }
  0xf9   :  { %11905 = shalt.err (!%p11902_p11)
}
  0xfa   :  { %177 = dma.hbm_to_vmem [thread:$0]  %s14331_s19, 3072, %s12269_s26, [#allocation22], %s11970_s30, %s11970_s30, %s11971_s8  }
  0xfb   :  { %s11982_s4 = smov [#allocation26]   ;;  %s11906_s28 = scalar_lea.hbm %s14335_s23, 2048 }
  0xfc   :  { %s197_s3 = sshll.u32 %s11982_s4, 4  ;;  %p11907_p12 = scmp.ne.s32.totalorder %s14335_s23, %s11906_s28  ;;  %s198_s3 = int_to_ptr.vmem [resolvable:$true] %s197_s3 }
  0xfd   :  { %p11910_p13 = scmp.lt.u32.totalorder %s11906_s28, %s14335_s23 }
  0xff   :  { %p11912_p0 = pnand %p11910_p13, %p11907_p12 }
 0x101   :  { %11915 = shalt.err (!%p11912_p0)
}
 0x102   :  { %s11916_s6 = scalar_lea.vmem %s198_s3, 2048  ;;  %p11921_p2 = scmp.lt.s32.totalorder %s198_s3, %s198_s3 }
 0x103   :  { %p11917_p1 = scmp.ne.s32.totalorder %s198_s3, %s11916_s6  ;;  %p11922_p3 = scmp.lt.s32.totalorder %s11916_s6, %s11916_s6 }
 0x105   :  { %p11923_p4 = por %p11922_p3, %p11921_p2 }
 0x107   :  { %p11924_p5 = pnand %p11923_p4, %p11917_p1 }
 0x109   :  { %11927 = shalt.err (!%p11924_p5)
}
 0x10a   :  { %s11983_s19 = smov 128   ;;  %s11984_s30 = smov 8  }
 0x10b   :  { %203 = dma.hbm_to_vmem [thread:$0]  %s14335_s23, 2048, %s198_s3, [#allocation25], %s11983_s19, %s11983_s19, %s11984_s30  }
 0x10c   :  { %s11985_s25 = smov [#allocation27]   ;;  %s11928_s18 = scalar_lea.hbm %s14336_s24, 16 }
 0x10d   :  { %s210_s29 = sshll.u32 %s11985_s25, 4  ;;  %p11929_p6 = scmp.ne.s32.totalorder %s14336_s24, %s11928_s18  ;;  %s211_s29 = int_to_ptr.vmem [resolvable:$true] %s210_s29 }
 0x10e   :  { %p11932_p7 = scmp.lt.u32.totalorder %s11928_s18, %s14336_s24 }
 0x110   :  { %p11934_p8 = pnand %p11932_p7, %p11929_p6 }
 0x112   :  { %11937 = shalt.err (!%p11934_p8)
}
 0x113   :  { %s11938_s9 = scalar_lea.vmem %s211_s29, 16  ;;  %s11942_s23 = scalar_lea.vmem %s211_s29, 32 }
 0x114   :  { %p11939_p9 = scmp.ne.s32.totalorder %s211_s29, %s11938_s9  ;;  %p11943_p10 = scmp.lt.s32.totalorder %s211_s29, %s211_s29 }
 0x115   :  { %p11944_p11 = scmp.lt.s32.totalorder %s11942_s23, %s11938_s9 }
 0x117   :  { %p11945_p12 = por %p11944_p11, %p11943_p10 }
 0x119   :  { %p11946_p13 = pnand %p11945_p12, %p11939_p9 }
 0x11b   :  { %11949 = shalt.err (!%p11946_p13)
}
 0x11c   :  { %213 = dma.hbm_to_vmem [thread:$0]  %s14336_s24, 16, %s211_s29, [#allocation28]  }
 0x11d   :  { %11950 = dma.done.wait [#allocation8], 768  }
 0x11e   :  { %11951 = vsyncadd [#allocation8], 4294966528 }
 0x11f   :  { %11952 = dma.done.wait [#allocation10], 816  }
 0x120   :  { %11953 = vsyncadd [#allocation10], 4294966480 }
 0x121   :  { %11954 = dma.done.wait [#allocation13], 3120  }
 0x122   :  { %11955 = vsyncadd [#allocation13], 4294964176 }
 0x123   :  { %11956 = dma.done.wait [#allocation16], 3120  }
 0x124   :  { %11957 = vsyncadd [#allocation16], 4294964176 }
 0x125   :  { %11958 = dma.done.wait [#allocation19], 64  }
 0x126   :  { %11959 = vsyncadd [#allocation19], 4294967232 }
 0x127   :  { %11960 = dma.done.wait [#allocation22], 3120  }
 0x128   :  { %11961 = vsyncadd [#allocation22], 4294964176 }
 0x129   :  { %11962 = dma.done.wait [#allocation25], 2096  }
 0x12a   :  { %11963 = vsyncadd [#allocation25], 4294965200 }
 0x12b   :  { %11964 = dma.done.wait [#allocation28], 16  }
 0x12c   :  { %11965 = vsyncadd [#allocation28], 4294967280  ;;  %v14350_v1 = vmov 0.0   ;;  %v14352_v2 = vmov 0   ;;  %v280_v3 = vld [vmem:[#allocation9 + $0x8] sm:$0xff]  ;;  %v283_v4 = vld [vmem:[#allocation9 + $0x20] sm:$0xff] }
 0x12d   :  { %374 = vmatprep.mubr.f32.mxu0 %v14350_v1  ;;  %404 = vmatprep.mubr.f32.mxu1 %v14350_v1  ;;  %v279_v5 = vld [vmem:[#allocation9] sm:$0xff]  ;;  %v10691_v6 = vpack.c.bf16 %v283_v4, %v280_v3  ;;  %v282_v7 = vld [vmem:[#allocation9 + $0x18] sm:$0xff]  ;;  %v281_v9 = vld [vmem:[#allocation9 + $0x10] sm:$0xff]  ;;  %s14372_s0 = sld [smem:[#allocation41_spill]]  ;;  %vm285_vm0 = vcmask 130048   ;;  %s14373_s5 = sld [smem:[#allocation40_spill]] }
 0x12e   :  { %11013 = vset.pattern.permute.xlu0 %v14352_v2  ;;  %11014 = vset.pattern.permute.xlu1 %v14352_v2  ;;  %v10693_v8 = vpack.c.bf16 %v282_v7, %v279_v5  ;;  %v284_v10 = vld [vmem:[#allocation9 + $0x28] sm:$0xff]  ;;  %v267_v14 = vld [vmem:[#allocation7 + $0x10] sm:$0xff]  ;;  %v270_v15 = vld [vmem:[#allocation7 + $0x28] sm:$0xff]  ;;  %vm11988_vm1 = vmmov 0   ;;  %s14374_s30 = sld [smem:[#allocation49_spill]]  ;;  %s14375_s14 = sld [smem:[#allocation48_spill]] }
 0x12f   :  { %10692 = vmatprep.subr.bf16.mxu0 %v10691_v6  ;;  %10939 = vmatprep.subr.bf16.mxu1 %v10691_v6  ;;  %v10695_v12 = vpack.c.bf16 %v284_v10, %v281_v9  ;;  %v10703_v16 = vpack.c.bf16 %v270_v15, %v267_v14  ;;  %v266_v17 = vld [vmem:[#allocation7 + $0x8] sm:$0xff]  ;;  %v269_v18 = vld [vmem:[#allocation7 + $0x20] sm:$0xff]  ;;  %v268_v21 = vld [vmem:[#allocation7 + $0x18] sm:$0xff]  ;;  %vm6064_vm2 = vcmask 1046528   ;;  %s14381_s28 = sld [smem:[#allocation42_spill]]  ;;  %vm6060_vm3 = vcmask 56320  }
 0x130   :  { %10694 = vmatpush1.bf16.msra.mxu0 %v10693_v8  ;;  %10940 = vmatpush1.bf16.msra.mxu1 %v10693_v8  ;;  %v10699_v19 = vpack.c.bf16 %v269_v18, %v266_v17  ;;  %v265_v20 = vld [vmem:[#allocation7] sm:$0xff]  ;;  %v12365_v28 = vld [vmem:[#allocation12 + $0x4] ss:$12 sps:$4 sm:$0xff]   ;;  %v11036_v31 = vld [vmem:[#allocation12 + $0x8] ss:$12 sps:$4 sm:$0xff]   ;;  %vm8656_vm4 = vcmask 523264  }
 0x131   :  { %10696 = vmatprep.subr.bf16.mxu1 %v10695_v12  ;;  %v10701_v24 = vpack.c.bf16 %v268_v21, %v265_v20  ;;  %v11040_v33 = vld [vmem:[#allocation12 + $0x20] ss:$12 sps:$4 sm:$0xff]   ;;  %v12397_v36 = vld [vmem:[#allocation12 + $0x1c] ss:$12 sps:$4 sm:$0xff]   ;;  %v11041_v37 = vld [vmem:[#allocation12 + $0x38] ss:$12 sps:$4 sm:$0xff]  }
 0x132   :  { %10700 = vmatprep.subr.bf16.mxu0 %v10699_v19  ;;  %v12389_v34 = vld [vmem:[#allocation12] ss:$12 sps:$4 sm:$0xff]   ;;  %v12401_v38 = vld [vmem:[#allocation12 + $0x18] ss:$12 sps:$4 sm:$0xff]   ;;  %v12418_v42 = vld [vmem:[#allocation12 + $0x30] ss:$12 sps:$4 sm:$0xff]  }
 0x133   :  { %v271_v11 = vld [vmem:[%s14372_s0] sm:$0xff]  ;;  %v276_v13 = vld [vmem:[%s14372_s0 + $0x28] sm:$0xff]  ;;  %v277_v23 = vld [vmem:[%s14372_s0 + $0x30] sm:$0xff]  ;;  %s14385_s4 = sld [smem:[#allocation50_spill]] }
 0x134   :  { %8966 = vmatmul.mubr.msk.f32.vlgmr.msra.gmra.mrb[0].mxu0 %vm285_vm0, %v271_v11  ;;  %8971 = vmatmul.mubr.msk.f32.vlgmr.msra.gmra.mrb[0].mxu1 %vm285_vm0, %v276_v13  ;;  %v272_v22 = vld [vmem:[%s14372_s0 + $0x8] sm:$0xff]  ;;  %v273_v25 = vld [vmem:[%s14372_s0 + $0x10] sm:$0xff]  ;;  %v278_v26 = vld [vmem:[%s14372_s0 + $0x38] sm:$0xff] }
 0x135   :  { %10698 = vmatpush3.bf16.msra.mxu1 %v10695_v12  ;;  %380 = vmatprep.mubr.f32.mxu0 %v14350_v1  ;;  %v274_v27 = vld [vmem:[%s14372_s0 + $0x18] sm:$0xff]  ;;  %v275_v29 = vld [vmem:[%s14372_s0 + $0x20] sm:$0xff]  ;;  %v258_v32 = vld [vmem:[%s14373_s5 + $0x8] sm:$0xff] }
 0x136   :  { %410 = vmatprep.mubr.f32.mxu1 %v14350_v1  ;;  %10704 = vmatprep.subr.bf16.mxu1 %v10703_v16  ;;  %v257_v30 = vld [vmem:[%s14373_s5] sm:$0xff]  ;;  %v259_v35 = vld [vmem:[%s14373_s5 + $0x10] sm:$0xff]  ;;  %v260_v39 = vld [vmem:[%s14373_s5 + $0x18] sm:$0xff] }
 0x137   :  { %10702 = vmatpush1.bf16.msra.mxu0 %v10701_v24  ;;  %v12409_v40 = vld [vmem:[#allocation12 + $0x34] ss:$12 sps:$4 sm:$0xff]   ;;  %v12425_v44 = vld [vmem:[#allocation12 + $0x4c] ss:$12 sps:$4 sm:$0xff]   ;;  %v11042_v46 = vld [vmem:[#allocation12 + $0x50] ss:$12 sps:$4 sm:$0xff]  }
 0x138   :  { %8967 = vmatmul.mubr.msk.f32.gmra.mrb[2].mxu0 %vm285_vm0, %v272_v22  ;;  %8972 = vmatmul.mubr.msk.f32.gmra.mrb[2].mxu1 %vm285_vm0, %v277_v23  ;;  %v261_v41 = vld [vmem:[%s14373_s5 + $0x20] sm:$0xff]  ;;  %v262_v43 = vld [vmem:[%s14373_s5 + $0x28] sm:$0xff]  ;;  %v263_v45 = vld [vmem:[%s14373_s5 + $0x30] sm:$0xff] }
 0x139   :  { %386 = vmatprep.mubr.f32.mxu0 %v14350_v1  ;;  %416 = vmatprep.mubr.f32.mxu1 %v14350_v1  ;;  %v11024_v47 = vld [vmem:[#allocation12 + $0x48] ss:$12 sps:$4 sm:$0xff]   ;;  %v11029_v49 = vld [vmem:[#allocation12 + $0x64] ss:$12 sps:$4 sm:$0xff]   ;;  %v11027_v50 = vld [vmem:[#allocation12 + $0x60] ss:$12 sps:$4 sm:$0xff]  }
 0x13a   :  { %10011 = vmatprep.subr.bf16.mxu0 %v14350_v1  ;;  %v264_v48 = vld [vmem:[%s14373_s5 + $0x38] sm:$0xff]  ;;  %v11032_v51 = vld [vmem:[#allocation12 + $0x7c] ss:$12 sps:$4 sm:$0xff]   ;;  %v11044_v55 = vld [vmem:[#allocation12 + $0x80] ss:$12 sps:$4 sm:$0xff]  }
 0x13b   :  { %v11043_v52 = vld [vmem:[#allocation12 + $0x68] ss:$12 sps:$4 sm:$0xff]   ;;  %v11030_v53 = vld [vmem:[#allocation12 + $0x78] ss:$12 sps:$4 sm:$0xff]   ;;  %v11033_v56 = vld [vmem:[#allocation12 + $0x90] ss:$12 sps:$4 sm:$0xff]  }
 0x13c   :  { %8968 = vmatmul.mubr.msk.f32.gmra.mrb[4].mxu0 %vm285_vm0, %v273_v25  ;;  %8973 = vmatmul.mubr.msk.f32.gmra.mrb[4].mxu1 %vm285_vm0, %v278_v26  ;;  %v11035_v54 = vld [vmem:[#allocation12 + $0x94] ss:$12 sps:$4 sm:$0xff]   ;;  %v11039_v57 = vld [vmem:[#allocation12 + $0xac] ss:$12 sps:$4 sm:$0xff]   ;;  %v11046_v60 = vld [vmem:[#allocation12 + $0xb0] ss:$12 sps:$4 sm:$0xff]  }
 0x13d   :  { %392 = vmatprep.mubr.f32.mxu0 %v14350_v1  ;;  %9983 = vmatprep.mubr.msk.f32.mxu1 %vm285_vm0, %v271_v11  ;;  %v11045_v58 = vld [vmem:[#allocation12 + $0x98] ss:$12 sps:$4 sm:$0xff]   ;;  %v11037_v59 = vld [vmem:[#allocation12 + $0xa8] ss:$12 sps:$4 sm:$0xff]   ;;  %v11048_v62 = vld [vmem:[#allocation12 + $0x20] ss:$12 sps:$4 sm:$0xff]  }
 0x13e   :  { %v11047_v61 = vld [vmem:[#allocation12 + $0x8] ss:$12 sps:$4 sm:$0xff]   ;;  %v11049_v63 = vld [vmem:[#allocation12 + $0x38] ss:$12 sps:$4 sm:$0xff]   ;;  %v11050_v0 = vld [vmem:[#allocation12 + $0x50] ss:$12 sps:$4 sm:$0xff]  }
 0x13f   :  { %v11051_v3 = vld [vmem:[#allocation12 + $0x68] ss:$12 sps:$4 sm:$0xff]   ;;  %v11052_v4 = vld [vmem:[#allocation12 + $0x80] ss:$12 sps:$4 sm:$0xff]   ;;  %v11053_v5 = vld [vmem:[#allocation12 + $0x98] ss:$12 sps:$4 sm:$0xff]  }
 0x140   :  { %8969 = vmatmul.mubr.msk.f32.gmra.mrb[6].mxu0 %vm285_vm0, %v274_v27  ;;  %9984 = vmatmul.mubr.msk.f32.vlgmr.msra.gmra.mrb[6].mxu1 %vm285_vm0, %v272_v22  ;;  %v11054_v6 = vld [vmem:[#allocation12 + $0xb0] ss:$12 sps:$4 sm:$0xff]  }
 0x141   :  { %10706 = vmatpush3.bf16.msra.mxu1 %v10703_v16  ;;  %398 = vmatprep.mubr.f32.mxu0 %v14350_v1  ;;  %v770_v20 = vld [vmem:[#allocation11] sm:$0x7] }
 0x142   :  { %9986 = vmatprep.mubr.msk.f32.mxu1 %vm285_vm0, %v273_v25  ;;  %988 = vmatprep.subr.bf16.mxu1 %v12365_v28 }
 0x144   :  { %8970 = vmatmul.mubr.msk.f32.gmra.mrb[8].mxu0 %vm285_vm0, %v275_v29  ;;  %9987 = vmatmul.mubr.msk.f32.gmra.mrb[8].mxu1 %vm285_vm0, %v274_v27 }
 0x145   :  { %9989 = vmatprep.mubr.msk.f32.mxu1 %vm285_vm0, %v275_v29  ;;  %616 = vmatprep.mubr.f32.mxu0 %v14350_v1 }
 0x148   :  { %9990 = vmatmul.mubr.msk.f32.gmra.mrb[10].mxu1 %vm285_vm0, %v276_v13  ;;  %8982 = vmatmul.mubr.msk.f32.vlgmr.msra.gmra.mrb[0].mxu0 %vm285_vm0, %v257_v30  ;;  %v772_v13 = vlaneseq }
 0x149   :  { %9992 = vmatprep.mubr.msk.f32.mxu1 %vm285_vm0, %v277_v23  ;;  %622 = vmatprep.mubr.f32.mxu0 %v14350_v1 }
 0x14a   :  { %10012 = vmatpush3.bf16.msra.mxu0 %v11036_v31  ;;  %v773_v14 = vshrl.u32 %v772_v13, 7 }
 0x14b   :  { %10013 = vmatprep.subr.bf16.mxu0 %v14350_v1 }
 0x14c   :  { %9993 = vmatmul.mubr.msk.f32.gmra.mrb[12].mxu1 %vm285_vm0, %v278_v26  ;;  %8983 = vmatmul.mubr.msk.f32.gmra.mrb[2].mxu0 %vm285_vm0, %v258_v32  ;;  %v12479_v15 = vsub.s32 0, %v773_v14  ;;  %v12481_v17 = vsub.s32 1, %v773_v14  ;;  %v12483_v18 = vsub.s32 2, %v773_v14 }
 0x14d   :  { %628 = vmatprep.mubr.f32.mxu0 %v14350_v1  ;;  %9999 = vmatprep.mubr.msk.f32.mxu1 %vm285_vm0, %v257_v30 }
 0x14e   :  { %10014 = vmatpush3.bf16.msra.mxu0 %v11040_v33  ;;  %v775_v21 = vrot.slane %v770_v20, %v12479_v15  ;;  %v779_v22 = vrot.slane %v770_v20, %v12481_v17  ;;  %v12488_v24 = vrot.slane %v770_v20, %v12483_v18  ;;  %v843_v20 = vld [vmem:[#allocation14] sm:$0x7] }
 0x14f   :  { %10015 = vmatprep.subr.bf16.mxu0 %v14350_v1 }
 0x150   :  { %8984 = vmatmul.mubr.msk.f32.gmra.mrb[4].mxu0 %vm285_vm0, %v259_v35  ;;  %10000 = vmatmul.mubr.msk.f32.vlgmr.msra.gmra.mrb[6].mxu1 %vm285_vm0, %v258_v32 }
 0x151   :  { %989 = vmatpush1.bf16.msra.mxu1 %v12389_v34  ;;  %634 = vmatprep.mubr.f32.mxu0 %v14350_v1 }
 0x152   :  { %10002 = vmatprep.mubr.msk.f32.mxu1 %vm285_vm0, %v259_v35  ;;  %990 = vmatprep.subr.bf16.mxu1 %v12397_v36 }
 0x153   :  { %10016 = vmatpush3.bf16.msra.mxu0 %v11041_v37 }
 0x154   :  { %8985 = vmatmul.mubr.msk.f32.gmra.mrb[6].mxu0 %vm285_vm0, %v260_v39  ;;  %10003 = vmatmul.mubr.msk.f32.gmra.mrb[8].mxu1 %vm285_vm0, %v260_v39 }
 0x155   :  { %991 = vmatpush1.bf16.msra.mxu1 %v12401_v38  ;;  %640 = vmatprep.mubr.f32.mxu0 %v14350_v1 }
 0x156   :  { %10005 = vmatprep.mubr.msk.f32.mxu1 %vm285_vm0, %v261_v41  ;;  %992 = vmatprep.subr.bf16.mxu1 %v12409_v40 }
 0x157   :  { %10017 = vmatprep.subr.bf16.mxu0 %v14350_v1 }
 0x158   :  { %8986 = vmatmul.mubr.msk.f32.gmra.mrb[8].mxu0 %vm285_vm0, %v261_v41  ;;  %10006 = vmatmul.mubr.msk.f32.gmra.mrb[10].mxu1 %vm285_vm0, %v262_v43 }
 0x159   :  { %993 = vmatpush1.bf16.msra.mxu1 %v12418_v42  ;;  %646 = vmatprep.mubr.f32.mxu0 %v14350_v1 }
 0x15a   :  { %10008 = vmatprep.mubr.msk.f32.mxu1 %vm285_vm0, %v263_v45  ;;  %994 = vmatprep.subr.bf16.mxu1 %v12425_v44 }
 0x15b   :  { %10018 = vmatpush3.bf16.msra.mxu0 %v11042_v46 }
 0x15c   :  { %8987 = vmatmul.mubr.msk.f32.gmra.mrb[10].mxu0 %vm285_vm0, %v262_v43  ;;  %10009 = vmatmul.mubr.msk.f32.gmra.mrb[12].mxu1 %vm285_vm0, %v264_v48 }
 0x15d   :  { %995 = vmatpush1.bf16.msra.mxu1 %v11024_v47  ;;  %652 = vmatprep.mubr.f32.mxu0 %v14350_v1 }
 0x15e   :  { %996 = vmatprep.subr.bf16.mxu1 %v11029_v49  ;;  %1020 = vmatprep.mubr.bf16.mxu1 %v14352_v2 }
 0x15f   :  { %10019 = vmatprep.subr.bf16.mxu0 %v14350_v1 }
 0x160   :  { %8988 = vmatmul.mubr.msk.f32.gmra.mrb[12].mxu0 %vm285_vm0, %v263_v45 }
 0x161   :  { %997 = vmatpush1.bf16.msra.mxu1 %v11027_v50  ;;  %658 = vmatprep.mubr.f32.mxu0 %v14350_v1 }
 0x162   :  { %998 = vmatprep.subr.bf16.mxu1 %v11032_v51  ;;  %10020 = vmatpush3.bf16.msra.mxu0 %v11043_v52 }
 0x163   :  { %10021 = vmatprep.subr.bf16.mxu0 %v14350_v1 }
 0x164   :  { %8989 = vmatmul.mubr.msk.f32.gmra.mrb[14].mxu0 %vm285_vm0, %v264_v48 }
 0x165   :  { %999 = vmatpush1.bf16.msra.mxu1 %v11030_v53  ;;  %10027 = vmatprep.mubr.msk.bf16.mxu0 %vm11988_vm1, %v14350_v1 }
 0x166   :  { %1000 = vmatprep.subr.bf16.mxu1 %v11035_v54  ;;  %10022 = vmatpush3.bf16.msra.mxu0 %v11044_v55 }
 0x167   :  { %10023 = vmatprep.subr.bf16.mxu0 %v14350_v1 }
 0x169   :  { %1001 = vmatpush1.bf16.msra.mxu1 %v11033_v56 }
 0x16a   :  { %1002 = vmatprep.subr.bf16.mxu1 %v11039_v57  ;;  %10024 = vmatpush3.bf16.msra.mxu0 %v11045_v58 }
 0x16b   :  { %10025 = vmatprep.subr.bf16.mxu0 %v14350_v1 }
 0x16d   :  { %1003 = vmatpush1.bf16.msra.mxu1 %v11037_v59 }
 0x16e   :  { %10026 = vmatpush3.bf16.msra.mxu0 %v11046_v60  ;;  %1270 = vmatprep.subr.bf16.mxu1 %v12365_v28 }
 0x16f   :  { %10031 = vmatprep.subr.bf16.mxu0 %v14350_v1 }
 0x170   :  { %1021 = vmatmul.mubr.bf16.vlgmr.msra.gmra.mrb[16].mxu1 %v14352_v2 }
 0x171   :  { %10028 = vmatmul.mubr.bf16.vlgmr.msra.gmra.mrb[16].mxu0 %v14352_v2  ;;  %1271 = vmatpush1.bf16.msra.mxu1 %v12389_v34 }
 0x172   :  { %1272 = vmatprep.subr.bf16.mxu1 %v12397_v36  ;;  %1302 = vmatprep.mubr.bf16.mxu1 %v14352_v2 }
 0x173   :  { %10047 = vmatprep.mubr.msk.bf16.mxu0 %vm11988_vm1, %v14350_v1  ;;  %10032 = vmatpush3.bf16.msra.mxu0 %v11047_v61 }
 0x174   :  { %10033 = vmatprep.subr.bf16.mxu0 %v14350_v1 }
 0x175   :  { %1273 = vmatpush1.bf16.msra.mxu1 %v12401_v38 }
 0x176   :  { %1274 = vmatprep.subr.bf16.mxu1 %v12409_v40 }
 0x177   :  { %10034 = vmatpush3.bf16.msra.mxu0 %v11048_v62 }
 0x178   :  { %10035 = vmatprep.subr.bf16.mxu0 %v14350_v1 }
 0x179   :  { %1275 = vmatpush1.bf16.msra.mxu1 %v12418_v42 }
 0x17a   :  { %1276 = vmatprep.subr.bf16.mxu1 %v12425_v44 }
 0x17b   :  { %10036 = vmatpush3.bf16.msra.mxu0 %v11049_v63 }
 0x17c   :  { %10037 = vmatprep.subr.bf16.mxu0 %v14350_v1 }
 0x17d   :  { %1277 = vmatpush1.bf16.msra.mxu1 %v11024_v47 }
 0x17e   :  { %1278 = vmatprep.subr.bf16.mxu1 %v11029_v49 }
 0x17f   :  { %10038 = vmatpush3.bf16.msra.mxu0 %v11050_v0 }
 0x180   :  { %10039 = vmatprep.subr.bf16.mxu0 %v14350_v1 }
 0x181   :  { %1279 = vmatpush1.bf16.msra.mxu1 %v11027_v50 }
 0x182   :  { %1280 = vmatprep.subr.bf16.mxu1 %v11032_v51 }
 0x183   :  { %10040 = vmatpush3.bf16.msra.mxu0 %v11051_v3 }
 0x184   :  { %10041 = vmatprep.subr.bf16.mxu0 %v14350_v1 }
 0x185   :  { %1281 = vmatpush1.bf16.msra.mxu1 %v11030_v53 }
 0x186   :  { %1282 = vmatprep.subr.bf16.mxu1 %v11035_v54 }
 0x187   :  { %10042 = vmatpush3.bf16.msra.mxu0 %v11052_v4 }
 0x188   :  { %10043 = vmatprep.subr.bf16.mxu0 %v14350_v1 }
 0x189   :  { %1283 = vmatpush1.bf16.msra.mxu1 %v11033_v56 }
 0x18a   :  { %1284 = vmatprep.subr.bf16.mxu1 %v11039_v57 }
 0x18b   :  { %10044 = vmatpush3.bf16.msra.mxu0 %v11053_v5 }
 0x18c   :  { %10045 = vmatprep.subr.bf16.mxu0 %v14350_v1 }
 0x18d   :  { %1285 = vmatpush1.bf16.msra.mxu1 %v11037_v59 }
 0x18e   :  { %1552 = vmatprep.subr.bf16.mxu1 %v12365_v28 }
 0x18f   :  { %10046 = vmatpush3.bf16.msra.mxu0 %v11054_v6 }
 0x190   :  { %10051 = vmatprep.subr.bf16.mxu0 %v14350_v1 }
 0x207   :  { %v406_v7 = vpop.f32.mrb[0].mxu1 }
 0x208   :  { %v408_v8 = vpop.f32.mrb[1].mxu1 }
 0x20b   :  { %v412_v9 = vpop.f32.mrb[2].mxu1 }
 0x20c   :  { %v414_v10 = vpop.f32.mrb[3].mxu1 }
 0x20f   :  { %v418_v11 = vpop.f32.mrb[4].mxu1 }
 0x210   :  { %v420_v12 = vpop.f32.mrb[5].mxu1 }
 0x21b   :  { %v618_v16 = vpop.f32.mrb[0].mxu0 }
 0x21c   :  { %v620_v19 = vpop.f32.mrb[1].mxu0 }
 0x21f   :  { %v624_v23 = vpop.f32.mrb[2].mxu0 }
 0x220   :  { %v12490_v25 = vadd.f32 %v775_v21, %v624_v23  ;;  %v626_v26 = vpop.f32.mrb[3].mxu0  ;;  %v848_v23 = vrot.slane %v843_v20, %v12479_v15 }
 0x221   :  { %v12492_v27 = vadd.f32 %v779_v22, %v626_v26  ;;  %v852_v26 = vrot.slane %v843_v20, %v12481_v17 }
 0x223   :  { %v10001_v28 = vpop.f32.mrb[6].mxu1  ;;  %v630_v29 = vpop.f32.mrb[4].mxu0 }
 0x224   :  { %v12495_v30 = vadd.f32 %v10001_v28, %v12488_v24  ;;  %v12497_v31 = vpop.f32.mrb[7].mxu1  ;;  %v12499_v32 = vadd.f32 %v775_v21, %v630_v29  ;;  %v632_v33 = vpop.f32.mrb[5].mxu0  ;;  %v787_v28 = vadd.f32 %v775_v21, %v618_v16  ;;  %v856_v16 = vrot.slane %v843_v20, %v12483_v18  ;;  %v12550_v20 = vld [vmem:[#allocation12] ss:$12 sps:$4 sm:$0xff]  }
 0x225   :  { %v12501_v34 = vadd.f32 %v779_v22, %v632_v33 }
 0x227   :  { %v10004_v35 = vpop.f32.mrb[8].mxu1  ;;  %v636_v36 = vpop.f32.mrb[6].mxu0 }
 0x228   :  { %v12504_v37 = vadd.f32 %v10004_v35, %v12488_v24  ;;  %v741_v38 = vpop.f32.mrb[9].mxu1  ;;  %v12506_v39 = vadd.f32 %v775_v21, %v636_v36  ;;  %v638_v40 = vpop.f32.mrb[7].mxu0  ;;  %v788_v35 = vadd.f32 %v779_v22, %v620_v19 }
 0x229   :  { %v12509_v41 = vadd.f32 %v12488_v24, %v741_v38  ;;  %v12511_v42 = vadd.f32 %v779_v22, %v638_v40 }
 0x22b   :  { %v10007_v43 = vpop.f32.mrb[10].mxu1  ;;  %v642_v44 = vpop.f32.mrb[8].mxu0 }
 0x22c   :  { %v12514_v45 = vadd.f32 %v10007_v43, %v12488_v24  ;;  %v751_v46 = vpop.f32.mrb[11].mxu1  ;;  %v12516_v47 = vadd.f32 %v775_v21, %v642_v44  ;;  %v644_v48 = vpop.f32.mrb[9].mxu0 }
 0x22d   :  { %v12519_v49 = vadd.f32 %v12488_v24, %v751_v46  ;;  %v12521_v50 = vadd.f32 %v779_v22, %v644_v48 }
 0x22f   :  { %v648_v51 = vpop.f32.mrb[10].mxu0  ;;  %v10010_v52 = vpop.f32.mrb[12].mxu1 }
 0x230   :  { %v649_v53 = vadd.f32 %v648_v51, %v406_v7  ;;  %v12524_v54 = vadd.f32 %v10010_v52, %v12488_v24  ;;  %v650_v55 = vpop.f32.mrb[11].mxu0  ;;  %v761_v56 = vpop.f32.mrb[13].mxu1 }
 0x231   :  { %v651_v57 = vadd.f32 %v650_v55, %v408_v8  ;;  %v12527_v58 = vadd.f32 %v12488_v24, %v761_v56  ;;  %v789_v56 = vadd.f32 %v12488_v24, %v12497_v31  ;;  %v12554_v24 = vld [vmem:[#allocation12 + $0x1c] ss:$12 sps:$4 sm:$0xff]   ;;  %v12559_v31 = vld [vmem:[#allocation12 + $0x18] ss:$12 sps:$4 sm:$0xff]  }
 0x232   :  { %v12529_v59 = vadd.f32 %v775_v21, %v649_v53 }
 0x233   :  { %v12531_v60 = vadd.f32 %v779_v22, %v651_v57  ;;  %v654_v61 = vpop.f32.mrb[12].mxu0 }
 0x234   :  { %v655_v62 = vadd.f32 %v654_v61, %v412_v9  ;;  %v656_v63 = vpop.f32.mrb[13].mxu0 }
 0x235   :  { %v657_v0 = vadd.f32 %v656_v63, %v414_v10 }
 0x236   :  { %v12533_v3 = vadd.f32 %v775_v21, %v655_v62 }
 0x237   :  { %v12535_v4 = vadd.f32 %v779_v22, %v657_v0  ;;  %v660_v5 = vpop.f32.mrb[14].mxu0 }
 0x238   :  { %v661_v6 = vadd.f32 %v660_v5, %v418_v11  ;;  %v662_v7 = vpop.f32.mrb[15].mxu0 }
 0x239   :  { %v663_v13 = vadd.f32 %v662_v7, %v420_v12 }
 0x23a   :  { %v12537_v8 = vadd.f32 %v775_v21, %v661_v6 }
 0x23b   :  { %v12539_v14 = vadd.f32 %v779_v22, %v663_v13 }
 0x243   :  { %v1022_v9 = vpop.f32.mrb[16].mxu1 }
 0x244   :  { %v1023_v10 = vadd.f32 %v1022_v9, %v848_v23  ;;  %v1024_v29 = vpop.f32.mrb[17].mxu1  ;;  %v1063_v33 = vpop.f32.mrb[16].mxu0  ;;  %v12562_v23 = vld [vmem:[#allocation12 + $0x34] ss:$12 sps:$4 sm:$0xff]   ;;  %v12568_v9 = vld [vmem:[#allocation12 + $0x4c] ss:$12 sps:$4 sm:$0xff]  }
 0x245   :  { %v1025_v36 = vadd.f32 %v1024_v29, %v852_v26  ;;  %v1026_v38 = vpop.f32.mrb[18].mxu1  ;;  %v10029_v11 = vpop.f32.mrb[17].mxu0  ;;  %v1064_v19 = vadd.f32 %v1063_v33, %v856_v16  ;;  %v12565_v26 = vld [vmem:[#allocation12 + $0x30] ss:$12 sps:$4 sm:$0xff]   ;;  %v12577_v29 = vld [vmem:[#allocation12 + $0x60] ss:$12 sps:$4 sm:$0xff]  }
 0x246   :  { %v1069_v40 = vadd.f32 %v1023_v10, %v787_v28  ;;  %v1027_v12 = vpop.f32.mrb[19].mxu1  ;;  %v1066_v43 = vpop.f32.mrb[18].mxu0  ;;  %v12571_v28 = vld [vmem:[#allocation12 + $0x48] ss:$12 sps:$4 sm:$0xff]   ;;  %v12574_v10 = vld [vmem:[#allocation12 + $0x64] ss:$12 sps:$4 sm:$0xff]  }
 0x247   :  { %v1070_v44 = vadd.f32 %v1025_v36, %v788_v35  ;;  %v10030_v46 = vpop.f32.mrb[19].mxu0  ;;  %v12580_v33 = vld [vmem:[#allocation12 + $0x7c] ss:$12 sps:$4 sm:$0xff]   ;;  %v12583_v35 = vld [vmem:[#allocation12 + $0x78] ss:$12 sps:$4 sm:$0xff]  }
 0x248   :  { %v9022_v48 = vmul.f32 -1.442695, %v1069_v40  ;;  %v12586_v36 = vld [vmem:[#allocation12 + $0x94] ss:$12 sps:$4 sm:$0xff]   ;;  %v12589_v38 = vld [vmem:[#allocation12 + $0x90] ss:$12 sps:$4 sm:$0xff]  }
 0x249   :  { %v9023_v51 = vmul.f32 -1.442695, %v1070_v44  ;;  %v12592_v11 = vld [vmem:[#allocation12 + $0xac] ss:$12 sps:$4 sm:$0xff]   ;;  %v12595_v40 = vld [vmem:[#allocation12 + $0xa8] ss:$12 sps:$4 sm:$0xff]  }
 0x24a   :  { %11351 = vpow2.f32 %v9022_v48  ;;  %v11640_v12 = vld [vmem:[#allocation12 + $0x4] ss:$12 sps:$4 sm:$0xff]   ;;  %v11055_v43 = vld [vmem:[#allocation12 + $0x8] ss:$12 sps:$4 sm:$0xff]   ;;  %v11056_v44 = vld [vmem:[#allocation12 + $0x20] ss:$12 sps:$4 sm:$0xff]  }
 0x24b   :  { %11353 = vpow2.f32 %v9023_v51  ;;  %v11057_v46 = vld [vmem:[#allocation12 + $0x38] ss:$12 sps:$4 sm:$0xff]   ;;  %v11058_v48 = vld [vmem:[#allocation12 + $0x50] ss:$12 sps:$4 sm:$0xff]   ;;  %v11059_v51 = vld [vmem:[#allocation12 + $0x68] ss:$12 sps:$4 sm:$0xff]  }
 0x24c   :  { %v11062_v16 = vld [vmem:[#allocation12 + $0xb0] ss:$12 sps:$4 sm:$0xff]  }
 0x254   :  { %v11352_v52 = vpop.eup %11351 }
 0x255   :  { %v1077_v53 = vadd.f32 1.0, %v11352_v52  ;;  %v11354_v21 = vpop.eup %11353  ;;  %v11060_v52 = vld [vmem:[#allocation12 + $0x80] ss:$12 sps:$4 sm:$0xff]  }
 0x256   :  { %v1078_v55 = vadd.f32 1.0, %v11354_v21  ;;  %v1125_v21 = vld [vmem:[#allocation14] sm:$0x7] }
 0x257   :  { %11355 = vrcp.f32 %v1077_v53  ;;  %v11061_v53 = vld [vmem:[#allocation12 + $0x98] ss:$12 sps:$4 sm:$0xff]  }
 0x258   :  { %11357 = vrcp.f32 %v1078_v55  ;;  %v1130_v55 = vrot.slane %v1125_v21, %v12479_v15 }
 0x261   :  { %v11356_v22 = vpop.eup %11355 }
 0x262   :  { %v1083_v57 = vmul.f32 %v11356_v22, %v1064_v19  ;;  %v11358_v62 = vpop.eup %11357  ;;  %v1134_v19 = vrot.slane %v1125_v21, %v12481_v17 }
 0x263   :  { %v1086_v63 = vsub.f32 1.0, %v11358_v62  ;;  %v1088_v5 = vmul.f32 0.0, %v11358_v62 }
 0x264   :  { %v1084_v61 = vadd.f32 %v1083_v57, %v789_v56 }
 0x266   :  { %11359 = vtanh.f32 %v1084_v61 }
 0x270   :  { %v11360_v0 = vpop.eup %11359 }
 0x271   :  { %v1087_v6 = vmul.f32 %v11360_v0, %v1086_v63 }
 0x273   :  { %v12546_v7 = vadd.f32 %v1088_v5, %v1087_v6 }
 0x275   :  { %v1092_v13 = vpack.c.bf16 %v12546_v7, %v12546_v7 }
 0x277   :  { %1303 = vmatmul.mubr.bf16.vlgmr.msra.gmra.mrb[20].mxu1 %v1092_v13  ;;  %10048 = vmatmul.mubr.bf16.vlgmr.msra.gmra.mrb[20].mxu0 %v1092_v13 }
 0x278   :  { %1553 = vmatpush1.bf16.msra.mxu1 %v12550_v20  ;;  %1584 = vmatprep.mubr.bf16.mxu1 %v14352_v2 }
 0x279   :  { %1554 = vmatprep.subr.bf16.mxu1 %v12554_v24  ;;  %10067 = vmatprep.mubr.msk.bf16.mxu0 %vm11988_vm1, %v14350_v1 }
 0x27a   :  { %10052 = vmatpush3.bf16.msra.mxu0 %v11055_v43 }
 0x27b   :  { %10053 = vmatprep.subr.bf16.mxu0 %v14350_v1 }
 0x27c   :  { %1555 = vmatpush1.bf16.msra.mxu1 %v12559_v31 }
 0x27d   :  { %1556 = vmatprep.subr.bf16.mxu1 %v12562_v23 }
 0x27e   :  { %10054 = vmatpush3.bf16.msra.mxu0 %v11056_v44 }
 0x27f   :  { %10055 = vmatprep.subr.bf16.mxu0 %v14350_v1 }
 0x280   :  { %1557 = vmatpush1.bf16.msra.mxu1 %v12565_v26 }
 0x281   :  { %1558 = vmatprep.subr.bf16.mxu1 %v12568_v9 }
 0x282   :  { %10056 = vmatpush3.bf16.msra.mxu0 %v11057_v46 }
 0x283   :  { %10057 = vmatprep.subr.bf16.mxu0 %v14350_v1 }
 0x284   :  { %1559 = vmatpush1.bf16.msra.mxu1 %v12571_v28 }
 0x285   :  { %1560 = vmatprep.subr.bf16.mxu1 %v12574_v10 }
 0x286   :  { %10058 = vmatpush3.bf16.msra.mxu0 %v11058_v48 }
 0x287   :  { %10059 = vmatprep.subr.bf16.mxu0 %v14350_v1 }
 0x288   :  { %1561 = vmatpush1.bf16.msra.mxu1 %v12577_v29 }
 0x289   :  { %1562 = vmatprep.subr.bf16.mxu1 %v12580_v33 }
 0x28a   :  { %10060 = vmatpush3.bf16.msra.mxu0 %v11059_v51 }
 0x28b   :  { %10061 = vmatprep.subr.bf16.mxu0 %v14350_v1 }
 0x28c   :  { %1563 = vmatpush1.bf16.msra.mxu1 %v12583_v35 }
 0x28d   :  { %1564 = vmatprep.subr.bf16.mxu1 %v12586_v36 }
 0x28e   :  { %10062 = vmatpush3.bf16.msra.mxu0 %v11060_v52 }
 0x28f   :  { %10063 = vmatprep.subr.bf16.mxu0 %v14350_v1 }
 0x290   :  { %1565 = vmatpush1.bf16.msra.mxu1 %v12589_v38 }
 0x291   :  { %1566 = vmatprep.subr.bf16.mxu1 %v12592_v11 }
 0x292   :  { %10064 = vmatpush3.bf16.msra.mxu0 %v11061_v53  ;;  %v1138_v53 = vrot.slane %v1125_v21, %v12483_v18 }
 0x293   :  { %10065 = vmatprep.subr.bf16.mxu0 %v14350_v1 }
 0x294   :  { %1567 = vmatpush1.bf16.msra.mxu1 %v12595_v40 }
 0x295   :  { %1834 = vmatprep.subr.bf16.mxu1 %v11640_v12 }
 0x296   :  { %10066 = vmatpush3.bf16.msra.mxu0 %v11062_v16 }
 0x297   :  { %10071 = vmatprep.subr.bf16.mxu0 %v14350_v1 }
 0x34a   :  { %v1304_v22 = vpop.f32.mrb[20].mxu1  ;;  %v1345_v56 = vpop.f32.mrb[20].mxu0 }
 0x34b   :  { %v1305_v57 = vadd.f32 %v1304_v22, %v1130_v55  ;;  %v1306_v61 = vpop.f32.mrb[21].mxu1  ;;  %v10049_v62 = vpop.f32.mrb[21].mxu0  ;;  %v1346_v55 = vadd.f32 %v1345_v56, %v1138_v53 }
 0x34c   :  { %v1307_v63 = vadd.f32 %v1306_v61, %v1134_v19  ;;  %v1308_v0 = vpop.f32.mrb[22].mxu1  ;;  %v1348_v5 = vpop.f32.mrb[22].mxu0 }
 0x34d   :  { %v1351_v6 = vadd.f32 %v1305_v57, %v12490_v25  ;;  %v1309_v13 = vpop.f32.mrb[23].mxu1  ;;  %v10050_v12 = vpop.f32.mrb[23].mxu0 }
 0x34e   :  { %v1352_v43 = vadd.f32 %v1307_v63, %v12492_v27 }
 0x34f   :  { %v9048_v44 = vmul.f32 -1.442695, %v1351_v6 }
 0x350   :  { %v9049_v46 = vmul.f32 -1.442695, %v1352_v43 }
 0x351   :  { %11361 = vpow2.f32 %v9048_v44 }
 0x352   :  { %11363 = vpow2.f32 %v9049_v46 }
 0x35b   :  { %v11362_v48 = vpop.eup %11361 }
 0x35c   :  { %v1359_v51 = vadd.f32 1.0, %v11362_v48  ;;  %v11364_v52 = vpop.eup %11363 }
 0x35d   :  { %v1360_v16 = vadd.f32 1.0, %v11364_v52 }
 0x35e   :  { %11365 = vrcp.f32 %v1359_v51 }
 0x35f   :  { %11367 = vrcp.f32 %v1360_v16 }
 0x368   :  { %v11366_v19 = vpop.eup %11365 }
 0x369   :  { %v1365_v22 = vmul.f32 %v11366_v19, %v1346_v55  ;;  %v11368_v57 = vpop.eup %11367 }
 0x36a   :  { %v1368_v27 = vsub.f32 1.0, %v11368_v57  ;;  %v1370_v63 = vmul.f32 %v11368_v57, %v12546_v7 }
 0x36b   :  { %v1366_v25 = vadd.f32 %v1365_v22, %v12495_v30  ;;  %v11063_v30 = vld [vmem:[#allocation12 + $0x8] ss:$12 sps:$4 sm:$0xff]  }
 0x36d   :  { %11369 = vtanh.f32 %v1366_v25 }
 0x377   :  { %v11370_v61 = vpop.eup %11369 }
 0x378   :  { %v1369_v62 = vmul.f32 %v11370_v61, %v1368_v27 }
 0x37a   :  { %v12613_v0 = vadd.f32 %v1370_v63, %v1369_v62 }
 0x37c   :  { %v1374_v5 = vpack.c.bf16 %v12613_v0, %v12613_v0 }
 0x37e   :  { %1585 = vmatmul.mubr.bf16.vlgmr.msra.gmra.mrb[24].mxu1 %v1374_v5  ;;  %10068 = vmatmul.mubr.bf16.vlgmr.msra.gmra.mrb[24].mxu0 %v1374_v5 }
 0x37f   :  { %1835 = vmatpush1.bf16.msra.mxu1 %v12550_v20  ;;  %1866 = vmatprep.mubr.bf16.mxu1 %v14352_v2  ;;  %v11064_v20 = vld [vmem:[#allocation12 + $0x20] ss:$12 sps:$4 sm:$0xff]  }
 0x380   :  { %1836 = vmatprep.subr.bf16.mxu1 %v12554_v24  ;;  %10087 = vmatprep.mubr.msk.bf16.mxu0 %vm11988_vm1, %v14350_v1  ;;  %v11065_v24 = vld [vmem:[#allocation12 + $0x38] ss:$12 sps:$4 sm:$0xff]  }
 0x381   :  { %10072 = vmatpush3.bf16.msra.mxu0 %v11063_v30  ;;  %v12659_v30 = vld [vmem:[#allocation12] ss:$12 sps:$4 sm:$0xff]  }
 0x382   :  { %10073 = vmatprep.subr.bf16.mxu0 %v14350_v1 }
 0x383   :  { %1837 = vmatpush1.bf16.msra.mxu1 %v12559_v31  ;;  %v11066_v31 = vld [vmem:[#allocation12 + $0x50] ss:$12 sps:$4 sm:$0xff]  }
 0x384   :  { %1838 = vmatprep.subr.bf16.mxu1 %v12562_v23  ;;  %v11067_v23 = vld [vmem:[#allocation12 + $0x68] ss:$12 sps:$4 sm:$0xff]  }
 0x385   :  { %10074 = vmatpush3.bf16.msra.mxu0 %v11064_v20  ;;  %v11074_v20 = vld [vmem:[#allocation12 + $0x8] ss:$12 sps:$4 sm:$0xff]  }
 0x386   :  { %10075 = vmatprep.subr.bf16.mxu0 %v14350_v1 }
 0x387   :  { %1839 = vmatpush1.bf16.msra.mxu1 %v12565_v26  ;;  %v11068_v26 = vld [vmem:[#allocation12 + $0x80] ss:$12 sps:$4 sm:$0xff]  }
 0x388   :  { %1840 = vmatprep.subr.bf16.mxu1 %v12568_v9  ;;  %v11069_v9 = vld [vmem:[#allocation12 + $0x98] ss:$12 sps:$4 sm:$0xff]  }
 0x389   :  { %10076 = vmatpush3.bf16.msra.mxu0 %v11065_v24  ;;  %v12663_v24 = vld [vmem:[#allocation12 + $0x1c] ss:$12 sps:$4 sm:$0xff]  }
 0x38a   :  { %10077 = vmatprep.subr.bf16.mxu0 %v14350_v1 }
 0x38b   :  { %1841 = vmatpush1.bf16.msra.mxu1 %v12571_v28  ;;  %v11070_v28 = vld [vmem:[#allocation12 + $0xb0] ss:$12 sps:$4 sm:$0xff]  }
 0x38c   :  { %1842 = vmatprep.subr.bf16.mxu1 %v12574_v10  ;;  %v1407_v10 = vld [vmem:[#allocation14] sm:$0x7] }
 0x38d   :  { %10078 = vmatpush3.bf16.msra.mxu0 %v11066_v31  ;;  %v1420_v16 = vrot.slane %v1407_v10, %v12483_v18  ;;  %v12666_v31 = vld [vmem:[#allocation12 + $0x18] ss:$12 sps:$4 sm:$0xff]  }
 0x38e   :  { %10079 = vmatprep.subr.bf16.mxu0 %v14350_v1 }
 0x38f   :  { %1843 = vmatpush1.bf16.msra.mxu1 %v12577_v29  ;;  %v1412_v29 = vrot.slane %v1407_v10, %v12479_v15 }
 0x390   :  { %1844 = vmatprep.subr.bf16.mxu1 %v12580_v33  ;;  %v1416_v33 = vrot.slane %v1407_v10, %v12481_v17  ;;  %v12677_v10 = vld [vmem:[#allocation12 + $0x4c] ss:$12 sps:$4 sm:$0xff]  }
 0x391   :  { %10080 = vmatpush3.bf16.msra.mxu0 %v11067_v23  ;;  %v11078_v23 = vld [vmem:[#allocation12 + $0x20] ss:$12 sps:$4 sm:$0xff]  }
 0x392   :  { %10081 = vmatprep.subr.bf16.mxu0 %v14350_v1 }
 0x393   :  { %1845 = vmatpush1.bf16.msra.mxu1 %v12583_v35 }
 0x394   :  { %1846 = vmatprep.subr.bf16.mxu1 %v12586_v36 }
 0x395   :  { %10082 = vmatpush3.bf16.msra.mxu0 %v11068_v26  ;;  %v12670_v26 = vld [vmem:[#allocation12 + $0x34] ss:$12 sps:$4 sm:$0xff]  }
 0x396   :  { %10083 = vmatprep.subr.bf16.mxu0 %v14350_v1 }
 0x397   :  { %1847 = vmatpush1.bf16.msra.mxu1 %v12589_v38 }
 0x398   :  { %1848 = vmatprep.subr.bf16.mxu1 %v12592_v11 }
 0x399   :  { %10084 = vmatpush3.bf16.msra.mxu0 %v11069_v9  ;;  %v12673_v9 = vld [vmem:[#allocation12 + $0x30] ss:$12 sps:$4 sm:$0xff]  }
 0x39a   :  { %10085 = vmatprep.subr.bf16.mxu0 %v14350_v1 }
 0x39b   :  { %1849 = vmatpush1.bf16.msra.mxu1 %v12595_v40 }
 0x39d   :  { %10086 = vmatpush3.bf16.msra.mxu0 %v11070_v28  ;;  %v11082_v28 = vld [vmem:[#allocation12 + $0x38] ss:$12 sps:$4 sm:$0xff]  }
 0x39e   :  { %10091 = vmatprep.subr.bf16.mxu0 %v14350_v1 }
 0x451   :  { %v1586_v35 = vpop.f32.mrb[24].mxu1  ;;  %v1627_v36 = vpop.f32.mrb[24].mxu0 }
 0x452   :  { %v1587_v38 = vadd.f32 %v1586_v35, %v1412_v29  ;;  %v1588_v11 = vpop.f32.mrb[25].mxu1  ;;  %v10069_v40 = vpop.f32.mrb[25].mxu0  ;;  %v1628_v19 = vadd.f32 %v1627_v36, %v1420_v16  ;;  %v12680_v29 = vld [vmem:[#allocation12 + $0x48] ss:$12 sps:$4 sm:$0xff]   ;;  %v12684_v35 = vld [vmem:[#allocation12 + $0x64] ss:$12 sps:$4 sm:$0xff]  }
 0x453   :  { %v1589_v21 = vadd.f32 %v1588_v11, %v1416_v33  ;;  %v1590_v56 = vpop.f32.mrb[26].mxu1  ;;  %v1630_v6 = vpop.f32.mrb[26].mxu0  ;;  %v11086_v33 = vld [vmem:[#allocation12 + $0x50] ss:$12 sps:$4 sm:$0xff]   ;;  %v12687_v36 = vld [vmem:[#allocation12 + $0x60] ss:$12 sps:$4 sm:$0xff]  }
 0x454   :  { %v1633_v13 = vadd.f32 %v1587_v38, %v12499_v32  ;;  %v1591_v12 = vpop.f32.mrb[27].mxu1  ;;  %v10070_v43 = vpop.f32.mrb[27].mxu0  ;;  %v11090_v38 = vld [vmem:[#allocation12 + $0x68] ss:$12 sps:$4 sm:$0xff]   ;;  %v12694_v40 = vld [vmem:[#allocation12 + $0x78] ss:$12 sps:$4 sm:$0xff]  }
 0x455   :  { %v1634_v44 = vadd.f32 %v1589_v21, %v12501_v34  ;;  %v12691_v11 = vld [vmem:[#allocation12 + $0x7c] ss:$12 sps:$4 sm:$0xff]   ;;  %v11094_v21 = vld [vmem:[#allocation12 + $0x80] ss:$12 sps:$4 sm:$0xff]  }
 0x456   :  { %v9074_v46 = vmul.f32 -1.442695, %v1633_v13  ;;  %v12698_v56 = vld [vmem:[#allocation12 + $0x94] ss:$12 sps:$4 sm:$0xff]   ;;  %v12701_v6 = vld [vmem:[#allocation12 + $0x90] ss:$12 sps:$4 sm:$0xff]  }
 0x457   :  { %v9075_v48 = vmul.f32 -1.442695, %v1634_v44  ;;  %v11098_v13 = vld [vmem:[#allocation12 + $0x98] ss:$12 sps:$4 sm:$0xff]   ;;  %v12708_v43 = vld [vmem:[#allocation12 + $0xa8] ss:$12 sps:$4 sm:$0xff]  }
 0x458   :  { %11371 = vpow2.f32 %v9074_v46  ;;  %v12705_v12 = vld [vmem:[#allocation12 + $0xac] ss:$12 sps:$4 sm:$0xff]   ;;  %v11102_v44 = vld [vmem:[#allocation12 + $0xb0] ss:$12 sps:$4 sm:$0xff]   ;;  %v1689_v46 = vld [vmem:[#allocation14] sm:$0x7] }
 0x459   :  { %11373 = vpow2.f32 %v9075_v48  ;;  %v1694_v48 = vrot.slane %v1689_v46, %v12479_v15 }
 0x462   :  { %v11372_v51 = vpop.eup %11371 }
 0x463   :  { %v1641_v52 = vadd.f32 1.0, %v11372_v51  ;;  %v11374_v53 = vpop.eup %11373  ;;  %v1698_v51 = vrot.slane %v1689_v46, %v12481_v17 }
 0x464   :  { %v1642_v55 = vadd.f32 1.0, %v11374_v53 }
 0x465   :  { %11375 = vrcp.f32 %v1641_v52 }
 0x466   :  { %11377 = vrcp.f32 %v1642_v55 }
 0x46f   :  { %v11376_v22 = vpop.eup %11375 }
 0x470   :  { %v1647_v25 = vmul.f32 %v11376_v22, %v1628_v19  ;;  %v11378_v57 = vpop.eup %11377 }
 0x471   :  { %v1650_v34 = vsub.f32 1.0, %v11378_v57  ;;  %v1652_v62 = vmul.f32 %v11378_v57, %v12613_v0 }
 0x472   :  { %v1648_v32 = vadd.f32 %v1647_v25, %v12509_v41  ;;  %v12657_v41 = vld [vmem:[#allocation12 + $0x4] ss:$12 sps:$4 sm:$0xff]  }
 0x473   :  { %2116 = vmatprep.subr.bf16.mxu1 %v12657_v41 }
 0x474   :  { %11379 = vtanh.f32 %v1648_v32 }
 0x47e   :  { %v11380_v27 = vpop.eup %11379 }
 0x47f   :  { %v1651_v61 = vmul.f32 %v11380_v27, %v1650_v34 }
 0x481   :  { %v12650_v63 = vadd.f32 %v1652_v62, %v1651_v61 }
 0x483   :  { %v1656_v5 = vpack.c.bf16 %v12650_v63, %v12650_v63 }
 0x485   :  { %1867 = vmatmul.mubr.bf16.vlgmr.msra.gmra.mrb[28].mxu1 %v1656_v5  ;;  %10088 = vmatmul.mubr.bf16.vlgmr.msra.gmra.mrb[28].mxu0 %v1656_v5 }
 0x486   :  { %2148 = vmatprep.mubr.bf16.mxu1 %v14352_v2  ;;  %10107 = vmatprep.mubr.msk.bf16.mxu0 %vm11988_vm1, %v14350_v1 }
 0x487   :  { %2117 = vmatpush1.bf16.msra.mxu1 %v12659_v30  ;;  %10092 = vmatpush3.bf16.msra.mxu0 %v11074_v20 }
 0x488   :  { %10093 = vmatprep.subr.bf16.mxu0 %v14350_v1  ;;  %2118 = vmatprep.subr.bf16.mxu1 %v12663_v24 }
 0x48b   :  { %2119 = vmatpush1.bf16.msra.mxu1 %v12666_v31  ;;  %10094 = vmatpush3.bf16.msra.mxu0 %v11078_v23 }
 0x48c   :  { %10095 = vmatprep.subr.bf16.mxu0 %v14350_v1  ;;  %2120 = vmatprep.subr.bf16.mxu1 %v12670_v26 }
 0x48f   :  { %2121 = vmatpush1.bf16.msra.mxu1 %v12673_v9  ;;  %10096 = vmatpush3.bf16.msra.mxu0 %v11082_v28 }
 0x490   :  { %10097 = vmatprep.subr.bf16.mxu0 %v14350_v1  ;;  %2122 = vmatprep.subr.bf16.mxu1 %v12677_v10 }
 0x493   :  { %2123 = vmatpush1.bf16.msra.mxu1 %v12680_v29  ;;  %10098 = vmatpush3.bf16.msra.mxu0 %v11086_v33  ;;  %v1702_v33 = vrot.slane %v1689_v46, %v12483_v18  ;;  %v11104_v46 = vld [vmem:[#allocation12 + $0x20] ss:$12 sps:$4 sm:$0xff]  }
 0x494   :  { %10099 = vmatprep.subr.bf16.mxu0 %v14350_v1  ;;  %2124 = vmatprep.subr.bf16.mxu1 %v12684_v35 }
 0x497   :  { %2125 = vmatpush1.bf16.msra.mxu1 %v12687_v36  ;;  %10100 = vmatpush3.bf16.msra.mxu0 %v11090_v38 }
 0x498   :  { %10101 = vmatprep.subr.bf16.mxu0 %v14350_v1  ;;  %2126 = vmatprep.subr.bf16.mxu1 %v12691_v11 }
 0x49b   :  { %2127 = vmatpush1.bf16.msra.mxu1 %v12694_v40  ;;  %10102 = vmatpush3.bf16.msra.mxu0 %v11094_v21 }
 0x49c   :  { %10103 = vmatprep.subr.bf16.mxu0 %v14350_v1  ;;  %2128 = vmatprep.subr.bf16.mxu1 %v12698_v56 }
 0x49f   :  { %2129 = vmatpush1.bf16.msra.mxu1 %v12701_v6  ;;  %10104 = vmatpush3.bf16.msra.mxu0 %v11098_v13 }
 0x4a0   :  { %10105 = vmatprep.subr.bf16.mxu0 %v14350_v1  ;;  %2130 = vmatprep.subr.bf16.mxu1 %v12705_v12 }
 0x4a3   :  { %2131 = vmatpush1.bf16.msra.mxu1 %v12708_v43  ;;  %10106 = vmatpush3.bf16.msra.mxu0 %v11102_v44 }
 0x4a4   :  { %2398 = vmatprep.subr.bf16.mxu1 %v12657_v41  ;;  %10111 = vmatprep.subr.bf16.mxu0 %v14350_v1 }
 0x558   :  { %v1868_v52 = vpop.f32.mrb[28].mxu1  ;;  %v1909_v53 = vpop.f32.mrb[28].mxu0 }
 0x559   :  { %v1869_v16 = vadd.f32 %v1868_v52, %v1694_v48  ;;  %v1870_v55 = vpop.f32.mrb[29].mxu1  ;;  %v10089_v19 = vpop.f32.mrb[29].mxu0  ;;  %v1910_v21 = vadd.f32 %v1909_v53, %v1702_v33  ;;  %v11105_v53 = vld [vmem:[#allocation12 + $0x38] ss:$12 sps:$4 sm:$0xff]  }
 0x55a   :  { %v1871_v22 = vadd.f32 %v1870_v55, %v1698_v51  ;;  %v1872_v25 = vpop.f32.mrb[30].mxu1  ;;  %v1912_v32 = vpop.f32.mrb[30].mxu0 }
 0x55b   :  { %v1915_v57 = vadd.f32 %v1869_v16, %v12506_v39  ;;  %v1873_v34 = vpop.f32.mrb[31].mxu1  ;;  %v10090_v27 = vpop.f32.mrb[31].mxu0  ;;  %v11107_v25 = vld [vmem:[#allocation12 + $0x68] ss:$12 sps:$4 sm:$0xff]   ;;  %v11108_v32 = vld [vmem:[#allocation12 + $0x80] ss:$12 sps:$4 sm:$0xff]  }
 0x55c   :  { %v1916_v61 = vadd.f32 %v1871_v22, %v12511_v42  ;;  %v11106_v22 = vld [vmem:[#allocation12 + $0x50] ss:$12 sps:$4 sm:$0xff]   ;;  %v1971_v27 = vld [vmem:[#allocation14] sm:$0x7] }
 0x55d   :  { %v9100_v62 = vmul.f32 -1.442695, %v1915_v57  ;;  %v11109_v57 = vld [vmem:[#allocation12 + $0x98] ss:$12 sps:$4 sm:$0xff]   ;;  %v11110_v34 = vld [vmem:[#allocation12 + $0xb0] ss:$12 sps:$4 sm:$0xff]  }
 0x55e   :  { %v9101_v5 = vmul.f32 -1.442695, %v1916_v61  ;;  %v1976_v61 = vrot.slane %v1971_v27, %v12479_v15 }
 0x55f   :  { %11381 = vpow2.f32 %v9100_v62  ;;  %v1980_v62 = vrot.slane %v1971_v27, %v12481_v17 }
 0x560   :  { %11383 = vpow2.f32 %v9101_v5 }
 0x569   :  { %v11382_v20 = vpop.eup %11381 }
 0x56a   :  { %v1923_v23 = vadd.f32 1.0, %v11382_v20  ;;  %v11384_v28 = vpop.eup %11383 }
 0x56b   :  { %v1924_v38 = vadd.f32 1.0, %v11384_v28 }
 0x56c   :  { %11385 = vrcp.f32 %v1923_v23 }
 0x56d   :  { %11387 = vrcp.f32 %v1924_v38 }
 0x576   :  { %v11386_v13 = vpop.eup %11385 }
 0x577   :  { %v1929_v44 = vmul.f32 %v11386_v13, %v1910_v21  ;;  %v11388_v48 = vpop.eup %11387 }
 0x578   :  { %v1932_v42 = vsub.f32 1.0, %v11388_v48  ;;  %v1934_v16 = vmul.f32 %v11388_v48, %v12650_v63 }
 0x579   :  { %v1930_v39 = vadd.f32 %v1929_v44, %v12504_v37  ;;  %v11103_v37 = vld [vmem:[#allocation12 + $0x8] ss:$12 sps:$4 sm:$0xff]  }
 0x57b   :  { %11389 = vtanh.f32 %v1930_v39 }
 0x585   :  { %v11390_v51 = vpop.eup %11389 }
 0x586   :  { %v1933_v52 = vmul.f32 %v11390_v51, %v1932_v42 }
 0x588   :  { %v12721_v55 = vadd.f32 %v1934_v16, %v1933_v52 }
 0x58a   :  { %v1938_v19 = vpack.c.bf16 %v12721_v55, %v12721_v55 }
 0x58c   :  { %2149 = vmatmul.mubr.bf16.vlgmr.msra.gmra.mrb[32].mxu1 %v1938_v19  ;;  %10108 = vmatmul.mubr.bf16.vlgmr.msra.gmra.mrb[32].mxu0 %v1938_v19 }
 0x58d   :  { %2399 = vmatpush1.bf16.msra.mxu1 %v12659_v30  ;;  %2430 = vmatprep.mubr.bf16.mxu1 %v14352_v2 }
 0x58e   :  { %2400 = vmatprep.subr.bf16.mxu1 %v12663_v24  ;;  %10127 = vmatprep.mubr.msk.bf16.mxu0 %vm11988_vm1, %v14350_v1 }
 0x58f   :  { %10112 = vmatpush3.bf16.msra.mxu0 %v11103_v37 }
 0x590   :  { %10113 = vmatprep.subr.bf16.mxu0 %v14350_v1 }
 0x591   :  { %2401 = vmatpush1.bf16.msra.mxu1 %v12666_v31 }
 0x592   :  { %2402 = vmatprep.subr.bf16.mxu1 %v12670_v26 }
 0x593   :  { %10114 = vmatpush3.bf16.msra.mxu0 %v11104_v46  ;;  %v1984_v46 = vrot.slane %v1971_v27, %v12483_v18  ;;  %v11112_v27 = vld [vmem:[#allocation12 + $0x20] ss:$12 sps:$4 sm:$0xff]  }
 0x594   :  { %10115 = vmatprep.subr.bf16.mxu0 %v14350_v1 }
 0x595   :  { %2403 = vmatpush1.bf16.msra.mxu1 %v12673_v9 }
 0x596   :  { %2404 = vmatprep.subr.bf16.mxu1 %v12677_v10 }
 0x597   :  { %10116 = vmatpush3.bf16.msra.mxu0 %v11105_v53 }
 0x598   :  { %10117 = vmatprep.subr.bf16.mxu0 %v14350_v1 }
 0x599   :  { %2405 = vmatpush1.bf16.msra.mxu1 %v12680_v29 }
 0x59a   :  { %2406 = vmatprep.subr.bf16.mxu1 %v12684_v35 }
 0x59b   :  { %10118 = vmatpush3.bf16.msra.mxu0 %v11106_v22 }
 0x59c   :  { %10119 = vmatprep.subr.bf16.mxu0 %v14350_v1 }
 0x59d   :  { %2407 = vmatpush1.bf16.msra.mxu1 %v12687_v36 }
 0x59e   :  { %2408 = vmatprep.subr.bf16.mxu1 %v12691_v11 }
 0x59f   :  { %10120 = vmatpush3.bf16.msra.mxu0 %v11107_v25 }
 0x5a0   :  { %10121 = vmatprep.subr.bf16.mxu0 %v14350_v1 }
 0x5a1   :  { %2409 = vmatpush1.bf16.msra.mxu1 %v12694_v40 }
 0x5a2   :  { %2410 = vmatprep.subr.bf16.mxu1 %v12698_v56 }
 0x5a3   :  { %10122 = vmatpush3.bf16.msra.mxu0 %v11108_v32 }
 0x5a4   :  { %10123 = vmatprep.subr.bf16.mxu0 %v14350_v1 }
 0x5a5   :  { %2411 = vmatpush1.bf16.msra.mxu1 %v12701_v6 }
 0x5a6   :  { %2412 = vmatprep.subr.bf16.mxu1 %v12705_v12 }
 0x5a7   :  { %10124 = vmatpush3.bf16.msra.mxu0 %v11109_v57 }
 0x5a8   :  { %10125 = vmatprep.subr.bf16.mxu0 %v14350_v1 }
 0x5a9   :  { %2413 = vmatpush1.bf16.msra.mxu1 %v12708_v43 }
 0x5aa   :  { %2680 = vmatprep.subr.bf16.mxu1 %v12657_v41 }
 0x5ab   :  { %10126 = vmatpush3.bf16.msra.mxu0 %v11110_v34 }
 0x5ac   :  { %10131 = vmatprep.subr.bf16.mxu0 %v14350_v1 }
 0x65f   :  { %v2150_v5 = vpop.f32.mrb[32].mxu1  ;;  %v2191_v20 = vpop.f32.mrb[32].mxu0 }
 0x660   :  { %v2151_v23 = vadd.f32 %v2150_v5, %v1976_v61  ;;  %v2152_v28 = vpop.f32.mrb[33].mxu1  ;;  %v10109_v33 = vpop.f32.mrb[33].mxu0  ;;  %v2192_v22 = vadd.f32 %v2191_v20, %v1984_v46  ;;  %v11113_v20 = vld [vmem:[#allocation12 + $0x38] ss:$12 sps:$4 sm:$0xff]  }
 0x661   :  { %v2153_v38 = vadd.f32 %v2152_v28, %v1980_v62  ;;  %v2154_v21 = vpop.f32.mrb[34].mxu1  ;;  %v2194_v13 = vpop.f32.mrb[34].mxu0  ;;  %v11114_v28 = vld [vmem:[#allocation12 + $0x50] ss:$12 sps:$4 sm:$0xff]   ;;  %v11115_v33 = vld [vmem:[#allocation12 + $0x68] ss:$12 sps:$4 sm:$0xff]  }
 0x662   :  { %v2197_v44 = vadd.f32 %v2151_v23, %v12516_v47  ;;  %v2155_v39 = vpop.f32.mrb[35].mxu1  ;;  %v10110_v48 = vpop.f32.mrb[35].mxu0  ;;  %v11118_v21 = vld [vmem:[#allocation12 + $0xb0] ss:$12 sps:$4 sm:$0xff]   ;;  %v2253_v13 = vld [vmem:[#allocation14] sm:$0x7] }
 0x663   :  { %v2198_v42 = vadd.f32 %v2153_v38, %v12521_v50  ;;  %v11117_v38 = vld [vmem:[#allocation12 + $0x98] ss:$12 sps:$4 sm:$0xff]   ;;  %v2262_v39 = vrot.slane %v2253_v13, %v12481_v17 }
 0x664   :  { %v9126_v51 = vmul.f32 -1.442695, %v2197_v44  ;;  %v2258_v44 = vrot.slane %v2253_v13, %v12479_v15 }
 0x665   :  { %v9127_v52 = vmul.f32 -1.442695, %v2198_v42 }
 0x666   :  { %11391 = vpow2.f32 %v9126_v51 }
 0x667   :  { %11393 = vpow2.f32 %v9127_v52 }
 0x670   :  { %v11392_v16 = vpop.eup %11391 }
 0x671   :  { %v2205_v19 = vadd.f32 1.0, %v11392_v16  ;;  %v11394_v37 = vpop.eup %11393 }
 0x672   :  { %v2206_v53 = vadd.f32 1.0, %v11394_v37 }
 0x673   :  { %11395 = vrcp.f32 %v2205_v19 }
 0x674   :  { %11397 = vrcp.f32 %v2206_v53 }
 0x67d   :  { %v11396_v25 = vpop.eup %11395 }
 0x67e   :  { %v2211_v32 = vmul.f32 %v11396_v25, %v2192_v22  ;;  %v11398_v57 = vpop.eup %11397 }
 0x67f   :  { %v2214_v50 = vsub.f32 1.0, %v11398_v57  ;;  %v2216_v62 = vmul.f32 %v11398_v57, %v12721_v55 }
 0x680   :  { %v2212_v47 = vadd.f32 %v2211_v32, %v12519_v49  ;;  %v11111_v49 = vld [vmem:[#allocation12 + $0x8] ss:$12 sps:$4 sm:$0xff]  }
 0x682   :  { %11399 = vtanh.f32 %v2212_v47 }
 0x68c   :  { %v11400_v34 = vpop.eup %11399 }
 0x68d   :  { %v2215_v61 = vmul.f32 %v11400_v34, %v2214_v50 }
 0x68f   :  { %v12759_v5 = vadd.f32 %v2216_v62, %v2215_v61  ;;  %v2266_v62 = vrot.slane %v2253_v13, %v12483_v18 }
 0x691   :  { %v2220_v23 = vpack.c.bf16 %v12759_v5, %v12759_v5 }
 0x693   :  { %2431 = vmatmul.mubr.bf16.vlgmr.msra.gmra.mrb[36].mxu1 %v2220_v23  ;;  %10128 = vmatmul.mubr.bf16.vlgmr.msra.gmra.mrb[36].mxu0 %v2220_v23 }
 0x694   :  { %2681 = vmatpush1.bf16.msra.mxu1 %v12659_v30  ;;  %2712 = vmatprep.mubr.bf16.mxu1 %v14352_v2 }
 0x695   :  { %2682 = vmatprep.subr.bf16.mxu1 %v12663_v24  ;;  %10147 = vmatprep.mubr.msk.bf16.mxu0 %vm11988_vm1, %v14350_v1 }
 0x696   :  { %10132 = vmatpush3.bf16.msra.mxu0 %v11111_v49 }
 0x697   :  { %10133 = vmatprep.subr.bf16.mxu0 %v14350_v1 }
 0x698   :  { %2683 = vmatpush1.bf16.msra.mxu1 %v12666_v31 }
 0x699   :  { %2684 = vmatprep.subr.bf16.mxu1 %v12670_v26 }
 0x69a   :  { %10134 = vmatpush3.bf16.msra.mxu0 %v11112_v27 }
 0x69b   :  { %10135 = vmatprep.subr.bf16.mxu0 %v14350_v1 }
 0x69c   :  { %2685 = vmatpush1.bf16.msra.mxu1 %v12673_v9 }
 0x69d   :  { %2686 = vmatprep.subr.bf16.mxu1 %v12677_v10 }
 0x69e   :  { %10136 = vmatpush3.bf16.msra.mxu0 %v11113_v20 }
 0x69f   :  { %10137 = vmatprep.subr.bf16.mxu0 %v14350_v1 }
 0x6a0   :  { %2687 = vmatpush1.bf16.msra.mxu1 %v12680_v29 }
 0x6a1   :  { %2688 = vmatprep.subr.bf16.mxu1 %v12684_v35 }
 0x6a2   :  { %10138 = vmatpush3.bf16.msra.mxu0 %v11114_v28 }
 0x6a3   :  { %10139 = vmatprep.subr.bf16.mxu0 %v14350_v1 }
 0x6a4   :  { %2689 = vmatpush1.bf16.msra.mxu1 %v12687_v36 }
 0x6a5   :  { %2690 = vmatprep.subr.bf16.mxu1 %v12691_v11 }
 0x6a6   :  { %10140 = vmatpush3.bf16.msra.mxu0 %v11115_v33 }
 0x6a7   :  { %10141 = vmatprep.subr.bf16.mxu0 %v14350_v1 }
 0x6a8   :  { %2691 = vmatpush1.bf16.msra.mxu1 %v12694_v40 }
 0x6a9   :  { %2692 = vmatprep.subr.bf16.mxu1 %v12698_v56 }
 0x6ac   :  { %2693 = vmatpush1.bf16.msra.mxu1 %v12701_v6 }
 0x6ad   :  { %2694 = vmatprep.subr.bf16.mxu1 %v12705_v12 }
 0x6b0   :  { %2695 = vmatpush1.bf16.msra.mxu1 %v12708_v43 }
 0x6b1   :  { %2962 = vmatprep.subr.bf16.mxu1 %v12657_v41  ;;  %v11116_v41 = vld [vmem:[#allocation12 + $0x80] ss:$12 sps:$4 sm:$0xff]  }
 0x6b2   :  { %10142 = vmatpush3.bf16.msra.mxu0 %v11116_v41 }
 0x6b3   :  { %10143 = vmatprep.subr.bf16.mxu0 %v14350_v1 }
 0x6b6   :  { %10144 = vmatpush3.bf16.msra.mxu0 %v11117_v38 }
 0x6b7   :  { %10145 = vmatprep.subr.bf16.mxu0 %v14350_v1 }
 0x6ba   :  { %10146 = vmatpush3.bf16.msra.mxu0 %v11118_v21 }
 0x6bb   :  { %10151 = vmatprep.subr.bf16.mxu0 %v14350_v1 }
 0x766   :  { %v2432_v48 = vpop.f32.mrb[36].mxu1  ;;  %v2473_v42 = vpop.f32.mrb[36].mxu0 }
 0x767   :  { %v2433_v51 = vadd.f32 %v2432_v48, %v2258_v44  ;;  %v2434_v52 = vpop.f32.mrb[37].mxu1  ;;  %v10129_v16 = vpop.f32.mrb[37].mxu0  ;;  %v2474_v49 = vadd.f32 %v2473_v42, %v2266_v62 }
 0x768   :  { %v2435_v19 = vadd.f32 %v2434_v52, %v2262_v39  ;;  %v2436_v37 = vpop.f32.mrb[38].mxu1  ;;  %v2476_v46 = vpop.f32.mrb[38].mxu0 }
 0x769   :  { %v2479_v53 = vadd.f32 %v2433_v51, %v12529_v59  ;;  %v2437_v22 = vpop.f32.mrb[39].mxu1  ;;  %v10130_v25 = vpop.f32.mrb[39].mxu0 }
 0x76a   :  { %v2480_v32 = vadd.f32 %v2435_v19, %v12531_v60 }
 0x76b   :  { %v9152_v47 = vmul.f32 -1.442695, %v2479_v53 }
 0x76c   :  { %v9153_v57 = vmul.f32 -1.442695, %v2480_v32 }
 0x76d   :  { %11401 = vpow2.f32 %v9152_v47 }
 0x76e   :  { %11403 = vpow2.f32 %v9153_v57 }
 0x777   :  { %v11402_v50 = vpop.eup %11401 }
 0x778   :  { %v2487_v34 = vadd.f32 1.0, %v11402_v50  ;;  %v11404_v61 = vpop.eup %11403 }
 0x779   :  { %v2488_v23 = vadd.f32 1.0, %v11404_v61 }
 0x77a   :  { %11405 = vrcp.f32 %v2487_v34 }
 0x77b   :  { %11407 = vrcp.f32 %v2488_v23 }
 0x784   :  { %v11406_v27 = vpop.eup %11405 }
 0x785   :  { %v2493_v20 = vmul.f32 %v11406_v27, %v2474_v49  ;;  %v11408_v28 = vpop.eup %11407 }
 0x786   :  { %v2496_v60 = vsub.f32 1.0, %v11408_v28  ;;  %v2498_v38 = vmul.f32 %v11408_v28, %v12759_v5 }
 0x787   :  { %v2494_v59 = vadd.f32 %v2493_v20, %v12514_v45  ;;  %v11119_v45 = vld [vmem:[#allocation12 + $0x8] ss:$12 sps:$4 sm:$0xff]   ;;  %v3134_v20 = vld [vmem:[%s14374_s30 + $0x20] sm:$0xff] }
 0x789   :  { %11409 = vtanh.f32 %v2494_v59  ;;  %v3132_v59 = vld [vmem:[%s14374_s30 + $0x10] sm:$0xff] }
 0x793   :  { %v11410_v33 = vpop.eup %11409 }
 0x794   :  { %v2497_v41 = vmul.f32 %v11410_v33, %v2496_v60  ;;  %v3135_v60 = vld [vmem:[%s14374_s30 + $0x28] sm:$0xff]  ;;  %v3130_v33 = vld [vmem:[%s14374_s30] sm:$0xff] }
 0x796   :  { %v12797_v21 = vadd.f32 %v2498_v38, %v2497_v41  ;;  %v3133_v41 = vld [vmem:[%s14374_s30 + $0x18] sm:$0xff]  ;;  %v10739_v38 = vpack.c.bf16 %v3135_v60, %v3132_v59  ;;  %v3163_v59 = vld [vmem:[%s14374_s30 + $0x108] sm:$0xff] }
 0x798   :  { %v2502_v44 = vpack.c.bf16 %v12797_v21, %v12797_v21 }
 0x79a   :  { %2713 = vmatmul.mubr.bf16.vlgmr.msra.gmra.mrb[40].mxu1 %v2502_v44  ;;  %10148 = vmatmul.mubr.bf16.vlgmr.msra.gmra.mrb[40].mxu0 %v2502_v44  ;;  %v10709_v44 = vpack.c.bf16 %v3133_v41, %v3130_v33  ;;  %v3167_v33 = vld [vmem:[%s14374_s30 + $0x128] sm:$0xff]  ;;  %v3170_v41 = vld [vmem:[%s14374_s30 + $0x140] sm:$0xff] }
 0x79b   :  { %2963 = vmatpush1.bf16.msra.mxu1 %v12659_v30  ;;  %2994 = vmatprep.mubr.bf16.mxu1 %v14352_v2  ;;  %v11120_v30 = vld [vmem:[#allocation12 + $0x20] ss:$12 sps:$4 sm:$0xff]  }
 0x79c   :  { %2964 = vmatprep.subr.bf16.mxu1 %v12663_v24  ;;  %10167 = vmatprep.mubr.msk.bf16.mxu0 %vm11988_vm1, %v14350_v1  ;;  %v11121_v24 = vld [vmem:[#allocation12 + $0x38] ss:$12 sps:$4 sm:$0xff]  }
 0x79d   :  { %10152 = vmatpush3.bf16.msra.mxu0 %v11119_v45  ;;  %v3137_v45 = vld [vmem:[%s14374_s30 + $0x38] sm:$0xff] }
 0x79e   :  { %10153 = vmatprep.subr.bf16.mxu0 %v14350_v1 }
 0x79f   :  { %2965 = vmatpush1.bf16.msra.mxu1 %v12666_v31  ;;  %v11122_v31 = vld [vmem:[#allocation12 + $0x50] ss:$12 sps:$4 sm:$0xff]  }
 0x7a0   :  { %2966 = vmatprep.subr.bf16.mxu1 %v12670_v26  ;;  %v11123_v26 = vld [vmem:[#allocation12 + $0x68] ss:$12 sps:$4 sm:$0xff]  }
 0x7a1   :  { %10154 = vmatpush3.bf16.msra.mxu0 %v11120_v30  ;;  %v3140_v30 = vld [vmem:[%s14374_s30 + $0x50] sm:$0xff] }
 0x7a2   :  { %10155 = vmatprep.subr.bf16.mxu0 %v14350_v1 }
 0x7a3   :  { %2967 = vmatpush1.bf16.msra.mxu1 %v12673_v9  ;;  %v11124_v9 = vld [vmem:[#allocation12 + $0x80] ss:$12 sps:$4 sm:$0xff]  }
 0x7a4   :  { %2968 = vmatprep.subr.bf16.mxu1 %v12677_v10  ;;  %v11125_v10 = vld [vmem:[#allocation12 + $0x98] ss:$12 sps:$4 sm:$0xff]  }
 0x7a5   :  { %10156 = vmatpush3.bf16.msra.mxu0 %v11121_v24  ;;  %v3138_v24 = vld [vmem:[%s14374_s30 + $0x40] sm:$0xff] }
 0x7a6   :  { %10157 = vmatprep.subr.bf16.mxu0 %v14350_v1 }
 0x7a7   :  { %2969 = vmatpush1.bf16.msra.mxu1 %v12680_v29  ;;  %v11126_v29 = vld [vmem:[#allocation12 + $0xb0] ss:$12 sps:$4 sm:$0xff]  }
 0x7a8   :  { %2970 = vmatprep.subr.bf16.mxu1 %v12684_v35  ;;  %v2535_v35 = vld [vmem:[#allocation14] sm:$0x7] }
 0x7a9   :  { %10158 = vmatpush3.bf16.msra.mxu0 %v11122_v31  ;;  %v2548_v25 = vrot.slane %v2535_v35, %v12483_v18  ;;  %v10711_v31 = vpack.c.bf16 %v3140_v30, %v3137_v45  ;;  %v3171_v45 = vld [vmem:[%s14374_s30 + $0x148] sm:$0xff]  ;;  %v3166_v30 = vld [vmem:[%s14374_s30 + $0x120] sm:$0xff] }
 0x7aa   :  { %10159 = vmatprep.subr.bf16.mxu0 %v14350_v1 }
 0x7ab   :  { %2971 = vmatpush1.bf16.msra.mxu1 %v12687_v36  ;;  %v2540_v36 = vrot.slane %v2535_v35, %v12479_v15 }
 0x7ac   :  { %2972 = vmatprep.subr.bf16.mxu1 %v12691_v11  ;;  %v2544_v11 = vrot.slane %v2535_v35, %v12481_v17 }
 0x7ad   :  { %10160 = vmatpush3.bf16.msra.mxu0 %v11123_v26  ;;  %v3141_v26 = vld [vmem:[%s14374_s30 + $0x58] sm:$0xff] }
 0x7ae   :  { %10161 = vmatprep.subr.bf16.mxu0 %v14350_v1 }
 0x7af   :  { %2973 = vmatpush1.bf16.msra.mxu1 %v12694_v40 }
 0x7b0   :  { %2974 = vmatprep.subr.bf16.mxu1 %v12698_v56 }
 0x7b1   :  { %10162 = vmatpush3.bf16.msra.mxu0 %v11124_v9  ;;  %v3136_v9 = vld [vmem:[%s14374_s30 + $0x30] sm:$0xff] }
 0x7b2   :  { %10163 = vmatprep.subr.bf16.mxu0 %v14350_v1 }
 0x7b3   :  { %2975 = vmatpush1.bf16.msra.mxu1 %v12701_v6 }
 0x7b4   :  { %2976 = vmatprep.subr.bf16.mxu1 %v12705_v12 }
 0x7b5   :  { %10164 = vmatpush3.bf16.msra.mxu0 %v11125_v10  ;;  %v3139_v10 = vld [vmem:[%s14374_s30 + $0x48] sm:$0xff] }
 0x7b6   :  { %10165 = vmatprep.subr.bf16.mxu0 %v14350_v1  ;;  %v10713_v35 = vpack.c.bf16 %v3139_v10, %v3136_v9  ;;  %v3173_v9 = vld [vmem:[%s14374_s30 + $0x158] sm:$0xff]  ;;  %v3176_v10 = vld [vmem:[%s14374_s30 + $0x170] sm:$0xff] }
 0x7b7   :  { %2977 = vmatpush1.bf16.msra.mxu1 %v12708_v43 }
 0x7b9   :  { %10166 = vmatpush3.bf16.msra.mxu0 %v11126_v29  ;;  %v10743_v29 = vpack.c.bf16 %v3141_v26, %v3138_v24  ;;  %v3169_v24 = vld [vmem:[%s14374_s30 + $0x138] sm:$0xff] }
 0x7ba   :  { %10740 = vmatprep.subr.bf16.mxu0 %v10739_v38  ;;  %v10733_v26 = vpack.c.bf16 %v3169_v24, %v3166_v30  ;;  %v3081_v24 = vld [vmem:[%s14375_s14 + $0x38] sm:$0xff] }
 0x86d   :  { %v2714_v40 = vpop.f32.mrb[40].mxu1  ;;  %v2755_v56 = vpop.f32.mrb[40].mxu0 }
 0x86e   :  { %v2715_v6 = vadd.f32 %v2714_v40, %v2540_v36  ;;  %v2716_v12 = vpop.f32.mrb[41].mxu1  ;;  %v10149_v43 = vpop.f32.mrb[41].mxu0  ;;  %v2756_v47 = vadd.f32 %v2755_v56, %v2548_v25  ;;  %v3143_v36 = vld [vmem:[%s14374_s30 + $0x68] sm:$0xff]  ;;  %v3144_v40 = vld [vmem:[%s14374_s30 + $0x70] sm:$0xff]  ;;  %v3158_v25 = vld [vmem:[%s14374_s30 + $0xe0] sm:$0xff] }
 0x86f   :  { %v2717_v13 = vadd.f32 %v2716_v12, %v2544_v11  ;;  %v2718_v39 = vpop.f32.mrb[42].mxu1  ;;  %v2758_v48 = vpop.f32.mrb[42].mxu0  ;;  %v3146_v11 = vld [vmem:[%s14374_s30 + $0x80] sm:$0xff]  ;;  %v3145_v43 = vld [vmem:[%s14374_s30 + $0x78] sm:$0xff] }
 0x870   :  { %v2761_v42 = vadd.f32 %v2715_v6, %v12533_v3  ;;  %v2719_v51 = vpop.f32.mrb[43].mxu1  ;;  %v10150_v52 = vpop.f32.mrb[43].mxu0  ;;  %v10715_v56 = vpack.c.bf16 %v3146_v11, %v3143_v36  ;;  %v3147_v6 = vld [vmem:[%s14374_s30 + $0x88] sm:$0xff]  ;;  %v3142_v12 = vld [vmem:[%s14374_s30 + $0x60] sm:$0xff]  ;;  %v3149_v48 = vld [vmem:[%s14374_s30 + $0x98] sm:$0xff] }
 0x871   :  { %v2762_v16 = vadd.f32 %v2717_v13, %v12535_v4  ;;  %v10747_v13 = vpack.c.bf16 %v3147_v6, %v3144_v40  ;;  %v10717_v39 = vpack.c.bf16 %v3145_v43, %v3142_v12  ;;  %v3150_v51 = vld [vmem:[%s14374_s30 + $0xa0] sm:$0xff]  ;;  %v3177_v36 = vld [vmem:[%s14374_s30 + $0x178] sm:$0xff]  ;;  %v3172_v11 = vld [vmem:[%s14374_s30 + $0x150] sm:$0xff] }
 0x872   :  { %v9178_v19 = vmul.f32 -1.442695, %v2761_v42  ;;  %v3152_v42 = vld [vmem:[%s14374_s30 + $0xb0] sm:$0xff]  ;;  %v3175_v40 = vld [vmem:[%s14374_s30 + $0x168] sm:$0xff]  ;;  %v3078_v43 = vld [vmem:[%s14375_s14 + $0x20] sm:$0xff] }
 0x873   :  { %v9179_v37 = vmul.f32 -1.442695, %v2762_v16  ;;  %v10719_v52 = vpack.c.bf16 %v3152_v42, %v3149_v48  ;;  %v3153_v16 = vld [vmem:[%s14374_s30 + $0xb8] sm:$0xff]  ;;  %v10737_v6 = vpack.c.bf16 %v3175_v40, %v3172_v11  ;;  %v3075_v12 = vld [vmem:[%s14375_s14 + $0x8] sm:$0xff] }
 0x874   :  { %11411 = vpow2.f32 %v9178_v19  ;;  %v3148_v19 = vld [vmem:[%s14374_s30 + $0x90] sm:$0xff]  ;;  %v3079_v48 = vld [vmem:[%s14375_s14 + $0x28] sm:$0xff] }
 0x875   :  { %11413 = vpow2.f32 %v9179_v37  ;;  %v3151_v37 = vld [vmem:[%s14374_s30 + $0xa8] sm:$0xff] }
 0x876   :  { %v3087_v40 = vld [vmem:[%s14375_s14 + $0x68] sm:$0xff] }
 0x87e   :  { %v11412_v46 = vpop.eup %11411 }
 0x87f   :  { %v2769_v53 = vadd.f32 1.0, %v11412_v46  ;;  %v11414_v22 = vpop.eup %11413  ;;  %v10751_v46 = vpack.c.bf16 %v3153_v16, %v3150_v51  ;;  %v2817_v51 = vld [vmem:[#allocation14] sm:$0x7] }
 0x880   :  { %v2770_v32 = vadd.f32 1.0, %v11414_v22  ;;  %v3155_v22 = vld [vmem:[%s14374_s30 + $0xc8] sm:$0xff]  ;;  %v2826_v16 = vrot.slane %v2817_v51, %v12481_v17 }
 0x881   :  { %11415 = vrcp.f32 %v2769_v53  ;;  %v10721_v53 = vpack.c.bf16 %v3151_v37, %v3148_v19 }
 0x882   :  { %11417 = vrcp.f32 %v2770_v32  ;;  %v3156_v32 = vld [vmem:[%s14374_s30 + $0xd0] sm:$0xff] }
 0x88b   :  { %v11416_v57 = vpop.eup %11415 }
 0x88c   :  { %v2775_v50 = vmul.f32 %v11416_v57, %v2756_v47  ;;  %v11418_v34 = vpop.eup %11417  ;;  %v10723_v47 = vpack.c.bf16 %v3158_v25, %v3155_v22  ;;  %v3159_v57 = vld [vmem:[%s14374_s30 + $0xe8] sm:$0xff] }
 0x88d   :  { %v2778_v4 = vsub.f32 1.0, %v11418_v34  ;;  %v2780_v23 = vmul.f32 %v11418_v34, %v12797_v21  ;;  %v10755_v34 = vpack.c.bf16 %v3159_v57, %v3156_v32 }
 0x88e   :  { %v2776_v3 = vadd.f32 %v2775_v50, %v12527_v58  ;;  %v3131_v58 = vld [vmem:[%s14374_s30 + $0x8] sm:$0xff]  ;;  %v3154_v50 = vld [vmem:[%s14374_s30 + $0xc0] sm:$0xff] }
 0x88f   :  { %v10707_v28 = vpack.c.bf16 %v3134_v20, %v3131_v58  ;;  %v3165_v58 = vld [vmem:[%s14374_s30 + $0x118] sm:$0xff]  ;;  %v3160_v20 = vld [vmem:[%s14374_s30 + $0xf0] sm:$0xff] }
 0x890   :  { %11419 = vtanh.f32 %v2776_v3  ;;  %v3157_v3 = vld [vmem:[%s14374_s30 + $0xd8] sm:$0xff]  ;;  %v10729_v60 = vpack.c.bf16 %v3163_v59, %v3160_v20 }
 0x891   :  { %10708 = vmatprep.subr.bf16.mxu1 %v10707_v28 }
 0x89a   :  { %v11420_v61 = vpop.eup %11419 }
 0x89b   :  { %v2779_v62 = vmul.f32 %v11420_v61, %v2778_v4  ;;  %v10725_v4 = vpack.c.bf16 %v3157_v3, %v3154_v50  ;;  %v3161_v61 = vld [vmem:[%s14374_s30 + $0xf8] sm:$0xff] }
 0x89d   :  { %v12833_v49 = vadd.f32 %v2780_v23, %v2779_v62  ;;  %v3164_v62 = vld [vmem:[%s14374_s30 + $0x110] sm:$0xff]  ;;  %v3162_v23 = vld [vmem:[%s14374_s30 + $0x100] sm:$0xff] }
 0x89e   :  { %v10759_v28 = vpack.c.bf16 %v3165_v58, %v3162_v23  ;;  %v2830_v58 = vrot.slane %v2817_v51, %v12483_v18 }
 0x89f   :  { %v2784_v27 = vpack.c.bf16 %v12833_v49, %v12833_v49 }
 0x8a1   :  { %2995 = vmatmul.mubr.bf16.vlgmr.msra.gmra.mrb[44].mxu1 %v2784_v27  ;;  %10168 = vmatmul.mubr.bf16.vlgmr.msra.gmra.mrb[44].mxu0 %v2784_v27  ;;  %v10727_v27 = vpack.c.bf16 %v3164_v62, %v3161_v61 }
 0x8a2   :  { %3242 = vmatprep.mubr.f32.mxu1 %v14350_v1  ;;  %10710 = vmatpush1.bf16.msra.mxu1 %v10709_v44  ;;  %v10731_v44 = vpack.c.bf16 %v3170_v41, %v3167_v33  ;;  %v3074_v41 = vld [vmem:[%s14375_s14] sm:$0xff] }
 0x8a3   :  { %10742 = vmatpush3.bf16.msra.mxu0 %v10739_v38  ;;  %10712 = vmatprep.subr.bf16.mxu1 %v10711_v31  ;;  %v3168_v38 = vld [vmem:[%s14374_s30 + $0x130] sm:$0xff] }
 0x8a4   :  { %10744 = vmatprep.subr.bf16.mxu0 %v10743_v29  ;;  %v10763_v31 = vpack.c.bf16 %v3171_v45, %v3168_v38  ;;  %v3077_v38 = vld [vmem:[%s14375_s14 + $0x18] sm:$0xff] }
 0x8a6   :  { %10714 = vmatpush1.bf16.msra.mxu1 %v10713_v35  ;;  %v10735_v35 = vpack.c.bf16 %v3176_v10, %v3173_v9  ;;  %v3085_v9 = vld [vmem:[%s14375_s14 + $0x58] sm:$0xff] }
 0x8a7   :  { %10746 = vmatpush3.bf16.msra.mxu0 %v10743_v29  ;;  %10716 = vmatprep.subr.bf16.mxu1 %v10715_v56  ;;  %v3174_v29 = vld [vmem:[%s14374_s30 + $0x160] sm:$0xff] }
 0x8a8   :  { %10748 = vmatprep.subr.bf16.mxu0 %v10747_v13  ;;  %v10767_v56 = vpack.c.bf16 %v3177_v36, %v3174_v29  ;;  %v3080_v29 = vld [vmem:[%s14375_s14 + $0x30] sm:$0xff] }
 0x8aa   :  { %10718 = vmatpush1.bf16.msra.mxu1 %v10717_v39  ;;  %v10771_v39 = vpack.c.bf16 %v3078_v43, %v3075_v12  ;;  %v3088_v12 = vld [vmem:[%s14375_s14 + $0x70] sm:$0xff]  ;;  %v3091_v43 = vld [vmem:[%s14375_s14 + $0x88] sm:$0xff] }
 0x8ab   :  { %10750 = vmatpush3.bf16.msra.mxu0 %v10747_v13  ;;  %10720 = vmatprep.subr.bf16.mxu1 %v10719_v52  ;;  %v3076_v13 = vld [vmem:[%s14375_s14 + $0x10] sm:$0xff]  ;;  %v2822_v52 = vrot.slane %v2817_v51, %v12479_v15  ;;  %v10811_v51 = vpack.c.bf16 %v3091_v43, %v3088_v12 }
 0x8ac   :  { %10752 = vmatprep.subr.bf16.mxu0 %v10751_v46  ;;  %v10803_v42 = vpack.c.bf16 %v3079_v48, %v3076_v13  ;;  %v3086_v13 = vld [vmem:[%s14375_s14 + $0x60] sm:$0xff] }
 0x8ad   :  { %v13158_v43 = vld [vmem:[#allocation17 + $0x4] ss:$12 sps:$4 sm:$0xff]  }
 0x8ae   :  { %10722 = vmatpush1.bf16.msra.mxu1 %v10721_v53 }
 0x8af   :  { %10754 = vmatpush3.bf16.msra.mxu0 %v10751_v46  ;;  %10724 = vmatprep.subr.bf16.mxu1 %v10723_v47 }
 0x8b0   :  { %10756 = vmatprep.subr.bf16.mxu0 %v10755_v34 }
 0x8b2   :  { %10726 = vmatpush1.bf16.msra.mxu1 %v10725_v4 }
 0x8b3   :  { %10758 = vmatpush3.bf16.msra.mxu0 %v10755_v34  ;;  %10728 = vmatprep.subr.bf16.mxu1 %v10727_v27 }
 0x8b4   :  { %10760 = vmatprep.subr.bf16.mxu0 %v10759_v28 }
 0x8b6   :  { %10730 = vmatpush1.bf16.msra.mxu1 %v10729_v60 }
 0x8b7   :  { %10762 = vmatpush3.bf16.msra.mxu0 %v10759_v28  ;;  %10732 = vmatprep.subr.bf16.mxu1 %v10731_v44 }
 0x8b8   :  { %10764 = vmatprep.subr.bf16.mxu0 %v10763_v31 }
 0x8ba   :  { %10734 = vmatpush1.bf16.msra.mxu1 %v10733_v26  ;;  %v3082_v26 = vld [vmem:[%s14375_s14 + $0x40] sm:$0xff] }
 0x8bb   :  { %10766 = vmatpush3.bf16.msra.mxu0 %v10763_v31  ;;  %10736 = vmatprep.subr.bf16.mxu1 %v10735_v35  ;;  %v10773_v31 = vpack.c.bf16 %v3077_v38, %v3074_v41  ;;  %v3083_v35 = vld [vmem:[%s14375_s14 + $0x48] sm:$0xff]  ;;  %v10807_v11 = vpack.c.bf16 %v3085_v9, %v3082_v26  ;;  %v3114_v41 = vld [vmem:[%s14375_s14 + $0x140] sm:$0xff]  ;;  %v3112_v38 = vld [vmem:[%s14375_s14 + $0x130] sm:$0xff] }
 0x8bc   :  { %10768 = vmatprep.subr.bf16.mxu0 %v10767_v56  ;;  %v3117_v26 = vld [vmem:[%s14375_s14 + $0x158] sm:$0xff]  ;;  %v3120_v9 = vld [vmem:[%s14375_s14 + $0x170] sm:$0xff] }
 0x8be   :  { %10738 = vmatpush1.bf16.msra.mxu1 %v10737_v6  ;;  %v10777_v6 = vpack.c.bf16 %v3083_v35, %v3080_v29  ;;  %v3118_v29 = vld [vmem:[%s14375_s14 + $0x160] sm:$0xff]  ;;  %v3121_v35 = vld [vmem:[%s14375_s14 + $0x178] sm:$0xff] }
 0x8bf   :  { %10770 = vmatpush3.bf16.msra.mxu0 %v10767_v56  ;;  %10772 = vmatprep.subr.bf16.mxu1 %v10771_v39  ;;  %v3090_v56 = vld [vmem:[%s14375_s14 + $0x80] sm:$0xff]  ;;  %v3089_v39 = vld [vmem:[%s14375_s14 + $0x78] sm:$0xff] }
 0x8c0   :  { %10804 = vmatprep.subr.bf16.mxu0 %v10803_v42  ;;  %v10779_v48 = vpack.c.bf16 %v3090_v56, %v3087_v40  ;;  %v3116_v40 = vld [vmem:[%s14375_s14 + $0x150] sm:$0xff]  ;;  %v3119_v56 = vld [vmem:[%s14375_s14 + $0x168] sm:$0xff] }
 0x8c1   :  { %v10801_v12 = vpack.c.bf16 %v3119_v56, %v3116_v40 }
 0x974   :  { %v2996_v19 = vpop.f32.mrb[44].mxu1  ;;  %v3037_v37 = vpop.f32.mrb[44].mxu0 }
 0x975   :  { %v2997_v46 = vadd.f32 %v2996_v19, %v2822_v52  ;;  %v2998_v53 = vpop.f32.mrb[45].mxu1  ;;  %v10169_v22 = vpop.f32.mrb[45].mxu0  ;;  %v3038_v59 = vadd.f32 %v3037_v37, %v2830_v58  ;;  %v3096_v52 = vld [vmem:[%s14375_s14 + $0xb0] sm:$0xff]  ;;  %v3094_v19 = vld [vmem:[%s14375_s14 + $0xa0] sm:$0xff]  ;;  %v3097_v37 = vld [vmem:[%s14375_s14 + $0xb8] sm:$0xff] }
 0x976   :  { %v2999_v25 = vadd.f32 %v2998_v53, %v2826_v16  ;;  %v3000_v32 = vpop.f32.mrb[46].mxu1  ;;  %v3040_v47 = vpop.f32.mrb[46].mxu0  ;;  %v10781_v16 = vpack.c.bf16 %v3089_v39, %v3086_v13  ;;  %v3095_v53 = vld [vmem:[%s14375_s14 + $0xa8] sm:$0xff]  ;;  %v3106_v58 = vld [vmem:[%s14375_s14 + $0x100] sm:$0xff] }
 0x977   :  { %v3043_v57 = vadd.f32 %v2997_v46, %v12537_v8  ;;  %v3001_v50 = vpop.f32.mrb[47].mxu1  ;;  %v10170_v3 = vpop.f32.mrb[47].mxu0  ;;  %v3092_v46 = vld [vmem:[%s14375_s14 + $0x90] sm:$0xff]  ;;  %v3099_v32 = vld [vmem:[%s14375_s14 + $0xc8] sm:$0xff]  ;;  %v3102_v47 = vld [vmem:[%s14375_s14 + $0xe0] sm:$0xff] }
 0x978   :  { %v3044_v34 = vadd.f32 %v2999_v25, %v12539_v14  ;;  %v10815_v25 = vpack.c.bf16 %v3097_v37, %v3094_v19  ;;  %v3100_v50 = vld [vmem:[%s14375_s14 + $0xd0] sm:$0xff]  ;;  %v3103_v3 = vld [vmem:[%s14375_s14 + $0xe8] sm:$0xff] }
 0x979   :  { %v9204_v4 = vmul.f32 -1.442695, %v3043_v57  ;;  %v10785_v57 = vpack.c.bf16 %v3095_v53, %v3092_v46  ;;  %v13162_v13 = vld [vmem:[#allocation17] ss:$12 sps:$4 sm:$0xff]   ;;  %v13165_v39 = vld [vmem:[#allocation17 + $0x1c] ss:$12 sps:$4 sm:$0xff]  }
 0x97a   :  { %v9205_v61 = vmul.f32 -1.442695, %v3044_v34  ;;  %v3098_v34 = vld [vmem:[%s14375_s14 + $0xc0] sm:$0xff]  ;;  %v13208_v53 = vld [vmem:[#allocation17 + $0x7c] ss:$12 sps:$4 sm:$0xff]  }
 0x97b   :  { %11421 = vpow2.f32 %v9204_v4  ;;  %v3101_v4 = vld [vmem:[%s14375_s14 + $0xd8] sm:$0xff]  ;;  %v11153_v19 = vld [vmem:[#allocation17 + $0x38] ss:$12 sps:$4 sm:$0xff]  }
 0x97c   :  { %11423 = vpow2.f32 %v9205_v61  ;;  %v10787_v61 = vpack.c.bf16 %v3102_v47, %v3099_v32  ;;  %v13197_v37 = vld [vmem:[#allocation17 + $0x64] ss:$12 sps:$4 sm:$0xff]   ;;  %v11156_v32 = vld [vmem:[#allocation17 + $0x80] ss:$12 sps:$4 sm:$0xff]  }
 0x97d   :  { %v11154_v46 = vld [vmem:[#allocation17 + $0x50] ss:$12 sps:$4 sm:$0xff]   ;;  %v13228_v47 = vld [vmem:[#allocation17 + $0xac] ss:$12 sps:$4 sm:$0xff]  }
 0x985   :  { %v11422_v62 = vpop.eup %11421 }
 0x986   :  { %v3051_v23 = vadd.f32 1.0, %v11422_v62  ;;  %v11424_v27 = vpop.eup %11423  ;;  %v3105_v62 = vld [vmem:[%s14375_s14 + $0xf8] sm:$0xff] }
 0x987   :  { %v3052_v20 = vadd.f32 1.0, %v11424_v27  ;;  %v10819_v27 = vpack.c.bf16 %v3103_v3, %v3100_v50  ;;  %v11158_v50 = vld [vmem:[#allocation17 + $0xb0] ss:$12 sps:$4 sm:$0xff]   ;;  %v11161_v3 = vld [vmem:[#allocation17 + $0x38] ss:$12 sps:$4 sm:$0xff]  }
 0x988   :  { %11425 = vrcp.f32 %v3051_v23  ;;  %v3108_v23 = vld [vmem:[%s14375_s14 + $0x110] sm:$0xff] }
 0x989   :  { %11427 = vrcp.f32 %v3052_v20  ;;  %v3109_v20 = vld [vmem:[%s14375_s14 + $0x118] sm:$0xff] }
 0x992   :  { %v11426_v28 = vpop.eup %11425 }
 0x993   :  { %v3057_v60 = vmul.f32 %v11426_v28, %v3038_v59  ;;  %v11428_v33 = vpop.eup %11427  ;;  %v10789_v59 = vpack.c.bf16 %v3101_v4, %v3098_v34  ;;  %v10791_v28 = vpack.c.bf16 %v3108_v23, %v3105_v62  ;;  %v11162_v34 = vld [vmem:[#allocation17 + $0x50] ss:$12 sps:$4 sm:$0xff]   ;;  %v11163_v4 = vld [vmem:[#allocation17 + $0x68] ss:$12 sps:$4 sm:$0xff]   ;;  %v11165_v62 = vld [vmem:[#allocation17 + $0x98] ss:$12 sps:$4 sm:$0xff]  }
 0x994   :  { %v3060_v14 = vsub.f32 1.0, %v11428_v33  ;;  %v3062_v30 = vmul.f32 %v11428_v33, %v12833_v49  ;;  %v10823_v33 = vpack.c.bf16 %v3109_v20, %v3106_v58  ;;  %v11166_v23 = vld [vmem:[#allocation17 + $0xb0] ss:$12 sps:$4 sm:$0xff]  }
 0x995   :  { %v3058_v8 = vadd.f32 %v3057_v60, %v12524_v54  ;;  %v3084_v54 = vld [vmem:[%s14375_s14 + $0x50] sm:$0xff] }
 0x996   :  { %v10775_v36 = vpack.c.bf16 %v3084_v54, %v3081_v24  ;;  %v3104_v60 = vld [vmem:[%s14375_s14 + $0xf0] sm:$0xff]  ;;  %v3110_v24 = vld [vmem:[%s14375_s14 + $0x120] sm:$0xff]  ;;  %v3113_v54 = vld [vmem:[%s14375_s14 + $0x138] sm:$0xff] }
 0x997   :  { %11429 = vtanh.f32 %v3058_v8  ;;  %v3107_v8 = vld [vmem:[%s14375_s14 + $0x108] sm:$0xff] }
 0x9a1   :  { %v11430_v44 = vpop.eup %11429 }
 0x9a2   :  { %v3061_v45 = vmul.f32 %v11430_v44, %v3060_v14  ;;  %v3111_v14 = vld [vmem:[%s14375_s14 + $0x128] sm:$0xff] }
 0x9a3   :  { %v3115_v44 = vld [vmem:[%s14375_s14 + $0x148] sm:$0xff] }
 0x9a4   :  { %v13019_v10 = vadd.f32 %v3062_v30, %v3061_v45  ;;  %v10793_v45 = vpack.c.bf16 %v3107_v8, %v3104_v60  ;;  %v10795_v30 = vpack.c.bf16 %v3114_v41, %v3111_v14 }
 0x9a6   :  { %3243 = vmatmul.mubr.f32.vlgmr.msra.gmra.mrb[14].mxu1 %v13019_v10  ;;  %10203 = vmatprep.mubr.f32.mxu0 %v13019_v10 }
 0x9a7   :  { %10204 = vmatmul.mubr.f32.vlgmr.msra.gmra.mrb[48].mxu0 %v12833_v49  ;;  %10774 = vmatpush1.bf16.msra.mxu1 %v10773_v31  ;;  %v10827_v31 = vpack.c.bf16 %v3115_v44, %v3112_v38 }
 0x9a8   :  { %10806 = vmatpush3.bf16.msra.mxu0 %v10803_v42  ;;  %10206 = vmatprep.mubr.f32.mxu0 %v12797_v21  ;;  %v3093_v42 = vld [vmem:[%s14375_s14 + $0x98] sm:$0xff] }
 0x9a9   :  { %3248 = vmatprep.mubr.f32.mxu1 %v14350_v1  ;;  %10776 = vmatprep.subr.bf16.mxu1 %v10775_v36  ;;  %v10783_v22 = vpack.c.bf16 %v3096_v52, %v3093_v42  ;;  %v10797_v36 = vpack.c.bf16 %v3113_v54, %v3110_v24  ;;  %v13176_v42 = vld [vmem:[#allocation17 + $0x34] ss:$12 sps:$4 sm:$0xff]  }
 0x9aa   :  { %3249 = vmatmul.mubr.f32.gmra.mrb[48].mxu1 %v12833_v49  ;;  %10808 = vmatprep.subr.bf16.mxu0 %v10807_v11  ;;  %v11152_v52 = vld [vmem:[#allocation17 + $0x20] ss:$12 sps:$4 sm:$0xff]  }
 0x9ab   :  { %10207 = vmatmul.mubr.f32.gmra.mrb[50].mxu0 %v12759_v5  ;;  %10778 = vmatpush1.bf16.msra.mxu1 %v10777_v6  ;;  %v10831_v6 = vpack.c.bf16 %v3121_v35, %v3118_v29 }
 0x9ac   :  { %10810 = vmatpush3.bf16.msra.mxu0 %v10807_v11  ;;  %10209 = vmatprep.mubr.f32.mxu0 %v12721_v55  ;;  %v10799_v11 = vpack.c.bf16 %v3120_v9, %v3117_v26 }
 0x9ad   :  { %3254 = vmatprep.mubr.f32.mxu1 %v14350_v1  ;;  %10780 = vmatprep.subr.bf16.mxu1 %v10779_v48  ;;  %v11148_v48 = vld [vmem:[#allocation17 + $0x8] ss:$12 sps:$4 sm:$0xff]  }
 0x9ae   :  { %3255 = vmatmul.mubr.f32.gmra.mrb[50].mxu1 %v12797_v21  ;;  %10812 = vmatprep.subr.bf16.mxu0 %v10811_v51 }
 0x9af   :  { %10210 = vmatmul.mubr.f32.gmra.mrb[52].mxu0 %v12650_v63  ;;  %10782 = vmatpush1.bf16.msra.mxu1 %v10781_v16  ;;  %v13187_v16 = vld [vmem:[#allocation17 + $0x4c] ss:$12 sps:$4 sm:$0xff]  }
 0x9b0   :  { %10814 = vmatpush3.bf16.msra.mxu0 %v10811_v51  ;;  %10212 = vmatprep.mubr.f32.mxu0 %v12613_v0  ;;  %v13171_v51 = vld [vmem:[#allocation17 + $0x18] ss:$12 sps:$4 sm:$0xff]  }
 0x9b1   :  { %3260 = vmatprep.mubr.f32.mxu1 %v14350_v1  ;;  %10784 = vmatprep.subr.bf16.mxu1 %v10783_v22  ;;  %v11155_v22 = vld [vmem:[#allocation17 + $0x68] ss:$12 sps:$4 sm:$0xff]  }
 0x9b2   :  { %3261 = vmatmul.mubr.f32.gmra.mrb[52].mxu1 %v12759_v5  ;;  %10816 = vmatprep.subr.bf16.mxu0 %v10815_v25 }
 0x9b3   :  { %10213 = vmatmul.mubr.f32.gmra.mrb[54].mxu0 %v12546_v7  ;;  %10786 = vmatpush1.bf16.msra.mxu1 %v10785_v57  ;;  %v11157_v57 = vld [vmem:[#allocation17 + $0x98] ss:$12 sps:$4 sm:$0xff]  }
 0x9b4   :  { %10818 = vmatpush3.bf16.msra.mxu0 %v10815_v25  ;;  %10247 = vmatprep.mubr.f32.mxu0 %v12546_v7  ;;  %v13219_v25 = vld [vmem:[#allocation17 + $0x94] ss:$12 sps:$4 sm:$0xff]  }
 0x9b5   :  { %3266 = vmatprep.mubr.f32.mxu1 %v14350_v1  ;;  %10788 = vmatprep.subr.bf16.mxu1 %v10787_v61  ;;  %v11164_v61 = vld [vmem:[#allocation17 + $0x80] ss:$12 sps:$4 sm:$0xff]  }
 0x9b6   :  { %3267 = vmatmul.mubr.f32.gmra.mrb[54].mxu1 %v12721_v55  ;;  %10820 = vmatprep.subr.bf16.mxu0 %v10819_v27 }
 0x9b7   :  { %10790 = vmatpush1.bf16.msra.mxu1 %v10789_v59  ;;  %3272 = vmatprep.mubr.f32.mxu1 %v14350_v1 }
 0x9b8   :  { %10822 = vmatpush3.bf16.msra.mxu0 %v10819_v27  ;;  %10792 = vmatprep.subr.bf16.mxu1 %v10791_v28  ;;  %v3614_v27 = vld [vmem:[#allocation15] sm:$0x7] }
 0x9b9   :  { %10824 = vmatprep.subr.bf16.mxu0 %v10823_v33  ;;  %v13273_v58 = vrot.slane %v3614_v27, %v12483_v18  ;;  %v3623_v14 = vrot.slane %v3614_v27, %v12481_v17 }
 0x9ba   :  { %3273 = vmatmul.mubr.f32.gmra.mrb[56].mxu1 %v12650_v63 }
 0x9bb   :  { %10794 = vmatpush1.bf16.msra.mxu1 %v10793_v45  ;;  %3278 = vmatprep.mubr.f32.mxu1 %v14350_v1 }
 0x9bc   :  { %10826 = vmatpush3.bf16.msra.mxu0 %v10823_v33  ;;  %10796 = vmatprep.subr.bf16.mxu1 %v10795_v30  ;;  %v3619_v33 = vrot.slane %v3614_v27, %v12479_v15 }
 0x9bd   :  { %10828 = vmatprep.subr.bf16.mxu0 %v10827_v31 }
 0x9be   :  { %3279 = vmatmul.mubr.f32.gmra.mrb[58].mxu1 %v12613_v0 }
 0x9bf   :  { %10798 = vmatpush1.bf16.msra.mxu1 %v10797_v36  ;;  %3284 = vmatprep.mubr.f32.mxu1 %v14350_v1 }
 0x9c0   :  { %10830 = vmatpush3.bf16.msra.mxu0 %v10827_v31  ;;  %10800 = vmatprep.subr.bf16.mxu1 %v10799_v11 }
 0x9c1   :  { %10832 = vmatprep.subr.bf16.mxu0 %v10831_v6 }
 0x9c2   :  { %3285 = vmatmul.mubr.f32.gmra.mrb[60].mxu1 %v12546_v7 }
 0x9c3   :  { %10802 = vmatpush1.bf16.msra.mxu1 %v10801_v12  ;;  %3460 = vmatprep.mubr.f32.mxu1 %v14350_v1 }
 0x9c4   :  { %10834 = vmatpush3.bf16.msra.mxu0 %v10831_v6  ;;  %3832 = vmatprep.subr.bf16.mxu1 %v13158_v43 }
 0x9c5   :  { %10259 = vmatprep.subr.bf16.mxu0 %v14350_v1 }
 0x9c6   :  { %3461 = vmatmul.mubr.f32.vlgmr.msra.gmra.mrb[14].mxu1 %v12546_v7  ;;  %v13182_v7 = vld [vmem:[#allocation17 + $0x30] ss:$12 sps:$4 sm:$0xff]  }
 0x9c7   :  { %10248 = vmatmul.mubr.f32.vlgmr.msra.gmra.mrb[48].mxu0 %v12613_v0  ;;  %3833 = vmatpush1.bf16.msra.mxu1 %v13162_v13 }
 0x9c8   :  { %10250 = vmatprep.mubr.f32.mxu0 %v12650_v63  ;;  %3466 = vmatprep.mubr.f32.mxu1 %v14350_v1 }
 0x9c9   :  { %3834 = vmatprep.subr.bf16.mxu1 %v13165_v39  ;;  %10260 = vmatpush3.bf16.msra.mxu0 %v11148_v48 }
 0x9ca   :  { %3467 = vmatmul.mubr.f32.gmra.mrb[48].mxu1 %v12613_v0  ;;  %10261 = vmatprep.subr.bf16.mxu0 %v14350_v1  ;;  %v13193_v0 = vld [vmem:[#allocation17 + $0x48] ss:$12 sps:$4 sm:$0xff]  }
 0x9cb   :  { %10251 = vmatmul.mubr.f32.gmra.mrb[50].mxu0 %v12721_v55  ;;  %3835 = vmatpush1.bf16.msra.mxu1 %v13171_v51 }
 0x9cc   :  { %10253 = vmatprep.mubr.f32.mxu0 %v12759_v5  ;;  %3472 = vmatprep.mubr.f32.mxu1 %v14350_v1 }
 0x9cd   :  { %3836 = vmatprep.subr.bf16.mxu1 %v13176_v42  ;;  %10262 = vmatpush3.bf16.msra.mxu0 %v11152_v52 }
 0x9ce   :  { %3473 = vmatmul.mubr.f32.gmra.mrb[50].mxu1 %v12650_v63  ;;  %10263 = vmatprep.subr.bf16.mxu0 %v14350_v1  ;;  %v13204_v63 = vld [vmem:[#allocation17 + $0x60] ss:$12 sps:$4 sm:$0xff]  }
 0x9cf   :  { %10254 = vmatmul.mubr.f32.gmra.mrb[52].mxu0 %v12797_v21  ;;  %3837 = vmatpush1.bf16.msra.mxu1 %v13182_v7 }
 0x9d0   :  { %10256 = vmatprep.mubr.f32.mxu0 %v12833_v49  ;;  %3478 = vmatprep.mubr.f32.mxu1 %v14350_v1 }
 0x9d1   :  { %3838 = vmatprep.subr.bf16.mxu1 %v13187_v16  ;;  %10264 = vmatpush3.bf16.msra.mxu0 %v11153_v19 }
 0x9d2   :  { %3479 = vmatmul.mubr.f32.gmra.mrb[52].mxu1 %v12721_v55  ;;  %10265 = vmatprep.subr.bf16.mxu0 %v14350_v1  ;;  %v13216_v55 = vld [vmem:[#allocation17 + $0x78] ss:$12 sps:$4 sm:$0xff]  }
 0x9d3   :  { %10257 = vmatmul.mubr.f32.gmra.mrb[54].mxu0 %v13019_v10  ;;  %3839 = vmatpush1.bf16.msra.mxu1 %v13193_v0 }
 0x9d4   :  { %3484 = vmatprep.mubr.f32.mxu1 %v14350_v1  ;;  %3840 = vmatprep.subr.bf16.mxu1 %v13197_v37 }
 0x9d5   :  { %10266 = vmatpush3.bf16.msra.mxu0 %v11154_v46  ;;  %10275 = vmatprep.mubr.msk.bf16.mxu0 %vm11988_vm1, %v14350_v1 }
 0x9d6   :  { %3485 = vmatmul.mubr.f32.gmra.mrb[54].mxu1 %v12759_v5  ;;  %10267 = vmatprep.subr.bf16.mxu0 %v14350_v1  ;;  %v13225_v5 = vld [vmem:[#allocation17 + $0x90] ss:$12 sps:$4 sm:$0xff]  }
 0x9d7   :  { %3841 = vmatpush1.bf16.msra.mxu1 %v13204_v63  ;;  %3490 = vmatprep.mubr.f32.mxu1 %v14350_v1 }
 0x9d8   :  { %3842 = vmatprep.subr.bf16.mxu1 %v13208_v53 }
 0x9d9   :  { %10268 = vmatpush3.bf16.msra.mxu0 %v11155_v22 }
 0x9da   :  { %3491 = vmatmul.mubr.f32.gmra.mrb[56].mxu1 %v12797_v21  ;;  %10269 = vmatprep.subr.bf16.mxu0 %v14350_v1  ;;  %v13234_v21 = vld [vmem:[#allocation17 + $0xa8] ss:$12 sps:$4 sm:$0xff]  }
 0x9db   :  { %3843 = vmatpush1.bf16.msra.mxu1 %v13216_v55  ;;  %3496 = vmatprep.mubr.f32.mxu1 %v14350_v1 }
 0x9dc   :  { %3844 = vmatprep.subr.bf16.mxu1 %v13219_v25 }
 0x9dd   :  { %10270 = vmatpush3.bf16.msra.mxu0 %v11156_v32 }
 0x9de   :  { %3497 = vmatmul.mubr.f32.gmra.mrb[58].mxu1 %v12833_v49  ;;  %10271 = vmatprep.subr.bf16.mxu0 %v14350_v1  ;;  %v11159_v49 = vld [vmem:[#allocation17 + $0x8] ss:$12 sps:$4 sm:$0xff]  }
 0x9df   :  { %3845 = vmatpush1.bf16.msra.mxu1 %v13225_v5  ;;  %3502 = vmatprep.mubr.f32.mxu1 %v14350_v1 }
 0x9e0   :  { %3846 = vmatprep.subr.bf16.mxu1 %v13228_v47 }
 0x9e1   :  { %10272 = vmatpush3.bf16.msra.mxu0 %v11157_v57 }
 0x9e2   :  { %3503 = vmatmul.mubr.f32.gmra.mrb[60].mxu1 %v13019_v10  ;;  %10273 = vmatprep.subr.bf16.mxu0 %v14350_v1  ;;  %v11160_v10 = vld [vmem:[#allocation17 + $0x20] ss:$12 sps:$4 sm:$0xff]  }
 0x9e3   :  { %3847 = vmatpush1.bf16.msra.mxu1 %v13234_v21  ;;  %3864 = vmatprep.mubr.bf16.mxu1 %v14352_v2 }
 0x9e4   :  { %4113 = vmatprep.subr.bf16.mxu1 %v13158_v43 }
 0x9e5   :  { %10274 = vmatpush3.bf16.msra.mxu0 %v11158_v50 }
 0x9e6   :  { %3865 = vmatmul.mubr.bf16.vlgmr.msra.gmra.mrb[64].mxu1 %v14352_v2  ;;  %10279 = vmatprep.subr.bf16.mxu0 %v14350_v1 }
 0x9e7   :  { %4114 = vmatpush1.bf16.msra.mxu1 %v13162_v13  ;;  %4145 = vmatprep.mubr.bf16.mxu1 %v14352_v2 }
 0x9e8   :  { %10276 = vmatmul.mubr.bf16.vlgmr.msra.gmra.mrb[56].mxu0 %v14352_v2  ;;  %4115 = vmatprep.subr.bf16.mxu1 %v13165_v39 }
 0x9e9   :  { %10295 = vmatprep.mubr.msk.bf16.mxu0 %vm11988_vm1, %v14350_v1  ;;  %10280 = vmatpush3.bf16.msra.mxu0 %v11159_v49 }
 0x9ea   :  { %10281 = vmatprep.subr.bf16.mxu0 %v14350_v1 }
 0x9eb   :  { %4116 = vmatpush1.bf16.msra.mxu1 %v13171_v51 }
 0x9ec   :  { %4117 = vmatprep.subr.bf16.mxu1 %v13176_v42 }
 0x9ed   :  { %10282 = vmatpush3.bf16.msra.mxu0 %v11160_v10 }
 0x9ee   :  { %10283 = vmatprep.subr.bf16.mxu0 %v14350_v1 }
 0x9ef   :  { %4118 = vmatpush1.bf16.msra.mxu1 %v13182_v7 }
 0x9f0   :  { %4119 = vmatprep.subr.bf16.mxu1 %v13187_v16 }
 0x9f1   :  { %10284 = vmatpush3.bf16.msra.mxu0 %v11161_v3 }
 0x9f2   :  { %10285 = vmatprep.subr.bf16.mxu0 %v14350_v1 }
 0x9f3   :  { %4120 = vmatpush1.bf16.msra.mxu1 %v13193_v0 }
 0x9f4   :  { %4121 = vmatprep.subr.bf16.mxu1 %v13197_v37 }
 0x9f5   :  { %10286 = vmatpush3.bf16.msra.mxu0 %v11162_v34 }
 0x9f6   :  { %10287 = vmatprep.subr.bf16.mxu0 %v14350_v1 }
 0x9f7   :  { %4122 = vmatpush1.bf16.msra.mxu1 %v13204_v63 }
 0x9f8   :  { %4123 = vmatprep.subr.bf16.mxu1 %v13208_v53 }
 0x9f9   :  { %10288 = vmatpush3.bf16.msra.mxu0 %v11163_v4 }
 0x9fa   :  { %10289 = vmatprep.subr.bf16.mxu0 %v14350_v1 }
 0x9fb   :  { %4124 = vmatpush1.bf16.msra.mxu1 %v13216_v55 }
 0x9fc   :  { %4125 = vmatprep.subr.bf16.mxu1 %v13219_v25 }
 0x9fd   :  { %10290 = vmatpush3.bf16.msra.mxu0 %v11164_v61 }
 0x9fe   :  { %10291 = vmatprep.subr.bf16.mxu0 %v14350_v1 }
 0x9ff   :  { %4126 = vmatpush1.bf16.msra.mxu1 %v13225_v5 }
 0xa00   :  { %4127 = vmatprep.subr.bf16.mxu1 %v13228_v47 }
 0xa01   :  { %10292 = vmatpush3.bf16.msra.mxu0 %v11165_v62 }
 0xa02   :  { %10293 = vmatprep.subr.bf16.mxu0 %v14350_v1 }
 0xa03   :  { %4128 = vmatpush1.bf16.msra.mxu1 %v13234_v21 }
 0xa04   :  { %4394 = vmatprep.subr.bf16.mxu1 %v13158_v43 }
 0xa05   :  { %10294 = vmatpush3.bf16.msra.mxu0 %v11166_v23 }
 0xa06   :  { %10299 = vmatprep.subr.bf16.mxu0 %v14350_v1 }
 0xa99   :  { %v3462_v20 = vpop.f32.mrb[14].mxu1 }
 0xa9a   :  { %v10249_v59 = vpop.f32.mrb[48].mxu0  ;;  %v3464_v28 = vpop.f32.mrb[15].mxu1 }
 0xa9b   :  { %v13276_v60 = vadd.f32 %v10249_v59, %v13273_v58  ;;  %v13278_v8 = vpop.f32.mrb[49].mxu0 }
 0xa9d   :  { %v3468_v41 = vpop.f32.mrb[48].mxu1 }
 0xa9e   :  { %v13282_v38 = vadd.f32 %v3619_v33, %v3468_v41  ;;  %v10252_v44 = vpop.f32.mrb[50].mxu0  ;;  %v3470_v45 = vpop.f32.mrb[49].mxu1  ;;  %v3687_v41 = vld [vmem:[#allocation18] sm:$0x7] }
 0xa9f   :  { %v13285_v30 = vadd.f32 %v10252_v44, %v13273_v58  ;;  %v13287_v24 = vadd.f32 %v3623_v14, %v3470_v45  ;;  %v3585_v54 = vpop.f32.mrb[51].mxu0 }
 0xaa0   :  { %v13290_v31 = vadd.f32 %v13273_v58, %v3585_v54 }
 0xaa1   :  { %v3474_v26 = vpop.f32.mrb[50].mxu1 }
 0xaa2   :  { %v13292_v9 = vadd.f32 %v3619_v33, %v3474_v26  ;;  %v10255_v29 = vpop.f32.mrb[52].mxu0  ;;  %v3476_v35 = vpop.f32.mrb[51].mxu1  ;;  %v3692_v26 = vrot.slane %v3687_v41, %v12479_v15 }
 0xaa3   :  { %v13295_v36 = vadd.f32 %v10255_v29, %v13273_v58  ;;  %v13297_v11 = vadd.f32 %v3623_v14, %v3476_v35  ;;  %v3595_v40 = vpop.f32.mrb[53].mxu0  ;;  %v3696_v35 = vrot.slane %v3687_v41, %v12481_v17 }
 0xaa4   :  { %v13300_v56 = vadd.f32 %v13273_v58, %v3595_v40 }
 0xaa5   :  { %v3480_v6 = vpop.f32.mrb[52].mxu1 }
 0xaa6   :  { %v13302_v12 = vadd.f32 %v3619_v33, %v3480_v6  ;;  %v10258_v48 = vpop.f32.mrb[54].mxu0  ;;  %v3482_v52 = vpop.f32.mrb[53].mxu1  ;;  %v3631_v6 = vadd.f32 %v3619_v33, %v3462_v20  ;;  %v3700_v20 = vrot.slane %v3687_v41, %v12483_v18 }
 0xaa7   :  { %v13305_v19 = vadd.f32 %v10258_v48, %v13273_v58  ;;  %v13307_v46 = vadd.f32 %v3623_v14, %v3482_v52  ;;  %v3605_v22 = vpop.f32.mrb[55].mxu0 }
 0xaa8   :  { %v13310_v32 = vadd.f32 %v13273_v58, %v3605_v22  ;;  %v3632_v22 = vadd.f32 %v3623_v14, %v3464_v28 }
 0xaa9   :  { %14376 = vst [vmem:[#allocation37_spill] sm:$0xff] %v13305_v19  ;;  %v3486_v57 = vpop.f32.mrb[54].mxu1 }
 0xaaa   :  { %v13312_v50 = vadd.f32 %v3619_v33, %v3486_v57  ;;  %v3488_v49 = vpop.f32.mrb[55].mxu1 }
 0xaab   :  { %v13314_v10 = vadd.f32 %v3623_v14, %v3488_v49 }
 0xaad   :  { %v3492_v3 = vpop.f32.mrb[56].mxu1 }
 0xaae   :  { %v13316_v34 = vadd.f32 %v3619_v33, %v3492_v3  ;;  %v3494_v4 = vpop.f32.mrb[57].mxu1 }
 0xaaf   :  { %v13318_v61 = vadd.f32 %v3623_v14, %v3494_v4 }
 0xab1   :  { %v3498_v62 = vpop.f32.mrb[58].mxu1 }
 0xab2   :  { %v13320_v23 = vadd.f32 %v3619_v33, %v3498_v62  ;;  %v3500_v27 = vpop.f32.mrb[59].mxu1 }
 0xab3   :  { %v13322_v59 = vadd.f32 %v3623_v14, %v3500_v27 }
 0xab5   :  { %v3504_v44 = vpop.f32.mrb[60].mxu1 }
 0xab6   :  { %v13324_v45 = vadd.f32 %v3619_v33, %v3504_v44  ;;  %v3506_v54 = vpop.f32.mrb[61].mxu1 }
 0xab7   :  { %v13327_v29 = vadd.f32 %v3623_v14, %v3506_v54 }
 0xab8   :  { %14377 = vst [vmem:[#allocation38_spill] sm:$0xff] %v13324_v45 }
 0xab9   :  { %14378 = vst [vmem:[#allocation39_spill] sm:$0xff] %v13327_v29  ;;  %v3866_v40 = vpop.f32.mrb[64].mxu1 }
 0xaba   :  { %v3867_v48 = vadd.f32 %v3866_v40, %v3692_v26  ;;  %v3868_v52 = vpop.f32.mrb[65].mxu1 }
 0xabb   :  { %v3869_v57 = vadd.f32 %v3868_v52, %v3696_v35  ;;  %v3870_v49 = vpop.f32.mrb[66].mxu1  ;;  %v3907_v3 = vpop.f32.mrb[56].mxu0  ;;  %v3633_v35 = vadd.f32 %v13273_v58, %v13278_v8  ;;  %v14379_v58 = vmov 0   ;;  %v14380_v8 = vmov 0.0  }
 0xabc   :  { %v3913_v4 = vadd.f32 %v3867_v48, %v3631_v6  ;;  %v3871_v62 = vpop.f32.mrb[67].mxu1  ;;  %v10277_v27 = vpop.f32.mrb[57].mxu0  ;;  %v3908_v14 = vadd.f32 %v3907_v3, %v3700_v20  ;;  %v11168_v49 = vld [vmem:[#allocation17 + $0x20] ss:$12 sps:$4 sm:$0xff]   ;;  %v11169_v3 = vld [vmem:[#allocation17 + $0x38] ss:$12 sps:$4 sm:$0xff]  }
 0xabd   :  { %v3914_v44 = vadd.f32 %v3869_v57, %v3632_v22  ;;  %v3910_v1 = vpop.f32.mrb[58].mxu0  ;;  %v11167_v57 = vld [vmem:[#allocation17 + $0x8] ss:$12 sps:$4 sm:$0xff]   ;;  %v11172_v27 = vld [vmem:[#allocation17 + $0x80] ss:$12 sps:$4 sm:$0xff]  }
 0xabe   :  { %v9230_v2 = vmul.f32 -1.442695, %v3913_v4  ;;  %v10278_v19 = vpop.f32.mrb[59].mxu0  ;;  %v11170_v4 = vld [vmem:[#allocation17 + $0x50] ss:$12 sps:$4 sm:$0xff]  }
 0xabf   :  { %v9231_v54 = vmul.f32 -1.442695, %v3914_v44  ;;  %v11171_v62 = vld [vmem:[#allocation17 + $0x68] ss:$12 sps:$4 sm:$0xff]   ;;  %v11174_v44 = vld [vmem:[#allocation17 + $0xb0] ss:$12 sps:$4 sm:$0xff]  }
 0xac0   :  { %11431 = vpow2.f32 %v9230_v2 }
 0xac1   :  { %11433 = vpow2.f32 %v9231_v54  ;;  %v3968_v54 = vld [vmem:[#allocation18] sm:$0x7] }
 0xac2   :  { %v3973_v20 = vrot.slane %v3968_v54, %v12479_v15 }
 0xaca   :  { %v11432_v29 = vpop.eup %11431 }
 0xacb   :  { %v3921_v45 = vadd.f32 1.0, %v11432_v29  ;;  %v11434_v33 = vpop.eup %11433  ;;  %v13333_v29 = vld [vmem:[#allocation20] ss:$0 sm:$0xff] }
 0xacc   :  { %v3922_v28 = vadd.f32 1.0, %v11434_v33  ;;  %v3977_v33 = vrot.slane %v3968_v54, %v12481_v17 }
 0xacd   :  { %11435 = vrcp.f32 %v3921_v45 }
 0xace   :  { %11437 = vrcp.f32 %v3922_v28 }
 0xad7   :  { %v11436_v26 = vpop.eup %11435 }
 0xad8   :  { %v3927_v40 = vmul.f32 %v11436_v26, %v3908_v14  ;;  %v11438_v19 = vpop.eup %11437 }
 0xad9   :  { %v3930_v2 = vsub.f32 1.0, %v11438_v19  ;;  %v3932_v52 = vmul.f32 0.0, %v11438_v19 }
 0xada   :  { %v3928_v1 = vadd.f32 %v3927_v40, %v3633_v35 }
 0xadc   :  { %11439 = vtanh.f32 %v3928_v1 }
 0xae6   :  { %v11440_v6 = vpop.eup %11439 }
 0xae7   :  { %v3931_v48 = vmul.f32 %v11440_v6, %v3930_v2 }
 0xae9   :  { %v13335_v45 = vadd.f32 %v3932_v52, %v3931_v48 }
 0xaeb   :  { %v5917_v41 = vmul.f32 %v13333_v29, %v13335_v45  ;;  %v3935_v22 = vpack.c.bf16 %v13335_v45, %v13335_v45 }
 0xaed   :  { %5925 = vadd.xlane.f32.xlu0 %v5917_v41  ;;  %4146 = vmatmul.mubr.bf16.vlgmr.msra.gmra.mrb[68].mxu1 %v3935_v22 }
 0xaee   :  { %10296 = vmatmul.mubr.bf16.vlgmr.msra.gmra.mrb[60].mxu0 %v3935_v22  ;;  %4395 = vmatpush1.bf16.msra.mxu1 %v13162_v13 }
 0xaef   :  { %4396 = vmatprep.subr.bf16.mxu1 %v13165_v39  ;;  %4426 = vmatprep.mubr.bf16.mxu1 %v14379_v58 }
 0xaf0   :  { %10315 = vmatprep.mubr.msk.bf16.mxu0 %vm11988_vm1, %v14380_v8  ;;  %10300 = vmatpush3.bf16.msra.mxu0 %v11167_v57 }
 0xaf1   :  { %10301 = vmatprep.subr.bf16.mxu0 %v14380_v8 }
 0xaf2   :  { %4397 = vmatpush1.bf16.msra.mxu1 %v13171_v51 }
 0xaf3   :  { %4398 = vmatprep.subr.bf16.mxu1 %v13176_v42 }
 0xaf4   :  { %10302 = vmatpush3.bf16.msra.mxu0 %v11168_v49 }
 0xaf5   :  { %10303 = vmatprep.subr.bf16.mxu0 %v14380_v8 }
 0xaf6   :  { %4399 = vmatpush1.bf16.msra.mxu1 %v13182_v7 }
 0xaf7   :  { %4400 = vmatprep.subr.bf16.mxu1 %v13187_v16 }
 0xaf8   :  { %10304 = vmatpush3.bf16.msra.mxu0 %v11169_v3 }
 0xaf9   :  { %10305 = vmatprep.subr.bf16.mxu0 %v14380_v8 }
 0xafa   :  { %4401 = vmatpush1.bf16.msra.mxu1 %v13193_v0 }
 0xafb   :  { %4402 = vmatprep.subr.bf16.mxu1 %v13197_v37 }
 0xafc   :  { %10306 = vmatpush3.bf16.msra.mxu0 %v11170_v4 }
 0xafd   :  { %10307 = vmatprep.subr.bf16.mxu0 %v14380_v8 }
 0xafe   :  { %4403 = vmatpush1.bf16.msra.mxu1 %v13204_v63 }
 0xaff   :  { %4404 = vmatprep.subr.bf16.mxu1 %v13208_v53 }
 0xb00   :  { %10308 = vmatpush3.bf16.msra.mxu0 %v11171_v62  ;;  %v3981_v62 = vrot.slane %v3968_v54, %v12483_v18 }
 0xb01   :  { %10309 = vmatprep.subr.bf16.mxu0 %v14380_v8 }
 0xb02   :  { %4405 = vmatpush1.bf16.msra.mxu1 %v13216_v55 }
 0xb03   :  { %4406 = vmatprep.subr.bf16.mxu1 %v13219_v25 }
 0xb04   :  { %10310 = vmatpush3.bf16.msra.mxu0 %v11172_v27 }
 0xb05   :  { %10311 = vmatprep.subr.bf16.mxu0 %v14380_v8 }
 0xb06   :  { %4407 = vmatpush1.bf16.msra.mxu1 %v13225_v5 }
 0xb07   :  { %4408 = vmatprep.subr.bf16.mxu1 %v13228_v47 }
 0xb0a   :  { %4409 = vmatpush1.bf16.msra.mxu1 %v13234_v21 }
 0xb0b   :  { %4675 = vmatprep.subr.bf16.mxu1 %v13158_v43  ;;  %v11173_v43 = vld [vmem:[#allocation17 + $0x98] ss:$12 sps:$4 sm:$0xff]  }
 0xb0c   :  { %10312 = vmatpush3.bf16.msra.mxu0 %v11173_v43 }
 0xb0d   :  { %10313 = vmatprep.subr.bf16.mxu0 %v14380_v8 }
 0xb10   :  { %10314 = vmatpush3.bf16.msra.mxu0 %v11174_v44 }
 0xb11   :  { %10319 = vmatprep.subr.bf16.mxu0 %v14380_v8 }
 0xbc0   :  { %v4147_v28 = vpop.f32.mrb[68].mxu1 }
 0xbc1   :  { %v4148_v14 = vadd.f32 %v4147_v28, %v3973_v20  ;;  %v4188_v26 = vpop.f32.mrb[60].mxu0  ;;  %v4149_v35 = vpop.f32.mrb[69].mxu1 }
 0xbc2   :  { %v4150_v40 = vadd.f32 %v4149_v35, %v3977_v33  ;;  %v10297_v1 = vpop.f32.mrb[61].mxu0  ;;  %v4151_v19 = vpop.f32.mrb[70].mxu1  ;;  %v4189_v43 = vadd.f32 %v4188_v26, %v3981_v62 }
 0xbc3   :  { %v4194_v2 = vadd.f32 %v4148_v14, %v13282_v38  ;;  %v4191_v6 = vpop.f32.mrb[62].mxu0  ;;  %v4152_v48 = vpop.f32.mrb[71].mxu1 }
 0xbc4   :  { %v4195_v52 = vadd.f32 %v4150_v40, %v13287_v24  ;;  %v10298_v41 = vpop.f32.mrb[63].mxu0 }
 0xbc5   :  { %v9256_v22 = vmul.f32 -1.442695, %v4194_v2 }
 0xbc6   :  { %v9257_v57 = vmul.f32 -1.442695, %v4195_v52 }
 0xbc7   :  { %11441 = vpow2.f32 %v9256_v22 }
 0xbc8   :  { %11443 = vpow2.f32 %v9257_v57 }
 0xbd1   :  { %v11442_v49 = vpop.eup %11441 }
 0xbd2   :  { %v4202_v3 = vadd.f32 1.0, %v11442_v49  ;;  %v11444_v4 = vpop.eup %11443 }
 0xbd3   :  { %v4203_v27 = vadd.f32 1.0, %v11444_v4 }
 0xbd4   :  { %11445 = vrcp.f32 %v4202_v3 }
 0xbd5   :  { %11447 = vrcp.f32 %v4203_v27 }
 0xbde   :  { %v11446_v44 = vpop.eup %11445 }
 0xbdf   :  { %v4208_v20 = vmul.f32 %v11446_v44, %v4189_v43  ;;  %v11448_v24 = vpop.eup %11447 }
 0xbe0   :  { %v4211_v33 = vsub.f32 1.0, %v11448_v24  ;;  %v4213_v35 = vmul.f32 %v11448_v24, %v13335_v45 }
 0xbe1   :  { %v4209_v38 = vadd.f32 %v4208_v20, %v13276_v60 }
 0xbe3   :  { %11449 = vtanh.f32 %v4209_v38 }
 0xbed   :  { %v11450_v28 = vpop.eup %11449 }
 0xbee   :  { %v4212_v14 = vmul.f32 %v11450_v28, %v4211_v33 }
 0xbf0   :  { %v13375_v40 = vadd.f32 %v4213_v35, %v4212_v14 }
 0xbf2   :  { %v5918_v1 = vmul.f32 %v13333_v29, %v13375_v40  ;;  %v4216_v54 = vpack.c.bf16 %v13375_v40, %v13375_v40 }
 0xbf4   :  { %5927 = vadd.xlane.f32.xlu0 %v5918_v1  ;;  %4427 = vmatmul.mubr.bf16.vlgmr.msra.gmra.mrb[72].mxu1 %v4216_v54 }
 0xbf5   :  { %10316 = vmatmul.mubr.bf16.vlgmr.msra.gmra.mrb[64].mxu0 %v4216_v54  ;;  %4676 = vmatpush1.bf16.msra.mxu1 %v13162_v13  ;;  %v11175_v13 = vld [vmem:[#allocation17 + $0x8] ss:$12 sps:$4 sm:$0xff]   ;;  %v13425_v54 = vld [vmem:[#allocation17] ss:$12 sps:$4 sm:$0xff]  }
 0xbf6   :  { %4677 = vmatprep.subr.bf16.mxu1 %v13165_v39  ;;  %4707 = vmatprep.mubr.bf16.mxu1 %v14379_v58  ;;  %v11176_v39 = vld [vmem:[#allocation17 + $0x20] ss:$12 sps:$4 sm:$0xff]  }
 0xbf7   :  { %10335 = vmatprep.mubr.msk.bf16.mxu0 %vm11988_vm1, %v14380_v8  ;;  %10320 = vmatpush3.bf16.msra.mxu0 %v11175_v13  ;;  %v11186_v13 = vld [vmem:[#allocation17 + $0x8] ss:$12 sps:$4 sm:$0xff]  }
 0xbf8   :  { %10321 = vmatprep.subr.bf16.mxu0 %v14380_v8 }
 0xbf9   :  { %4678 = vmatpush1.bf16.msra.mxu1 %v13171_v51  ;;  %v11177_v51 = vld [vmem:[#allocation17 + $0x38] ss:$12 sps:$4 sm:$0xff]  }
 0xbfa   :  { %4679 = vmatprep.subr.bf16.mxu1 %v13176_v42  ;;  %v11178_v42 = vld [vmem:[#allocation17 + $0x50] ss:$12 sps:$4 sm:$0xff]  }
 0xbfb   :  { %10322 = vmatpush3.bf16.msra.mxu0 %v11176_v39  ;;  %v13429_v39 = vld [vmem:[#allocation17 + $0x1c] ss:$12 sps:$4 sm:$0xff]  }
 0xbfc   :  { %10323 = vmatprep.subr.bf16.mxu0 %v14380_v8 }
 0xbfd   :  { %4680 = vmatpush1.bf16.msra.mxu1 %v13182_v7  ;;  %v11179_v7 = vld [vmem:[#allocation17 + $0x68] ss:$12 sps:$4 sm:$0xff]  }
 0xbfe   :  { %4681 = vmatprep.subr.bf16.mxu1 %v13187_v16  ;;  %v11180_v16 = vld [vmem:[#allocation17 + $0x80] ss:$12 sps:$4 sm:$0xff]  }
 0xbff   :  { %10324 = vmatpush3.bf16.msra.mxu0 %v11177_v51  ;;  %v13432_v51 = vld [vmem:[#allocation17 + $0x18] ss:$12 sps:$4 sm:$0xff]  }
 0xc00   :  { %10325 = vmatprep.subr.bf16.mxu0 %v14380_v8 }
 0xc01   :  { %4682 = vmatpush1.bf16.msra.mxu1 %v13193_v0  ;;  %v11181_v0 = vld [vmem:[#allocation17 + $0x98] ss:$12 sps:$4 sm:$0xff]  }
 0xc02   :  { %4683 = vmatprep.subr.bf16.mxu1 %v13197_v37  ;;  %v11182_v37 = vld [vmem:[#allocation17 + $0xb0] ss:$12 sps:$4 sm:$0xff]  }
 0xc03   :  { %10326 = vmatpush3.bf16.msra.mxu0 %v11178_v42  ;;  %v11190_v42 = vld [vmem:[#allocation17 + $0x20] ss:$12 sps:$4 sm:$0xff]  }
 0xc04   :  { %10327 = vmatprep.subr.bf16.mxu0 %v14380_v8 }
 0xc05   :  { %4684 = vmatpush1.bf16.msra.mxu1 %v13204_v63  ;;  %v4249_v63 = vld [vmem:[#allocation18] sm:$0x7] }
 0xc06   :  { %4685 = vmatprep.subr.bf16.mxu1 %v13208_v53  ;;  %v4254_v53 = vrot.slane %v4249_v63, %v12479_v15  ;;  %v4262_v62 = vrot.slane %v4249_v63, %v12483_v18 }
 0xc07   :  { %10328 = vmatpush3.bf16.msra.mxu0 %v11179_v7  ;;  %v13436_v7 = vld [vmem:[#allocation17 + $0x34] ss:$12 sps:$4 sm:$0xff]  }
 0xc08   :  { %10329 = vmatprep.subr.bf16.mxu0 %v14380_v8 }
 0xc09   :  { %4686 = vmatpush1.bf16.msra.mxu1 %v13216_v55  ;;  %v4258_v55 = vrot.slane %v4249_v63, %v12481_v17  ;;  %v13446_v63 = vld [vmem:[#allocation17 + $0x48] ss:$12 sps:$4 sm:$0xff]  }
 0xc0a   :  { %4687 = vmatprep.subr.bf16.mxu1 %v13219_v25 }
 0xc0b   :  { %10330 = vmatpush3.bf16.msra.mxu0 %v11180_v16  ;;  %v13439_v16 = vld [vmem:[#allocation17 + $0x30] ss:$12 sps:$4 sm:$0xff]  }
 0xc0c   :  { %10331 = vmatprep.subr.bf16.mxu0 %v14380_v8 }
 0xc0d   :  { %4688 = vmatpush1.bf16.msra.mxu1 %v13225_v5 }
 0xc0e   :  { %4689 = vmatprep.subr.bf16.mxu1 %v13228_v47 }
 0xc0f   :  { %10332 = vmatpush3.bf16.msra.mxu0 %v11181_v0  ;;  %v11194_v0 = vld [vmem:[#allocation17 + $0x38] ss:$12 sps:$4 sm:$0xff]  }
 0xc10   :  { %10333 = vmatprep.subr.bf16.mxu0 %v14380_v8 }
 0xc11   :  { %4690 = vmatpush1.bf16.msra.mxu1 %v13234_v21 }
 0xc13   :  { %10334 = vmatpush3.bf16.msra.mxu0 %v11182_v37  ;;  %v13443_v37 = vld [vmem:[#allocation17 + $0x4c] ss:$12 sps:$4 sm:$0xff]  }
 0xc14   :  { %10339 = vmatprep.subr.bf16.mxu0 %v14380_v8 }
 0xcc7   :  { %v4428_v25 = vpop.f32.mrb[72].mxu1 }
 0xcc8   :  { %v4429_v5 = vadd.f32 %v4428_v25, %v4254_v53  ;;  %v4469_v47 = vpop.f32.mrb[64].mxu0  ;;  %v4430_v21 = vpop.f32.mrb[73].mxu1  ;;  %v11198_v53 = vld [vmem:[#allocation17 + $0x50] ss:$12 sps:$4 sm:$0xff]  }
 0xcc9   :  { %v4431_v60 = vadd.f32 %v4430_v21, %v4258_v55  ;;  %v10317_v26 = vpop.f32.mrb[65].mxu0  ;;  %v4432_v19 = vpop.f32.mrb[74].mxu1  ;;  %v4470_v43 = vadd.f32 %v4469_v47, %v4262_v62  ;;  %v13450_v55 = vld [vmem:[#allocation17 + $0x60] ss:$12 sps:$4 sm:$0xff]   ;;  %v13452_v25 = vld [vmem:[#allocation17 + $0x64] ss:$12 sps:$4 sm:$0xff]  }
 0xcca   :  { %v4475_v2 = vadd.f32 %v4429_v5, %v13292_v9  ;;  %v4472_v6 = vpop.f32.mrb[66].mxu0  ;;  %v4433_v48 = vpop.f32.mrb[75].mxu1  ;;  %v11202_v5 = vld [vmem:[#allocation17 + $0x68] ss:$12 sps:$4 sm:$0xff]   ;;  %v13459_v21 = vld [vmem:[#allocation17 + $0x78] ss:$12 sps:$4 sm:$0xff]  }
 0xccb   :  { %v4476_v52 = vadd.f32 %v4431_v60, %v13297_v11  ;;  %v10318_v41 = vpop.f32.mrb[67].mxu0  ;;  %v13455_v47 = vld [vmem:[#allocation17 + $0x7c] ss:$12 sps:$4 sm:$0xff]   ;;  %v11206_v60 = vld [vmem:[#allocation17 + $0x80] ss:$12 sps:$4 sm:$0xff]  }
 0xccc   :  { %v9282_v22 = vmul.f32 -1.442695, %v4475_v2  ;;  %v13463_v26 = vld [vmem:[#allocation17 + $0x94] ss:$12 sps:$4 sm:$0xff]   ;;  %v13466_v19 = vld [vmem:[#allocation17 + $0x90] ss:$12 sps:$4 sm:$0xff]  }
 0xccd   :  { %v9283_v57 = vmul.f32 -1.442695, %v4476_v52  ;;  %v11210_v2 = vld [vmem:[#allocation17 + $0x98] ss:$12 sps:$4 sm:$0xff]   ;;  %v13473_v48 = vld [vmem:[#allocation17 + $0xa8] ss:$12 sps:$4 sm:$0xff]  }
 0xcce   :  { %11451 = vpow2.f32 %v9282_v22  ;;  %v13470_v6 = vld [vmem:[#allocation17 + $0xac] ss:$12 sps:$4 sm:$0xff]   ;;  %v11214_v52 = vld [vmem:[#allocation17 + $0xb0] ss:$12 sps:$4 sm:$0xff]   ;;  %v4530_v41 = vld [vmem:[#allocation18] sm:$0x7] }
 0xccf   :  { %11453 = vpow2.f32 %v9283_v57  ;;  %v4535_v22 = vrot.slane %v4530_v41, %v12479_v15  ;;  %v4539_v57 = vrot.slane %v4530_v41, %v12481_v17 }
 0xcd8   :  { %v11452_v49 = vpop.eup %11451 }
 0xcd9   :  { %v4483_v3 = vadd.f32 1.0, %v11452_v49  ;;  %v11454_v4 = vpop.eup %11453 }
 0xcda   :  { %v4484_v27 = vadd.f32 1.0, %v11454_v4 }
 0xcdb   :  { %11455 = vrcp.f32 %v4483_v3 }
 0xcdc   :  { %11457 = vrcp.f32 %v4484_v27 }
 0xce5   :  { %v11456_v44 = vpop.eup %11455 }
 0xce6   :  { %v4489_v20 = vmul.f32 %v11456_v44, %v4470_v43  ;;  %v11458_v11 = vpop.eup %11457 }
 0xce7   :  { %v4492_v38 = vsub.f32 1.0, %v11458_v11  ;;  %v4494_v28 = vmul.f32 %v11458_v11, %v13375_v40 }
 0xce8   :  { %v4490_v9 = vadd.f32 %v4489_v20, %v13290_v31  ;;  %v13423_v31 = vld [vmem:[#allocation17 + $0x4] ss:$12 sps:$4 sm:$0xff]  }
 0xce9   :  { %4956 = vmatprep.subr.bf16.mxu1 %v13423_v31 }
 0xcea   :  { %11459 = vtanh.f32 %v4490_v9 }
 0xcf4   :  { %v11460_v24 = vpop.eup %11459 }
 0xcf5   :  { %v4493_v33 = vmul.f32 %v11460_v24, %v4492_v38 }
 0xcf7   :  { %v13414_v14 = vadd.f32 %v4494_v28, %v4493_v33 }
 0xcf9   :  { %v5919_v35 = vmul.f32 %v13333_v29, %v13414_v14  ;;  %v4497_v1 = vpack.c.bf16 %v13414_v14, %v13414_v14 }
 0xcfb   :  { %5929 = vadd.xlane.f32.xlu1 %v5919_v35  ;;  %4708 = vmatmul.mubr.bf16.vlgmr.msra.gmra.mrb[76].mxu1 %v4497_v1 }
 0xcfc   :  { %10336 = vmatmul.mubr.bf16.vlgmr.msra.gmra.mrb[68].mxu0 %v4497_v1  ;;  %4988 = vmatprep.mubr.bf16.mxu1 %v14379_v58 }
 0xcfd   :  { %10355 = vmatprep.mubr.msk.bf16.mxu0 %vm11988_vm1, %v14380_v8  ;;  %4957 = vmatpush1.bf16.msra.mxu1 %v13425_v54 }
 0xcfe   :  { %10340 = vmatpush3.bf16.msra.mxu0 %v11186_v13  ;;  %4958 = vmatprep.subr.bf16.mxu1 %v13429_v39 }
 0xcff   :  { %10341 = vmatprep.subr.bf16.mxu0 %v14380_v8 }
 0xd01   :  { %4959 = vmatpush1.bf16.msra.mxu1 %v13432_v51 }
 0xd02   :  { %10342 = vmatpush3.bf16.msra.mxu0 %v11190_v42  ;;  %4960 = vmatprep.subr.bf16.mxu1 %v13436_v7  ;;  %v4543_v42 = vrot.slane %v4530_v41, %v12483_v18 }
 0xd03   :  { %10343 = vmatprep.subr.bf16.mxu0 %v14380_v8 }
 0xd05   :  { %4961 = vmatpush1.bf16.msra.mxu1 %v13439_v16 }
 0xd06   :  { %10344 = vmatpush3.bf16.msra.mxu0 %v11194_v0  ;;  %4962 = vmatprep.subr.bf16.mxu1 %v13443_v37 }
 0xd07   :  { %10345 = vmatprep.subr.bf16.mxu0 %v14380_v8 }
 0xd09   :  { %4963 = vmatpush1.bf16.msra.mxu1 %v13446_v63 }
 0xd0a   :  { %10346 = vmatpush3.bf16.msra.mxu0 %v11198_v53  ;;  %4964 = vmatprep.subr.bf16.mxu1 %v13452_v25 }
 0xd0b   :  { %10347 = vmatprep.subr.bf16.mxu0 %v14380_v8 }
 0xd0d   :  { %4965 = vmatpush1.bf16.msra.mxu1 %v13450_v55 }
 0xd0e   :  { %10348 = vmatpush3.bf16.msra.mxu0 %v11202_v5  ;;  %4966 = vmatprep.subr.bf16.mxu1 %v13455_v47 }
 0xd0f   :  { %10349 = vmatprep.subr.bf16.mxu0 %v14380_v8 }
 0xd11   :  { %4967 = vmatpush1.bf16.msra.mxu1 %v13459_v21 }
 0xd12   :  { %10350 = vmatpush3.bf16.msra.mxu0 %v11206_v60  ;;  %4968 = vmatprep.subr.bf16.mxu1 %v13463_v26 }
 0xd13   :  { %10351 = vmatprep.subr.bf16.mxu0 %v14380_v8 }
 0xd15   :  { %4969 = vmatpush1.bf16.msra.mxu1 %v13466_v19 }
 0xd16   :  { %10352 = vmatpush3.bf16.msra.mxu0 %v11210_v2  ;;  %4970 = vmatprep.subr.bf16.mxu1 %v13470_v6 }
 0xd17   :  { %10353 = vmatprep.subr.bf16.mxu0 %v14380_v8 }
 0xd19   :  { %4971 = vmatpush1.bf16.msra.mxu1 %v13473_v48 }
 0xd1a   :  { %10354 = vmatpush3.bf16.msra.mxu0 %v11214_v52  ;;  %5237 = vmatprep.subr.bf16.mxu1 %v13423_v31 }
 0xd1b   :  { %10359 = vmatprep.subr.bf16.mxu0 %v14380_v8 }
 0xdce   :  { %v4709_v49 = vpop.f32.mrb[76].mxu1 }
 0xdcf   :  { %v4710_v3 = vadd.f32 %v4709_v49, %v4535_v22  ;;  %v4750_v4 = vpop.f32.mrb[68].mxu0  ;;  %v4711_v62 = vpop.f32.mrb[77].mxu1 }
 0xdd0   :  { %v4712_v27 = vadd.f32 %v4711_v62, %v4539_v57  ;;  %v10337_v43 = vpop.f32.mrb[69].mxu0  ;;  %v4713_v44 = vpop.f32.mrb[78].mxu1  ;;  %v4751_v53 = vadd.f32 %v4750_v4, %v4543_v42  ;;  %v11216_v4 = vld [vmem:[#allocation17 + $0x20] ss:$12 sps:$4 sm:$0xff]   ;;  %v11217_v62 = vld [vmem:[#allocation17 + $0x38] ss:$12 sps:$4 sm:$0xff]  }
 0xdd1   :  { %v4756_v20 = vadd.f32 %v4710_v3, %v13302_v12  ;;  %v4753_v9 = vpop.f32.mrb[70].mxu0  ;;  %v4714_v11 = vpop.f32.mrb[79].mxu1  ;;  %v11219_v43 = vld [vmem:[#allocation17 + $0x68] ss:$12 sps:$4 sm:$0xff]   ;;  %v11220_v44 = vld [vmem:[#allocation17 + $0x80] ss:$12 sps:$4 sm:$0xff]  }
 0xdd2   :  { %v4757_v38 = vadd.f32 %v4712_v27, %v13307_v46  ;;  %v10338_v24 = vpop.f32.mrb[71].mxu0  ;;  %v11218_v27 = vld [vmem:[#allocation17 + $0x50] ss:$12 sps:$4 sm:$0xff]   ;;  %v4811_v11 = vld [vmem:[#allocation18] sm:$0x7] }
 0xdd3   :  { %v9308_v33 = vmul.f32 -1.442695, %v4756_v20  ;;  %v11221_v20 = vld [vmem:[#allocation17 + $0x98] ss:$12 sps:$4 sm:$0xff]   ;;  %v11222_v9 = vld [vmem:[#allocation17 + $0xb0] ss:$12 sps:$4 sm:$0xff]   ;;  %v4820_v24 = vrot.slane %v4811_v11, %v12481_v17 }
 0xdd4   :  { %v9309_v28 = vmul.f32 -1.442695, %v4757_v38  ;;  %v4816_v38 = vrot.slane %v4811_v11, %v12479_v15 }
 0xdd5   :  { %11461 = vpow2.f32 %v9308_v33 }
 0xdd6   :  { %11463 = vpow2.f32 %v9309_v28 }
 0xddf   :  { %v11462_v35 = vpop.eup %11461 }
 0xde0   :  { %v4764_v1 = vadd.f32 1.0, %v11462_v35  ;;  %v11464_v13 = vpop.eup %11463 }
 0xde1   :  { %v4765_v0 = vadd.f32 1.0, %v11464_v13 }
 0xde2   :  { %11465 = vrcp.f32 %v4764_v1 }
 0xde3   :  { %11467 = vrcp.f32 %v4765_v0 }
 0xdec   :  { %v11466_v5 = vpop.eup %11465 }
 0xded   :  { %v4770_v60 = vmul.f32 %v11466_v5, %v4751_v53  ;;  %v11468_v46 = vpop.eup %11467 }
 0xdee   :  { %v4773_v2 = vsub.f32 1.0, %v11468_v46  ;;  %v4775_v57 = vmul.f32 %v11468_v46, %v13414_v14 }
 0xdef   :  { %v4771_v12 = vadd.f32 %v4770_v60, %v13285_v30  ;;  %v11215_v30 = vld [vmem:[#allocation17 + $0x8] ss:$12 sps:$4 sm:$0xff]  }
 0xdf1   :  { %11469 = vtanh.f32 %v4771_v12 }
 0xdfb   :  { %v11470_v52 = vpop.eup %11469 }
 0xdfc   :  { %v4774_v22 = vmul.f32 %v11470_v52, %v4773_v2 }
 0xdfe   :  { %v13487_v49 = vadd.f32 %v4775_v57, %v4774_v22 }
 0xe00   :  { %v5920_v3 = vmul.f32 %v13333_v29, %v13487_v49  ;;  %v4778_v41 = vpack.c.bf16 %v13487_v49, %v13487_v49 }
 0xe02   :  { %5931 = vadd.xlane.f32.xlu1 %v5920_v3  ;;  %4989 = vmatmul.mubr.bf16.vlgmr.msra.gmra.mrb[80].mxu1 %v4778_v41 }
 0xe03   :  { %10356 = vmatmul.mubr.bf16.vlgmr.msra.gmra.mrb[72].mxu0 %v4778_v41  ;;  %5238 = vmatpush1.bf16.msra.mxu1 %v13425_v54  ;;  %v4824_v41 = vrot.slane %v4811_v11, %v12483_v18 }
 0xe04   :  { %5239 = vmatprep.subr.bf16.mxu1 %v13429_v39  ;;  %5269 = vmatprep.mubr.bf16.mxu1 %v14379_v58 }
 0xe05   :  { %10375 = vmatprep.mubr.msk.bf16.mxu0 %vm11988_vm1, %v14380_v8  ;;  %10360 = vmatpush3.bf16.msra.mxu0 %v11215_v30 }
 0xe06   :  { %10361 = vmatprep.subr.bf16.mxu0 %v14380_v8 }
 0xe07   :  { %5240 = vmatpush1.bf16.msra.mxu1 %v13432_v51 }
 0xe08   :  { %5241 = vmatprep.subr.bf16.mxu1 %v13436_v7 }
 0xe09   :  { %10362 = vmatpush3.bf16.msra.mxu0 %v11216_v4 }
 0xe0a   :  { %10363 = vmatprep.subr.bf16.mxu0 %v14380_v8 }
 0xe0b   :  { %5242 = vmatpush1.bf16.msra.mxu1 %v13439_v16 }
 0xe0c   :  { %5243 = vmatprep.subr.bf16.mxu1 %v13443_v37 }
 0xe0d   :  { %10364 = vmatpush3.bf16.msra.mxu0 %v11217_v62 }
 0xe0e   :  { %10365 = vmatprep.subr.bf16.mxu0 %v14380_v8 }
 0xe0f   :  { %5244 = vmatpush1.bf16.msra.mxu1 %v13446_v63 }
 0xe10   :  { %5245 = vmatprep.subr.bf16.mxu1 %v13452_v25 }
 0xe11   :  { %10366 = vmatpush3.bf16.msra.mxu0 %v11218_v27 }
 0xe12   :  { %10367 = vmatprep.subr.bf16.mxu0 %v14380_v8 }
 0xe13   :  { %5246 = vmatpush1.bf16.msra.mxu1 %v13450_v55 }
 0xe14   :  { %5247 = vmatprep.subr.bf16.mxu1 %v13455_v47 }
 0xe15   :  { %10368 = vmatpush3.bf16.msra.mxu0 %v11219_v43 }
 0xe16   :  { %10369 = vmatprep.subr.bf16.mxu0 %v14380_v8 }
 0xe17   :  { %5248 = vmatpush1.bf16.msra.mxu1 %v13459_v21 }
 0xe18   :  { %5249 = vmatprep.subr.bf16.mxu1 %v13463_v26 }
 0xe19   :  { %10370 = vmatpush3.bf16.msra.mxu0 %v11220_v44 }
 0xe1a   :  { %10371 = vmatprep.subr.bf16.mxu0 %v14380_v8 }
 0xe1b   :  { %5250 = vmatpush1.bf16.msra.mxu1 %v13466_v19 }
 0xe1c   :  { %5251 = vmatprep.subr.bf16.mxu1 %v13470_v6 }
 0xe1d   :  { %10372 = vmatpush3.bf16.msra.mxu0 %v11221_v20 }
 0xe1e   :  { %10373 = vmatprep.subr.bf16.mxu0 %v14380_v8 }
 0xe1f   :  { %5252 = vmatpush1.bf16.msra.mxu1 %v13473_v48 }
 0xe20   :  { %5518 = vmatprep.subr.bf16.mxu1 %v13423_v31 }
 0xe21   :  { %10374 = vmatpush3.bf16.msra.mxu0 %v11222_v9 }
 0xe22   :  { %10379 = vmatprep.subr.bf16.mxu0 %v14380_v8 }
 0xed5   :  { %v4990_v33 = vpop.f32.mrb[80].mxu1 }
 0xed6   :  { %v4991_v28 = vadd.f32 %v4990_v33, %v4816_v38  ;;  %v5031_v35 = vpop.f32.mrb[72].mxu0  ;;  %v4992_v1 = vpop.f32.mrb[81].mxu1  ;;  %v11224_v33 = vld [vmem:[#allocation17 + $0x20] ss:$12 sps:$4 sm:$0xff]  }
 0xed7   :  { %v4993_v13 = vadd.f32 %v4992_v1, %v4820_v24  ;;  %v10357_v42 = vpop.f32.mrb[73].mxu0  ;;  %v4994_v0 = vpop.f32.mrb[82].mxu1  ;;  %v5032_v4 = vadd.f32 %v5031_v35, %v4824_v41  ;;  %v11226_v35 = vld [vmem:[#allocation17 + $0x50] ss:$12 sps:$4 sm:$0xff]   ;;  %v11227_v1 = vld [vmem:[#allocation17 + $0x68] ss:$12 sps:$4 sm:$0xff]  }
 0xed8   :  { %v5037_v53 = vadd.f32 %v4991_v28, %v13312_v50  ;;  %v5034_v5 = vpop.f32.mrb[74].mxu0  ;;  %v4995_v60 = vpop.f32.mrb[83].mxu1  ;;  %v11225_v28 = vld [vmem:[#allocation17 + $0x38] ss:$12 sps:$4 sm:$0xff]   ;;  %v11230_v42 = vld [vmem:[#allocation17 + $0xb0] ss:$12 sps:$4 sm:$0xff]  }
 0xed9   :  { %v5038_v12 = vadd.f32 %v4993_v13, %v13314_v10  ;;  %v10358_v46 = vpop.f32.mrb[75].mxu0  ;;  %v11228_v13 = vld [vmem:[#allocation17 + $0x80] ss:$12 sps:$4 sm:$0xff]  }
 0xeda   :  { %v9334_v2 = vmul.f32 -1.442695, %v5037_v53  ;;  %v5092_v0 = vld [vmem:[#allocation18] sm:$0x7] }
 0xedb   :  { %v9335_v52 = vmul.f32 -1.442695, %v5038_v12  ;;  %v5097_v53 = vrot.slane %v5092_v0, %v12479_v15  ;;  %v5101_v5 = vrot.slane %v5092_v0, %v12481_v17 }
 0xedc   :  { %11471 = vpow2.f32 %v9334_v2 }
 0xedd   :  { %11473 = vpow2.f32 %v9335_v52 }
 0xee6   :  { %v11472_v22 = vpop.eup %11471 }
 0xee7   :  { %v5045_v57 = vadd.f32 1.0, %v11472_v22  ;;  %v11474_v3 = vpop.eup %11473 }
 0xee8   :  { %v5046_v30 = vadd.f32 1.0, %v11474_v3 }
 0xee9   :  { %11475 = vrcp.f32 %v5045_v57 }
 0xeea   :  { %11477 = vrcp.f32 %v5046_v30 }
 0xef3   :  { %v11476_v62 = vpop.eup %11475 }
 0xef4   :  { %v5051_v27 = vmul.f32 %v11476_v62, %v5032_v4  ;;  %v11478_v10 = vpop.eup %11477 }
 0xef5   :  { %v5054_v43 = vsub.f32 1.0, %v11478_v10  ;;  %v5056_v9 = vmul.f32 %v11478_v10, %v13487_v49 }
 0xef6   :  { %v5052_v50 = vadd.f32 %v5051_v27, %v13300_v56  ;;  %v11223_v56 = vld [vmem:[#allocation17 + $0x8] ss:$12 sps:$4 sm:$0xff]  }
 0xef8   :  { %11479 = vtanh.f32 %v5052_v50 }
 0xf02   :  { %v11480_v44 = vpop.eup %11479 }
 0xf03   :  { %v5055_v20 = vmul.f32 %v11480_v44, %v5054_v43 }
 0xf05   :  { %v13527_v38 = vadd.f32 %v5056_v9, %v5055_v20  ;;  %v5105_v20 = vrot.slane %v5092_v0, %v12483_v18 }
 0xf07   :  { %v5921_v24 = vmul.f32 %v13333_v29, %v13527_v38  ;;  %v5059_v11 = vpack.c.bf16 %v13527_v38, %v13527_v38 }
 0xf09   :  { %5933 = vadd.xlane.f32.xlu0 %v5921_v24  ;;  %5270 = vmatmul.mubr.bf16.vlgmr.msra.gmra.mrb[84].mxu1 %v5059_v11 }
 0xf0a   :  { %10376 = vmatmul.mubr.bf16.vlgmr.msra.gmra.mrb[76].mxu0 %v5059_v11  ;;  %5519 = vmatpush1.bf16.msra.mxu1 %v13425_v54 }
 0xf0b   :  { %5520 = vmatprep.subr.bf16.mxu1 %v13429_v39  ;;  %5550 = vmatprep.mubr.bf16.mxu1 %v14379_v58 }
 0xf0c   :  { %10395 = vmatprep.mubr.msk.bf16.mxu0 %vm11988_vm1, %v14380_v8  ;;  %10380 = vmatpush3.bf16.msra.mxu0 %v11223_v56 }
 0xf0d   :  { %10381 = vmatprep.subr.bf16.mxu0 %v14380_v8 }
 0xf0e   :  { %5521 = vmatpush1.bf16.msra.mxu1 %v13432_v51 }
 0xf0f   :  { %5522 = vmatprep.subr.bf16.mxu1 %v13436_v7 }
 0xf10   :  { %10382 = vmatpush3.bf16.msra.mxu0 %v11224_v33 }
 0xf11   :  { %10383 = vmatprep.subr.bf16.mxu0 %v14380_v8 }
 0xf12   :  { %5523 = vmatpush1.bf16.msra.mxu1 %v13439_v16 }
 0xf13   :  { %5524 = vmatprep.subr.bf16.mxu1 %v13443_v37 }
 0xf14   :  { %10384 = vmatpush3.bf16.msra.mxu0 %v11225_v28 }
 0xf15   :  { %10385 = vmatprep.subr.bf16.mxu0 %v14380_v8 }
 0xf16   :  { %5525 = vmatpush1.bf16.msra.mxu1 %v13446_v63 }
 0xf17   :  { %5526 = vmatprep.subr.bf16.mxu1 %v13452_v25 }
 0xf18   :  { %10386 = vmatpush3.bf16.msra.mxu0 %v11226_v35 }
 0xf19   :  { %10387 = vmatprep.subr.bf16.mxu0 %v14380_v8 }
 0xf1a   :  { %5527 = vmatpush1.bf16.msra.mxu1 %v13450_v55 }
 0xf1b   :  { %5528 = vmatprep.subr.bf16.mxu1 %v13455_v47 }
 0xf1c   :  { %10388 = vmatpush3.bf16.msra.mxu0 %v11227_v1 }
 0xf1d   :  { %10389 = vmatprep.subr.bf16.mxu0 %v14380_v8 }
 0xf1e   :  { %5529 = vmatpush1.bf16.msra.mxu1 %v13459_v21 }
 0xf1f   :  { %5530 = vmatprep.subr.bf16.mxu1 %v13463_v26 }
 0xf20   :  { %10390 = vmatpush3.bf16.msra.mxu0 %v11228_v13 }
 0xf21   :  { %10391 = vmatprep.subr.bf16.mxu0 %v14380_v8 }
 0xf22   :  { %5531 = vmatpush1.bf16.msra.mxu1 %v13466_v19 }
 0xf23   :  { %5532 = vmatprep.subr.bf16.mxu1 %v13470_v6 }
 0xf26   :  { %5533 = vmatpush1.bf16.msra.mxu1 %v13473_v48 }
 0xf27   :  { %5799 = vmatprep.subr.bf16.mxu1 %v13423_v31  ;;  %v11229_v31 = vld [vmem:[#allocation17 + $0x98] ss:$12 sps:$4 sm:$0xff]  }
 0xf28   :  { %10392 = vmatpush3.bf16.msra.mxu0 %v11229_v31 }
 0xf29   :  { %10393 = vmatprep.subr.bf16.mxu0 %v14380_v8 }
 0xf2c   :  { %10394 = vmatpush3.bf16.msra.mxu0 %v11230_v42 }
 0xf2d   :  { %10399 = vmatprep.subr.bf16.mxu0 %v14380_v8 }
 0xfdc   :  { %v5271_v60 = vpop.f32.mrb[84].mxu1 }
 0xfdd   :  { %v5272_v12 = vadd.f32 %v5271_v60, %v5097_v53  ;;  %v5312_v46 = vpop.f32.mrb[76].mxu0  ;;  %v5273_v2 = vpop.f32.mrb[85].mxu1 }
 0xfde   :  { %v5274_v52 = vadd.f32 %v5273_v2, %v5101_v5  ;;  %v10377_v22 = vpop.f32.mrb[77].mxu0  ;;  %v5275_v57 = vpop.f32.mrb[86].mxu1  ;;  %v5313_v24 = vadd.f32 %v5312_v46, %v5105_v20 }
 0xfdf   :  { %v5318_v3 = vadd.f32 %v5272_v12, %v13316_v34  ;;  %v5315_v41 = vpop.f32.mrb[78].mxu0  ;;  %v5276_v30 = vpop.f32.mrb[87].mxu1 }
 0xfe0   :  { %v5319_v4 = vadd.f32 %v5274_v52, %v13318_v61  ;;  %v10378_v62 = vpop.f32.mrb[79].mxu0 }
 0xfe1   :  { %v9360_v27 = vmul.f32 -1.442695, %v5318_v3 }
 0xfe2   :  { %v9361_v50 = vmul.f32 -1.442695, %v5319_v4 }
 0xfe3   :  { %11481 = vpow2.f32 %v9360_v27 }
 0xfe4   :  { %11483 = vpow2.f32 %v9361_v50  ;;  %v5926_v50 = vpop.xlane.xlu0 %5925 }
 0xfed   :  { %v11482_v10 = vpop.eup %11481 }
 0xfee   :  { %v5326_v43 = vadd.f32 1.0, %v11482_v10  ;;  %v11484_v44 = vpop.eup %11483 }
 0xfef   :  { %v5327_v9 = vadd.f32 1.0, %v11484_v44 }
 0xff0   :  { %11485 = vrcp.f32 %v5326_v43 }
 0xff1   :  { %11487 = vrcp.f32 %v5327_v9 }
 0xffa   :  { %v11486_v11 = vpop.eup %11485 }
 0xffb   :  { %v5332_v56 = vmul.f32 %v11486_v11, %v5313_v24  ;;  %v11488_v61 = vpop.eup %11487 }
 0xffc   :  { %v5335_v33 = vsub.f32 1.0, %v11488_v61  ;;  %v5337_v1 = vmul.f32 %v11488_v61, %v13527_v38 }
 0xffd   :  { %v5333_v34 = vadd.f32 %v5332_v56, %v13295_v36  ;;  %v11231_v36 = vld [vmem:[#allocation17 + $0x8] ss:$12 sps:$4 sm:$0xff]   ;;  %v13611_v56 = vld [vmem:[#allocation20] ss:$0 sm:$0xff] }
 0xfff   :  { %11489 = vtanh.f32 %v5333_v34 }
0x1009   :  { %v11490_v28 = vpop.eup %11489 }
0x100a   :  { %v5336_v35 = vmul.f32 %v11490_v28, %v5335_v33 }
0x100c   :  { %v13567_v13 = vadd.f32 %v5337_v1, %v5336_v35  ;;  %v6052_v35 = vld [vmem:[%s14327_s15] sm:$0x7f] }
0x100d   :  { %v6051_v1 = vld [vmem:[%s14381_s28] sm:$0xff] }
0x100e   :  { %v5922_v31 = vmul.f32 %v13333_v29, %v13567_v13  ;;  %v5340_v42 = vpack.c.bf16 %v13567_v13, %v13567_v13  ;;  %v11232_v29 = vld [vmem:[#allocation17 + $0x20] ss:$12 sps:$4 sm:$0xff]  }
0x1010   :  { %5935 = vadd.xlane.f32.xlu1 %v5922_v31  ;;  %5551 = vmatmul.mubr.bf16.vlgmr.msra.gmra.mrb[88].mxu1 %v5340_v42  ;;  %v5654_v31 = vld [vmem:[#allocation18] sm:$0x7] }
0x1011   :  { %10396 = vmatmul.mubr.bf16.vlgmr.msra.gmra.mrb[80].mxu0 %v5340_v42  ;;  %5800 = vmatpush1.bf16.msra.mxu1 %v13425_v54  ;;  %v11233_v54 = vld [vmem:[#allocation17 + $0x38] ss:$12 sps:$4 sm:$0xff]   ;;  %v5659_v42 = vrot.slane %v5654_v31, %v12479_v15 }
0x1012   :  { %5801 = vmatprep.subr.bf16.mxu1 %v13429_v39  ;;  %5831 = vmatprep.mubr.bf16.mxu1 %v14379_v58  ;;  %v11234_v39 = vld [vmem:[#allocation17 + $0x50] ss:$12 sps:$4 sm:$0xff]  }
0x1013   :  { %10415 = vmatprep.mubr.msk.bf16.mxu0 %vm11988_vm1, %v14380_v8  ;;  %10400 = vmatpush3.bf16.msra.mxu0 %v11231_v36  ;;  %v5663_v36 = vrot.slane %v5654_v31, %v12481_v17 }
0x1014   :  { %10401 = vmatprep.subr.bf16.mxu0 %v14380_v8 }
0x1015   :  { %5802 = vmatpush1.bf16.msra.mxu1 %v13432_v51  ;;  %v11235_v51 = vld [vmem:[#allocation17 + $0x68] ss:$12 sps:$4 sm:$0xff]  }
0x1016   :  { %5803 = vmatprep.subr.bf16.mxu1 %v13436_v7  ;;  %v11236_v7 = vld [vmem:[#allocation17 + $0x80] ss:$12 sps:$4 sm:$0xff]  }
0x1017   :  { %10402 = vmatpush3.bf16.msra.mxu0 %v11232_v29 }
0x1018   :  { %10403 = vmatprep.subr.bf16.mxu0 %v14380_v8 }
0x1019   :  { %5804 = vmatpush1.bf16.msra.mxu1 %v13439_v16  ;;  %v11237_v16 = vld [vmem:[#allocation17 + $0x98] ss:$12 sps:$4 sm:$0xff]  }
0x101a   :  { %5805 = vmatprep.subr.bf16.mxu1 %v13443_v37  ;;  %v11238_v37 = vld [vmem:[#allocation17 + $0xb0] ss:$12 sps:$4 sm:$0xff]  }
0x101b   :  { %10404 = vmatpush3.bf16.msra.mxu0 %v11233_v54 }
0x101c   :  { %10405 = vmatprep.subr.bf16.mxu0 %v14380_v8 }
0x101d   :  { %5806 = vmatpush1.bf16.msra.mxu1 %v13446_v63  ;;  %v5373_v63 = vld [vmem:[#allocation18] sm:$0x7] }
0x101e   :  { %5807 = vmatprep.subr.bf16.mxu1 %v13452_v25  ;;  %v5382_v25 = vrot.slane %v5373_v63, %v12481_v17  ;;  %v5386_v41 = vrot.slane %v5373_v63, %v12483_v18 }
0x101f   :  { %10406 = vmatpush3.bf16.msra.mxu0 %v11234_v39 }
0x1020   :  { %10407 = vmatprep.subr.bf16.mxu0 %v14380_v8 }
0x1021   :  { %5808 = vmatpush1.bf16.msra.mxu1 %v13450_v55  ;;  %v5378_v55 = vrot.slane %v5373_v63, %v12479_v15  ;;  %v14382_v63 = vld [vmem:[#allocation38_spill] sm:$0xff] }
0x1022   :  { %5809 = vmatprep.subr.bf16.mxu1 %v13455_v47 }
0x1023   :  { %10408 = vmatpush3.bf16.msra.mxu0 %v11235_v51 }
0x1024   :  { %10409 = vmatprep.subr.bf16.mxu0 %v14380_v8 }
0x1025   :  { %5810 = vmatpush1.bf16.msra.mxu1 %v13459_v21 }
0x1026   :  { %5811 = vmatprep.subr.bf16.mxu1 %v13463_v26 }
0x1027   :  { %10410 = vmatpush3.bf16.msra.mxu0 %v11236_v7 }
0x1028   :  { %10411 = vmatprep.subr.bf16.mxu0 %v14380_v8 }
0x1029   :  { %5812 = vmatpush1.bf16.msra.mxu1 %v13466_v19 }
0x102a   :  { %5813 = vmatprep.subr.bf16.mxu1 %v13470_v6 }
0x102b   :  { %10412 = vmatpush3.bf16.msra.mxu0 %v11237_v16 }
0x102c   :  { %10413 = vmatprep.subr.bf16.mxu0 %v14380_v8 }
0x102d   :  { %5814 = vmatpush1.bf16.msra.mxu1 %v13473_v48 }
0x102e   :  { %10419 = vmatprep.subr.mxu1 %v14380_v8 }
0x102f   :  { %10414 = vmatpush3.bf16.msra.mxu0 %v11238_v37 }
0x10e3   :  { %v5552_v47 = vpop.f32.mrb[88].mxu1 }
0x10e4   :  { %v5553_v21 = vadd.f32 %v5552_v47, %v5378_v55  ;;  %v5593_v26 = vpop.f32.mrb[80].mxu0  ;;  %v5554_v19 = vpop.f32.mrb[89].mxu1 }
0x10e5   :  { %v5555_v6 = vadd.f32 %v5554_v19, %v5382_v25  ;;  %v10397_v48 = vpop.f32.mrb[81].mxu0  ;;  %v5556_v0 = vpop.f32.mrb[90].mxu1  ;;  %v5594_v4 = vadd.f32 %v5593_v26, %v5386_v41 }
0x10e6   :  { %v5599_v53 = vadd.f32 %v5553_v21, %v13320_v23  ;;  %v5596_v5 = vpop.f32.mrb[82].mxu0  ;;  %v5557_v60 = vpop.f32.mrb[91].mxu1  ;;  %v14383_v21 = vld [vmem:[#allocation39_spill] sm:$0xff] }
0x10e7   :  { %v5600_v12 = vadd.f32 %v5555_v6, %v13322_v59  ;;  %v10398_v46 = vpop.f32.mrb[83].mxu0  ;;  %v13605_v59 = vld [vmem:[#allocation6] ss:$0 sm:$0xff]  ;;  %v5667_v60 = vrot.slane %v5654_v31, %v12483_v18 }
0x10e8   :  { %v9386_v2 = vmul.f32 -1.442695, %v5599_v53  ;;  %v5948_v43 = vadd.f32 %v13605_v59, %v5926_v50 }
0x10e9   :  { %v9387_v52 = vmul.f32 -1.442695, %v5600_v12 }
0x10ea   :  { %11491 = vpow2.f32 %v9386_v2 }
0x10eb   :  { %11493 = vpow2.f32 %v9387_v52 }
0x10f4   :  { %v11492_v22 = vpop.eup %11491 }
0x10f5   :  { %v5607_v57 = vadd.f32 1.0, %v11492_v22  ;;  %v11494_v3 = vpop.eup %11493  ;;  %v14384_v22 = vld [vmem:[#allocation37_spill] sm:$0xff] }
0x10f6   :  { %v5608_v30 = vadd.f32 1.0, %v11494_v3  ;;  %v5928_v3 = vpop.xlane.xlu0 %5927 }
0x10f7   :  { %11495 = vrcp.f32 %v5607_v57  ;;  %v5949_v41 = vadd.f32 %v13605_v59, %v5928_v3 }
0x10f8   :  { %11497 = vrcp.f32 %v5608_v30  ;;  %v5930_v30 = vpop.xlane.xlu1 %5929 }
0x1101   :  { %v11496_v62 = vpop.eup %11495 }
0x1102   :  { %v5613_v27 = vmul.f32 %v11496_v62, %v5594_v4  ;;  %v11498_v10 = vpop.eup %11497  ;;  %v5950_v62 = vadd.f32 %v13605_v59, %v5930_v30  ;;  %v6149_v30 = vld [vmem:[%s14329_s17 + $0x50] sm:$0xff] }
0x1103   :  { %v5616_v44 = vsub.f32 1.0, %v11498_v10  ;;  %v5618_v24 = vmul.f32 %v11498_v10, %v13567_v13 }
0x1104   :  { %v5614_v23 = vadd.f32 %v5613_v27, %v13310_v32  ;;  %v5932_v27 = vpop.xlane.xlu1 %5931 }
0x1105   :  { %v5951_v10 = vadd.f32 %v13605_v59, %v5932_v27  ;;  %v6148_v27 = vld [vmem:[%s14329_s17 + $0x48] sm:$0xff] }
0x1106   :  { %11499 = vtanh.f32 %v5614_v23 }
0x1107   :  { %11501 = vtanh.f32 %v5948_v43  ;;  %v5934_v43 = vpop.xlane.xlu0 %5933 }
0x1110   :  { %v11500_v20 = vpop.eup %11499 }
0x1111   :  { %v5617_v9 = vmul.f32 %v11500_v20, %v5616_v44  ;;  %v11502_v61 = vpop.eup %11501 }
0x1112   :  { %v5964_v33 = vmul.f32 1.442695, %v11502_v61 }
0x1113   :  { %v13609_v11 = vadd.f32 %v5618_v24, %v5617_v9  ;;  %v5952_v24 = vadd.f32 %v13605_v59, %v5934_v43 }
0x1114   :  { %11503 = vpow2.f32 %v5964_v33 }
0x1115   :  { %v5923_v32 = vmul.f32 %v13611_v56, %v13609_v11  ;;  %v5621_v34 = vpack.c.bf16 %v13609_v11, %v13609_v11 }
0x1117   :  { %5937 = vadd.xlane.f32.xlu0 %v5923_v32  ;;  %5832 = vmatmul.mubr.bf16.vlgmr.msra.gmra.mrb[92].mxu1 %v5621_v34  ;;  %v5936_v32 = vpop.xlane.xlu1 %5935 }
0x1118   :  { %10416 = vmatmul.mubr.bf16.vlgmr.msra.gmra.mrb[84].mxu0 %v5621_v34  ;;  %10421 = vmatprep.mubr.msk.f32.mxu1 %vm11988_vm1, %v14380_v8  ;;  %v5953_v33 = vadd.f32 %v13605_v59, %v5936_v32 }
0x1119   :  { %10456 = vmatprep.mubr.msk.f32.mxu0 %vm11988_vm1, %v14380_v8  ;;  %10420 = vmatpush3.msk.msra.mxu1 %vm6064_vm2, %v6052_v35 }
0x111e   :  { %v13621_v28 = vpop.eup %11503 }
0x111f   :  { %10422 = vmatmul.mubr.msk.f32.vlgmr.msra.gmra.mrb[62].mxu1 %vm6060_vm3, %v6051_v1 }
0x1120   :  { %6268 = vmatprep.mubr.f32.mxu1 %v14380_v8 }
0x112d   :  { %5982 = vperm.xlu0 %11013, %v13621_v28  }
0x11a4   :  { %v5938_v1 = vpop.xlane.xlu0 %5937 }
0x11ea   :  { %v5833_v29 = vpop.f32.mrb[92].mxu1 }
0x11eb   :  { %v5834_v54 = vadd.f32 %v5833_v29, %v5659_v42  ;;  %v5874_v39 = vpop.f32.mrb[84].mxu0  ;;  %v5835_v51 = vpop.f32.mrb[93].mxu1  ;;  %v5954_v42 = vadd.f32 %v13605_v59, %v5938_v1  ;;  %v6161_v1 = vld [vmem:[%s14329_s17 + $0xb0] sm:$0xff] }
0x11ec   :  { %v5836_v7 = vadd.f32 %v5835_v51, %v5663_v36  ;;  %v10417_v16 = vpop.f32.mrb[85].mxu0  ;;  %v5837_v37 = vpop.f32.mrb[94].mxu1  ;;  %v5875_v46 = vadd.f32 %v5874_v39, %v5667_v60  ;;  %v6139_v60 = vld [vmem:[%s14329_s17] sm:$0xff] }
0x11ed   :  { %v5880_v55 = vadd.f32 %v5834_v54, %v14382_v63  ;;  %v5877_v25 = vpop.f32.mrb[86].mxu0  ;;  %v5838_v47 = vpop.f32.mrb[95].mxu1 }
0x11ee   :  { %v5881_v26 = vadd.f32 %v5836_v7, %v14383_v21  ;;  %v10418_v19 = vpop.f32.mrb[87].mxu0  ;;  %v8608_v47 = vld [vmem:[%s14334_s22] sm:$0xff] }
0x11ef   :  { %v9412_v6 = vmul.f32 -1.442695, %v5880_v55  ;;  %8618 = vperm.xlu0 %11013, %v8608_v47  }
0x11f0   :  { %v9413_v48 = vmul.f32 -1.442695, %v5881_v26  ;;  %v8610_v26 = vld [vmem:[%s14334_s22 + $0x10] sm:$0xff] }
0x11f1   :  { %11505 = vpow2.f32 %v9412_v6  ;;  %v8612_v6 = vld [vmem:[%s14334_s22 + $0x20] sm:$0xff] }
0x11f2   :  { %11507 = vpow2.f32 %v9413_v48 }
0x11f3   :  { %8628 = vperm.xlu0 %11013, %v8610_v26  }
0x11f7   :  { %8638 = vperm.xlu0 %11013, %v8612_v6  }
0x11fb   :  { %v11506_v0 = vpop.eup %11505 }
0x11fc   :  { %v5888_v53 = vadd.f32 1.0, %v11506_v0  ;;  %v11508_v5 = vpop.eup %11507  ;;  %v8614_v0 = vld [vmem:[%s14334_s22 + $0x30] sm:$0xff] }
0x11fd   :  { %v5889_v12 = vadd.f32 1.0, %v11508_v5  ;;  %8648 = vperm.xlu0 %11013, %v8614_v0   ;;  %v6143_v5 = vld [vmem:[%s14329_s17 + $0x20] sm:$0xff] }
0x11fe   :  { %11509 = vrcp.f32 %v5888_v53  ;;  %v6140_v53 = vld [vmem:[%s14329_s17 + $0x8] sm:$0xff] }
0x11ff   :  { %11511 = vrcp.f32 %v5889_v12  ;;  %v10835_v12 = vpack.c.bf16 %v6143_v5, %v6140_v53 }
0x1201   :  { %10836 = vmatprep.subr.bf16.mxu1 %v10835_v12 }
0x1208   :  { %v11510_v2 = vpop.eup %11509 }
0x1209   :  { %v5894_v52 = vmul.f32 %v11510_v2, %v5875_v46  ;;  %v11512_v4 = vpop.eup %11511  ;;  %v11989_v46 = vmov 0.0|0.0   ;;  %v6142_v2 = vld [vmem:[%s14329_s17 + $0x18] sm:$0xff] }
0x120a   :  { %v5897_v23 = vsub.f32 1.0, %v11512_v4  ;;  %v5899_v20 = vmul.f32 %v11512_v4, %v13609_v11  ;;  %10867 = vmatprep.subr.bf16.mxu0 %v11989_v46  ;;  %v6145_v4 = vld [vmem:[%s14329_s17 + $0x30] sm:$0xff] }
0x120b   :  { %v5895_v57 = vadd.f32 %v5894_v52, %v14384_v22  ;;  %v6141_v52 = vld [vmem:[%s14329_s17 + $0x10] sm:$0xff]  ;;  %v6144_v22 = vld [vmem:[%s14329_s17 + $0x28] sm:$0xff] }
0x120c   :  { %v10868_v3 = vpack.c.bf16 %v6144_v22, %v6141_v52  ;;  %v6168_v52 = vld [vmem:[%s14329_s17 + $0xe8] sm:$0xff]  ;;  %v6170_v22 = vld [vmem:[%s14329_s17 + $0xf8] sm:$0xff] }
0x120d   :  { %11513 = vtanh.f32 %v5895_v57  ;;  %v10837_v57 = vpack.c.bf16 %v6142_v2, %v6139_v60  ;;  %v6167_v2 = vld [vmem:[%s14329_s17 + $0xe0] sm:$0xff] }
0x120e   :  { %11515 = vtanh.f32 %v5949_v41  ;;  %v6146_v41 = vld [vmem:[%s14329_s17 + $0x38] sm:$0xff]  ;;  %10869 = vmatpush3.bf16.msra.mxu0 %v10868_v3 }
0x120f   :  { %11517 = vtanh.f32 %v5950_v62  ;;  %v10839_v62 = vpack.c.bf16 %v6149_v30, %v6146_v41  ;;  %10838 = vmatpush1.bf16.msra.mxu1 %v10837_v57  ;;  %10870 = vmatprep.subr.bf16.mxu0 %v11989_v46  ;;  %v13784_v57 = vpop.f32.mrb[62].mxu1  ;;  %v6173_v41 = vld [vmem:[%s14329_s17 + $0x110] sm:$0xff] }
0x1210   :  { %11519 = vtanh.f32 %v5951_v10  ;;  %v10841_v10 = vpack.c.bf16 %v6148_v27, %v6145_v4  ;;  %v6169_v30 = vld [vmem:[%s14329_s17 + $0xf0] sm:$0xff]  ;;  %v6172_v4 = vld [vmem:[%s14329_s17 + $0x108] sm:$0xff]  ;;  %v10855_v27 = vpack.c.bf16 %v6173_v41, %v6170_v22 }
0x1211   :  { %11521 = vtanh.f32 %v5952_v24  ;;  %v6151_v24 = vld [vmem:[%s14329_s17 + $0x60] sm:$0xff]  ;;  %10840 = vmatprep.subr.bf16.mxu1 %v10839_v62  ;;  %v10423_v62 = vpop.f32.mrb[63].mxu1 }
0x1212   :  { %11523 = vtanh.f32 %v5953_v33  ;;  %v6156_v33 = vld [vmem:[%s14329_s17 + $0x88] sm:$0xff] }
0x1213   :  { %10842 = vmatpush1.bf16.msra.mxu1 %v10841_v10  ;;  %v6174_v10 = vld [vmem:[%s14329_s17 + $0x118] sm:$0xff] }
0x1217   :  { %v11514_v50 = vpop.eup %11513 }
0x1218   :  { %v5898_v44 = vmul.f32 %v11514_v50, %v5897_v23  ;;  %v11516_v61 = vpop.eup %11515  ;;  %v6147_v23 = vld [vmem:[%s14329_s17 + $0x40] sm:$0xff]  ;;  %v6150_v50 = vld [vmem:[%s14329_s17 + $0x58] sm:$0xff] }
0x1219   :  { %v5966_v35 = vmul.f32 1.442695, %v11516_v61  ;;  %v11518_v31 = vpop.eup %11517  ;;  %v10871_v43 = vpack.c.bf16 %v6150_v50, %v6147_v23  ;;  %v6153_v61 = vld [vmem:[%s14329_s17 + $0x70] sm:$0xff]  ;;  %v10857_v23 = vpack.c.bf16 %v6172_v4, %v6169_v30  ;;  %v6171_v50 = vld [vmem:[%s14329_s17 + $0x100] sm:$0xff] }
0x121a   :  { %v13641_v9 = vadd.f32 %v5899_v20, %v5898_v44  ;;  %v5968_v36 = vmul.f32 1.442695, %v11518_v31  ;;  %v11520_v29 = vpop.eup %11519  ;;  %v6152_v44 = vld [vmem:[%s14329_s17 + $0x68] sm:$0xff]  ;;  %v6155_v20 = vld [vmem:[%s14329_s17 + $0x80] sm:$0xff] }
0x121b   :  { %11525 = vpow2.f32 %v5966_v35  ;;  %v5970_v54 = vmul.f32 1.442695, %v11520_v29  ;;  %v11522_v39 = vpop.eup %11521  ;;  %v10843_v32 = vpack.c.bf16 %v6155_v20, %v6152_v44  ;;  %v6158_v35 = vld [vmem:[%s14329_s17 + $0x98] sm:$0xff]  ;;  %10872 = vmatpush3.bf16.msra.mxu0 %v10871_v43  ;;  %v6176_v43 = vld [vmem:[%s14329_s17 + $0x128] sm:$0xff]  ;;  %v10883_v44 = vpack.c.bf16 %v6174_v10, %v6171_v50  ;;  %v6179_v20 = vld [vmem:[%s14329_s17 + $0x140] sm:$0xff] }
0x121c   :  { %v5924_v34 = vmul.f32 %v13611_v56, %v13641_v9  ;;  %11527 = vtanh.f32 %v5954_v42  ;;  %v5972_v56 = vmul.f32 1.442695, %v11522_v39  ;;  %v11524_v51 = vpop.eup %11523  ;;  %v10874_v42 = vpack.c.bf16 %v6156_v33, %v6153_v61  ;;  %10873 = vmatprep.subr.bf16.mxu0 %v11989_v46  ;;  %v6159_v39 = vld [vmem:[%s14329_s17 + $0xa0] sm:$0xff]  ;;  %v6177_v61 = vld [vmem:[%s14329_s17 + $0x130] sm:$0xff]  ;;  %v6180_v33 = vld [vmem:[%s14329_s17 + $0x148] sm:$0xff] }
0x121d   :  { %11529 = vpow2.f32 %v5968_v36  ;;  %v5974_v16 = vmul.f32 1.442695, %v11524_v51  ;;  %v6157_v36 = vld [vmem:[%s14329_s17 + $0x90] sm:$0xff]  ;;  %10844 = vmatprep.subr.bf16.mxu1 %v10843_v32  ;;  %v10847_v29 = vpack.c.bf16 %v6161_v1, %v6158_v35  ;;  %v6178_v32 = vld [vmem:[%s14329_s17 + $0x138] sm:$0xff] }
0x121e   :  { %5939 = vadd.xlane.f32.xlu1 %v5924_v34  ;;  %11531 = vpow2.f32 %v5970_v54  ;;  %v6154_v34 = vld [vmem:[%s14329_s17 + $0x78] sm:$0xff]  ;;  %v6160_v54 = vld [vmem:[%s14329_s17 + $0xa8] sm:$0xff]  ;;  %v6185_v1 = vld [vmem:[%s14329_s17 + $0x170] sm:$0xff] }
0x121f   :  { %11533 = vpow2.f32 %v5972_v56  ;;  %v10845_v31 = vpack.c.bf16 %v6154_v34, %v6151_v24  ;;  %v6162_v56 = vld [vmem:[%s14329_s17 + $0xb8] sm:$0xff]  ;;  %10875 = vmatpush3.bf16.msra.mxu0 %v10874_v42  ;;  %v10849_v51 = vpack.c.bf16 %v6160_v54, %v6157_v36  ;;  %v6175_v24 = vld [vmem:[%s14329_s17 + $0x120] sm:$0xff]  ;;  %v10859_v34 = vpack.c.bf16 %v6179_v20, %v6176_v43  ;;  %v6184_v54 = vld [vmem:[%s14329_s17 + $0x168] sm:$0xff] }
0x1220   :  { %11535 = vpow2.f32 %v5974_v16  ;;  %v10877_v16 = vpack.c.bf16 %v6162_v56, %v6159_v39  ;;  %10876 = vmatprep.subr.bf16.mxu0 %v11989_v46  ;;  %v6182_v35 = vld [vmem:[%s14329_s17 + $0x158] sm:$0xff]  ;;  %v10886_v42 = vpack.c.bf16 %v6180_v33, %v6177_v61  ;;  %v13883_v43 = vld [vmem:[#allocation23 + $0x30] ss:$12 sps:$4 sm:$0xff]   ;;  %v13886_v20 = vld [vmem:[#allocation23 + $0x4c] ss:$12 sps:$4 sm:$0xff]  }
0x1221   :  { %10846 = vmatpush1.bf16.msra.mxu1 %v10845_v31  ;;  %v10861_v31 = vpack.c.bf16 %v6178_v32, %v6175_v24  ;;  %v10863_v36 = vpack.c.bf16 %v6185_v1, %v6182_v35  ;;  %v13870_v10 = vld [vmem:[#allocation23 + $0x1c] ss:$12 sps:$4 sm:$0xff]   ;;  %v13897_v61 = vld [vmem:[#allocation23 + $0x60] ss:$12 sps:$4 sm:$0xff]   ;;  %v13904_v1 = vld [vmem:[#allocation23 + $0x78] ss:$12 sps:$4 sm:$0xff]  }
0x1222   :  { %10848 = vmatprep.subr.bf16.mxu1 %v10847_v29  ;;  %v6181_v29 = vld [vmem:[%s14329_s17 + $0x150] sm:$0xff]  ;;  %v13890_v24 = vld [vmem:[#allocation23 + $0x48] ss:$12 sps:$4 sm:$0xff]  }
0x1223   :  { %10878 = vmatpush3.bf16.msra.mxu0 %v10877_v16  ;;  %v10865_v56 = vpack.c.bf16 %v6184_v54, %v6181_v29  ;;  %v6186_v16 = vld [vmem:[%s14329_s17 + $0x178] sm:$0xff]  ;;  %v11266_v32 = vld [vmem:[#allocation23 + $0x50] ss:$12 sps:$4 sm:$0xff]   ;;  %v13914_v54 = vld [vmem:[#allocation23 + $0xac] ss:$12 sps:$4 sm:$0xff]  }
0x1224   :  { %10879 = vmatprep.subr.bf16.mxu0 %v11989_v46  ;;  %v11267_v33 = vld [vmem:[#allocation23 + $0x68] ss:$12 sps:$4 sm:$0xff]   ;;  %v11269_v29 = vld [vmem:[#allocation23 + $0x98] ss:$12 sps:$4 sm:$0xff]  }
0x1225   :  { %v13648_v7 = vpop.eup %11525  ;;  %10850 = vmatpush1.bf16.msra.mxu1 %v10849_v51  ;;  %v6183_v51 = vld [vmem:[%s14329_s17 + $0x160] sm:$0xff] }
0x1226   :  { %v11528_v37 = vpop.eup %11527  ;;  %v5995_v6 = vadd.f32 %v13648_v7, %v13621_v28  ;;  %v13900_v35 = vld [vmem:[#allocation23 + $0x7c] ss:$12 sps:$4 sm:$0xff]  }
0x1227   :  { %v13651_v63 = vpop.eup %11529  ;;  %v5976_v55 = vmul.f32 1.442695, %v11528_v37 }
0x1228   :  { %v13654_v25 = vpop.eup %11531  ;;  %v6003_v0 = vadd.f32 %v13651_v63, %v5995_v6  ;;  %v8615_v6 = vld [vmem:[%s14334_s22 + $0x38] sm:$0xff] }
0x1229   :  { %11537 = vpow2.f32 %v5976_v55  ;;  %v13660_v21 = vpop.eup %11533 }
0x122a   :  { %v13666_v19 = vpop.eup %11535  ;;  %v6011_v53 = vadd.f32 %v13654_v25, %v6003_v0 }
0x122c   :  { %v6019_v5 = vadd.f32 %v13660_v21, %v6011_v53 }
0x122e   :  { %v6027_v60 = vadd.f32 %v13666_v19, %v6019_v5 }
0x122f   :  { %5990 = vperm.xlu1 %11014, %v13648_v7  }
0x1233   :  { %5998 = vperm.xlu1 %11014, %v13651_v63   ;;  %v13672_v48 = vpop.eup %11537  ;;  %v6163_v63 = vld [vmem:[%s14329_s17 + $0xc0] sm:$0xff] }
0x1234   :  { %v6035_v12 = vadd.f32 %v13672_v48, %v6027_v60 }
0x1237   :  { %6006 = vperm.xlu1 %11014, %v13654_v25   ;;  %v6166_v25 = vld [vmem:[%s14329_s17 + $0xd8] sm:$0xff] }
0x123b   :  { %6014 = vperm.xlu1 %11014, %v13660_v21  }
0x123f   :  { %6022 = vperm.xlu1 %11014, %v13666_v19   ;;  %v10853_v19 = vpack.c.bf16 %v6166_v25, %v6163_v63 }
0x1243   :  { %6030 = vperm.xlu1 %11014, %v13672_v48   ;;  %v6165_v48 = vld [vmem:[%s14329_s17 + $0xd0] sm:$0xff] }
0x1244   :  { %v10880_v3 = vpack.c.bf16 %v6168_v52, %v6165_v48 }
0x1246   :  { %10881 = vmatpush3.bf16.msra.mxu0 %v10880_v3 }
0x1247   :  { %10882 = vmatprep.subr.bf16.mxu0 %v11989_v46 }
0x124a   :  { %10884 = vmatpush3.bf16.msra.mxu0 %v10883_v44  ;;  %v11265_v44 = vld [vmem:[#allocation23 + $0x38] ss:$12 sps:$4 sm:$0xff]  }
0x124b   :  { %10885 = vmatprep.subr.bf16.mxu0 %v11989_v46 }
0x124e   :  { %10887 = vmatpush3.bf16.msra.mxu0 %v10886_v42  ;;  %v13907_v42 = vld [vmem:[#allocation23 + $0x94] ss:$12 sps:$4 sm:$0xff]  }
0x124f   :  { %10888 = vmatprep.subr.bf16.mxu0 %v11989_v46  ;;  %v8611_v46 = vld [vmem:[%s14334_s22 + $0x18] sm:$0xff] }
0x12ab   :  { %v5940_v37 = vpop.xlane.xlu1 %5939 }
0x12ac   :  { %v5955_v55 = vadd.f32 %v13605_v59, %v5940_v37  ;;  %v6164_v59 = vld [vmem:[%s14329_s17 + $0xc8] sm:$0xff]  ;;  %v10889_v37 = vpack.c.bf16 %v6186_v16, %v6183_v51  ;;  %v11272_v16 = vld [vmem:[#allocation23 + $0x20] ss:$12 sps:$4 sm:$0xff]  }
0x12ad   :  { %v10851_v7 = vpack.c.bf16 %v6167_v2, %v6164_v59  ;;  %v11271_v51 = vld [vmem:[#allocation23 + $0x8] ss:$12 sps:$4 sm:$0xff]  }
0x12ae   :  { %11539 = vtanh.f32 %v5955_v55  ;;  %v8609_v55 = vld [vmem:[%s14334_s22 + $0x8] sm:$0xff]  ;;  %10890 = vmatpush3.bf16.msra.mxu0 %v10889_v37 }
0x12af   :  { %10852 = vmatprep.subr.bf16.mxu1 %v10851_v7  ;;  %10459 = vmatprep.subr.bf16.mxu0 %v14380_v8  ;;  %v5991_v0 = vpop.permute.xlu1 %5990  ;;  %v11273_v37 = vld [vmem:[#allocation23 + $0x38] ss:$12 sps:$4 sm:$0xff]  }
0x12b0   :  { %10854 = vmatpush1.bf16.msra.mxu1 %v10853_v19  ;;  %v5993_v2 = vmul.f32 %v5991_v0, %v13375_v40  ;;  %v11278_v0 = vld [vmem:[#allocation23 + $0xb0] ss:$12 sps:$4 sm:$0xff]  }
0x12b1   :  { %10856 = vmatprep.subr.bf16.mxu1 %v10855_v27 }
0x12b3   :  { %v5999_v53 = vpop.permute.xlu1 %5998 }
0x12b4   :  { %10858 = vmatpush1.bf16.msra.mxu1 %v10857_v23  ;;  %v6001_v7 = vmul.f32 %v5999_v53, %v13414_v14  ;;  %v13868_v23 = vld [vmem:[#allocation23] ss:$12 sps:$4 sm:$0xff]  }
0x12b5   :  { %10860 = vmatprep.subr.bf16.mxu1 %v10859_v34  ;;  %v13893_v34 = vld [vmem:[#allocation23 + $0x64] ss:$12 sps:$4 sm:$0xff]  }
0x12b7   :  { %v6007_v5 = vpop.permute.xlu1 %6006 }
0x12b8   :  { %v11540_v47 = vpop.eup %11539  ;;  %10862 = vmatpush1.bf16.msra.mxu1 %v10861_v31  ;;  %v6009_v25 = vmul.f32 %v6007_v5, %v13487_v49  ;;  %v11268_v31 = vld [vmem:[#allocation23 + $0x80] ss:$12 sps:$4 sm:$0xff]  }
0x12b9   :  { %v5978_v26 = vmul.f32 1.442695, %v11540_v47  ;;  %10864 = vmatprep.subr.bf16.mxu1 %v10863_v36  ;;  %v13843_v47 = vld [vmem:[#allocation23 + $0x4] ss:$12 sps:$4 sm:$0xff]  }
0x12ba   :  { %v13911_v36 = vld [vmem:[#allocation23 + $0x90] ss:$12 sps:$4 sm:$0xff]  }
0x12bb   :  { %11541 = vpow2.f32 %v5978_v26  ;;  %v8613_v26 = vld [vmem:[%s14334_s22 + $0x28] sm:$0xff]  ;;  %v6015_v60 = vpop.permute.xlu1 %6014 }
0x12bc   :  { %10866 = vmatpush1.bf16.msra.mxu1 %v10865_v56  ;;  %v6017_v48 = vmul.f32 %v6015_v60, %v13527_v38  ;;  %v11270_v56 = vld [vmem:[#allocation23 + $0xb0] ss:$12 sps:$4 sm:$0xff]  }
0x12bd   :  { %6522 = vmatprep.subr.bf16.mxu1 %v13843_v47 }
0x12bf   :  { %v6023_v59 = vpop.permute.xlu1 %6022 }
0x12c0   :  { %v6025_v22 = vmul.f32 %v6023_v59, %v13567_v13  ;;  %v11260_v13 = vld [vmem:[#allocation23 + $0x8] ss:$12 sps:$4 sm:$0xff]   ;;  %v6187_v59 = vld [vmem:[#allocation21] sm:$0x7] }
0x12c5   :  { %v11542_v28 = vpop.eup %11541 }
0x12c6   :  { %v6043_v21 = vadd.f32 %v11542_v28, %v6035_v12  ;;  %6038 = vperm.xlu1 %11014, %v11542_v28   ;;  %v5983_v12 = vpop.permute.xlu0 %5982 }
0x12c7   :  { %v5985_v28 = vmul.f32 %v5983_v12, %v13335_v45  ;;  %v9416_v45 = vld [vmem:[%s14328_s16] ss:$0 sm:$0xff] }
0x12c8   :  { %11543 = vrcp.f32 %v6043_v21  ;;  %v6031_v21 = vpop.permute.xlu1 %6030  ;;  %v6135_v49 = vadd.f32 %v9416_v45, %v13784_v57  ;;  %v13876_v57 = vld [vmem:[#allocation23 + $0x34] ss:$12 sps:$4 sm:$0xff]  }
0x12c9   :  { %v5994_v63 = vadd.f32 %v5993_v2, %v5985_v28  ;;  %v6033_v30 = vmul.f32 %v6031_v21, %v13609_v11  ;;  %v13873_v11 = vld [vmem:[#allocation23 + $0x18] ss:$12 sps:$4 sm:$0xff]   ;;  %v6377_v2 = vld [vmem:[#allocation24] sm:$0x7]  ;;  %v6192_v28 = vrot.slane %v6187_v59, %v12479_v15 }
0x12cb   :  { %v6002_v19 = vadd.f32 %v6001_v7, %v5994_v63  ;;  %v6382_v7 = vrot.slane %v6377_v2, %v12479_v15  ;;  %v6386_v63 = vrot.slane %v6377_v2, %v12481_v17 }
0x12cd   :  { %v6010_v52 = vadd.f32 %v6009_v25, %v6002_v19  ;;  %v6196_v25 = vrot.slane %v6187_v59, %v12481_v17 }
0x12cf   :  { %v6018_v41 = vadd.f32 %v6017_v48, %v6010_v52 }
0x12d1   :  { %v6026_v4 = vadd.f32 %v6025_v22, %v6018_v41 }
0x12d2   :  { %v11544_v39 = vpop.eup %11543 }
0x12d3   :  { %6047 = vperm.xlu1 %11014, %v11544_v39   ;;  %v6034_v14 = vadd.f32 %v6033_v30, %v6026_v4  ;;  %v13918_v39 = vld [vmem:[#allocation23 + $0xa8] ss:$12 sps:$4 sm:$0xff]  }
0x12d7   :  { %8623 = vperm.xlu1 %11014, %v8609_v55   ;;  %v11274_v55 = vld [vmem:[#allocation23 + $0x50] ss:$12 sps:$4 sm:$0xff]  }
0x12db   :  { %8633 = vperm.xlu1 %11014, %v8611_v46   ;;  %v11275_v46 = vld [vmem:[#allocation23 + $0x68] ss:$12 sps:$4 sm:$0xff]  }
0x12df   :  { %8643 = vperm.xlu1 %11014, %v8613_v26   ;;  %v11276_v26 = vld [vmem:[#allocation23 + $0x80] ss:$12 sps:$4 sm:$0xff]  }
0x12e3   :  { %8653 = vperm.xlu1 %11014, %v8615_v6   ;;  %v11277_v6 = vld [vmem:[#allocation23 + $0x98] ss:$12 sps:$4 sm:$0xff]  }
0x1345   :  { %v6039_v3 = vpop.permute.xlu1 %6038 }
0x1346   :  { %v6041_v40 = vmul.f32 %v6039_v3, %v13641_v9  ;;  %v11264_v9 = vld [vmem:[#allocation23 + $0x20] ss:$12 sps:$4 sm:$0xff]  }
0x1348   :  { %v6042_v62 = vadd.f32 %v6041_v40, %v6034_v14 }
0x1352   :  { %v6048_v27 = vpop.permute.xlu1 %6047 }
0x1353   :  { %v6050_v38 = vmul.f32 %v6048_v27, %v6042_v62 }
0x1355   :  { %v6138_v50 = vmul.f32 %v6135_v49, %v6050_v38 }
0x1357   :  { %6269 = vmatmul.mubr.f32.vlgmr.msra.gmra.mrb[96].mxu1 %v6138_v50  ;;  %10457 = vmatmul.mubr.f32.vlgmr.msra.gmra.mrb[88].mxu0 %v6138_v50 }
0x1358   :  { %6523 = vmatpush1.bf16.msra.mxu1 %v13868_v23  ;;  %10460 = vmatpush3.bf16.msra.mxu0 %v11260_v13 }
0x1359   :  { %6524 = vmatprep.subr.bf16.mxu1 %v13870_v10  ;;  %10461 = vmatprep.subr.bf16.mxu0 %v14380_v8 }
0x135a   :  { %6554 = vmatprep.mubr.bf16.mxu1 %v14379_v58  ;;  %10475 = vmatprep.mubr.msk.bf16.mxu0 %vm11988_vm1, %v14380_v8 }
0x135c   :  { %6525 = vmatpush1.bf16.msra.mxu1 %v13873_v11  ;;  %10462 = vmatpush3.bf16.msra.mxu0 %v11264_v9  ;;  %v6390_v9 = vrot.slane %v6377_v2, %v12483_v18  ;;  %v11283_v2 = vld [vmem:[#allocation23 + $0x68] ss:$12 sps:$4 sm:$0xff]  }
0x135d   :  { %6526 = vmatprep.subr.bf16.mxu1 %v13876_v57  ;;  %10463 = vmatprep.subr.bf16.mxu0 %v14380_v8 }
0x1360   :  { %6527 = vmatpush1.bf16.msra.mxu1 %v13883_v43  ;;  %10464 = vmatpush3.bf16.msra.mxu0 %v11265_v44 }
0x1361   :  { %6528 = vmatprep.subr.bf16.mxu1 %v13886_v20  ;;  %10465 = vmatprep.subr.bf16.mxu0 %v14380_v8 }
0x1364   :  { %6529 = vmatpush1.bf16.msra.mxu1 %v13890_v24  ;;  %10466 = vmatpush3.bf16.msra.mxu0 %v11266_v32  ;;  %v6200_v32 = vrot.slane %v6187_v59, %v12483_v18  ;;  %v11282_v59 = vld [vmem:[#allocation23 + $0x50] ss:$12 sps:$4 sm:$0xff]  }
0x1365   :  { %6530 = vmatprep.subr.bf16.mxu1 %v13893_v34  ;;  %10467 = vmatprep.subr.bf16.mxu0 %v14380_v8 }
0x1368   :  { %6531 = vmatpush1.bf16.msra.mxu1 %v13897_v61  ;;  %10468 = vmatpush3.bf16.msra.mxu0 %v11267_v33 }
0x1369   :  { %6532 = vmatprep.subr.bf16.mxu1 %v13900_v35  ;;  %10469 = vmatprep.subr.bf16.mxu0 %v14380_v8 }
0x136c   :  { %6533 = vmatpush1.bf16.msra.mxu1 %v13904_v1  ;;  %10470 = vmatpush3.bf16.msra.mxu0 %v11268_v31 }
0x136d   :  { %6534 = vmatprep.subr.bf16.mxu1 %v13907_v42  ;;  %10471 = vmatprep.subr.bf16.mxu0 %v14380_v8 }
0x1370   :  { %6535 = vmatpush1.bf16.msra.mxu1 %v13911_v36  ;;  %10472 = vmatpush3.bf16.msra.mxu0 %v11269_v29 }
0x1371   :  { %6536 = vmatprep.subr.bf16.mxu1 %v13914_v54  ;;  %10473 = vmatprep.subr.bf16.mxu0 %v14380_v8 }
0x1374   :  { %6537 = vmatpush1.bf16.msra.mxu1 %v13918_v39  ;;  %10474 = vmatpush3.bf16.msra.mxu0 %v11270_v56 }
0x1375   :  { %6803 = vmatprep.subr.bf16.mxu1 %v13843_v47  ;;  %10479 = vmatprep.subr.bf16.mxu0 %v14380_v8 }
0x1377   :  { %6555 = vmatmul.mubr.bf16.vlgmr.msra.gmra.mrb[100].mxu1 %v14379_v58  ;;  %10476 = vmatmul.mubr.bf16.vlgmr.msra.gmra.mrb[92].mxu0 %v14379_v58 }
0x1378   :  { %6804 = vmatpush1.bf16.msra.mxu1 %v13868_v23  ;;  %6835 = vmatprep.mubr.bf16.mxu1 %v14379_v58 }
0x1379   :  { %6805 = vmatprep.subr.bf16.mxu1 %v13870_v10  ;;  %10495 = vmatprep.mubr.msk.bf16.mxu0 %vm11988_vm1, %v14380_v8 }
0x137a   :  { %10480 = vmatpush3.bf16.msra.mxu0 %v11271_v51 }
0x137b   :  { %10481 = vmatprep.subr.bf16.mxu0 %v14380_v8 }
0x137c   :  { %6806 = vmatpush1.bf16.msra.mxu1 %v13873_v11 }
0x137d   :  { %6807 = vmatprep.subr.bf16.mxu1 %v13876_v57 }
0x137e   :  { %10482 = vmatpush3.bf16.msra.mxu0 %v11272_v16 }
0x137f   :  { %10483 = vmatprep.subr.bf16.mxu0 %v14380_v8 }
0x1380   :  { %6808 = vmatpush1.bf16.msra.mxu1 %v13883_v43 }
0x1381   :  { %6809 = vmatprep.subr.bf16.mxu1 %v13886_v20 }
0x1382   :  { %10484 = vmatpush3.bf16.msra.mxu0 %v11273_v37 }
0x1383   :  { %10485 = vmatprep.subr.bf16.mxu0 %v14380_v8 }
0x1384   :  { %6810 = vmatpush1.bf16.msra.mxu1 %v13890_v24 }
0x1385   :  { %6811 = vmatprep.subr.bf16.mxu1 %v13893_v34 }
0x1386   :  { %10486 = vmatpush3.bf16.msra.mxu0 %v11274_v55 }
0x1387   :  { %10487 = vmatprep.subr.bf16.mxu0 %v14380_v8 }
0x1388   :  { %6812 = vmatpush1.bf16.msra.mxu1 %v13897_v61 }
0x1389   :  { %6813 = vmatprep.subr.bf16.mxu1 %v13900_v35 }
0x138a   :  { %10488 = vmatpush3.bf16.msra.mxu0 %v11275_v46 }
0x138b   :  { %10489 = vmatprep.subr.bf16.mxu0 %v14380_v8 }
0x138c   :  { %6814 = vmatpush1.bf16.msra.mxu1 %v13904_v1 }
0x138d   :  { %6815 = vmatprep.subr.bf16.mxu1 %v13907_v42 }
0x138e   :  { %10490 = vmatpush3.bf16.msra.mxu0 %v11276_v26 }
0x138f   :  { %10491 = vmatprep.subr.bf16.mxu0 %v14380_v8 }
0x1390   :  { %6816 = vmatpush1.bf16.msra.mxu1 %v13911_v36 }
0x1391   :  { %6817 = vmatprep.subr.bf16.mxu1 %v13914_v54 }
0x1392   :  { %10492 = vmatpush3.bf16.msra.mxu0 %v11277_v6 }
0x1393   :  { %10493 = vmatprep.subr.bf16.mxu0 %v14380_v8 }
0x1394   :  { %6818 = vmatpush1.bf16.msra.mxu1 %v13918_v39 }
0x1395   :  { %7084 = vmatprep.subr.bf16.mxu1 %v13843_v47 }
0x1396   :  { %10494 = vmatpush3.bf16.msra.mxu0 %v11278_v0 }
0x1397   :  { %10499 = vmatprep.subr.bf16.mxu0 %v14380_v8 }
0x142a   :  { %v6270_v53 = vpop.f32.mrb[96].mxu1  ;;  %v6341_v5 = vpop.f32.mrb[88].mxu0 }
0x142b   :  { %v6272_v60 = vpop.f32.mrb[97].mxu1  ;;  %v10458_v12 = vpop.f32.mrb[89].mxu0  ;;  %v13958_v48 = vadd.f32 %v6270_v53, %v6192_v28  ;;  %v13966_v56 = vadd.f32 %v6341_v5, %v6200_v32  ;;  %v11279_v5 = vld [vmem:[#allocation23 + $0x8] ss:$12 sps:$4 sm:$0xff]   ;;  %v11284_v28 = vld [vmem:[#allocation23 + $0x80] ss:$12 sps:$4 sm:$0xff]  }
0x142c   :  { %v13961_v49 = vadd.f32 %v6272_v60, %v6196_v25  ;;  %v11280_v60 = vld [vmem:[#allocation23 + $0x20] ss:$12 sps:$4 sm:$0xff]   ;;  %v11281_v12 = vld [vmem:[#allocation23 + $0x38] ss:$12 sps:$4 sm:$0xff]  }
0x144a   :  { %v6556_v21 = vpop.f32.mrb[100].mxu1  ;;  %v6597_v19 = vpop.f32.mrb[92].mxu0 }
0x144b   :  { %v6557_v52 = vadd.f32 %v6556_v21, %v6382_v7  ;;  %v6558_v22 = vpop.f32.mrb[101].mxu1  ;;  %v10477_v3 = vpop.f32.mrb[93].mxu0  ;;  %v6598_v31 = vadd.f32 %v6597_v19, %v6390_v9  ;;  %v11286_v7 = vld [vmem:[#allocation23 + $0xb0] ss:$12 sps:$4 sm:$0xff]  }
0x144c   :  { %v6559_v41 = vadd.f32 %v6558_v22, %v6386_v63  ;;  %v6560_v30 = vpop.f32.mrb[102].mxu1  ;;  %v6600_v4 = vpop.f32.mrb[94].mxu0  ;;  %v6658_v63 = vld [vmem:[#allocation24] sm:$0x7] }
0x144d   :  { %v6603_v40 = vadd.f32 %v6557_v52, %v13958_v48  ;;  %v6561_v45 = vpop.f32.mrb[103].mxu1  ;;  %v10478_v14 = vpop.f32.mrb[95].mxu0  ;;  %v6663_v25 = vrot.slane %v6658_v63, %v12479_v15  ;;  %v6667_v21 = vrot.slane %v6658_v63, %v12481_v17  ;;  %v6671_v32 = vrot.slane %v6658_v63, %v12483_v18 }
0x144e   :  { %v6604_v27 = vadd.f32 %v6559_v41, %v13961_v49 }
0x144f   :  { %v9443_v62 = vmul.f32 -1.442695, %v6603_v40 }
0x1450   :  { %v9444_v38 = vmul.f32 -1.442695, %v6604_v27 }
0x1451   :  { %11545 = vpow2.f32 %v9443_v62 }
0x1452   :  { %11547 = vpow2.f32 %v9444_v38 }
0x145b   :  { %v11546_v13 = vpop.eup %11545 }
0x145c   :  { %v6611_v50 = vadd.f32 1.0, %v11546_v13  ;;  %v11548_v44 = vpop.eup %11547 }
0x145d   :  { %v6612_v33 = vadd.f32 1.0, %v11548_v44 }
0x145e   :  { %11549 = vrcp.f32 %v6611_v50 }
0x145f   :  { %11551 = vrcp.f32 %v6612_v33 }
0x1468   :  { %v11550_v29 = vpop.eup %11549 }
0x1469   :  { %v6617_v51 = vmul.f32 %v11550_v29, %v6598_v31  ;;  %v11552_v37 = vpop.eup %11551 }
0x146a   :  { %v6620_v55 = vsub.f32 1.0, %v11552_v37  ;;  %v6622_v6 = vmul.f32 0.0, %v11552_v37 }
0x146b   :  { %v6618_v16 = vadd.f32 %v6617_v51, %v13966_v56 }
0x146d   :  { %11553 = vtanh.f32 %v6618_v16 }
0x1477   :  { %v11554_v46 = vpop.eup %11553 }
0x1478   :  { %v6621_v26 = vmul.f32 %v11554_v46, %v6620_v55 }
0x147a   :  { %v13969_v0 = vadd.f32 %v6622_v6, %v6621_v26 }
0x147c   :  { %v6625_v53 = vpack.c.bf16 %v13969_v0, %v13969_v0 }
0x147e   :  { %6836 = vmatmul.mubr.bf16.vlgmr.msra.gmra.mrb[104].mxu1 %v6625_v53  ;;  %10496 = vmatmul.mubr.bf16.vlgmr.msra.gmra.mrb[96].mxu0 %v6625_v53 }
0x147f   :  { %7085 = vmatpush1.bf16.msra.mxu1 %v13868_v23  ;;  %7116 = vmatprep.mubr.bf16.mxu1 %v14379_v58 }
0x1480   :  { %7086 = vmatprep.subr.bf16.mxu1 %v13870_v10  ;;  %10515 = vmatprep.mubr.msk.bf16.mxu0 %vm11988_vm1, %v14380_v8 }
0x1481   :  { %10500 = vmatpush3.bf16.msra.mxu0 %v11279_v5 }
0x1482   :  { %10501 = vmatprep.subr.bf16.mxu0 %v14380_v8 }
0x1483   :  { %7087 = vmatpush1.bf16.msra.mxu1 %v13873_v11 }
0x1484   :  { %7088 = vmatprep.subr.bf16.mxu1 %v13876_v57 }
0x1485   :  { %10502 = vmatpush3.bf16.msra.mxu0 %v11280_v60 }
0x1486   :  { %10503 = vmatprep.subr.bf16.mxu0 %v14380_v8 }
0x1487   :  { %7089 = vmatpush1.bf16.msra.mxu1 %v13883_v43 }
0x1488   :  { %7090 = vmatprep.subr.bf16.mxu1 %v13886_v20 }
0x1489   :  { %10504 = vmatpush3.bf16.msra.mxu0 %v11281_v12 }
0x148a   :  { %10505 = vmatprep.subr.bf16.mxu0 %v14380_v8 }
0x148b   :  { %7091 = vmatpush1.bf16.msra.mxu1 %v13890_v24 }
0x148c   :  { %7092 = vmatprep.subr.bf16.mxu1 %v13893_v34 }
0x148d   :  { %10506 = vmatpush3.bf16.msra.mxu0 %v11282_v59 }
0x148e   :  { %10507 = vmatprep.subr.bf16.mxu0 %v14380_v8 }
0x148f   :  { %7093 = vmatpush1.bf16.msra.mxu1 %v13897_v61 }
0x1490   :  { %7094 = vmatprep.subr.bf16.mxu1 %v13900_v35 }
0x1491   :  { %10508 = vmatpush3.bf16.msra.mxu0 %v11283_v2 }
0x1492   :  { %10509 = vmatprep.subr.bf16.mxu0 %v14380_v8 }
0x1493   :  { %7095 = vmatpush1.bf16.msra.mxu1 %v13904_v1 }
0x1494   :  { %7096 = vmatprep.subr.bf16.mxu1 %v13907_v42 }
0x1495   :  { %10510 = vmatpush3.bf16.msra.mxu0 %v11284_v28 }
0x1496   :  { %10511 = vmatprep.subr.bf16.mxu0 %v14380_v8 }
0x1497   :  { %7097 = vmatpush1.bf16.msra.mxu1 %v13911_v36 }
0x1498   :  { %7098 = vmatprep.subr.bf16.mxu1 %v13914_v54 }
0x149b   :  { %7099 = vmatpush1.bf16.msra.mxu1 %v13918_v39 }
0x149c   :  { %7365 = vmatprep.subr.bf16.mxu1 %v13843_v47  ;;  %v11285_v47 = vld [vmem:[#allocation23 + $0x98] ss:$12 sps:$4 sm:$0xff]  }
0x149d   :  { %10512 = vmatpush3.bf16.msra.mxu0 %v11285_v47 }
0x149e   :  { %10513 = vmatprep.subr.bf16.mxu0 %v14380_v8 }
0x14a1   :  { %10514 = vmatpush3.bf16.msra.mxu0 %v11286_v7 }
0x14a2   :  { %10519 = vmatprep.subr.bf16.mxu0 %v14380_v8 }
0x1551   :  { %v6837_v19 = vpop.f32.mrb[104].mxu1  ;;  %v6878_v52 = vpop.f32.mrb[96].mxu0 }
0x1552   :  { %v6838_v22 = vadd.f32 %v6837_v19, %v6663_v25  ;;  %v6839_v3 = vpop.f32.mrb[105].mxu1  ;;  %v10497_v41 = vpop.f32.mrb[97].mxu0  ;;  %v6879_v31 = vadd.f32 %v6878_v52, %v6671_v32  ;;  %v14053_v32 = vld [vmem:[#allocation23] ss:$12 sps:$4 sm:$0xff]  }
0x1553   :  { %v6840_v30 = vadd.f32 %v6839_v3, %v6667_v21  ;;  %v6841_v4 = vpop.f32.mrb[106].mxu1  ;;  %v6881_v40 = vpop.f32.mrb[98].mxu0 }
0x1554   :  { %v6884_v45 = vadd.f32 %v6838_v22, %v13958_v48  ;;  %v6842_v14 = vpop.f32.mrb[107].mxu1  ;;  %v10498_v62 = vpop.f32.mrb[99].mxu0 }
0x1555   :  { %v6885_v38 = vadd.f32 %v6840_v30, %v13961_v49 }
0x1556   :  { %v9469_v27 = vmul.f32 -1.442695, %v6884_v45 }
0x1557   :  { %v9470_v13 = vmul.f32 -1.442695, %v6885_v38 }
0x1558   :  { %11555 = vpow2.f32 %v9469_v27 }
0x1559   :  { %11557 = vpow2.f32 %v9470_v13 }
0x1562   :  { %v11556_v50 = vpop.eup %11555 }
0x1563   :  { %v6892_v9 = vadd.f32 1.0, %v11556_v50  ;;  %v11558_v44 = vpop.eup %11557 }
0x1564   :  { %v6893_v33 = vadd.f32 1.0, %v11558_v44  ;;  %v14051_v44 = vld [vmem:[#allocation23 + $0x4] ss:$12 sps:$4 sm:$0xff]  }
0x1565   :  { %11559 = vrcp.f32 %v6892_v9 }
0x1566   :  { %11561 = vrcp.f32 %v6893_v33  ;;  %v11298_v33 = vld [vmem:[#allocation23 + $0x8] ss:$12 sps:$4 sm:$0xff]  }
0x156f   :  { %v11560_v29 = vpop.eup %11559 }
0x1570   :  { %v6898_v51 = vmul.f32 %v11560_v29, %v6879_v31  ;;  %v11562_v37 = vpop.eup %11561  ;;  %v14057_v31 = vld [vmem:[#allocation23 + $0x1c] ss:$12 sps:$4 sm:$0xff]   ;;  %v14060_v29 = vld [vmem:[#allocation23 + $0x18] ss:$12 sps:$4 sm:$0xff]  }
0x1571   :  { %v6901_v55 = vsub.f32 1.0, %v11562_v37  ;;  %v6903_v6 = vmul.f32 %v11562_v37, %v13969_v0  ;;  %v14067_v37 = vld [vmem:[#allocation23 + $0x30] ss:$12 sps:$4 sm:$0xff]  }
0x1572   :  { %v6899_v16 = vadd.f32 %v6898_v51, %v13966_v56  ;;  %v11302_v51 = vld [vmem:[#allocation23 + $0x20] ss:$12 sps:$4 sm:$0xff]  }
0x1574   :  { %11563 = vtanh.f32 %v6899_v16  ;;  %v14064_v16 = vld [vmem:[#allocation23 + $0x34] ss:$12 sps:$4 sm:$0xff]  }
0x157e   :  { %v11564_v46 = vpop.eup %11563 }
0x157f   :  { %v6902_v26 = vmul.f32 %v11564_v46, %v6901_v55  ;;  %v11306_v55 = vld [vmem:[#allocation23 + $0x38] ss:$12 sps:$4 sm:$0xff]  }
0x1580   :  { %v14071_v46 = vld [vmem:[#allocation23 + $0x4c] ss:$12 sps:$4 sm:$0xff]  }
0x1581   :  { %v14007_v53 = vadd.f32 %v6903_v6, %v6902_v26  ;;  %v14074_v26 = vld [vmem:[#allocation23 + $0x48] ss:$12 sps:$4 sm:$0xff]   ;;  %v11310_v6 = vld [vmem:[#allocation23 + $0x50] ss:$12 sps:$4 sm:$0xff]  }
0x1583   :  { %v6906_v5 = vpack.c.bf16 %v14007_v53, %v14007_v53 }
0x1585   :  { %7117 = vmatmul.mubr.bf16.vlgmr.msra.gmra.mrb[108].mxu1 %v6906_v5  ;;  %10516 = vmatmul.mubr.bf16.vlgmr.msra.gmra.mrb[100].mxu0 %v6906_v5  ;;  %v14078_v5 = vld [vmem:[#allocation23 + $0x64] ss:$12 sps:$4 sm:$0xff]  }
0x1586   :  { %7366 = vmatpush1.bf16.msra.mxu1 %v13868_v23  ;;  %7397 = vmatprep.mubr.bf16.mxu1 %v14379_v58  ;;  %v11287_v23 = vld [vmem:[#allocation23 + $0x8] ss:$12 sps:$4 sm:$0xff]  }
0x1587   :  { %7367 = vmatprep.subr.bf16.mxu1 %v13870_v10  ;;  %10535 = vmatprep.mubr.msk.bf16.mxu0 %vm11988_vm1, %v14380_v8  ;;  %v11288_v10 = vld [vmem:[#allocation23 + $0x20] ss:$12 sps:$4 sm:$0xff]  }
0x1588   :  { %10520 = vmatpush3.bf16.msra.mxu0 %v11287_v23  ;;  %v14081_v23 = vld [vmem:[#allocation23 + $0x60] ss:$12 sps:$4 sm:$0xff]  }
0x1589   :  { %10521 = vmatprep.subr.bf16.mxu0 %v14380_v8 }
0x158a   :  { %7368 = vmatpush1.bf16.msra.mxu1 %v13873_v11  ;;  %v11289_v11 = vld [vmem:[#allocation23 + $0x38] ss:$12 sps:$4 sm:$0xff]  }
0x158b   :  { %7369 = vmatprep.subr.bf16.mxu1 %v13876_v57  ;;  %v11290_v57 = vld [vmem:[#allocation23 + $0x50] ss:$12 sps:$4 sm:$0xff]  }
0x158c   :  { %10522 = vmatpush3.bf16.msra.mxu0 %v11288_v10  ;;  %v11314_v10 = vld [vmem:[#allocation23 + $0x68] ss:$12 sps:$4 sm:$0xff]  }
0x158d   :  { %10523 = vmatprep.subr.bf16.mxu0 %v14380_v8 }
0x158e   :  { %7370 = vmatpush1.bf16.msra.mxu1 %v13883_v43  ;;  %v11291_v43 = vld [vmem:[#allocation23 + $0x68] ss:$12 sps:$4 sm:$0xff]  }
0x158f   :  { %7371 = vmatprep.subr.bf16.mxu1 %v13886_v20  ;;  %v11292_v20 = vld [vmem:[#allocation23 + $0x80] ss:$12 sps:$4 sm:$0xff]  }
0x1590   :  { %10524 = vmatpush3.bf16.msra.mxu0 %v11289_v11  ;;  %v14084_v11 = vld [vmem:[#allocation23 + $0x7c] ss:$12 sps:$4 sm:$0xff]  }
0x1591   :  { %10525 = vmatprep.subr.bf16.mxu0 %v14380_v8 }
0x1592   :  { %7372 = vmatpush1.bf16.msra.mxu1 %v13890_v24  ;;  %v11293_v24 = vld [vmem:[#allocation23 + $0x98] ss:$12 sps:$4 sm:$0xff]  }
0x1593   :  { %7373 = vmatprep.subr.bf16.mxu1 %v13893_v34  ;;  %v11294_v34 = vld [vmem:[#allocation23 + $0xb0] ss:$12 sps:$4 sm:$0xff]  }
0x1594   :  { %10526 = vmatpush3.bf16.msra.mxu0 %v11290_v57  ;;  %v14087_v57 = vld [vmem:[#allocation23 + $0x78] ss:$12 sps:$4 sm:$0xff]  }
0x1595   :  { %10527 = vmatprep.subr.bf16.mxu0 %v14380_v8 }
0x1596   :  { %7374 = vmatpush1.bf16.msra.mxu1 %v13897_v61  ;;  %v6939_v61 = vld [vmem:[#allocation24] sm:$0x7] }
0x1597   :  { %7375 = vmatprep.subr.bf16.mxu1 %v13900_v35  ;;  %v6944_v35 = vrot.slane %v6939_v61, %v12479_v15  ;;  %v6952_v3 = vrot.slane %v6939_v61, %v12483_v18 }
0x1598   :  { %10528 = vmatpush3.bf16.msra.mxu0 %v11291_v43  ;;  %v11318_v43 = vld [vmem:[#allocation23 + $0x80] ss:$12 sps:$4 sm:$0xff]  }
0x1599   :  { %10529 = vmatprep.subr.bf16.mxu0 %v14380_v8 }
0x159a   :  { %7376 = vmatpush1.bf16.msra.mxu1 %v13904_v1  ;;  %v6948_v1 = vrot.slane %v6939_v61, %v12481_v17  ;;  %v14098_v61 = vld [vmem:[#allocation23 + $0xac] ss:$12 sps:$4 sm:$0xff]  }
0x159b   :  { %7377 = vmatprep.subr.bf16.mxu1 %v13907_v42 }
0x159c   :  { %10530 = vmatpush3.bf16.msra.mxu0 %v11292_v20  ;;  %v14091_v20 = vld [vmem:[#allocation23 + $0x94] ss:$12 sps:$4 sm:$0xff]  }
0x159d   :  { %10531 = vmatprep.subr.bf16.mxu0 %v14380_v8 }
0x159e   :  { %7378 = vmatpush1.bf16.msra.mxu1 %v13911_v36 }
0x159f   :  { %7379 = vmatprep.subr.bf16.mxu1 %v13914_v54 }
0x15a0   :  { %10532 = vmatpush3.bf16.msra.mxu0 %v11293_v24  ;;  %v14094_v24 = vld [vmem:[#allocation23 + $0x90] ss:$12 sps:$4 sm:$0xff]  }
0x15a1   :  { %10533 = vmatprep.subr.bf16.mxu0 %v14380_v8 }
0x15a2   :  { %7380 = vmatpush1.bf16.msra.mxu1 %v13918_v39 }
0x15a3   :  { %7646 = vmatprep.subr.bf16.mxu1 %v14051_v44 }
0x15a4   :  { %10534 = vmatpush3.bf16.msra.mxu0 %v11294_v34  ;;  %v11322_v34 = vld [vmem:[#allocation23 + $0x98] ss:$12 sps:$4 sm:$0xff]  }
0x15a5   :  { %10539 = vmatprep.subr.bf16.mxu0 %v14380_v8 }
0x1658   :  { %v7118_v42 = vpop.f32.mrb[108].mxu1  ;;  %v7159_v36 = vpop.f32.mrb[100].mxu0 }
0x1659   :  { %v7119_v54 = vadd.f32 %v7118_v42, %v6944_v35  ;;  %v7120_v39 = vpop.f32.mrb[109].mxu1  ;;  %v10517_v60 = vpop.f32.mrb[101].mxu0  ;;  %v7160_v30 = vadd.f32 %v7159_v36, %v6952_v3  ;;  %v14101_v35 = vld [vmem:[#allocation23 + $0xa8] ss:$12 sps:$4 sm:$0xff]   ;;  %v7220_v42 = vld [vmem:[#allocation24] sm:$0x7] }
0x165a   :  { %v7121_v12 = vadd.f32 %v7120_v39, %v6948_v1  ;;  %v7122_v59 = vpop.f32.mrb[110].mxu1  ;;  %v7162_v2 = vpop.f32.mrb[102].mxu0  ;;  %v11326_v1 = vld [vmem:[#allocation23 + $0xb0] ss:$12 sps:$4 sm:$0xff]   ;;  %v7225_v36 = vrot.slane %v7220_v42, %v12479_v15 }
0x165b   :  { %v7165_v28 = vadd.f32 %v7119_v54, %v13958_v48  ;;  %v7123_v47 = vpop.f32.mrb[111].mxu1  ;;  %v10518_v7 = vpop.f32.mrb[103].mxu0  ;;  %v7229_v54 = vrot.slane %v7220_v42, %v12481_v17 }
0x165c   :  { %v7166_v25 = vadd.f32 %v7121_v12, %v13961_v49 }
0x165d   :  { %v9495_v63 = vmul.f32 -1.442695, %v7165_v28 }
0x165e   :  { %v9496_v21 = vmul.f32 -1.442695, %v7166_v25 }
0x165f   :  { %11565 = vpow2.f32 %v9495_v63 }
0x1660   :  { %11567 = vpow2.f32 %v9496_v21 }
0x1669   :  { %v11566_v19 = vpop.eup %11565 }
0x166a   :  { %v7173_v52 = vadd.f32 1.0, %v11566_v19  ;;  %v11568_v22 = vpop.eup %11567 }
0x166b   :  { %v7174_v41 = vadd.f32 1.0, %v11568_v22 }
0x166c   :  { %11569 = vrcp.f32 %v7173_v52 }
0x166d   :  { %11571 = vrcp.f32 %v7174_v41 }
0x1676   :  { %v11570_v4 = vpop.eup %11569 }
0x1677   :  { %v7179_v40 = vmul.f32 %v11570_v4, %v7160_v30  ;;  %v11572_v14 = vpop.eup %11571  ;;  %v7233_v4 = vrot.slane %v7220_v42, %v12483_v18  ;;  %v11331_v42 = vld [vmem:[#allocation23 + $0x68] ss:$12 sps:$4 sm:$0xff]  }
0x1678   :  { %v7182_v62 = vsub.f32 1.0, %v11572_v14  ;;  %v7184_v13 = vmul.f32 %v11572_v14, %v14007_v53 }
0x1679   :  { %v7180_v45 = vadd.f32 %v7179_v40, %v13966_v56 }
0x167b   :  { %11573 = vtanh.f32 %v7180_v45 }
0x1685   :  { %v11574_v27 = vpop.eup %11573 }
0x1686   :  { %v7183_v38 = vmul.f32 %v11574_v27, %v7182_v62 }
0x1688   :  { %v14044_v50 = vadd.f32 %v7184_v13, %v7183_v38 }
0x168a   :  { %v7187_v9 = vpack.c.bf16 %v14044_v50, %v14044_v50 }
0x168c   :  { %7398 = vmatmul.mubr.bf16.vlgmr.msra.gmra.mrb[112].mxu1 %v7187_v9  ;;  %10536 = vmatmul.mubr.bf16.vlgmr.msra.gmra.mrb[104].mxu0 %v7187_v9 }
0x168d   :  { %7678 = vmatprep.mubr.bf16.mxu1 %v14379_v58  ;;  %10555 = vmatprep.mubr.msk.bf16.mxu0 %vm11988_vm1, %v14380_v8 }
0x168e   :  { %7647 = vmatpush1.bf16.msra.mxu1 %v14053_v32  ;;  %10540 = vmatpush3.bf16.msra.mxu0 %v11298_v33 }
0x168f   :  { %10541 = vmatprep.subr.bf16.mxu0 %v14380_v8  ;;  %7648 = vmatprep.subr.bf16.mxu1 %v14057_v31 }
0x1692   :  { %7649 = vmatpush1.bf16.msra.mxu1 %v14060_v29  ;;  %10542 = vmatpush3.bf16.msra.mxu0 %v11302_v51 }
0x1693   :  { %10543 = vmatprep.subr.bf16.mxu0 %v14380_v8  ;;  %7650 = vmatprep.subr.bf16.mxu1 %v14064_v16 }
0x1696   :  { %7651 = vmatpush1.bf16.msra.mxu1 %v14067_v37  ;;  %10544 = vmatpush3.bf16.msra.mxu0 %v11306_v55 }
0x1697   :  { %10545 = vmatprep.subr.bf16.mxu0 %v14380_v8  ;;  %7652 = vmatprep.subr.bf16.mxu1 %v14071_v46 }
0x169a   :  { %7653 = vmatpush1.bf16.msra.mxu1 %v14074_v26  ;;  %10546 = vmatpush3.bf16.msra.mxu0 %v11310_v6 }
0x169b   :  { %10547 = vmatprep.subr.bf16.mxu0 %v14380_v8  ;;  %7654 = vmatprep.subr.bf16.mxu1 %v14078_v5 }
0x169e   :  { %7655 = vmatpush1.bf16.msra.mxu1 %v14081_v23  ;;  %10548 = vmatpush3.bf16.msra.mxu0 %v11314_v10  ;;  %v11327_v10 = vld [vmem:[#allocation23 + $0x8] ss:$12 sps:$4 sm:$0xff]  }
0x169f   :  { %7656 = vmatprep.subr.bf16.mxu1 %v14084_v11  ;;  %10549 = vmatprep.subr.bf16.mxu0 %v14380_v8 }
0x16a2   :  { %7657 = vmatpush1.bf16.msra.mxu1 %v14087_v57  ;;  %10550 = vmatpush3.bf16.msra.mxu0 %v11318_v43  ;;  %v11328_v43 = vld [vmem:[#allocation23 + $0x20] ss:$12 sps:$4 sm:$0xff]  }
0x16a3   :  { %7658 = vmatprep.subr.bf16.mxu1 %v14091_v20  ;;  %10551 = vmatprep.subr.bf16.mxu0 %v14380_v8 }
0x16a6   :  { %7659 = vmatpush1.bf16.msra.mxu1 %v14094_v24  ;;  %10552 = vmatpush3.bf16.msra.mxu0 %v11322_v34  ;;  %v11329_v34 = vld [vmem:[#allocation23 + $0x38] ss:$12 sps:$4 sm:$0xff]  }
0x16a7   :  { %7660 = vmatprep.subr.bf16.mxu1 %v14098_v61  ;;  %10553 = vmatprep.subr.bf16.mxu0 %v14380_v8 }
0x16aa   :  { %7661 = vmatpush1.bf16.msra.mxu1 %v14101_v35  ;;  %10554 = vmatpush3.bf16.msra.mxu0 %v11326_v1  ;;  %v11330_v1 = vld [vmem:[#allocation23 + $0x50] ss:$12 sps:$4 sm:$0xff]  }
0x16ab   :  { %7927 = vmatprep.subr.bf16.mxu1 %v14051_v44  ;;  %10559 = vmatprep.subr.bf16.mxu0 %v14380_v8 }
0x175f   :  { %v7399_v39 = vpop.f32.mrb[112].mxu1  ;;  %v7440_v60 = vpop.f32.mrb[104].mxu0 }
0x1760   :  { %v7400_v12 = vadd.f32 %v7399_v39, %v7225_v36  ;;  %v7401_v59 = vpop.f32.mrb[113].mxu1  ;;  %v10537_v2 = vpop.f32.mrb[105].mxu0  ;;  %v7441_v45 = vadd.f32 %v7440_v60, %v7233_v4  ;;  %v11332_v36 = vld [vmem:[#allocation23 + $0x80] ss:$12 sps:$4 sm:$0xff]   ;;  %v11334_v39 = vld [vmem:[#allocation23 + $0xb0] ss:$12 sps:$4 sm:$0xff]  }
0x1761   :  { %v7402_v28 = vadd.f32 %v7401_v59, %v7229_v54  ;;  %v7403_v47 = vpop.f32.mrb[114].mxu1  ;;  %v7443_v7 = vpop.f32.mrb[106].mxu0  ;;  %v11333_v54 = vld [vmem:[#allocation23 + $0x98] ss:$12 sps:$4 sm:$0xff]   ;;  %v7501_v60 = vld [vmem:[#allocation24] sm:$0x7] }
0x1762   :  { %v7446_v63 = vadd.f32 %v7400_v12, %v13958_v48  ;;  %v7404_v25 = vpop.f32.mrb[115].mxu1  ;;  %v10538_v21 = vpop.f32.mrb[107].mxu0  ;;  %v7506_v12 = vrot.slane %v7501_v60, %v12479_v15  ;;  %v7510_v59 = vrot.slane %v7501_v60, %v12481_v17 }
0x1763   :  { %v7447_v52 = vadd.f32 %v7402_v28, %v13961_v49 }
0x1764   :  { %v9521_v19 = vmul.f32 -1.442695, %v7446_v63 }
0x1765   :  { %v9522_v22 = vmul.f32 -1.442695, %v7447_v52 }
0x1766   :  { %11575 = vpow2.f32 %v9521_v19 }
0x1767   :  { %11577 = vpow2.f32 %v9522_v22 }
0x1770   :  { %v11576_v3 = vpop.eup %11575 }
0x1771   :  { %v7454_v41 = vadd.f32 1.0, %v11576_v3  ;;  %v11578_v30 = vpop.eup %11577 }
0x1772   :  { %v7455_v40 = vadd.f32 1.0, %v11578_v30 }
0x1773   :  { %11579 = vrcp.f32 %v7454_v41 }
0x1774   :  { %11581 = vrcp.f32 %v7455_v40 }
0x177d   :  { %v11580_v14 = vpop.eup %11579 }
0x177e   :  { %v7460_v62 = vmul.f32 %v11580_v14, %v7441_v45  ;;  %v11582_v38 = vpop.eup %11581 }
0x177f   :  { %v7463_v13 = vsub.f32 1.0, %v11582_v38  ;;  %v7465_v51 = vmul.f32 %v11582_v38, %v14044_v50 }
0x1780   :  { %v7461_v27 = vadd.f32 %v7460_v62, %v13966_v56  ;;  %v7514_v62 = vrot.slane %v7501_v60, %v12483_v18  ;;  %v11338_v60 = vld [vmem:[#allocation23 + $0x50] ss:$12 sps:$4 sm:$0xff]  }
0x1782   :  { %11583 = vtanh.f32 %v7461_v27 }
0x178c   :  { %v11584_v9 = vpop.eup %11583 }
0x178d   :  { %v7464_v33 = vmul.f32 %v11584_v9, %v7463_v13 }
0x178f   :  { %v14115_v55 = vadd.f32 %v7465_v51, %v7464_v33 }
0x1791   :  { %v7468_v6 = vpack.c.bf16 %v14115_v55, %v14115_v55 }
0x1793   :  { %7679 = vmatmul.mubr.bf16.vlgmr.msra.gmra.mrb[116].mxu1 %v7468_v6  ;;  %10556 = vmatmul.mubr.bf16.vlgmr.msra.gmra.mrb[108].mxu0 %v7468_v6 }
0x1794   :  { %7928 = vmatpush1.bf16.msra.mxu1 %v14053_v32  ;;  %7959 = vmatprep.mubr.bf16.mxu1 %v14379_v58 }
0x1795   :  { %7929 = vmatprep.subr.bf16.mxu1 %v14057_v31  ;;  %10575 = vmatprep.mubr.msk.bf16.mxu0 %vm11988_vm1, %v14380_v8 }
0x1796   :  { %10560 = vmatpush3.bf16.msra.mxu0 %v11327_v10 }
0x1797   :  { %10561 = vmatprep.subr.bf16.mxu0 %v14380_v8 }
0x1798   :  { %7930 = vmatpush1.bf16.msra.mxu1 %v14060_v29 }
0x1799   :  { %7931 = vmatprep.subr.bf16.mxu1 %v14064_v16 }
0x179a   :  { %10562 = vmatpush3.bf16.msra.mxu0 %v11328_v43 }
0x179b   :  { %10563 = vmatprep.subr.bf16.mxu0 %v14380_v8 }
0x179c   :  { %7932 = vmatpush1.bf16.msra.mxu1 %v14067_v37 }
0x179d   :  { %7933 = vmatprep.subr.bf16.mxu1 %v14071_v46 }
0x179e   :  { %10564 = vmatpush3.bf16.msra.mxu0 %v11329_v34 }
0x179f   :  { %10565 = vmatprep.subr.bf16.mxu0 %v14380_v8 }
0x17a0   :  { %7934 = vmatpush1.bf16.msra.mxu1 %v14074_v26 }
0x17a1   :  { %7935 = vmatprep.subr.bf16.mxu1 %v14078_v5 }
0x17a2   :  { %10566 = vmatpush3.bf16.msra.mxu0 %v11330_v1 }
0x17a3   :  { %10567 = vmatprep.subr.bf16.mxu0 %v14380_v8 }
0x17a4   :  { %7936 = vmatpush1.bf16.msra.mxu1 %v14081_v23 }
0x17a5   :  { %7937 = vmatprep.subr.bf16.mxu1 %v14084_v11 }
0x17a6   :  { %10568 = vmatpush3.bf16.msra.mxu0 %v11331_v42 }
0x17a7   :  { %10569 = vmatprep.subr.bf16.mxu0 %v14380_v8 }
0x17a8   :  { %7938 = vmatpush1.bf16.msra.mxu1 %v14087_v57 }
0x17a9   :  { %7939 = vmatprep.subr.bf16.mxu1 %v14091_v20 }
0x17aa   :  { %10570 = vmatpush3.bf16.msra.mxu0 %v11332_v36  ;;  %v11335_v36 = vld [vmem:[#allocation23 + $0x8] ss:$12 sps:$4 sm:$0xff]  }
0x17ab   :  { %10571 = vmatprep.subr.bf16.mxu0 %v14380_v8 }
0x17ac   :  { %7940 = vmatpush1.bf16.msra.mxu1 %v14094_v24 }
0x17ad   :  { %7941 = vmatprep.subr.bf16.mxu1 %v14098_v61 }
0x17ae   :  { %10572 = vmatpush3.bf16.msra.mxu0 %v11333_v54  ;;  %v11336_v54 = vld [vmem:[#allocation23 + $0x20] ss:$12 sps:$4 sm:$0xff]  }
0x17af   :  { %10573 = vmatprep.subr.bf16.mxu0 %v14380_v8 }
0x17b0   :  { %7942 = vmatpush1.bf16.msra.mxu1 %v14101_v35 }
0x17b1   :  { %8208 = vmatprep.subr.bf16.mxu1 %v14051_v44 }
0x17b2   :  { %10574 = vmatpush3.bf16.msra.mxu0 %v11334_v39  ;;  %v11337_v39 = vld [vmem:[#allocation23 + $0x38] ss:$12 sps:$4 sm:$0xff]  }
0x17b3   :  { %10579 = vmatprep.subr.bf16.mxu0 %v14380_v8 }
0x1866   :  { %v7680_v2 = vpop.f32.mrb[116].mxu1  ;;  %v7721_v28 = vpop.f32.mrb[108].mxu0 }
0x1867   :  { %v7681_v47 = vadd.f32 %v7680_v2, %v7506_v12  ;;  %v7682_v7 = vpop.f32.mrb[117].mxu1  ;;  %v10557_v63 = vpop.f32.mrb[109].mxu0  ;;  %v7722_v38 = vadd.f32 %v7721_v28, %v7514_v62  ;;  %v11339_v12 = vld [vmem:[#allocation23 + $0x68] ss:$12 sps:$4 sm:$0xff]   ;;  %v11342_v2 = vld [vmem:[#allocation23 + $0xb0] ss:$12 sps:$4 sm:$0xff]  }
0x1868   :  { %v7683_v25 = vadd.f32 %v7682_v7, %v7510_v59  ;;  %v7684_v21 = vpop.f32.mrb[118].mxu1  ;;  %v7724_v19 = vpop.f32.mrb[110].mxu0  ;;  %v11340_v59 = vld [vmem:[#allocation23 + $0x80] ss:$12 sps:$4 sm:$0xff]  }
0x1869   :  { %v7727_v52 = vadd.f32 %v7681_v47, %v13958_v48  ;;  %v7685_v22 = vpop.f32.mrb[119].mxu1  ;;  %v10558_v3 = vpop.f32.mrb[111].mxu0  ;;  %v7782_v28 = vld [vmem:[#allocation24] sm:$0x7] }
0x186a   :  { %v7728_v30 = vadd.f32 %v7683_v25, %v13961_v49  ;;  %v7787_v47 = vrot.slane %v7782_v28, %v12479_v15  ;;  %v7791_v7 = vrot.slane %v7782_v28, %v12481_v17 }
0x186b   :  { %v9547_v41 = vmul.f32 -1.442695, %v7727_v52 }
0x186c   :  { %v9548_v4 = vmul.f32 -1.442695, %v7728_v30 }
0x186d   :  { %11585 = vpow2.f32 %v9547_v41 }
0x186e   :  { %11587 = vpow2.f32 %v9548_v4 }
0x1877   :  { %v11586_v40 = vpop.eup %11585 }
0x1878   :  { %v7735_v45 = vadd.f32 1.0, %v11586_v40  ;;  %v11588_v14 = vpop.eup %11587 }
0x1879   :  { %v7736_v27 = vadd.f32 1.0, %v11588_v14 }
0x187a   :  { %11589 = vrcp.f32 %v7735_v45 }
0x187b   :  { %11591 = vrcp.f32 %v7736_v27 }
0x1884   :  { %v11590_v13 = vpop.eup %11589 }
0x1885   :  { %v7741_v9 = vmul.f32 %v11590_v13, %v7722_v38  ;;  %v11592_v51 = vpop.eup %11591 }
0x1886   :  { %v7744_v6 = vsub.f32 1.0, %v11592_v51  ;;  %v7746_v34 = vmul.f32 %v11592_v51, %v14115_v55 }
0x1887   :  { %v7742_v33 = vadd.f32 %v7741_v9, %v13966_v56  ;;  %v7795_v9 = vrot.slane %v7782_v28, %v12483_v18 }
0x1889   :  { %11593 = vtanh.f32 %v7742_v33 }
0x1893   :  { %v11594_v10 = vpop.eup %11593 }
0x1894   :  { %v7745_v43 = vmul.f32 %v11594_v10, %v7744_v6 }
0x1896   :  { %v14153_v1 = vadd.f32 %v7746_v34, %v7745_v43 }
0x1898   :  { %v7749_v42 = vpack.c.bf16 %v14153_v1, %v14153_v1 }
0x189a   :  { %7960 = vmatmul.mubr.bf16.vlgmr.msra.gmra.mrb[120].mxu1 %v7749_v42  ;;  %10576 = vmatmul.mubr.bf16.vlgmr.msra.gmra.mrb[112].mxu0 %v7749_v42 }
0x189b   :  { %8209 = vmatpush1.bf16.msra.mxu1 %v14053_v32  ;;  %8240 = vmatprep.mubr.bf16.mxu1 %v14379_v58 }
0x189c   :  { %8210 = vmatprep.subr.bf16.mxu1 %v14057_v31  ;;  %10595 = vmatprep.mubr.msk.bf16.mxu0 %vm11988_vm1, %v14380_v8 }
0x189d   :  { %10580 = vmatpush3.bf16.msra.mxu0 %v11335_v36 }
0x189e   :  { %10581 = vmatprep.subr.bf16.mxu0 %v14380_v8 }
0x189f   :  { %8211 = vmatpush1.bf16.msra.mxu1 %v14060_v29 }
0x18a0   :  { %8212 = vmatprep.subr.bf16.mxu1 %v14064_v16 }
0x18a1   :  { %10582 = vmatpush3.bf16.msra.mxu0 %v11336_v54 }
0x18a2   :  { %10583 = vmatprep.subr.bf16.mxu0 %v14380_v8 }
0x18a3   :  { %8213 = vmatpush1.bf16.msra.mxu1 %v14067_v37 }
0x18a4   :  { %8214 = vmatprep.subr.bf16.mxu1 %v14071_v46 }
0x18a5   :  { %10584 = vmatpush3.bf16.msra.mxu0 %v11337_v39 }
0x18a6   :  { %10585 = vmatprep.subr.bf16.mxu0 %v14380_v8 }
0x18a7   :  { %8215 = vmatpush1.bf16.msra.mxu1 %v14074_v26 }
0x18a8   :  { %8216 = vmatprep.subr.bf16.mxu1 %v14078_v5 }
0x18a9   :  { %10586 = vmatpush3.bf16.msra.mxu0 %v11338_v60 }
0x18aa   :  { %10587 = vmatprep.subr.bf16.mxu0 %v14380_v8 }
0x18ab   :  { %8217 = vmatpush1.bf16.msra.mxu1 %v14081_v23 }
0x18ac   :  { %8218 = vmatprep.subr.bf16.mxu1 %v14084_v11 }
0x18ad   :  { %10588 = vmatpush3.bf16.msra.mxu0 %v11339_v12 }
0x18ae   :  { %10589 = vmatprep.subr.bf16.mxu0 %v14380_v8 }
0x18af   :  { %8219 = vmatpush1.bf16.msra.mxu1 %v14087_v57 }
0x18b0   :  { %8220 = vmatprep.subr.bf16.mxu1 %v14091_v20 }
0x18b1   :  { %10590 = vmatpush3.bf16.msra.mxu0 %v11340_v59 }
0x18b2   :  { %10591 = vmatprep.subr.bf16.mxu0 %v14380_v8 }
0x18b3   :  { %8221 = vmatpush1.bf16.msra.mxu1 %v14094_v24 }
0x18b4   :  { %8222 = vmatprep.subr.bf16.mxu1 %v14098_v61 }
0x18b7   :  { %8223 = vmatpush1.bf16.msra.mxu1 %v14101_v35 }
0x18b8   :  { %8489 = vmatprep.subr.bf16.mxu1 %v14051_v44  ;;  %v11341_v44 = vld [vmem:[#allocation23 + $0x98] ss:$12 sps:$4 sm:$0xff]  }
0x18b9   :  { %10592 = vmatpush3.bf16.msra.mxu0 %v11341_v44 }
0x18ba   :  { %10593 = vmatprep.subr.bf16.mxu0 %v14380_v8 }
0x18bd   :  { %10594 = vmatpush3.bf16.msra.mxu0 %v11342_v2 }
0x18be   :  { %10599 = vmatprep.subr.bf16.mxu0 %v14380_v8 }
0x196d   :  { %v7961_v63 = vpop.f32.mrb[120].mxu1  ;;  %v8002_v25 = vpop.f32.mrb[112].mxu0 }
0x196e   :  { %v7962_v21 = vadd.f32 %v7961_v63, %v7787_v47  ;;  %v7963_v19 = vpop.f32.mrb[121].mxu1  ;;  %v10577_v52 = vpop.f32.mrb[113].mxu0  ;;  %v8003_v51 = vadd.f32 %v8002_v25, %v7795_v9 }
0x196f   :  { %v7964_v22 = vadd.f32 %v7963_v19, %v7791_v7  ;;  %v7965_v3 = vpop.f32.mrb[122].mxu1  ;;  %v8005_v41 = vpop.f32.mrb[114].mxu0 }
0x1970   :  { %v8008_v30 = vadd.f32 %v7962_v21, %v13958_v48  ;;  %v7966_v4 = vpop.f32.mrb[123].mxu1  ;;  %v10578_v40 = vpop.f32.mrb[115].mxu0 }
0x1971   :  { %v8009_v14 = vadd.f32 %v7964_v22, %v13961_v49 }
0x1972   :  { %v9573_v45 = vmul.f32 -1.442695, %v8008_v30 }
0x1973   :  { %v9574_v62 = vmul.f32 -1.442695, %v8009_v14 }
0x1974   :  { %11595 = vpow2.f32 %v9573_v45 }
0x1975   :  { %11597 = vpow2.f32 %v9574_v62 }
0x197e   :  { %v11596_v27 = vpop.eup %11595 }
0x197f   :  { %v8016_v38 = vadd.f32 1.0, %v11596_v27  ;;  %v11598_v13 = vpop.eup %11597 }
0x1980   :  { %v8017_v33 = vadd.f32 1.0, %v11598_v13 }
0x1981   :  { %11599 = vrcp.f32 %v8016_v38 }
0x1982   :  { %11601 = vrcp.f32 %v8017_v33 }
0x198b   :  { %v11600_v6 = vpop.eup %11599 }
0x198c   :  { %v8022_v10 = vmul.f32 %v11600_v6, %v8003_v51  ;;  %v11602_v34 = vpop.eup %11601  ;;  %v10895_v51 = vpack.c.bf16 %v14115_v55, %v14044_v50 }
0x198d   :  { %v8025_v42 = vsub.f32 1.0, %v11602_v34  ;;  %v8027_v39 = vmul.f32 %v11602_v34, %v14153_v1  ;;  %v8795_v34 = vld [vmem:[#allocation26 + $0x8] sm:$0xff] }
0x198e   :  { %v8023_v43 = vadd.f32 %v8022_v10, %v13966_v56  ;;  %v8600_v10 = vld [vmem:[%s14333_s21] sm:$0xff] }
0x1990   :  { %11603 = vtanh.f32 %v8023_v43  ;;  %v8794_v43 = vld [vmem:[#allocation26] sm:$0xff] }
0x199a   :  { %v11604_v36 = vpop.eup %11603 }
0x199b   :  { %v8026_v54 = vmul.f32 %v11604_v36, %v8025_v42  ;;  %v8796_v42 = vld [vmem:[#allocation26 + $0x10] sm:$0xff]  ;;  %v10907_v36 = vpack.c.bf16 %v8795_v34, %v8794_v43  ;;  %v8604_v43 = vld [vmem:[%s14333_s21 + $0x20] sm:$0xff] }
0x199c   :  { %v8605_v34 = vld [vmem:[%s14333_s21 + $0x28] sm:$0xff] }
0x199d   :  { %v14191_v60 = vadd.f32 %v8027_v39, %v8026_v54  ;;  %v8797_v54 = vld [vmem:[#allocation26 + $0x18] sm:$0xff] }
0x199e   :  { %v10911_v39 = vpack.c.bf16 %v8797_v54, %v8796_v42  ;;  %v8606_v42 = vld [vmem:[%s14333_s21 + $0x30] sm:$0xff] }
0x199f   :  { %v8030_v12 = vpack.c.bf16 %v14191_v60, %v14191_v60  ;;  %v10899_v6 = vpack.c.bf16 %v14191_v60, %v14153_v1  ;;  %v8808_v54 = vld [vmem:[#allocation26 + $0x70] sm:$0xff] }
0x19a1   :  { %8241 = vmatmul.mubr.bf16.vlgmr.msra.gmra.mrb[124].mxu1 %v8030_v12  ;;  %10596 = vmatmul.mubr.bf16.vlgmr.msra.gmra.mrb[116].mxu0 %v8030_v12  ;;  %v8798_v12 = vld [vmem:[#allocation26 + $0x20] sm:$0xff] }
0x19a2   :  { %8490 = vmatpush1.bf16.msra.mxu1 %v14053_v32  ;;  %8521 = vmatprep.mubr.bf16.mxu1 %v14379_v58  ;;  %v14214_v58 = vpack.c.bf16 %v14007_v53, %v13969_v0  ;;  %v11343_v32 = vld [vmem:[#allocation23 + $0x8] ss:$12 sps:$4 sm:$0xff]  }
0x19a3   :  { %8491 = vmatprep.subr.bf16.mxu1 %v14057_v31  ;;  %10615 = vmatprep.mubr.msk.bf16.mxu0 %vm11988_vm1, %v14380_v8  ;;  %v11344_v31 = vld [vmem:[#allocation23 + $0x20] ss:$12 sps:$4 sm:$0xff]  }
0x19a4   :  { %10600 = vmatpush3.bf16.msra.mxu0 %v11343_v32 }
0x19a5   :  { %10601 = vmatprep.subr.bf16.mxu0 %v14380_v8 }
0x19a6   :  { %8492 = vmatpush1.bf16.msra.mxu1 %v14060_v29  ;;  %v11345_v29 = vld [vmem:[#allocation23 + $0x38] ss:$12 sps:$4 sm:$0xff]  }
0x19a7   :  { %8493 = vmatprep.subr.bf16.mxu1 %v14064_v16  ;;  %v11346_v16 = vld [vmem:[#allocation23 + $0x50] ss:$12 sps:$4 sm:$0xff]  }
0x19a8   :  { %10602 = vmatpush3.bf16.msra.mxu0 %v11344_v31  ;;  %v8800_v31 = vld [vmem:[#allocation26 + $0x30] sm:$0xff] }
0x19a9   :  { %10603 = vmatprep.subr.bf16.mxu0 %v14380_v8 }
0x19aa   :  { %8494 = vmatpush1.bf16.msra.mxu1 %v14067_v37  ;;  %v11347_v37 = vld [vmem:[#allocation23 + $0x68] ss:$12 sps:$4 sm:$0xff]  }
0x19ab   :  { %8495 = vmatprep.subr.bf16.mxu1 %v14071_v46  ;;  %v11348_v46 = vld [vmem:[#allocation23 + $0x80] ss:$12 sps:$4 sm:$0xff]  }
0x19ac   :  { %10604 = vmatpush3.bf16.msra.mxu0 %v11345_v29  ;;  %v8801_v29 = vld [vmem:[#allocation26 + $0x38] sm:$0xff] }
0x19ad   :  { %10605 = vmatprep.subr.bf16.mxu0 %v14380_v8 }
0x19ae   :  { %8496 = vmatpush1.bf16.msra.mxu1 %v14074_v26  ;;  %v11349_v26 = vld [vmem:[#allocation23 + $0x98] ss:$12 sps:$4 sm:$0xff]  }
0x19af   :  { %8497 = vmatprep.subr.bf16.mxu1 %v14078_v5  ;;  %v11350_v5 = vld [vmem:[#allocation23 + $0xb0] ss:$12 sps:$4 sm:$0xff]  }
0x19b0   :  { %10606 = vmatpush3.bf16.msra.mxu0 %v11346_v16  ;;  %v10919_v16 = vpack.c.bf16 %v8801_v29, %v8800_v31 }
0x19b1   :  { %10607 = vmatprep.subr.bf16.mxu0 %v14380_v8 }
0x19b2   :  { %8498 = vmatpush1.bf16.msra.mxu1 %v14081_v23  ;;  %v8063_v23 = vld [vmem:[#allocation24] sm:$0x7] }
0x19b3   :  { %8499 = vmatprep.subr.bf16.mxu1 %v14084_v11  ;;  %v8068_v11 = vrot.slane %v8063_v23, %v12479_v15  ;;  %v8076_v3 = vrot.slane %v8063_v23, %v12483_v18 }
0x19b4   :  { %10608 = vmatpush3.bf16.msra.mxu0 %v11347_v37  ;;  %v8802_v37 = vld [vmem:[#allocation26 + $0x40] sm:$0xff] }
0x19b5   :  { %10609 = vmatprep.subr.bf16.mxu0 %v14380_v8 }
0x19b6   :  { %8500 = vmatpush1.bf16.msra.mxu1 %v14087_v57  ;;  %v8072_v57 = vrot.slane %v8063_v23, %v12481_v17  ;;  %v8805_v23 = vld [vmem:[#allocation26 + $0x58] sm:$0xff] }
0x19b7   :  { %8501 = vmatprep.subr.bf16.mxu1 %v14091_v20 }
0x19b8   :  { %10610 = vmatpush3.bf16.msra.mxu0 %v11348_v46  ;;  %v8803_v46 = vld [vmem:[#allocation26 + $0x48] sm:$0xff] }
0x19b9   :  { %10611 = vmatprep.subr.bf16.mxu0 %v14380_v8 }
0x19ba   :  { %8502 = vmatpush1.bf16.msra.mxu1 %v14094_v24 }
0x19bb   :  { %8503 = vmatprep.subr.bf16.mxu1 %v14098_v61 }
0x19bc   :  { %10612 = vmatpush3.bf16.msra.mxu0 %v11349_v26  ;;  %v10923_v26 = vpack.c.bf16 %v8803_v46, %v8802_v37 }
0x19bd   :  { %10613 = vmatprep.subr.bf16.mxu0 %v14380_v8 }
0x19be   :  { %8504 = vmatpush1.bf16.msra.mxu1 %v14101_v35 }
0x19bf   :  { %10892 = vmatprep.subr.bf16.mxu1 %v14214_v58 }
0x19c0   :  { %10614 = vmatpush3.bf16.msra.mxu0 %v11350_v5  ;;  %v8804_v5 = vld [vmem:[#allocation26 + $0x50] sm:$0xff] }
0x19c1   :  { %10908 = vmatprep.subr.bf16.mxu0 %v10907_v36 }
0x1a74   :  { %v8242_v20 = vpop.f32.mrb[124].mxu1  ;;  %v8283_v24 = vpop.f32.mrb[116].mxu0 }
0x1a75   :  { %v8243_v61 = vadd.f32 %v8242_v20, %v8068_v11  ;;  %v8244_v35 = vpop.f32.mrb[125].mxu1  ;;  %v10597_v59 = vpop.f32.mrb[117].mxu0  ;;  %v8284_v30 = vadd.f32 %v8283_v24, %v8076_v3  ;;  %v10927_v11 = vpack.c.bf16 %v8805_v23, %v8804_v5  ;;  %v8807_v20 = vld [vmem:[#allocation26 + $0x68] sm:$0xff] }
0x1a76   :  { %v8245_v44 = vadd.f32 %v8244_v35, %v8072_v57  ;;  %v8246_v2 = vpop.f32.mrb[126].mxu1  ;;  %v8286_v28 = vpop.f32.mrb[118].mxu0  ;;  %v8806_v57 = vld [vmem:[#allocation26 + $0x60] sm:$0xff] }
0x1a77   :  { %v8289_v47 = vadd.f32 %v8243_v61, %v13958_v48  ;;  %v8247_v7 = vpop.f32.mrb[127].mxu1  ;;  %v10598_v63 = vpop.f32.mrb[119].mxu0  ;;  %v10931_v24 = vpack.c.bf16 %v8807_v20, %v8806_v57  ;;  %v8344_v61 = vld [vmem:[#allocation24] sm:$0x7] }
0x1a78   :  { %v8290_v8 = vadd.f32 %v8245_v44, %v13961_v49  ;;  %v8349_v35 = vrot.slane %v8344_v61, %v12479_v15  ;;  %v8353_v59 = vrot.slane %v8344_v61, %v12481_v17 }
0x1a79   :  { %v9599_v25 = vmul.f32 -1.442695, %v8289_v47 }
0x1a7a   :  { %v9600_v21 = vmul.f32 -1.442695, %v8290_v8 }
0x1a7b   :  { %11605 = vpow2.f32 %v9599_v25 }
0x1a7c   :  { %11607 = vpow2.f32 %v9600_v21 }
0x1a85   :  { %v11606_v19 = vpop.eup %11605 }
0x1a86   :  { %v8297_v52 = vadd.f32 1.0, %v11606_v19  ;;  %v11608_v22 = vpop.eup %11607 }
0x1a87   :  { %v8298_v41 = vadd.f32 1.0, %v11608_v22 }
0x1a88   :  { %11609 = vrcp.f32 %v8297_v52 }
0x1a89   :  { %11611 = vrcp.f32 %v8298_v41 }
0x1a92   :  { %v11610_v4 = vpop.eup %11609 }
0x1a93   :  { %v8303_v40 = vmul.f32 %v11610_v4, %v8284_v30  ;;  %v11612_v14 = vpop.eup %11611  ;;  %v8357_v4 = vrot.slane %v8344_v61, %v12483_v18  ;;  %v8601_v18 = vld [vmem:[%s14333_s21 + $0x8] sm:$0xff] }
0x1a94   :  { %v8306_v62 = vsub.f32 1.0, %v11612_v14  ;;  %v8308_v13 = vmul.f32 %v11612_v14, %v14191_v60 }
0x1a95   :  { %v8304_v45 = vadd.f32 %v8303_v40, %v13966_v56 }
0x1a97   :  { %11613 = vtanh.f32 %v8304_v45 }
0x1aa1   :  { %v11614_v27 = vpop.eup %11613 }
0x1aa2   :  { %v8307_v38 = vmul.f32 %v11614_v27, %v8306_v62 }
0x1aa4   :  { %v14232_v9 = vadd.f32 %v8308_v13, %v8307_v38 }
0x1aa6   :  { %v8311_v33 = vpack.c.bf16 %v14232_v9, %v14232_v9 }
0x1aa8   :  { %8522 = vmatmul.mubr.bf16.vlgmr.msra.gmra.mrb[128].mxu1 %v8311_v33  ;;  %10616 = vmatmul.mubr.bf16.vlgmr.msra.gmra.mrb[120].mxu0 %v8311_v33 }
0x1aa9   :  { %10894 = vmatpush3.bf16.msra.mxu1 %v14214_v58  ;;  %10635 = vmatprep.mubr.msk.f32.mxu1 %vm8656_vm4, %v8600_v10  ;;  %v8799_v58 = vld [vmem:[#allocation26 + $0x28] sm:$0xff]  ;;  %v8603_v10 = vld [vmem:[%s14333_s21 + $0x18] sm:$0xff] }
0x1aaa   :  { %10896 = vmatprep.subr.bf16.mxu1 %v10895_v51  ;;  %10910 = vmatpush3.bf16.msra.mxu0 %v10907_v36  ;;  %v10915_v32 = vpack.c.bf16 %v8799_v58, %v8798_v12  ;;  %v8607_v36 = vld [vmem:[%s14333_s21 + $0x38] sm:$0xff]  ;;  %v8624_v58 = vpop.permute.xlu1 %8623 }
0x1aab   :  { %10912 = vmatprep.subr.bf16.mxu0 %v10911_v39 }
0x1aad   :  { %10898 = vmatpush3.bf16.msra.mxu1 %v10895_v51 }
0x1aae   :  { %10900 = vmatprep.subr.bf16.mxu1 %v10899_v6  ;;  %10914 = vmatpush3.bf16.msra.mxu0 %v10911_v39  ;;  %v8809_v39 = vld [vmem:[#allocation26 + $0x78] sm:$0xff]  ;;  %v8634_v31 = vpop.permute.xlu1 %8633 }
0x1aaf   :  { %10916 = vmatprep.subr.bf16.mxu0 %v10915_v32  ;;  %v10935_v12 = vpack.c.bf16 %v8809_v39, %v8808_v54 }
0x1ab1   :  { %10902 = vmatpush3.bf16.msra.mxu1 %v10899_v6 }
0x1ab2   :  { %10918 = vmatpush3.bf16.msra.mxu0 %v10915_v32  ;;  %v8619_v32 = vpop.permute.xlu0 %8618 }
0x1ab3   :  { %10920 = vmatprep.subr.bf16.mxu0 %v10919_v16 }
0x1ab6   :  { %10922 = vmatpush3.bf16.msra.mxu0 %v10919_v16  ;;  %v8629_v16 = vpop.permute.xlu0 %8628 }
0x1ab7   :  { %10924 = vmatprep.subr.bf16.mxu0 %v10923_v26 }
0x1aba   :  { %10926 = vmatpush3.bf16.msra.mxu0 %v10923_v26 }
0x1abb   :  { %10928 = vmatprep.subr.bf16.mxu0 %v10927_v11 }
0x1abe   :  { %10930 = vmatpush3.bf16.msra.mxu0 %v10927_v11 }
0x1abf   :  { %10932 = vmatprep.subr.bf16.mxu0 %v10931_v24 }
0x1ac2   :  { %10934 = vmatpush3.bf16.msra.mxu0 %v10931_v24  ;;  %v8644_v24 = vpop.permute.xlu1 %8643 }
0x1ac3   :  { %10936 = vmatprep.subr.bf16.mxu0 %v10935_v12 }
0x1ac6   :  { %10938 = vmatpush3.bf16.msra.mxu0 %v10935_v12 }
0x1b7b   :  { %v8523_v44 = vpop.f32.mrb[128].mxu1  ;;  %v8564_v2 = vpop.f32.mrb[120].mxu0 }
0x1b7c   :  { %v8524_v28 = vadd.f32 %v8523_v44, %v8349_v35  ;;  %v8525_v47 = vpop.f32.mrb[129].mxu1  ;;  %v10617_v7 = vpop.f32.mrb[121].mxu0  ;;  %v8565_v45 = vadd.f32 %v8564_v2, %v8357_v4 }
0x1b7d   :  { %v8526_v63 = vadd.f32 %v8525_v47, %v8353_v59  ;;  %v8527_v25 = vpop.f32.mrb[130].mxu1  ;;  %v8567_v8 = vpop.f32.mrb[122].mxu0 }
0x1b7e   :  { %v8570_v21 = vadd.f32 %v8524_v28, %v13958_v48  ;;  %v8528_v19 = vpop.f32.mrb[131].mxu1  ;;  %v10618_v52 = vpop.f32.mrb[123].mxu0 }
0x1b7f   :  { %v8571_v3 = vadd.f32 %v8526_v63, %v13961_v49  ;;  %v8639_v35 = vpop.permute.xlu0 %8638 }
0x1b80   :  { %v9625_v22 = vmul.f32 -1.442695, %v8570_v21 }
0x1b81   :  { %v9626_v41 = vmul.f32 -1.442695, %v8571_v3 }
0x1b82   :  { %11615 = vpow2.f32 %v9625_v22  ;;  %v9635_v22 = vld [vmem:[#allocation27] ss:$0 sm:$0xff] }
0x1b83   :  { %11617 = vpow2.f32 %v9626_v41  ;;  %v8649_v25 = vpop.permute.xlu0 %8648 }
0x1b8c   :  { %v11616_v15 = vpop.eup %11615 }
0x1b8d   :  { %v8578_v17 = vadd.f32 1.0, %v11616_v15  ;;  %v11618_v30 = vpop.eup %11617 }
0x1b8e   :  { %v8579_v40 = vadd.f32 1.0, %v11618_v30 }
0x1b8f   :  { %11619 = vrcp.f32 %v8578_v17 }
0x1b90   :  { %11621 = vrcp.f32 %v8579_v40 }
0x1b99   :  { %v11620_v14 = vpop.eup %11619 }
0x1b9a   :  { %v8584_v62 = vmul.f32 %v11620_v14, %v8565_v45  ;;  %v11622_v27 = vpop.eup %11621 }
0x1b9b   :  { %v8587_v38 = vsub.f32 1.0, %v11622_v27  ;;  %v8589_v33 = vmul.f32 %v11622_v27, %v14232_v9 }
0x1b9c   :  { %v8585_v48 = vadd.f32 %v8584_v62, %v13966_v56  ;;  %v8602_v56 = vld [vmem:[%s14333_s21 + $0x10] sm:$0xff] }
0x1b9e   :  { %11623 = vtanh.f32 %v8585_v48 }
0x1ba8   :  { %v11624_v49 = vpop.eup %11623 }
0x1ba9   :  { %v8588_v13 = vmul.f32 %v11624_v49, %v8587_v38 }
0x1bab   :  { %v8590_v51 = vadd.f32 %v8589_v33, %v8588_v13 }
0x1bad   :  { %v10903_v6 = vpack.c.bf16 %v8590_v51, %v14232_v9 }
0x1baf   :  { %10904 = vmatprep.subr.bf16.mxu1 %v10903_v6 }
0x1bb0   :  { %10906 = vmatpush3.bf16.msra.mxu1 %v10903_v6 }
0x1bb3   :  { %10636 = vmatmul.mubr.msk.f32.vlgmr.msra.gmra.mrb[98].mxu1 %vm8656_vm4, %v8601_v18 }
0x1bb4   :  { %10638 = vmatprep.mubr.msk.f32.mxu1 %vm8656_vm4, %v8602_v56 }
0x1bb7   :  { %10639 = vmatmul.mubr.msk.f32.gmra.mrb[132].mxu1 %vm8656_vm4, %v8603_v10 }
0x1bb8   :  { %10641 = vmatprep.mubr.msk.f32.mxu1 %vm8656_vm4, %v8604_v43 }
0x1bbb   :  { %10642 = vmatmul.mubr.msk.f32.gmra.mrb[134].mxu1 %vm8656_vm4, %v8605_v34 }
0x1bbc   :  { %10644 = vmatprep.mubr.msk.f32.mxu1 %vm8656_vm4, %v8606_v42 }
0x1bbf   :  { %10645 = vmatmul.mubr.msk.f32.gmra.mrb[136].mxu1 %vm8656_vm4, %v8607_v36 }
0x1c86   :  { %v10637_v29 = vpop.f32.mrb[98].mxu1 }
0x1c87   :  { %v8753_v37 = vadd.f32 %v10637_v29, %v8624_v58  ;;  %v8747_v46 = vpop.f32.mrb[99].mxu1 }
0x1c88   :  { %v8748_v26 = vadd.f32 %v8747_v46, %v8619_v32 }
0x1c89   :  { %v8787_v11 = vmul.f32 %v8753_v37, %v14007_v53 }
0x1c8a   :  { %v8786_v5 = vmul.f32 %v8748_v26, %v13969_v0  ;;  %v10640_v23 = vpop.f32.mrb[132].mxu1  ;;  %v8654_v0 = vpop.permute.xlu1 %8653 }
0x1c8b   :  { %v8763_v57 = vadd.f32 %v10640_v23, %v8634_v31  ;;  %v8757_v20 = vpop.f32.mrb[133].mxu1 }
0x1c8c   :  { %v8758_v61 = vadd.f32 %v8757_v20, %v8629_v16  ;;  %10679 = vmatprep.mubr.f32.mxu0 %v8786_v5 }
0x1c8d   :  { %10680 = vmatmul.mubr.f32.vlgmr.msra.gmra.mrb[90].mxu0 %v8787_v11  ;;  %v8789_v2 = vmul.f32 %v8763_v57, %v14115_v55 }
0x1c8e   :  { %v8788_v59 = vmul.f32 %v8758_v61, %v14044_v50  ;;  %v10643_v44 = vpop.f32.mrb[134].mxu1 }
0x1c8f   :  { %v8773_v28 = vadd.f32 %v10643_v44, %v8644_v24  ;;  %v8767_v47 = vpop.f32.mrb[135].mxu1 }
0x1c90   :  { %v8768_v7 = vadd.f32 %v8767_v47, %v8639_v35  ;;  %10682 = vmatprep.mubr.f32.mxu0 %v8788_v59 }
0x1c91   :  { %10683 = vmatmul.mubr.f32.gmra.mrb[124].mxu0 %v8789_v2  ;;  %v8791_v8 = vmul.f32 %v8773_v28, %v14191_v60 }
0x1c92   :  { %v8790_v53 = vmul.f32 %v8768_v7, %v14153_v1  ;;  %v10646_v63 = vpop.f32.mrb[136].mxu1 }
0x1c93   :  { %v8783_v21 = vadd.f32 %v10646_v63, %v8654_v0  ;;  %v8777_v19 = vpop.f32.mrb[137].mxu1 }
0x1c94   :  { %v8778_v52 = vadd.f32 %v8777_v19, %v8649_v25  ;;  %10685 = vmatprep.mubr.f32.mxu0 %v8790_v53 }
0x1c95   :  { %10686 = vmatmul.mubr.f32.gmra.mrb[126].mxu0 %v8791_v8  ;;  %v8793_v55 = vmul.f32 %v8783_v21, %v8590_v51 }
0x1c96   :  { %v8792_v50 = vmul.f32 %v8778_v52, %v14232_v9 }
0x1c98   :  { %10688 = vmatprep.mubr.f32.mxu0 %v8792_v50 }
0x1c99   :  { %10689 = vmatmul.mubr.f32.gmra.mrb[128].mxu0 %v8793_v55 }
0x1d60   :  { %v10681_v3 = vpop.f32.mrb[90].mxu0 }
0x1d61   :  { %v8889_v41 = vadd.f32 %v10681_v3, %v9635_v22  ;;  %v8883_v15 = vpop.f32.mrb[91].mxu0 }
0x1d62   :  { %v8884_v17 = vadd.f32 %v9635_v22, %v8883_v15 }
0x1d63   :  { %vm8923_vm5 = vcmp.gt.f32.partialorder %v8889_v41, 0.0  ;;  %v8931_v1 = vmul.f32 0.01, %v8889_v41 }
0x1d64   :  { %vm8922_vm6 = vcmp.gt.f32.partialorder %v8884_v17, 0.0  ;;  %v8930_v30 = vmul.f32 0.01, %v8884_v17  ;;  %v10684_v60 = vpop.f32.mrb[124].mxu0 }
0x1d65   :  { %v8939_v4 = vsel %vm8923_vm5, %v8889_v41, %v8931_v1  ;;  %v8899_v40 = vadd.f32 %v10684_v60, %v9635_v22  ;;  %v8893_v45 = vpop.f32.mrb[125].mxu0 }
0x1d66   :  { %8947 = vst [vmem:[%s14385_s4 + $0x8] sm:$0xff] %v8939_v4  ;;  %v8938_v9 = vsel %vm8922_vm6, %v8884_v17, %v8930_v30  ;;  %v8894_v14 = vadd.f32 %v9635_v22, %v8893_v45 }
0x1d67   :  { %8946 = vst [vmem:[%s14385_s4] sm:$0xff] %v8938_v9  ;;  %vm8925_vm7 = vcmp.gt.f32.partialorder %v8899_v40, 0.0  ;;  %v8933_v62 = vmul.f32 0.01, %v8899_v40 }
0x1d68   :  { %vm8924_vm8 = vcmp.gt.f32.partialorder %v8894_v14, 0.0  ;;  %v8932_v48 = vmul.f32 0.01, %v8894_v14  ;;  %v10687_v27 = vpop.f32.mrb[126].mxu0 }
0x1d69   :  { %v8941_v38 = vsel %vm8925_vm7, %v8899_v40, %v8933_v62  ;;  %v8909_v49 = vadd.f32 %v10687_v27, %v9635_v22  ;;  %v8903_v13 = vpop.f32.mrb[127].mxu0 }
0x1d6a   :  { %8949 = vst [vmem:[%s14385_s4 + $0x18] sm:$0xff] %v8941_v38  ;;  %v8940_v33 = vsel %vm8924_vm8, %v8894_v14, %v8932_v48  ;;  %v8904_v51 = vadd.f32 %v9635_v22, %v8903_v13 }
0x1d6b   :  { %8948 = vst [vmem:[%s14385_s4 + $0x10] sm:$0xff] %v8940_v33  ;;  %vm8927_vm9 = vcmp.gt.f32.partialorder %v8909_v49, 0.0  ;;  %v8935_v6 = vmul.f32 0.01, %v8909_v49 }
0x1d6c   :  { %vm8926_vm10 = vcmp.gt.f32.partialorder %v8904_v51, 0.0  ;;  %v8934_v18 = vmul.f32 0.01, %v8904_v51  ;;  %v10690_v56 = vpop.f32.mrb[128].mxu0 }
0x1d6d   :  { %v8943_v10 = vsel %vm8927_vm9, %v8909_v49, %v8935_v6  ;;  %v8919_v43 = vadd.f32 %v10690_v56, %v9635_v22  ;;  %v8913_v34 = vpop.f32.mrb[129].mxu0 }
0x1d6e   :  { %8951 = vst [vmem:[%s14385_s4 + $0x28] sm:$0xff] %v8943_v10  ;;  %v8942_v42 = vsel %vm8926_vm10, %v8904_v51, %v8934_v18  ;;  %v8914_v36 = vadd.f32 %v9635_v22, %v8913_v34 }
0x1d6f   :  { %8950 = vst [vmem:[%s14385_s4 + $0x20] sm:$0xff] %v8942_v42  ;;  %vm8929_vm11 = vcmp.gt.f32.partialorder %v8919_v43, 0.0  ;;  %v8937_v54 = vmul.f32 0.01, %v8919_v43 }
0x1d70   :  { %vm8928_vm12 = vcmp.gt.f32.partialorder %v8914_v36, 0.0  ;;  %v8936_v39 = vmul.f32 0.01, %v8914_v36 }
0x1d71   :  { %v8945_v12 = vsel %vm8929_vm11, %v8919_v43, %v8937_v54 }
0x1d72   :  { %8953 = vst [vmem:[%s14385_s4 + $0x38] sm:$0xff] %v8945_v12  ;;  %v8944_v58 = vsel %vm8928_vm12, %v8914_v36, %v8936_v39 }
0x1d73   :  { %8952 = vst [vmem:[%s14385_s4 + $0x30] sm:$0xff] %v8944_v58 }
0x1d74   :  { %8958 = vsyncpa [#allocation8], 1 }
0x1d75   :  { %8959 = vsyncpa [#allocation10], 1 }
0x1d76   :  { %8960 = vsyncpa [#allocation13], 1 }
0x1d77   :  { %8961 = vsyncpa [#allocation16], 1 }
0x1d78   :  { %8962 = vsyncpa [#allocation19], 1 }
0x1d79   :  { %8963 = vsyncpa [#allocation22], 1 }
0x1d7a   :  { %8964 = vsyncpa [#allocation25], 1 }
0x1d7b   :  { %8965 = vsyncpa [#allocation28], 1 }

</bundles_post_ra>
